<compile_context>
chip_gen: v6e
topology: v6e:2x2x1
jax: 0.10.0
libtpu: 0.0.40
codegen_flags: <defaults>
</compile_context>

<pallas_src>
import functools

import jax
import jax.numpy as jnp
import numpy as np
from jax.experimental import pallas as pl
from jax.experimental.pallas import tpu as pltpu

KSIZE = 5
STRIDE = 2
LANE = 128


def _conv_out(size, k=KSIZE, s=STRIDE):
    return (size - (k - 1) - 1) // s + 1


def _round_up(n, m):
    return ((n + m - 1) // m) * m


# ---------------------------------------------------------------------------
# Fused kernel: one grid step = Bb samples.  All 2-D, only contiguous slices.
# ---------------------------------------------------------------------------
def _dqn_kernel(x_ref, s1_ref, bw1_ref, sb1_ref, s2_ref, bw2_ref, sb2_ref,
                s3_ref, bw3_ref, sb3_ref, sh_ref, wh_ref, hb_ref,
                o_ref, a1_ref, a2_ref, a3_ref, *, h4):
    def conv_layer(src_ref, s_ref, bw_ref, sb_ref, dst_ref):
        # src_ref : [Bb*H_in, WCin_pad]  (bf16, batch-flattened scanlines)
        # s_ref   : [Bb*H_out, Bb*H_in - 4] 0/1 row-selection (stride-2 + gaps)
        # bw_ref  : [5*WCin_pad, WCout_pad] banded weight (kw taps + w-stride)
        r_sel = s_ref.shape[1]
        taps = [src_ref[pl.ds(kh, r_sel), :] for kh in range(KSIZE)]
        ashift = jnp.concatenate(taps, axis=-1)            # [r_sel, 5*WCin_pad]
        # Row gather via MXU (exact: one 1.0 per row).
        g = jnp.dot(s_ref[...], ashift,
                    preferred_element_type=jnp.float32)    # [Bb*H_out, 5*WCin]
        # Single fused-tap conv matmul, f32 accumulation.
        y = jnp.dot(g.astype(jnp.bfloat16), bw_ref[...],
                    preferred_element_type=jnp.float32)    # [Bb*H_out, WCout]
        scale = sb_ref[pl.ds(0, 1), :]                     # [1, WCout_pad]
        shift = sb_ref[pl.ds(1, 1), :]
        # Fused conv-bias + eval-BN + ReLU epilogue (f32), store bf16.
        dst_ref[...] = jnp.maximum(y * scale + shift, 0.0).astype(dst_ref.dtype)

    conv_layer(x_ref, s1_ref, bw1_ref, sb1_ref, a1_ref)
    conv_layer(a1_ref, s2_ref, bw2_ref, sb2_ref, a2_ref)
    conv_layer(a2_ref, s3_ref, bw3_ref, sb3_ref, a3_ref)

    # Linear head: flatten each sample's H4 rows into one row (same lane-concat
    # + selection-matmul trick), then one f32 matmul, bias folded in.
    r_h = sh_ref.shape[1]
    head_taps = [a3_ref[pl.ds(hh, r_h), :] for hh in range(h4)]
    ahead = jnp.concatenate(head_taps, axis=-1)            # [r_h, H4*P3]
    g = jnp.dot(sh_ref[...], ahead,
                preferred_element_type=jnp.float32)        # [Bb, H4*P3]
    o_ref[...] = jnp.dot(g, wh_ref[...],
                         preferred_element_type=jnp.float32) + hb_ref[...]


# ---------------------------------------------------------------------------
# One-time host-side weight preprocessing
# ---------------------------------------------------------------------------
def _make_banded(w_oihw, w_out, k_pad, n_pad):
    """torch conv weight [Cout,Cin,5,5] -> [5*k_pad, n_pad] bf16 banded matrix.

    bw[kh*k_pad + (2*wo+kw)*Cin + ci, wo*Cout + co] = w[co, ci, kh, kw]
    Rows for lane-padded input positions and columns for lane-padded output
    positions stay zero.
    """
    w_np = np.asarray(w_oihw, np.float32)
    cout, cin, k, _ = w_np.shape
    bw = np.zeros((k, k_pad, n_pad), np.float32)
    for kh in range(k):
        for kw in range(k):
            blk = w_np[:, :, kh, kw].T                     # [Cin, Cout]
            for wo in range(w_out):
                wi = STRIDE * wo + kw
                bw[kh, wi * cin:(wi + 1) * cin, wo * cout:(wo + 1) * cout] = blk
    return jnp.asarray(bw.reshape(k * k_pad, n_pad), jnp.bfloat16)


def _fold_bn(b, gamma, beta, mean, var, w_out, cout, n_pad, eps=1e-5):
    """conv-bias + eval-BN -> per-lane scale/shift [2, n_pad] (pads = 0)."""
    scale = np.asarray(gamma, np.float32) / np.sqrt(np.asarray(var, np.float32) + eps)
    shift = (np.asarray(beta, np.float32)
             - np.asarray(mean, np.float32) * scale
             + np.asarray(b, np.float32) * scale)
    out = np.zeros((2, n_pad), np.float32)
    out[0, :w_out * cout] = np.tile(scale, w_out)
    out[1, :w_out * cout] = np.tile(shift, w_out)
    return jnp.asarray(out, jnp.float32)


def _make_select(bb, h_in, h_out):
    """0/1 matrix: row b*h_out+j picks source row b*h_in + 2j (of a 4-row-shorter view)."""
    s = np.zeros((bb * h_out, bb * h_in - (KSIZE - 1)), np.float32)
    for b in range(bb):
        for j in range(h_out):
            s[b * h_out + j, b * h_in + 2 * j] = 1.0
    return jnp.asarray(s, jnp.bfloat16)


def _make_head_select(bb, h4):
    s = np.zeros((bb, bb * h4 - (h4 - 1)), np.float32)
    for b in range(bb):
        s[b, b * h4] = 1.0
    return jnp.asarray(s, jnp.bfloat16)


def make_dqn_forward(params, h, w, outputs, batch_block=8):
    H1, W1 = h, w
    H2, W2 = _conv_out(H1), _conv_out(W1)
    H3, W3 = _conv_out(H2), _conv_out(W2)
    H4, W4 = _conv_out(H3), _conv_out(W3)
    assert H4 >= 1 and W4 >= 1, "input too small for three 5x5/s2 convs"
    Bb = batch_block

    # Lane-padded widths (multiples of 128).
    P0 = _round_up(W1 * 3, LANE)
    P1 = _round_up(W2 * 16, LANE)
    P2 = _round_up(W3 * 32, LANE)
    P3 = _round_up(W4 * 32, LANE)
    OUTP = _round_up(outputs, LANE)

    w1, b1, g1, be1, m1, v1 = params["l1"]
    w2, b2, g2, be2, m2, v2 = params["l2"]
    w3, b3, g3, be3, m3, v3 = params["l3"]
    wh, bh = params["head"]

    bw1 = _make_banded(w1, W2, P0, P1)
    bw2 = _make_banded(w2, W3, P1, P2)
    bw3 = _make_banded(w3, W4, P2, P3)
    sb1 = _fold_bn(b1, g1, be1, m1, v1, W2, 16, P1)
    sb2 = _fold_bn(b2, g2, be2, m2, v2, W3, 32, P2)
    sb3 = _fold_bn(b3, g3, be3, m3, v3, W4, 32, P3)

    s1 = _make_select(Bb, H1, H2)
    s2 = _make_select(Bb, H2, H3)
    s3 = _make_select(Bb, H3, H4)
    sh = _make_head_select(Bb, H4)

    # Head weight permuted so lane order [h-block][w*32 + c] matches torch's
    # x.view(B, -1) order (c*H4*W4 + h*W4 + w).  Zero rows for padded lanes.
    whf = np.zeros((H4, P3, OUTP), np.float32)
    whf[:, :W4 * 32, :outputs] = (np.asarray(wh, np.float32)
                                  .reshape(outputs, 32, H4, W4)
                                  .transpose(2, 3, 1, 0)
                                  .reshape(H4, W4 * 32, outputs))
    whf = jnp.asarray(whf.reshape(H4 * P3, OUTP), jnp.float32)
    hbp = np.zeros((1, OUTP), np.float32)
    hbp[0, :outputs] = np.asarray(bh, np.float32)
    hbp = jnp.asarray(hbp, jnp.float32)

    kern = functools.partial(_dqn_kernel, h4=H4)

    consts = (s1, bw1, sb1, s2, bw2, sb2, s3, bw3, sb3, sh, whf, hbp)
    weight_bytes = int(sum(int(a.size) * a.dtype.itemsize for a in consts))

    def _mm(m, k, n):
        return 2 * m * k * n

    flops_step = int(
        _mm(Bb * H2, Bb * H1 - 4, KSIZE * P0) + _mm(Bb * H2, KSIZE * P0, P1)
        + _mm(Bb * H3, Bb * H2 - 4, KSIZE * P1) + _mm(Bb * H3, KSIZE * P1, P2)
        + _mm(Bb * H4, Bb * H3 - 4, KSIZE * P2) + _mm(Bb * H4, KSIZE * P2, P3)
        + _mm(Bb, Bb * H4 - (H4 - 1), H4 * P3) + _mm(Bb, H4 * P3, OUTP))

    def forward(x_nchw):
        B = x_nchw.shape[0]
        G = -(-B // Bb)                       # cdiv
        Bpad = G * Bb
        # NCHW -> scanline [B, H, W*C] -> lane/batch pad -> [Bpad*H1, P0] bf16.
        xs = jnp.transpose(x_nchw, (0, 2, 3, 1)).reshape(B, H1, W1 * 3)
        xs = jnp.pad(xs, ((0, Bpad - B), (0, 0), (0, P0 - W1 * 3)))
        xs = xs.reshape(Bpad * H1, P0).astype(jnp.bfloat16)

        cost = pl.CostEstimate(
            flops=int(G * flops_step),
            transcendentals=0,
            bytes_accessed=int(xs.size * 2 + weight_bytes + Bpad * OUTP * 4))

        out = pl.pallas_call(
            kern,
            out_shape=jax.ShapeDtypeStruct((Bpad, OUTP), jnp.float32),
            grid_spec=pltpu.PrefetchScalarGridSpec(
                num_scalar_prefetch=0,
                grid=(G,),
                in_specs=[
                    pl.BlockSpec((Bb * H1, P0), lambda g: (g, 0)),
                    pl.BlockSpec(s1.shape, lambda g: (0, 0)),
                    pl.BlockSpec(bw1.shape, lambda g: (0, 0)),
                    pl.BlockSpec(sb1.shape, lambda g: (0, 0)),
                    pl.BlockSpec(s2.shape, lambda g: (0, 0)),
                    pl.BlockSpec(bw2.shape, lambda g: (0, 0)),
                    pl.BlockSpec(sb2.shape, lambda g: (0, 0)),
                    pl.BlockSpec(s3.shape, lambda g: (0, 0)),
                    pl.BlockSpec(bw3.shape, lambda g: (0, 0)),
                    pl.BlockSpec(sb3.shape, lambda g: (0, 0)),
                    pl.BlockSpec(sh.shape, lambda g: (0, 0)),
                    pl.BlockSpec(whf.shape, lambda g: (0, 0)),
                    pl.BlockSpec(hbp.shape, lambda g: (0, 0)),
                ],
                out_specs=pl.BlockSpec((Bb, OUTP), lambda g: (g, 0)),
                scratch_shapes=[
                    pltpu.VMEM((Bb * H2, P1), jnp.bfloat16),   # conv1 activations
                    pltpu.VMEM((Bb * H3, P2), jnp.bfloat16),   # conv2 activations
                    pltpu.VMEM((Bb * H4, P3), jnp.bfloat16),   # conv3 activations
                ],
            ),
            compiler_params=pltpu.CompilerParams(
                dimension_semantics=("parallel",)),
            cost_estimate=cost,
        )(xs, s1, bw1, sb1, s2, bw2, sb2, s3, bw3, sb3, sh, whf, hbp)
        return out[:B, :outputs]

    return jax.jit(forward)


# ---------------------------------------------------------------------------
# Deterministic parameter init (shapes from DQN.__init__)
# ---------------------------------------------------------------------------
def init_params(key, h, w, outputs):
    convw = _conv_out(_conv_out(_conv_out(w)))
    convh = _conv_out(_conv_out(_conv_out(h)))
    lin_in = convw * convh * 32

    ks = jax.random.split(key, 20)
    ki = iter(range(20))

    def conv_layer(cin, cout):
        w_ = 0.05 * jax.random.normal(ks[next(ki)], (cout, cin, 5, 5), jnp.float32)
        b_ = 0.05 * jax.random.normal(ks[next(ki)], (cout,), jnp.float32)
        gamma = 1.0 + 0.1 * jax.random.normal(ks[next(ki)], (cout,), jnp.float32)
        beta = 0.1 * jax.random.normal(ks[next(ki)], (cout,), jnp.float32)
        mean = 0.05 * jax.random.normal(ks[next(ki)], (cout,), jnp.float32)
        var = 1.0 + 0.1 * jax.nn.softplus(
            jax.random.normal(ks[next(ki)], (cout,), jnp.float32))
        return (w_, b_, gamma, beta, mean, var)

    return {
        "l1": conv_layer(3, 16),
        "l2": conv_layer(16, 32),
        "l3": conv_layer(32, 32),
        "head": (0.05 * jax.random.normal(ks[next(ki)], (outputs, lin_in), jnp.float32),
                 0.05 * jax.random.normal(ks[next(ki)], (outputs,), jnp.float32)),
    }


# ---------------------------------------------------------------------------
# Pure-JAX reference (f32) for self-check
# ---------------------------------------------------------------------------
def ref_forward(params, x, eps=1e-5):
    def conv(x, w, b):
        y = jax.lax.conv_general_dilated(
            x, w, (2, 2), "VALID", dimension_numbers=("NCHW", "OIHW", "NCHW"))
        return y + b[None, :, None, None]

    def bn(x, g, bt, m, v):
        return ((x - m[None, :, None, None])
                / jnp.sqrt(v[None, :, None, None] + eps)
                * g[None, :, None, None] + bt[None, :, None, None])

    for name in ("l1", "l2", "l3"):
        w, b, g, bt, m, v = params[name]
        x = jax.nn.relu(bn(conv(x, w, b), g, bt, m, v))
    wh, bh = params["head"]
    return x.reshape(x.shape[0], -1) @ wh.T + bh


if __name__ == "__main__":
    # 40x40 (smallest "classic" size surviving three 5x5/s2 convs), 4 actions.
    # B=10 with batch_block=8 exercises both batch padding and a 2-step grid.
    B, H, W, OUT = 10, 40, 40, 4
    key = jax.random.PRNGKey(0)
    pkey, xkey = jax.random.split(key)
    params = init_params(pkey, H, W, OUT)
    x = jax.random.normal(xkey, (B, 3, H, W), jnp.float32)   # NCHW, like PyTorch

    forward = make_dqn_forward(params, H, W, OUT, batch_block=8)
    out = jax.block_until_ready(forward(x))

    ref = jax.block_until_ready(ref_forward(params, x))
    # Conv path runs bf16 on the MXU with bf16 inter-layer activations
    # (f32 accumulation) -> loosened tolerance.
    np.testing.assert_allclose(np.asarray(out), np.asarray(ref), rtol=3e-2, atol=3e-2)
    assert out.shape == (B, OUT)

    print("KERNEL_OK")
</pallas_src>

<mosaic_0001>
module attributes {stable_mosaic.version = 11 : i64} {
  func.func @_dqn_kernel(%arg0: i32, %arg1: memref<320x128xbf16, #tpu.memory_space<vmem>>, %arg2: memref<144x316xbf16, #tpu.memory_space<vmem>>, %arg3: memref<640x384xbf16, #tpu.memory_space<vmem>>, %arg4: memref<2x384xf32, #tpu.memory_space<vmem>>, %arg5: memref<56x140xbf16, #tpu.memory_space<vmem>>, %arg6: memref<1920x256xbf16, #tpu.memory_space<vmem>>, %arg7: memref<2x256xf32, #tpu.memory_space<vmem>>, %arg8: memref<16x52xbf16, #tpu.memory_space<vmem>>, %arg9: memref<1280x128xbf16, #tpu.memory_space<vmem>>, %arg10: memref<2x128xf32, #tpu.memory_space<vmem>>, %arg11: memref<8x15xbf16, #tpu.memory_space<vmem>>, %arg12: memref<256x128xf32, #tpu.memory_space<vmem>>, %arg13: memref<1x128xf32, #tpu.memory_space<vmem>>, %arg14: memref<8x128xf32, #tpu.memory_space<vmem>>, %arg15: memref<144x384xbf16, #tpu.memory_space<vmem>>, %arg16: memref<56x256xbf16, #tpu.memory_space<vmem>>, %arg17: memref<16x128xbf16, #tpu.memory_space<vmem>>) attributes {dimension_semantics = [#tpu.dimension_semantics<parallel>], iteration_bounds = array<i64: 2>, scalar_prefetch = 0 : i64, scratch_operands = 3 : i64, tpu.core_type = #tpu.core_type<tc>, window_params = [{transform_indices = @transform_0, window_bounds = array<i64: 320, 128>}, {pipeline_mode = #tpu.pipeline_mode<synchronous>, transform_indices = @transform_1, window_bounds = array<i64: 144, 316>}, {pipeline_mode = #tpu.pipeline_mode<synchronous>, transform_indices = @transform_2, window_bounds = array<i64: 640, 384>}, {pipeline_mode = #tpu.pipeline_mode<synchronous>, transform_indices = @transform_3, window_bounds = array<i64: 2, 384>}, {pipeline_mode = #tpu.pipeline_mode<synchronous>, transform_indices = @transform_4, window_bounds = array<i64: 56, 140>}, {pipeline_mode = #tpu.pipeline_mode<synchronous>, transform_indices = @transform_5, window_bounds = array<i64: 1920, 256>}, {pipeline_mode = #tpu.pipeline_mode<synchronous>, transform_indices = @transform_6, window_bounds = array<i64: 2, 256>}, {pipeline_mode = #tpu.pipeline_mode<synchronous>, transform_indices = @transform_7, window_bounds = array<i64: 16, 52>}, {pipeline_mode = #tpu.pipeline_mode<synchronous>, transform_indices = @transform_8, window_bounds = array<i64: 1280, 128>}, {pipeline_mode = #tpu.pipeline_mode<synchronous>, transform_indices = @transform_9, window_bounds = array<i64: 2, 128>}, {pipeline_mode = #tpu.pipeline_mode<synchronous>, transform_indices = @transform_10, window_bounds = array<i64: 8, 15>}, {pipeline_mode = #tpu.pipeline_mode<synchronous>, transform_indices = @transform_11, window_bounds = array<i64: 256, 128>}, {pipeline_mode = #tpu.pipeline_mode<synchronous>, transform_indices = @transform_12, window_bounds = array<i64: 1, 128>}, {transform_indices = @transform_13, window_bounds = array<i64: 8, 128>}]} {
    %c0 = arith.constant 0 : index
    %c0_0 = arith.constant 0 : index
    %0 = vector.load %arg1[%c0, %c0_0] : memref<320x128xbf16, #tpu.memory_space<vmem>>, vector<316x128xbf16>
    %c1 = arith.constant 1 : index
    %c0_1 = arith.constant 0 : index
    %1 = vector.load %arg1[%c1, %c0_1] : memref<320x128xbf16, #tpu.memory_space<vmem>>, vector<316x128xbf16>
    %c2 = arith.constant 2 : index
    %c0_2 = arith.constant 0 : index
    %2 = vector.load %arg1[%c2, %c0_2] : memref<320x128xbf16, #tpu.memory_space<vmem>>, vector<316x128xbf16>
    %c3 = arith.constant 3 : index
    %c0_3 = arith.constant 0 : index
    %3 = vector.load %arg1[%c3, %c0_3] : memref<320x128xbf16, #tpu.memory_space<vmem>>, vector<316x128xbf16>
    %c4 = arith.constant 4 : index
    %c0_4 = arith.constant 0 : index
    %4 = vector.load %arg1[%c4, %c0_4] : memref<320x128xbf16, #tpu.memory_space<vmem>>, vector<316x128xbf16>
    %5 = tpu.concatenate %0, %1, %2, %3, %4 in 1 : vector<316x128xbf16>, vector<316x128xbf16>, vector<316x128xbf16>, vector<316x128xbf16>, vector<316x128xbf16> -> vector<316x640xbf16>
    %c0_5 = arith.constant 0 : index
    %c0_6 = arith.constant 0 : index
    %6 = vector.load %arg2[%c0_5, %c0_6] : memref<144x316xbf16, #tpu.memory_space<vmem>>, vector<144x316xbf16>
    %cst = arith.constant dense<0.000000e+00> : vector<144x640xf32>
    %7 = tpu.matmul %6, %5, %cst {dimension_numbers = #tpu.dot_dimension_numbers<[1], [0], [0], [1], [0, 0, 1, 1], [], []>} : vector<144x316xbf16>, vector<316x640xbf16>, vector<144x640xf32> -> vector<144x640xf32>
    %8 = arith.truncf %7 : vector<144x640xf32> to vector<144x640xbf16>
    %c0_7 = arith.constant 0 : index
    %c0_8 = arith.constant 0 : index
    %9 = vector.load %arg3[%c0_7, %c0_8] : memref<640x384xbf16, #tpu.memory_space<vmem>>, vector<640x384xbf16>
    %cst_9 = arith.constant dense<0.000000e+00> : vector<144x384xf32>
    %10 = tpu.matmul %8, %9, %cst_9 {dimension_numbers = #tpu.dot_dimension_numbers<[1], [0], [0], [1], [0, 0, 1, 1], [], []>} : vector<144x640xbf16>, vector<640x384xbf16>, vector<144x384xf32> -> vector<144x384xf32>
    %c0_10 = arith.constant 0 : index
    %c0_11 = arith.constant 0 : index
    %11 = vector.load %arg4[%c0_10, %c0_11] : memref<2x384xf32, #tpu.memory_space<vmem>>, vector<1x384xf32>
    %c1_12 = arith.constant 1 : index
    %c0_13 = arith.constant 0 : index
    %12 = vector.load %arg4[%c1_12, %c0_13] : memref<2x384xf32, #tpu.memory_space<vmem>>, vector<1x384xf32>
    %13 = vector.broadcast %11 : vector<1x384xf32> to vector<144x384xf32>
    %14 = arith.mulf %10, %13 : vector<144x384xf32>
    %15 = vector.broadcast %12 : vector<1x384xf32> to vector<144x384xf32>
    %16 = arith.addf %14, %15 : vector<144x384xf32>
    %cst_14 = arith.constant 0.000000e+00 : f32
    %17 = vector.broadcast %cst_14 : f32 to vector<144x384xf32>
    %18 = arith.maximumf %16, %17 : vector<144x384xf32>
    %19 = arith.truncf %18 : vector<144x384xf32> to vector<144x384xbf16>
    %c0_15 = arith.constant 0 : index
    %c0_16 = arith.constant 0 : index
    %20 = vector.load %arg15[%c0_15, %c0_16] : memref<144x384xbf16, #tpu.memory_space<vmem>>, vector<144x384xbf16>
    tpu.vector_store %arg15[%c0_15, %c0_16], %19 {strides = array<i32>} : memref<144x384xbf16, #tpu.memory_space<vmem>>, vector<144x384xbf16>,
    %c0_17 = arith.constant 0 : index
    %c0_18 = arith.constant 0 : index
    %21 = vector.load %arg15[%c0_17, %c0_18] : memref<144x384xbf16, #tpu.memory_space<vmem>>, vector<140x384xbf16>
    %c1_19 = arith.constant 1 : index
    %c0_20 = arith.constant 0 : index
    %22 = vector.load %arg15[%c1_19, %c0_20] : memref<144x384xbf16, #tpu.memory_space<vmem>>, vector<140x384xbf16>
    %c2_21 = arith.constant 2 : index
    %c0_22 = arith.constant 0 : index
    %23 = vector.load %arg15[%c2_21, %c0_22] : memref<144x384xbf16, #tpu.memory_space<vmem>>, vector<140x384xbf16>
    %c3_23 = arith.constant 3 : index
    %c0_24 = arith.constant 0 : index
    %24 = vector.load %arg15[%c3_23, %c0_24] : memref<144x384xbf16, #tpu.memory_space<vmem>>, vector<140x384xbf16>
    %c4_25 = arith.constant 4 : index
    %c0_26 = arith.constant 0 : index
    %25 = vector.load %arg15[%c4_25, %c0_26] : memref<144x384xbf16, #tpu.memory_space<vmem>>, vector<140x384xbf16>
    %26 = tpu.concatenate %21, %22, %23, %24, %25 in 1 : vector<140x384xbf16>, vector<140x384xbf16>, vector<140x384xbf16>, vector<140x384xbf16>, vector<140x384xbf16> -> vector<140x1920xbf16>
    %c0_27 = arith.constant 0 : index
    %c0_28 = arith.constant 0 : index
    %27 = vector.load %arg5[%c0_27, %c0_28] : memref<56x140xbf16, #tpu.memory_space<vmem>>, vector<56x140xbf16>
    %cst_29 = arith.constant dense<0.000000e+00> : vector<56x1920xf32>
    %28 = tpu.matmul %27, %26, %cst_29 {dimension_numbers = #tpu.dot_dimension_numbers<[1], [0], [0], [1], [0, 0, 1, 1], [], []>} : vector<56x140xbf16>, vector<140x1920xbf16>, vector<56x1920xf32> -> vector<56x1920xf32>
    %29 = arith.truncf %28 : vector<56x1920xf32> to vector<56x1920xbf16>
    %c0_30 = arith.constant 0 : index
    %c0_31 = arith.constant 0 : index
    %30 = vector.load %arg6[%c0_30, %c0_31] : memref<1920x256xbf16, #tpu.memory_space<vmem>>, vector<1920x256xbf16>
    %cst_32 = arith.constant dense<0.000000e+00> : vector<56x256xf32>
    %31 = tpu.matmul %29, %30, %cst_32 {dimension_numbers = #tpu.dot_dimension_numbers<[1], [0], [0], [1], [0, 0, 1, 1], [], []>} : vector<56x1920xbf16>, vector<1920x256xbf16>, vector<56x256xf32> -> vector<56x256xf32>
    %c0_33 = arith.constant 0 : index
    %c0_34 = arith.constant 0 : index
    %32 = vector.load %arg7[%c0_33, %c0_34] : memref<2x256xf32, #tpu.memory_space<vmem>>, vector<1x256xf32>
    %c1_35 = arith.constant 1 : index
    %c0_36 = arith.constant 0 : index
    %33 = vector.load %arg7[%c1_35, %c0_36] : memref<2x256xf32, #tpu.memory_space<vmem>>, vector<1x256xf32>
    %34 = vector.broadcast %32 : vector<1x256xf32> to vector<56x256xf32>
    %35 = arith.mulf %31, %34 : vector<56x256xf32>
    %36 = vector.broadcast %33 : vector<1x256xf32> to vector<56x256xf32>
    %37 = arith.addf %35, %36 : vector<56x256xf32>
    %cst_37 = arith.constant 0.000000e+00 : f32
    %38 = vector.broadcast %cst_37 : f32 to vector<56x256xf32>
    %39 = arith.maximumf %37, %38 : vector<56x256xf32>
    %40 = arith.truncf %39 : vector<56x256xf32> to vector<56x256xbf16>
    %c0_38 = arith.constant 0 : index
    %c0_39 = arith.constant 0 : index
    %41 = vector.load %arg16[%c0_38, %c0_39] : memref<56x256xbf16, #tpu.memory_space<vmem>>, vector<56x256xbf16>
    tpu.vector_store %arg16[%c0_38, %c0_39], %40 {strides = array<i32>} : memref<56x256xbf16, #tpu.memory_space<vmem>>, vector<56x256xbf16>,
    %c0_40 = arith.constant 0 : index
    %c0_41 = arith.constant 0 : index
    %42 = vector.load %arg16[%c0_40, %c0_41] : memref<56x256xbf16, #tpu.memory_space<vmem>>, vector<52x256xbf16>
    %c1_42 = arith.constant 1 : index
    %c0_43 = arith.constant 0 : index
    %43 = vector.load %arg16[%c1_42, %c0_43] : memref<56x256xbf16, #tpu.memory_space<vmem>>, vector<52x256xbf16>
    %c2_44 = arith.constant 2 : index
    %c0_45 = arith.constant 0 : index
    %44 = vector.load %arg16[%c2_44, %c0_45] : memref<56x256xbf16, #tpu.memory_space<vmem>>, vector<52x256xbf16>
    %c3_46 = arith.constant 3 : index
    %c0_47 = arith.constant 0 : index
    %45 = vector.load %arg16[%c3_46, %c0_47] : memref<56x256xbf16, #tpu.memory_space<vmem>>, vector<52x256xbf16>
    %c4_48 = arith.constant 4 : index
    %c0_49 = arith.constant 0 : index
    %46 = vector.load %arg16[%c4_48, %c0_49] : memref<56x256xbf16, #tpu.memory_space<vmem>>, vector<52x256xbf16>
    %47 = tpu.concatenate %42, %43, %44, %45, %46 in 1 : vector<52x256xbf16>, vector<52x256xbf16>, vector<52x256xbf16>, vector<52x256xbf16>, vector<52x256xbf16> -> vector<52x1280xbf16>
    %c0_50 = arith.constant 0 : index
    %c0_51 = arith.constant 0 : index
    %48 = vector.load %arg8[%c0_50, %c0_51] : memref<16x52xbf16, #tpu.memory_space<vmem>>, vector<16x52xbf16>
    %cst_52 = arith.constant dense<0.000000e+00> : vector<16x1280xf32>
    %49 = tpu.matmul %48, %47, %cst_52 {dimension_numbers = #tpu.dot_dimension_numbers<[1], [0], [0], [1], [0, 0, 1, 1], [], []>} : vector<16x52xbf16>, vector<52x1280xbf16>, vector<16x1280xf32> -> vector<16x1280xf32>
    %50 = arith.truncf %49 : vector<16x1280xf32> to vector<16x1280xbf16>
    %c0_53 = arith.constant 0 : index
    %c0_54 = arith.constant 0 : index
    %51 = vector.load %arg9[%c0_53, %c0_54] : memref<1280x128xbf16, #tpu.memory_space<vmem>>, vector<1280x128xbf16>
    %cst_55 = arith.constant dense<0.000000e+00> : vector<16x128xf32>
    %52 = tpu.matmul %50, %51, %cst_55 {dimension_numbers = #tpu.dot_dimension_numbers<[1], [0], [0], [1], [0, 0, 1, 1], [], []>} : vector<16x1280xbf16>, vector<1280x128xbf16>, vector<16x128xf32> -> vector<16x128xf32>
    %c0_56 = arith.constant 0 : index
    %c0_57 = arith.constant 0 : index
    %53 = vector.load %arg10[%c0_56, %c0_57] : memref<2x128xf32, #tpu.memory_space<vmem>>, vector<1x128xf32>
    %c1_58 = arith.constant 1 : index
    %c0_59 = arith.constant 0 : index
    %54 = vector.load %arg10[%c1_58, %c0_59] : memref<2x128xf32, #tpu.memory_space<vmem>>, vector<1x128xf32>
    %55 = vector.broadcast %53 : vector<1x128xf32> to vector<16x128xf32>
    %56 = arith.mulf %52, %55 : vector<16x128xf32>
    %57 = vector.broadcast %54 : vector<1x128xf32> to vector<16x128xf32>
    %58 = arith.addf %56, %57 : vector<16x128xf32>
    %cst_60 = arith.constant 0.000000e+00 : f32
    %59 = vector.broadcast %cst_60 : f32 to vector<16x128xf32>
    %60 = arith.maximumf %58, %59 : vector<16x128xf32>
    %61 = arith.truncf %60 : vector<16x128xf32> to vector<16x128xbf16>
    %c0_61 = arith.constant 0 : index
    %c0_62 = arith.constant 0 : index
    %62 = vector.load %arg17[%c0_61, %c0_62] : memref<16x128xbf16, #tpu.memory_space<vmem>>, vector<16x128xbf16>
    tpu.vector_store %arg17[%c0_61, %c0_62], %61 {strides = array<i32>} : memref<16x128xbf16, #tpu.memory_space<vmem>>, vector<16x128xbf16>,
    %c0_63 = arith.constant 0 : index
    %c0_64 = arith.constant 0 : index
    %63 = vector.load %arg17[%c0_63, %c0_64] : memref<16x128xbf16, #tpu.memory_space<vmem>>, vector<15x128xbf16>
    %c1_65 = arith.constant 1 : index
    %c0_66 = arith.constant 0 : index
    %64 = vector.load %arg17[%c1_65, %c0_66] : memref<16x128xbf16, #tpu.memory_space<vmem>>, vector<15x128xbf16>
    %65 = tpu.concatenate %63, %64 in 1 : vector<15x128xbf16>, vector<15x128xbf16> -> vector<15x256xbf16>
    %c0_67 = arith.constant 0 : index
    %c0_68 = arith.constant 0 : index
    %66 = vector.load %arg11[%c0_67, %c0_68] : memref<8x15xbf16, #tpu.memory_space<vmem>>, vector<8x15xbf16>
    %cst_69 = arith.constant dense<0.000000e+00> : vector<8x256xf32>
    %67 = tpu.matmul %66, %65, %cst_69 {dimension_numbers = #tpu.dot_dimension_numbers<[1], [0], [0], [1], [0, 0, 1, 1], [], []>} : vector<8x15xbf16>, vector<15x256xbf16>, vector<8x256xf32> -> vector<8x256xf32>
    %c0_70 = arith.constant 0 : index
    %c0_71 = arith.constant 0 : index
    %68 = vector.load %arg12[%c0_70, %c0_71] : memref<256x128xf32, #tpu.memory_space<vmem>>, vector<256x128xf32>
    %cst_72 = arith.constant dense<0.000000e+00> : vector<8x128xf32>
    %69 = tpu.matmul %67, %68, %cst_72 {dimension_numbers = #tpu.dot_dimension_numbers<[1], [0], [0], [1], [0, 0, 1, 1], [], []>} : vector<8x256xf32>, vector<256x128xf32>, vector<8x128xf32> -> vector<8x128xf32>
    %c0_73 = arith.constant 0 : index
    %c0_74 = arith.constant 0 : index
    %70 = vector.load %arg13[%c0_73, %c0_74] : memref<1x128xf32, #tpu.memory_space<vmem>>, vector<1x128xf32>
    %71 = vector.broadcast %70 : vector<1x128xf32> to vector<8x128xf32>
    %72 = arith.addf %69, %71 : vector<8x128xf32>
    %c0_75 = arith.constant 0 : index
    %c0_76 = arith.constant 0 : index
    %73 = vector.load %arg14[%c0_75, %c0_76] : memref<8x128xf32, #tpu.memory_space<vmem>>, vector<8x128xf32>
    tpu.vector_store %arg14[%c0_75, %c0_76], %72 {strides = array<i32>} : memref<8x128xf32, #tpu.memory_space<vmem>>, vector<8x128xf32>,
    return
  }
  func.func @transform_0(%arg0: i32) -> (i32, i32) {
    %c0_i32 = arith.constant 0 : i32
    %c0_i32_0 = arith.constant 0 : i32
    return %arg0, %c0_i32 : i32, i32
  }
  func.func @transform_1(%arg0: i32) -> (i32, i32) {
    %c0_i32 = arith.constant 0 : i32
    %c0_i32_0 = arith.constant 0 : i32
    %c0_i32_1 = arith.constant 0 : i32
    return %c0_i32, %c0_i32_0 : i32, i32
  }
  func.func @transform_2(%arg0: i32) -> (i32, i32) {
    %c0_i32 = arith.constant 0 : i32
    %c0_i32_0 = arith.constant 0 : i32
    %c0_i32_1 = arith.constant 0 : i32
    return %c0_i32, %c0_i32_0 : i32, i32
  }
  func.func @transform_3(%arg0: i32) -> (i32, i32) {
    %c0_i32 = arith.constant 0 : i32
    %c0_i32_0 = arith.constant 0 : i32
    %c0_i32_1 = arith.constant 0 : i32
    return %c0_i32, %c0_i32_0 : i32, i32
  }
  func.func @transform_4(%arg0: i32) -> (i32, i32) {
    %c0_i32 = arith.constant 0 : i32
    %c0_i32_0 = arith.constant 0 : i32
    %c0_i32_1 = arith.constant 0 : i32
    return %c0_i32, %c0_i32_0 : i32, i32
  }
  func.func @transform_5(%arg0: i32) -> (i32, i32) {
    %c0_i32 = arith.constant 0 : i32
    %c0_i32_0 = arith.constant 0 : i32
    %c0_i32_1 = arith.constant 0 : i32
    return %c0_i32, %c0_i32_0 : i32, i32
  }
  func.func @transform_6(%arg0: i32) -> (i32, i32) {
    %c0_i32 = arith.constant 0 : i32
    %c0_i32_0 = arith.constant 0 : i32
    %c0_i32_1 = arith.constant 0 : i32
    return %c0_i32, %c0_i32_0 : i32, i32
  }
  func.func @transform_7(%arg0: i32) -> (i32, i32) {
    %c0_i32 = arith.constant 0 : i32
    %c0_i32_0 = arith.constant 0 : i32
    %c0_i32_1 = arith.constant 0 : i32
    return %c0_i32, %c0_i32_0 : i32, i32
  }
  func.func @transform_8(%arg0: i32) -> (i32, i32) {
    %c0_i32 = arith.constant 0 : i32
    %c0_i32_0 = arith.constant 0 : i32
    %c0_i32_1 = arith.constant 0 : i32
    return %c0_i32, %c0_i32_0 : i32, i32
  }
  func.func @transform_9(%arg0: i32) -> (i32, i32) {
    %c0_i32 = arith.constant 0 : i32
    %c0_i32_0 = arith.constant 0 : i32
    %c0_i32_1 = arith.constant 0 : i32
    return %c0_i32, %c0_i32_0 : i32, i32
  }
  func.func @transform_10(%arg0: i32) -> (i32, i32) {
    %c0_i32 = arith.constant 0 : i32
    %c0_i32_0 = arith.constant 0 : i32
    %c0_i32_1 = arith.constant 0 : i32
    return %c0_i32, %c0_i32_0 : i32, i32
  }
  func.func @transform_11(%arg0: i32) -> (i32, i32) {
    %c0_i32 = arith.constant 0 : i32
    %c0_i32_0 = arith.constant 0 : i32
    %c0_i32_1 = arith.constant 0 : i32
    return %c0_i32, %c0_i32_0 : i32, i32
  }
  func.func @transform_12(%arg0: i32) -> (i32, i32) {
    %c0_i32 = arith.constant 0 : i32
    %c0_i32_0 = arith.constant 0 : i32
    %c0_i32_1 = arith.constant 0 : i32
    return %c0_i32, %c0_i32_0 : i32, i32
  }
  func.func @transform_13(%arg0: i32) -> (i32, i32) {
    %c0_i32 = arith.constant 0 : i32
    %c0_i32_0 = arith.constant 0 : i32
    return %arg0, %c0_i32 : i32, i32
  }
}

</mosaic_0001>

<bundles_post_ra>
// kernel: forward.1
= control target key start
LH: loop header
LB: loop body
LE: loop exit
PB: predicated region body
PF: predicated region fallthrough
CT: control target
= control target key end

     0   :  { %s11143_s25 = smov 0   ;;  %s15756_s0 = inlined_call_operand.vmem [shape: bf16[640,128], index: 0, kind: input, shape index: {}]   ;;  %s15757_s1 = inlined_call_operand.vmem [shape: bf16[144,316], index: 1, kind: input, shape index: {}]   ;;  %s15758_s2 = inlined_call_operand.vmem [shape: bf16[640,384], index: 2, kind: input, shape index: {}]   ;;  %s15759_s3 = inlined_call_operand.vmem [shape: f32[2,384], index: 3, kind: input, shape index: {}]   ;;  %s15760_s4 = inlined_call_operand.vmem [shape: bf16[56,140], index: 4, kind: input, shape index: {}]   ;;  %s15761_s5 = inlined_call_operand.vmem [shape: bf16[1920,256], index: 5, kind: input, shape index: {}]   ;;  %s15762_s6 = inlined_call_operand.vmem [shape: f32[2,256], index: 6, kind: input, shape index: {}]   ;;  %s15763_s7 = inlined_call_operand.vmem [shape: bf16[16,52], index: 7, kind: input, shape index: {}]   ;;  %s15764_s8 = inlined_call_operand.vmem [shape: bf16[1280,128], index: 8, kind: input, shape index: {}]   ;;  %s15765_s9 = inlined_call_operand.vmem [shape: f32[2,128], index: 9, kind: input, shape index: {}]   ;;  %s15766_s10 = inlined_call_operand.vmem [shape: bf16[8,15], index: 10, kind: input, shape index: {}]   ;;  %s15767_s11 = inlined_call_operand.vmem [shape: f32[256,128], index: 11, kind: input, shape index: {}]   ;;  %s15768_s12 = inlined_call_operand.vmem [shape: f32[1,128], index: 12, kind: input, shape index: {}]   ;;  %s15769_s13 = inlined_call_operand.vmem [shape: f32[16,128], index: 13, kind: output, shape index: {}]  }
   0x1 LB: > { %s11149_s26 = sadd.s32 4294967295, %s11067_s25   ;;  %p9094_p0 = scmp.ge.s32.totalorder %s11067_s25, 1  ;;  %s11067_s25 = sphi %s11143_s25, %s23_s25  }
   0x2   : > { %p388_p1 = scmp.lt.s32.totalorder %s11067_s25, 3 }
   0x4   : > { %p389_p2 = pnand %p9094_p0, %p388_p1 }
   0x6   : > { %392 = sbr.rel (%p389_p2) target bundleno = 2331 (0x91b), region = 72 }
   0xb   : > { %s431_s27 = smul.u32 40, %s11149_s26  ;;  %v15788_v0 = vmov 0   ;;  %v10351_v1 = vld [vmem:[%s15757_s1 + $0x4] ss:$12 sps:$4 sm:$0xff]   ;;  %vm608_vm0 = vsmask.f32 7424 }
   0xc   : > { %1393 = vmatprep.mubr.bf16.mxu1 %v15788_v0  ;;  %1270 = vmatprep.mubr.bf16.mxu0 %v10351_v1  ;;  %vm964_vm1 = vcmask 1045504   ;;  %vm852_vm2 = vsmask.f32 6400  ;;  %vm1194_vm3 = vcmask 490496   ;;  %vm790_vm4 = vcmask 1046528   ;;  %p437_p4 = scmp.lt.s32.totalorder %s11149_s26, 1 }
   0xd   : > { %p432_p3 = scmp.lt.s32.totalorder %s431_s27, 79  ;;  %vm11071_vm5 = vmmov 0   ;;  %vm4685_vm6 = vcmask 97280   ;;  %vm7731_vm7 = vcmask 1041408   ;;  %vm7727_vm8 = vcmask 424960  }
   0xe   : > { %vm8878_vm9 = vcmask 1047552   ;;  %vm8873_vm10 = vcmask 121856   ;;  %s16008_s26 = smov (!%p437_p4, %s11149_s26), 1 }
   0xf   : > { %s16006_s27 = smov (!%p432_p3, %s431_s27), 79  ;;  %s9096_s14 = sshll.u32 %s16008_s26, 3 }
  0x10   : > { %s9095_s30 = sshll.u32 %s16006_s27, 2  ;;  %s440_s19 = scalar_lea.vmem %s15769_s13, %s9096_s14 }
  0x11   : > { %s11161_s16 = scalar_lea.vmem %s15756_s0, %s9095_s30 }
  0x12   : > { %v11164_v2 = vld [vmem:[%s11161_s16 + $0x38] sm:$0xff]   ;;  %v11167_v3 = vld [vmem:[%s11161_s16 + $0x40] sm:$0xff]   ;;  %v11170_v4 = vld [vmem:[%s11161_s16 + $0x30] sm:$0xff]  }
  0x13   : > { %v665_v5 = vshll.u32 %v11164_v2, 16  ;;  %v669_v6 = vshrl.u32 %v11164_v2, 16  ;;  %v673_v7 = vshll.u32 %v11167_v3, 16  ;;  %v11176_v8 = vld [vmem:[%s11161_s16 + $0x28] sm:$0xff]   ;;  %v657_v9 = vshll.u32 %v11170_v4, 16  ;;  %v11191_v16 = vld [vmem:[%s11161_s16 + $0x20] sm:$0xff]  }
  0x14   : > { %v661_v10 = vshrl.u32 %v11170_v4, 16  ;;  %v649_v13 = vshll.u32 %v11176_v8, 16  ;;  %v653_v14 = vshrl.u32 %v11176_v8, 16  ;;  %v11198_v19 = vld [vmem:[%s11161_s16 + $0x18] sm:$0xff]   ;;  %v641_v21 = vshll.u32 %v11191_v16, 16  ;;  %v11204_v22 = vld [vmem:[%s11161_s16 + $0x10] sm:$0xff]  }
  0x15   : > { %v667_v11 = vrot.slane %v665_v5, 1  ;;  %v11184_v12 = vrot.slane %v673_v7, 1  ;;  %v659_v15 = vrot.slane %v657_v9, 1  ;;  %v645_v25 = vshrl.u32 %v11191_v16, 16  ;;  %v442_v29 = vld [vmem:[%s11161_s16] sm:$0xf] }
  0x16   : > { %v651_v18 = vrot.slane %v649_v13, 1  ;;  %v633_v26 = vshll.u32 %v11198_v19, 16  ;;  %v643_v28 = vrot.slane %v641_v21, 1  ;;  %v625_v30 = vshll.u32 %v11204_v22, 16  ;;  %v11219_v31 = vld [vmem:[%s11161_s16 + $0x8] sm:$0xff]   ;;  %v11243_v43 = vld [vmem:[%s11161_s16 + $0x78] sm:$0xff]  }
  0x17   : > { %v671_v17 = vor.u32 %v669_v6, %v667_v11  ;;  %v663_v20 = vor.u32 %v661_v10, %v659_v15  ;;  %v637_v35 = vshrl.u32 %v11198_v19, 16  ;;  %v11228_v36 = vld [vmem:[%s11161_s16 + $0x4] sm:$0xf]  ;;  %v11232_v37 = vld [vmem:[%s11161_s16 + $0x98] sm:$0xf]  ;;  %v629_v40 = vshrl.u32 %v11204_v22, 16 }
  0x18   : > { %v655_v24 = vor.u32 %v653_v14, %v651_v18  ;;  %v647_v33 = vor.u32 %v645_v25, %v643_v28  ;;  %v635_v34 = vrot.slane %v633_v26, 1  ;;  %v482_v38 = vld [vmem:[%s11161_s16 + $0x9c] sm:$0x7]  ;;  %v627_v39 = vrot.slane %v625_v30, 1  ;;  %v11253_v48 = vld [vmem:[%s11161_s16 + $0x80] sm:$0xff]   ;;  %v11261_v53 = vld [vmem:[%s11161_s16 + $0x90] sm:$0xff]  }
  0x19   : > { %v676_v23 = vsel %vm608_vm0, %v671_v17, %v11184_v12  ;;  %v668_v27 = vsel %vm608_vm0, %v663_v20, %v667_v11  ;;  %v617_v41 = vshll.u32 %v11219_v31, 16  ;;  %v11240_v42 = vcombine.low %v442_v29, %v11228_v36  ;;  %v481_v47 = vld [vmem:[%s11161_s16 + $0x9c] sm:$0x3]  ;;  %v11270_v58 = vld [vmem:[%s11161_s16 + $0x88] sm:$0xff]  }
  0x1a   : > { %1238 = vmatprep.subr.bf16.mxu0 %v676_v23  ;;  %v660_v32 = vsel %vm608_vm0, %v655_v24, %v659_v15  ;;  %v652_v44 = vsel %vm608_vm0, %v647_v33, %v651_v18  ;;  %v639_v45 = vor.u32 %v637_v35, %v635_v34  ;;  %v11249_v46 = vcombine.low %v11232_v37, %v482_v38 }
  0x1b   : > { %1239 = vmatpush1.bf16.msra.mxu0 %v11164_v2  ;;  %v9116_v49 = vcombine.low %v11232_v37, %v481_v47  ;;  %v621_v50 = vshrl.u32 %v11219_v31, 16  ;;  %v631_v54 = vor.u32 %v629_v40, %v627_v39  ;;  %v619_v55 = vrot.slane %v617_v41, 1 }
  0x1c   : > { %1240 = vmatprep.subr.bf16.mxu0 %v668_v27  ;;  %v761_v51 = vshll.u32 %v11249_v46, 16  ;;  %v765_v52 = vshrl.u32 %v11249_v46, 16  ;;  %v612_v56 = vshll.u32 %v11240_v42, 16  ;;  %v729_v57 = vshll.u32 %v11243_v43, 16  ;;  %v11287_v27 = vld [vmem:[%s11161_s16 + $0x70] sm:$0xff]  }
  0x1d   : > { %v644_v59 = vsel %vm608_vm0, %v639_v45, %v643_v28  ;;  %v15772_v61 = vshll.u32 %v11261_v53, 16  ;;  %v15774_v62 = vshrl.u32 %v11261_v53, 16  ;;  %v737_v63 = vshll.u32 %v11253_v48, 16 }
  0x1e   : > { %v763_v60 = vrot.slane %v761_v51, 1  ;;  %v1224_v1 = vsel %vm964_vm1, %v9116_v49, 0  ;;  %v15770_v17 = vshll.u32 %v11270_v58, 16  ;;  %v15771_v18 = vshrl.u32 %v11270_v58, 16  ;;  %v11308_v51 = vld [vmem:[%s11161_s16 + $0x68] sm:$0xff]  }
  0x1f   : > { %1241 = vmatpush1.bf16.msra.mxu0 %v11170_v4  ;;  %v755_v15 = vrot.slane %v15772_v61, 1  ;;  %v636_v20 = vsel %vm608_vm0, %v631_v54, %v635_v34  ;;  %v623_v23 = vor.u32 %v621_v50, %v619_v55  ;;  %v610_v24 = vshrl.u32 %v11240_v42, 16 }
  0x20   : > { %1242 = vmatprep.subr.bf16.mxu0 %v660_v32  ;;  %v767_v11 = vor.u32 %v765_v52, %v763_v60  ;;  %v614_v28 = vrot.slane %v612_v56, 1  ;;  %v747_v32 = vrot.slane %v15770_v17, 1  ;;  %v741_v33 = vshrl.u32 %v11253_v48, 16  ;;  %v11348_v17 = vld [vmem:[%s11161_s16 + $0x58] sm:$0xff]  }
  0x21   : > { %v759_v29 = vor.u32 %v15774_v62, %v755_v15  ;;  %v739_v34 = vrot.slane %v737_v63, 1  ;;  %v11300_v38 = vrot.slane %v729_v57, 1  ;;  %v721_v49 = vshll.u32 %v11287_v27, 16 }
  0x22   : > { %9148 = vmatprep.subr.msk.bf16.mxu1 %vm964_vm1, %v767_v11  ;;  %v751_v47 = vor.u32 %v15771_v18, %v747_v32  ;;  %v628_v54 = vsel %vm608_vm0, %v623_v23, %v627_v39  ;;  %v615_v56 = vor.u32 %v614_v28, %v610_v24  ;;  %v885_v11 = vrot.slane %v669_v6, 1 }
  0x23   : > { %1243 = vmatpush1.bf16.msra.mxu0 %v11176_v8  ;;  %1370 = vmatpush1.bf16.msra.mxu1 %v1224_v1  ;;  %v764_v45 = vsel %vm608_vm0, %v759_v29, %v763_v60  ;;  %v743_v52 = vor.u32 %v741_v33, %v739_v34  ;;  %v677_v1 = vshrl.u32 %v11167_v3, 16  ;;  %v11317_v60 = vld [vmem:[%s11161_s16 + $0x60] sm:$0xff]   ;;  %v890_v24 = vrot.slane %v673_v7, 2 }
  0x24   : > { %1244 = vmatprep.subr.bf16.mxu0 %v652_v44  ;;  %v733_v44 = vshrl.u32 %v11243_v43, 16  ;;  %1371 = vmatprep.subr.bf16.mxu1 %v764_v45  ;;  %v15776_v6 = vshll.u32 %v11308_v51, 16  ;;  %v620_v45 = vsel %vm608_vm0, %v615_v56, %v619_v55  ;;  %v882_v7 = vrot.slane %v657_v9, 2 }
  0x25   : > { %v889_v23 = vrot.slane %v677_v1, 1  ;;  %v748_v28 = vsel %vm608_vm0, %v743_v52, %v747_v32  ;;  %v804_v55 = vrot.slane %v11164_v2, 1  ;;  %v877_v52 = vrot.slane %v653_v14, 1  ;;  %v10348_v14 = vld [vmem:[%s15757_s1 + $0x8] ss:$12 sps:$4 sm:$0xff]  }
  0x26   : > { %v735_v39 = vor.u32 %v733_v44, %v11300_v38  ;;  %v878_v56 = vrot.slane %v649_v13, 2  ;;  %v11375_v13 = vld [vmem:[%s11161_s16 + $0x48] sm:$0xff]  }
  0x27   : > { %1245 = vmatpush1.bf16.msra.mxu0 %v11191_v16  ;;  %1372 = vmatpush1.bf16.msra.mxu1 %v11261_v53 }
  0x28   : > { %1246 = vmatprep.subr.bf16.mxu0 %v644_v59  ;;  %v756_v59 = vsel %vm608_vm0, %v751_v47, %v755_v15  ;;  %v725_v15 = vshrl.u32 %v11287_v27, 16  ;;  %v11339_v47 = vor.u32 %v890_v24, %v889_v23  ;;  %v715_v23 = vrot.slane %v15776_v6, 1 }
  0x29   : > { %1373 = vmatprep.subr.bf16.mxu1 %v756_v59  ;;  %v881_v59 = vrot.slane %v661_v10, 1  ;;  %v15775_v10 = vrot.slane %v11167_v3, 1  ;;  %v717_v24 = vshrl.u32 %v11308_v51, 16  ;;  %v879_v61 = vor.u32 %v878_v56, %v877_v52 }
  0x2a   : > { %v15779_v52 = vshll.u32 %v11375_v13, 16  ;;  %v800_v56 = vrot.slane %v11176_v8, 1  ;;  %v869_v6 = vrot.slane %v637_v35, 1 }
  0x2b   : > { %1247 = vmatpush1.bf16.msra.mxu0 %v11198_v19  ;;  %1374 = vmatpush1.bf16.msra.mxu1 %v11270_v58  ;;  %v883_v32 = vor.u32 %v882_v7, %v881_v59  ;;  %v807_v59 = vsel %vm790_vm4, %v804_v55, %v15775_v10  ;;  %v802_v7 = vrot.slane %v11170_v4, 1  ;;  %v719_v62 = vor.u32 %v717_v24, %v715_v23 }
  0x2c   : > { %1248 = vmatprep.subr.bf16.mxu0 %v636_v20  ;;  %v886_v20 = vrot.slane %v665_v5, 2  ;;  %v11334_v5 = vrot.slane %v721_v49, 1  ;;  %1375 = vmatprep.subr.bf16.mxu1 %v748_v28  ;;  %v11367_v28 = vld [vmem:[%s11161_s16 + $0x50] sm:$0xff]   ;;  %v683_v35 = vrot.slane %v15779_v52, 1  ;;  %v866_v52 = vrot.slane %v625_v30, 2 }
  0x2d   : > { %v15781_v10 = vshll.u32 %v11367_v28, 16  ;;  %v862_v30 = vrot.slane %v617_v41, 2 }
  0x2e   : > { %v887_v29 = vor.u32 %v886_v20, %v885_v11  ;;  %v740_v11 = vsel %vm608_vm0, %v735_v39, %v739_v34  ;;  %v727_v20 = vor.u32 %v725_v15, %v11334_v5  ;;  %v15778_v39 = vshll.u32 %v11348_v17, 16 }
  0x2f   : > { %1249 = vmatpush1.bf16.msra.mxu0 %v11204_v22  ;;  %1376 = vmatpush1.bf16.msra.mxu1 %v11253_v48 }
  0x30   : > { %1250 = vmatprep.subr.bf16.mxu0 %v628_v54  ;;  %v15773_v54 = vshll.u32 %v11317_v60, 16  ;;  %v892_v9 = vsel %vm852_vm2, %v887_v29, %v11339_v47  ;;  %v888_v18 = vsel %vm852_vm2, %v883_v32, %v887_v29  ;;  %v701_v29 = vshrl.u32 %v11348_v17, 16 }
  0x31   : > { %1484 = vmatprep.subr.bf16.mxu1 %v892_v9  ;;  %v732_v9 = vsel %vm608_vm0, %v727_v20, %v11300_v38  ;;  %v805_v38 = vsel %vm790_vm4, %v802_v7, %v804_v55  ;;  %v483_v20 = vld [vmem:[%s11161_s16] sm:$0xe]  ;;  %v15782_v55 = vshrl.u32 %v11367_v28, 16 }
  0x32   : > { %v11380_v34 = vrot.slane %v15773_v54, 1  ;;  %v874_v54 = vrot.slane %v641_v21, 2  ;;  %9149 = vmatmul.mubr.msk.bf16.vlgmr.msra.gmra.mxu1 %vm1194_vm3, %v10348_v14  ;;  %v884_v14 = vsel %vm852_vm2, %v879_v61, %v883_v32 }
  0x33   : > { %1251 = vmatpush1.bf16.msra.mxu0 %v11219_v31  ;;  %1403 = vmatprep.mubr.bf16.mxu1 %v15788_v0 }
  0x34   : > { %1252 = vmatprep.subr.bf16.mxu0 %v620_v45  ;;  %v15777_v45 = vshrl.u32 %v11317_v60, 16  ;;  %1485 = vmatpush1.bf16.msra.mxu1 %v807_v59 }
  0x35   : > { %1486 = vmatprep.subr.bf16.mxu1 %v888_v18  ;;  %v691_v18 = vrot.slane %v15781_v10, 1  ;;  %v921_v10 = vrot.slane %v741_v33, 1 }
  0x36   : > { %v711_v21 = vor.u32 %v15777_v45, %v11380_v34  ;;  %v870_v45 = vrot.slane %v633_v26, 2  ;;  %v15780_v26 = vshrl.u32 %v11375_v13, 16 }
  0x37   : > { %1253 = vmatpush1.bf16.msra.mxu0 %v11240_v42  ;;  %v873_v42 = vrot.slane %v645_v25, 1  ;;  %v11408_v25 = vrot.slane %v15778_v39, 1  ;;  %v724_v39 = vsel %vm608_vm0, %v719_v62, %v11334_v5  ;;  %v11433_v62 = vcombine.low %v483_v20, %v11228_v36 }
  0x38   : > { %1254 = vmatprep.subr.bf16.mxu0 %v740_v11  ;;  %v484_v11 = vld [vmem:[%s11161_s16 + $0x9c] sm:$0xf]  ;;  %1487 = vmatpush1.bf16.msra.mxu1 %v805_v38  ;;  %v716_v5 = vsel %vm608_vm0, %v711_v21, %v715_v23  ;;  %v871_v38 = vor.u32 %v870_v45, %v869_v6  ;;  %v865_v20 = vrot.slane %v629_v40, 1  ;;  %v695_v23 = vor.u32 %v15782_v55, %v691_v18 }
  0x39   : > { %v875_v59 = vor.u32 %v874_v54, %v873_v42  ;;  %v11427_v54 = vcombine.low %v11232_v37, %v484_v11  ;;  %v703_v32 = vor.u32 %v701_v29, %v11408_v25  ;;  %1488 = vmatprep.subr.bf16.mxu1 %v884_v14  ;;  %v803_v37 = vsel %vm790_vm4, %v800_v56, %v802_v7 }
  0x3a   : > { %v798_v42 = vrot.slane %v11191_v16, 1  ;;  %v679_v21 = vor.u32 %v677_v1, %v11184_v12  ;;  %v687_v40 = vor.u32 %v15780_v26, %v683_v35  ;;  %v854_v6 = vshrl.u32 %v11433_v62, 16  ;;  %v10354_v1 = vld [vmem:[%s15757_s1 + $0x38] ss:$12 sps:$4 sm:$0xff]  }
  0x3b   : > { %1255 = vmatpush2.bf16.msra.mxu0 %v11243_v43  ;;  %v880_v11 = vsel %vm852_vm2, %v875_v59, %v879_v61  ;;  %v861_v61 = vrot.slane %v621_v50, 1  ;;  %v857_v12 = vshll.u32 %v11433_v62, 16  ;;  %v794_v45 = vrot.slane %v11204_v22, 1 }
  0x3c   : > { %1256 = vmatprep.subr.bf16.mxu0 %v732_v9  ;;  %v10350_v9 = vld [vmem:[%s15757_s1 + $0x20] ss:$12 sps:$4 sm:$0xff]   ;;  %1489 = vmatpush1.bf16.msra.mxu1 %v803_v37  ;;  %v801_v50 = vsel %vm790_vm4, %v798_v42, %v800_v56  ;;  %v934_v7 = vshrl.u32 %v11427_v54, 16  ;;  %v937_v14 = vshll.u32 %v11427_v54, 16  ;;  %v876_v41 = vsel %vm852_vm2, %v871_v38, %v875_v59 }
  0x3d   : > { %9150 = vmatmul.mubr.msk.bf16.gmra.mxu1 %vm1194_vm3, %v10350_v9  ;;  %1490 = vmatprep.subr.bf16.mxu1 %v880_v11  ;;  %v867_v9 = vor.u32 %v866_v52, %v865_v20  ;;  %v792_v37 = vrot.slane %v11219_v31, 1  ;;  %v917_v26 = vrot.slane %v733_v44, 1  ;;  %v708_v11 = vsel %vm608_vm0, %v703_v32, %v11380_v34 }
  0x3e   : > { %1413 = vmatprep.mubr.bf16.mxu1 %v15788_v0  ;;  %v918_v56 = vrot.slane %v729_v57, 2  ;;  %v863_v59 = vor.u32 %v862_v30, %v861_v61  ;;  %v828_v52 = vrot.slane %v11249_v46, 1  ;;  %v856_v20 = vrot.slane %v854_v6, 1 }
  0x3f   : > { %1257 = vmatpush2.bf16.msra.mxu0 %v11287_v27  ;;  %v859_v55 = vrot.slane %v857_v12, 2  ;;  %v700_v44 = vsel %vm608_vm0, %v695_v23, %v11408_v25  ;;  %v936_v34 = vrot.slane %v934_v7, 1  ;;  %v939_v32 = vrot.slane %v937_v14, 2 }
  0x40   : > { %1258 = vmatprep.subr.bf16.mxu0 %v724_v39  ;;  %v796_v39 = vrot.slane %v11198_v19, 1  ;;  %1491 = vmatpush1.bf16.msra.mxu1 %v801_v50  ;;  %v692_v33 = vsel %vm608_vm0, %v687_v40, %v691_v18  ;;  %v872_v61 = vsel %vm852_vm2, %v867_v9, %v871_v38  ;;  %v791_v30 = vrot.slane %v11433_v62, 1 }
  0x41   : > { %1492 = vmatprep.subr.bf16.mxu1 %v876_v41  ;;  %v795_v25 = vsel %vm790_vm4, %v792_v37, %v794_v45  ;;  %v11497_v23 = vor.u32 %v918_v56, %v917_v26  ;;  %v868_v18 = vsel %vm852_vm2, %v863_v59, %v867_v9  ;;  %v860_v62 = vor.u32 %v859_v55, %v856_v20 }
  0x42   : > { %v799_v57 = vsel %vm790_vm4, %v796_v39, %v798_v42  ;;  %v797_v6 = vsel %vm790_vm4, %v794_v45, %v796_v39  ;;  %v820_v38 = vrot.slane %v11243_v43, 1  ;;  %v11513_v26 = vor.u32 %v939_v32, %v936_v34 }
  0x43   : > { %1259 = vmatpush2.bf16.msra.mxu0 %v11308_v51  ;;  %v913_v39 = vrot.slane %v725_v15, 1  ;;  %v914_v40 = vrot.slane %v721_v49, 2  ;;  %v793_v55 = vsel %vm790_vm4, %v791_v30, %v792_v37  ;;  %v818_v12 = vrot.slane %v11287_v27, 1 }
  0x44   : > { %1260 = vmatprep.subr.bf16.mxu0 %v716_v5  ;;  %v922_v5 = vrot.slane %v737_v63, 2  ;;  %v11490_v63 = vsel %vm608_vm0, %v679_v21, %v683_v35  ;;  %1493 = vmatpush1.bf16.msra.mxu1 %v799_v57  ;;  %v11506_v35 = vsel %vm964_vm1, %v828_v52, 0  ;;  %v822_v21 = vrot.slane %v11253_v48, 1 }
  0x45   : > { %9151 = vmatmul.mubr.msk.bf16.gmra.mxu1 %vm1194_vm3, %v10354_v1  ;;  %1494 = vmatprep.subr.bf16.mxu1 %v872_v61  ;;  %v11524_v1 = vrot.slane %v717_v24, 1  ;;  %v15847_v50 = vshll.u32 %v11308_v51, 16  ;;  %v15848_v7 = vshrl.u32 %v11261_v53, 16  ;;  %v15849_v14 = vshll.u32 %v11261_v53, 16 }
  0x46   : > { %v11499_v42 = vor.u32 %v922_v5, %v921_v10  ;;  %1423 = vmatprep.mubr.bf16.mxu1 %v15788_v0  ;;  %v10358_v10 = vld [vmem:[%s15757_s1 + $0x50] ss:$12 sps:$4 sm:$0xff]   ;;  %v994_v9 = vrot.slane %v11243_v43, 2  ;;  %v864_v24 = vsel %vm852_vm2, %v860_v62, %v863_v59  ;;  %v816_v37 = vrot.slane %v11308_v51, 1 }
  0x47   : > { %1261 = vmatpush2.bf16.msra.mxu0 %v11317_v60  ;;  %v11528_v45 = vrot.slane %v15847_v50, 2  ;;  %v929_v49 = vrot.slane %v15848_v7, 1  ;;  %v930_v41 = vrot.slane %v15849_v14, 2  ;;  %v15785_v56 = vrot.slane %v11253_v48, 2 }
  0x48   : > { %1262 = vmatprep.subr.bf16.mxu0 %v708_v11  ;;  %v924_v15 = vsel %vm852_vm2, %v11497_v23, %v11499_v42  ;;  %1495 = vmatpush1.bf16.msra.mxu1 %v797_v6  ;;  %v826_v11 = vrot.slane %v11261_v53, 1  ;;  %v11543_v5 = vor.u32 %v914_v40, %v913_v39  ;;  %v15850_v20 = vshrl.u32 %v11317_v60, 16 }
  0x49   : > { %1496 = vmatprep.subr.bf16.mxu1 %v868_v18  ;;  %v15851_v57 = vshrl.u32 %v11270_v58, 16  ;;  %v15784_v59 = vrot.slane %v11164_v2, 2  ;;  %v11555_v32 = vsel %vm964_vm1, %v994_v9, %v15785_v56  ;;  %v15783_v61 = vrot.slane %v11427_v54, 2 }
  0x4a   : > { %v992_v30 = vrot.slane %v11287_v27, 2  ;;  %v976_v6 = vrot.slane %v11170_v4, 2  ;;  %v11561_v18 = vor.u32 %v930_v41, %v929_v49  ;;  %v990_v62 = vrot.slane %v11308_v51, 2 }
  0x4b   : > { %1263 = vmatpush2.bf16.msra.mxu0 %v11348_v17  ;;  %v925_v34 = vrot.slane %v15851_v57, 1  ;;  %v974_v39 = vrot.slane %v11176_v8, 2  ;;  %v15852_v40 = vshll.u32 %v11270_v58, 16  ;;  %v11582_v8 = vld [vmem:[%s15757_s1 + $0x68] ss:$12 sps:$4 sm:$0xff]   ;;  %v972_v41 = vrot.slane %v11191_v16, 2 }
  0x4c   : > { %1264 = vmatprep.subr.bf16.mxu0 %v700_v44  ;;  %v11547_v44 = vrot.slane %v15850_v20, 1  ;;  %1497 = vmatpush1.bf16.msra.mxu1 %v795_v25  ;;  %v11570_v7 = vsel %vm964_vm1, %v992_v30, %v994_v9  ;;  %v11575_v4 = vsel %vm964_vm1, %v976_v6, %v15784_v59  ;;  %v11585_v25 = vsel %vm964_vm1, %v990_v62, %v992_v30  ;;  %v11600_v9 = vld [vmem:[%s15757_s1] ss:$12 sps:$4 sm:$0xff]   ;;  %v11611_v16 = vld [vmem:[%s15757_s1 + $0x1c] ss:$12 sps:$4 sm:$0xff]  }
  0x4d   : > { %9152 = vmatmul.mubr.msk.bf16.gmra.mxu1 %vm1194_vm3, %v10358_v10  ;;  %v926_v50 = vrot.slane %v15852_v40, 2  ;;  %v988_v10 = vrot.slane %v11317_v60, 2  ;;  %1498 = vmatprep.subr.bf16.mxu1 %v864_v24  ;;  %v11588_v49 = vsel %vm964_vm1, %v974_v39, %v976_v6  ;;  %v986_v20 = vrot.slane %v11348_v17, 2 }
  0x4e   : > { %1433 = vmatprep.mubr.bf16.mxu1 %v15788_v0  ;;  %v970_v57 = vrot.slane %v11198_v19, 2  ;;  %v984_v30 = vrot.slane %v11367_v28, 2  ;;  %v968_v6 = vrot.slane %v11204_v22, 2  ;;  %v982_v40 = vrot.slane %v11375_v13, 2 }
  0x4f   : > { %1265 = vmatpush2.bf16.msra.mxu0 %v11367_v28  ;;  %v11603_v24 = vsel %vm964_vm1, %v988_v10, %v990_v62  ;;  %v966_v62 = vrot.slane %v11219_v31, 2  ;;  %v11621_v19 = vsel %vm964_vm1, %v986_v20, %v988_v10  ;;  %v15853_v10 = vshll.u32 %v11317_v60, 16 }
  0x50   : > { %1266 = vmatprep.subr.bf16.mxu0 %v692_v33  ;;  %v1000_v33 = vrot.slane %v11261_v53, 2  ;;  %1499 = vmatpush1.bf16.msra.mxu1 %v793_v55  ;;  %v11624_v59 = vsel %vm964_vm1, %v970_v57, %v972_v41  ;;  %v11627_v56 = vsel %vm964_vm1, %v984_v30, %v986_v20  ;;  %v11632_v22 = vsel %vm964_vm1, %v968_v6, %v970_v57 }
  0x51   : > { %1500 = vmatprep.subr.bf16.mxu1 %v924_v15  ;;  %v11637_v31 = vsel %vm964_vm1, %v982_v40, %v984_v30  ;;  %v11640_v55 = vsel %vm964_vm1, %v966_v62, %v968_v6  ;;  %v823_v15 = vsel %vm790_vm4, %v820_v38, %v822_v21  ;;  %v927_v20 = vor.u32 %v926_v50, %v925_v34 }
  0x52   : > { %v11593_v14 = vsel %vm964_vm1, %v1000_v33, %v15783_v61  ;;  %v485_v61 = vld [vmem:[%s11161_s16] sm:$0xc]  ;;  %v920_v57 = vsel %vm852_vm2, %v11543_v5, %v11497_v23  ;;  %v911_v30 = vor.u32 %v11528_v45, %v11524_v1  ;;  %v821_v23 = vsel %vm790_vm4, %v818_v12, %v820_v38  ;;  %v11682_v1 = vld [vmem:[%s15757_s1 + $0x18] ss:$12 sps:$4 sm:$0xff]  }
  0x53   : > { %1267 = vmatpush2.bf16.msra.mxu0 %v11375_v13  ;;  %v814_v45 = vrot.slane %v11317_v60, 1  ;;  %v824_v43 = vrot.slane %v11270_v58, 1  ;;  %v11697_v38 = vld [vmem:[%s15757_s1 + $0x34] ss:$12 sps:$4 sm:$0xff]   ;;  %v901_v46 = vrot.slane %v701_v29, 1  ;;  %v819_v29 = vsel %vm790_vm4, %v816_v37, %v818_v12 }
  0x54   : > { %1268 = vmatprep.subr.bf16.mxu0 %v11490_v63  ;;  %v11614_v63 = vsel %vm964_vm1, %v972_v41, %v974_v39  ;;  %v9120_v39 = vcombine.low %v485_v61, %v11228_v36  ;;  %v906_v36 = vrot.slane %v15853_v10, 2  ;;  %v941_v41 = vsel %vm852_vm2, %v11561_v18, %v11513_v26  ;;  %1501 = vmatpush2.bf16.msra.mxu1 %v823_v15 }
  0x55   : > { %9153 = vmatmul.mubr.msk.bf16.gmra.mxu1 %vm1194_vm3, %v11582_v8  ;;  %1502 = vmatprep.subr.bf16.mxu1 %v920_v57  ;;  %v916_v60 = vsel %vm852_vm2, %v911_v30, %v11543_v5  ;;  %v15855_v10 = vshrl.u32 %v11367_v28, 16  ;;  %v928_v27 = vsel %vm852_vm2, %v11499_v42, %v927_v20  ;;  %v15857_v53 = vshrl.u32 %v11375_v13, 16  ;;  %v11741_v42 = vld [vmem:[%s15757_s1 + $0x98] ss:$12 sps:$4 sm:$0xff]  }
  0x56   : > { %v965_v61 = vrot.slane %v9120_v39, 2  ;;  %1443 = vmatprep.mubr.bf16.mxu1 %v15788_v0  ;;  %v998_v39 = vrot.slane %v11270_v58, 2  ;;  %v907_v50 = vor.u32 %v906_v36, %v11547_v44  ;;  %v932_v58 = vsel %vm852_vm2, %v927_v20, %v11561_v18  ;;  %v11746_v20 = vld [vmem:[%s15757_s1 + $0x30] ss:$12 sps:$4 sm:$0xff]  }
  0x57   : > { %1269 = vmatpush2.bf16.msra.mxu0 %v11167_v3  ;;  %v827_v44 = vsel %vm790_vm4, %v824_v43, %v826_v11  ;;  %v15856_v18 = vshll.u32 %v11367_v28, 16  ;;  %v893_v12 = vrot.slane %v15857_v53, 1  ;;  %v11845_v53 = vld [vmem:[%s15757_s1 + $0x90] ss:$12 sps:$4 sm:$0xff]  }
  0x58   : > { %9158 = vmatprep.subr.msk.bf16.mxu0 %vm964_vm1, %v11513_v26  ;;  %v11664_v6 = vsel %vm964_vm1, %v965_v61, %v966_v62  ;;  %v11672_v26 = vld [vmem:[%s15757_s1 + $0x80] ss:$12 sps:$4 sm:$0xff]   ;;  %v11692_v34 = vsel %vm964_vm1, %v998_v39, %v1000_v33  ;;  %v812_v33 = vrot.slane %v11348_v17, 1  ;;  %v897_v61 = vrot.slane %v15855_v10, 1  ;;  %1503 = vmatpush2.bf16.msra.mxu1 %v821_v23 }
  0x59   : > { %1504 = vmatprep.subr.bf16.mxu1 %v916_v60  ;;  %v898_v36 = vrot.slane %v15856_v18, 2  ;;  %v817_v23 = vsel %vm790_vm4, %v814_v45, %v816_v37 }
  0x5a   : > { %1271 = vmatmul.mubr.bf16.vlgmr.msra.gmra.mxu0 %v11600_v9 }
  0x5b   : > { %1280 = vmatprep.mubr.bf16.mxu0 %v11611_v16  ;;  %1616 = vmatpush1.bf16.msra.mxu0 %v11506_v35  ;;  %v829_v35 = vsel %vm790_vm4, %v826_v11, %v828_v52  ;;  %v15854_v52 = vshll.u32 %v11348_v17, 16  ;;  %v912_v17 = vsel %vm852_vm2, %v907_v50, %v911_v30  ;;  %v15858_v11 = vshll.u32 %v11375_v13, 16 }
  0x5c   : > { %1617 = vmatprep.subr.bf16.mxu0 %v941_v41  ;;  %v15859_v41 = vrot.slane %v11253_v48, 2  ;;  %1505 = vmatpush2.bf16.msra.mxu1 %v819_v29  ;;  %v825_v30 = vsel %vm790_vm4, %v822_v21, %v824_v43  ;;  %v815_v48 = vsel %vm790_vm4, %v812_v33, %v814_v45  ;;  %v810_v21 = vrot.slane %v11367_v28, 1  ;;  %v11778_v28 = vld [vmem:[%s15757_s1 + $0x48] ss:$12 sps:$4 sm:$0xff]   ;;  %v11783_v45 = vld [vmem:[%s15757_s1 + $0x64] ss:$12 sps:$4 sm:$0xff]  }
  0x5d   : > { %v902_v62 = vrot.slane %v15854_v52, 2  ;;  %9154 = vmatmul.mubr.msk.bf16.gmra.mxu1 %vm1194_vm3, %v11672_v26  ;;  %v894_v15 = vrot.slane %v15858_v11, 2  ;;  %1506 = vmatprep.subr.bf16.mxu1 %v912_v17  ;;  %v15786_v52 = vmov 0.0   ;;  %v808_v43 = vrot.slane %v11375_v13, 1  ;;  %v11808_v29 = vld [vmem:[%s15757_s1 + $0x7c] ss:$12 sps:$4 sm:$0xff]  }
  0x5e   : > { %1453 = vmatprep.mubr.bf16.mxu1 %v15788_v0  ;;  %v11735_v57 = vsel %vm964_vm1, %v15859_v41, %v998_v39  ;;  %v11754_v39 = vld [vmem:[%s15757_s1 + $0x4c] ss:$12 sps:$4 sm:$0xff]   ;;  %v11820_v17 = vld [vmem:[%s15757_s1 + $0x4] ss:$12 sps:$4 sm:$0xff]  }
  0x5f   : > { %1618 = vmatpush1.bf16.msra.mxu0 %v829_v35  ;;  %v903_v5 = vor.u32 %v902_v62, %v901_v46  ;;  %v899_v46 = vor.u32 %v898_v36, %v897_v61  ;;  %v895_v37 = vor.u32 %v894_v15, %v893_v12  ;;  %v813_v62 = vsel %vm790_vm4, %v810_v21, %v812_v33  ;;  %v11798_v33 = vld [vmem:[%s15757_s1 + $0xc8] ss:$12 sps:$4 sm:$0xff]   ;;  %v11803_v61 = vld [vmem:[%s15757_s1 + $0x60] ss:$12 sps:$4 sm:$0xff]   ;;  %v10405_v12 = vld [vmem:[%s15758_s2 + $0x18] ss:$12 sps:$4 sm:$0xff]  }
  0x60   : > { %1619 = vmatprep.subr.bf16.mxu0 %v932_v58  ;;  %1507 = vmatpush2.bf16.msra.mxu1 %v817_v23  ;;  %v811_v60 = vsel %vm790_vm4, %v808_v43, %v810_v21  ;;  %v15861_v36 = vrot.slane %v11164_v2, 2  ;;  %v11851_v2 = vld [vmem:[%s15757_s1 + $0xac] ss:$12 sps:$4 sm:$0xff]   ;;  %v10410_v11 = vld [vmem:[%s15758_s2 + $0x4] ss:$12 sps:$4 sm:$0xff]  }
  0x61   : > { %v908_v35 = vsel %vm852_vm2, %v903_v5, %v907_v50  ;;  %v904_v51 = vsel %vm852_vm2, %v899_v46, %v903_v5  ;;  %v11773_v50 = vld [vmem:[%s15757_s1 + $0xb0] ss:$12 sps:$4 sm:$0xff]   ;;  %v900_v58 = vsel %vm852_vm2, %v895_v37, %v899_v46  ;;  %v896_v10 = vsel %vm852_vm2, %v11339_v47, %v895_v37  ;;  %v11018_v5 = vld [vmem:[%s11161_s16 + $0x40] sm:$0xff]   ;;  %v10413_v41 = vld [vmem:[%s15758_s2 + $0x16c] ss:$12 sps:$4 sm:$0xff]  }
  0x62   : > { %1281 = vmatmul.mubr.bf16.gmra.mxu0 %v11682_v1  ;;  %1508 = vmatprep.subr.bf16.mxu1 %v908_v35  ;;  %v15860_v47 = vrot.slane %v11167_v3, 1  ;;  %v11827_v3 = vld [vmem:[%s15757_s1 + $0x78] ss:$12 sps:$4 sm:$0xff]   ;;  %v980_v18 = vrot.slane %v11018_v5, 2  ;;  %v10408_v15 = vld [vmem:[%s15758_s2] ss:$12 sps:$4 sm:$0xff]  }
  0x63   : > { %1290 = vmatprep.mubr.bf16.mxu0 %v11697_v38  ;;  %1620 = vmatpush1.bf16.msra.mxu0 %v827_v44  ;;  %v10419_v23 = vld [vmem:[%s15758_s2 + $0x13c] ss:$12 sps:$4 sm:$0xff]   ;;  %v10422_v21 = vld [vmem:[%s15758_s2 + $0x124] ss:$12 sps:$4 sm:$0xff]  }
  0x64   : > { %1621 = vmatprep.subr.bf16.mxu0 %v928_v27  ;;  %1509 = vmatpush2.bf16.msra.mxu1 %v815_v48  ;;  %v809_v44 = vsel %vm790_vm4, %v15860_v47, %v808_v43  ;;  %v981_v27 = vsel %vm964_vm1, %v15861_v36, %v980_v18  ;;  %v10438_v35 = vld [vmem:[%s15758_s2 + $0x210] ss:$12 sps:$4 sm:$0xff]   ;;  %v10417_v48 = vld [vmem:[%s15758_s2 + $0x138] ss:$12 sps:$4 sm:$0xff]   ;;  %v10420_v43 = vld [vmem:[%s15758_s2 + $0x120] ss:$12 sps:$4 sm:$0xff]  }
  0x65   : > { %9155 = vmatmul.mubr.msk.bf16.gmra.mxu1 %vm1194_vm3, %v11741_v42  ;;  %1510 = vmatprep.subr.bf16.mxu1 %v904_v51  ;;  %v10443_v46 = vld [vmem:[%s15758_s2 + $0x1fc] ss:$12 sps:$4 sm:$0xff]   ;;  %v10441_v51 = vld [vmem:[%s15758_s2 + $0x1f8] ss:$12 sps:$4 sm:$0xff]  }
  0x66   : > { %1463 = vmatprep.mubr.bf16.mxu1 %v15788_v0  ;;  %v10446_v37 = vld [vmem:[%s15758_s2 + $0x1e4] ss:$12 sps:$4 sm:$0xff]  }
  0x67   : > { %1622 = vmatpush1.bf16.msra.mxu0 %v825_v30  ;;  %v10414_v30 = vld [vmem:[%s15758_s2 + $0x150] ss:$12 sps:$4 sm:$0xff]   ;;  %v10429_v5 = vld [vmem:[%s15758_s2 + $0xd8] ss:$12 sps:$4 sm:$0xff]  }
  0x68   : > { %10219 = vmatprep.subr.bf16.mxu0 %v15786_v52  ;;  %1511 = vmatpush2.bf16.msra.mxu1 %v813_v62  ;;  %v10423_v62 = vld [vmem:[%s15758_s2 + $0x108] ss:$12 sps:$4 sm:$0xff]   ;;  %v10450_v47 = vld [vmem:[%s15758_s2 + $0x1b0] ss:$12 sps:$4 sm:$0xff]  }
  0x69   : > { %1512 = vmatprep.subr.bf16.mxu1 %v900_v58  ;;  %v10428_v58 = vld [vmem:[%s15758_s2 + $0xf4] ss:$12 sps:$4 sm:$0xff]  }
  0x6a   : > { %1291 = vmatmul.mubr.bf16.gmra.mxu0 %v11746_v20 }
  0x6b   : > { %1300 = vmatprep.mubr.bf16.mxu0 %v11754_v39 }
  0x6c   : > { %1513 = vmatpush2.bf16.msra.mxu1 %v811_v60  ;;  %v10447_v60 = vld [vmem:[%s15758_s2 + $0x1c8] ss:$12 sps:$4 sm:$0xff]  }
  0x6d   : > { %9156 = vmatmul.mubr.msk.bf16.gmra.mxu1 %vm1194_vm3, %v11773_v50  ;;  %1514 = vmatprep.subr.bf16.mxu1 %v896_v10  ;;  %v10452_v10 = vld [vmem:[%s15758_s2 + $0x1b4] ss:$12 sps:$4 sm:$0xff]  }
  0x6e   : > { %1473 = vmatprep.mubr.bf16.mxu1 %v15788_v0 }
  0x70   : > { %1515 = vmatpush2.bf16.msra.mxu1 %v809_v44 }
  0x71   : > { %9834 = vmatprep.subr.bf16.mxu1 %v11555_v32  ;;  %v11833_v32 = vld [vmem:[%s15757_s1 + $0x94] ss:$12 sps:$4 sm:$0xff]  }
  0x72   : > { %1301 = vmatmul.mubr.bf16.gmra.mxu0 %v11778_v28 }
  0x73   : > { %1310 = vmatprep.mubr.bf16.mxu0 %v11783_v45 }
  0x75   : > { %9157 = vmatmul.mubr.msk.bf16.gmra.mxu1 %vm1194_vm3, %v11798_v33 }
  0x76   : > { %1516 = vmatprep.mubr.bf16.mxu1 %v11820_v17 }
  0x7a   : > { %1311 = vmatmul.mubr.bf16.gmra.mxu0 %v11803_v61 }
  0x7b   : > { %1320 = vmatprep.mubr.bf16.mxu0 %v11808_v29 }
  0x7d   : > { %1517 = vmatmul.mubr.bf16.vlgmr.msra.gmra.mxu1 %v11600_v9 }
  0x7e   : > { %1526 = vmatprep.mubr.bf16.mxu1 %v11611_v16  ;;  %9835 = vmatpush3.bf16.msra.mxu1 %v981_v27 }
  0x7f   : > { %9836 = vmatprep.subr.bf16.mxu1 %v11570_v7  ;;  %v11863_v7 = vld [vmem:[%s15757_s1 + $0xa8] ss:$12 sps:$4 sm:$0xff]  }
  0x82   : > { %1321 = vmatmul.mubr.bf16.gmra.mxu0 %v11827_v3  ;;  %9837 = vmatpush3.bf16.msra.mxu1 %v11575_v4  ;;  %v11869_v4 = vld [vmem:[%s15757_s1 + $0xc4] ss:$12 sps:$4 sm:$0xff]  }
  0x83   : > { %1330 = vmatprep.mubr.bf16.mxu0 %v11833_v32  ;;  %9838 = vmatprep.subr.bf16.mxu1 %v11585_v25  ;;  %v11881_v25 = vld [vmem:[%s15757_s1 + $0xc0] ss:$12 sps:$4 sm:$0xff]  }
  0x85   : > { %1527 = vmatmul.mubr.bf16.gmra.mxu1 %v11682_v1 }
  0x86   : > { %1536 = vmatprep.mubr.bf16.mxu1 %v11697_v38  ;;  %9839 = vmatpush3.bf16.msra.mxu1 %v11588_v49  ;;  %v983_v49 = vsel %vm964_vm1, %v980_v18, %v982_v40  ;;  %v11944_v40 = vld [vmem:[%s15757_s1 + $0x50] ss:$12 sps:$4 sm:$0xff]  }
  0x87   : > { %9840 = vmatprep.subr.bf16.mxu1 %v11603_v24  ;;  %v11905_v24 = vld [vmem:[%s15757_s1 + $0x8] ss:$12 sps:$4 sm:$0xff]   ;;  %v10434_v18 = vld [vmem:[%s15758_s2 + $0xc4] ss:$12 sps:$4 sm:$0xff]  }
  0x8a   : > { %1331 = vmatmul.mubr.bf16.gmra.mxu0 %v11845_v53  ;;  %9841 = vmatpush3.bf16.msra.mxu1 %v11614_v63  ;;  %v11934_v63 = vld [vmem:[%s15757_s1 + $0x38] ss:$12 sps:$4 sm:$0xff]  }
  0x8b   : > { %1340 = vmatprep.mubr.bf16.mxu0 %v11851_v2  ;;  %9842 = vmatprep.subr.bf16.mxu1 %v11621_v19  ;;  %v10387_v19 = vld [vmem:[%s15758_s2 + $0xa8] ss:$12 sps:$4 sm:$0xff]  }
  0x8d   : > { %1537 = vmatmul.mubr.bf16.gmra.mxu1 %v11746_v20 }
  0x8e   : > { %1546 = vmatprep.mubr.bf16.mxu1 %v11754_v39  ;;  %9843 = vmatpush3.bf16.msra.mxu1 %v11624_v59  ;;  %v15862_v59 = vrot.slane %v11427_v54, 2  ;;  %v11918_v54 = vld [vmem:[%s15757_s1 + $0x20] ss:$12 sps:$4 sm:$0xff]  }
  0x8f   : > { %9844 = vmatprep.subr.bf16.mxu1 %v11627_v56  ;;  %v10389_v56 = vld [vmem:[%s15758_s2 + $0xac] ss:$12 sps:$4 sm:$0xff]  }
  0x90   : > { %v1236_v13 = vsel %vm964_vm1, %v15862_v59, 0 }
  0x92   : > { %1341 = vmatmul.mubr.bf16.gmra.mxu0 %v11863_v7  ;;  %9845 = vmatpush3.bf16.msra.mxu1 %v11632_v22  ;;  %v10392_v22 = vld [vmem:[%s15758_s2 + $0x94] ss:$12 sps:$4 sm:$0xff]  }
  0x93   : > { %1350 = vmatprep.mubr.bf16.mxu0 %v11869_v4  ;;  %9846 = vmatprep.subr.bf16.mxu1 %v11637_v31  ;;  %v10390_v31 = vld [vmem:[%s15758_s2 + $0x90] ss:$12 sps:$4 sm:$0xff]  }
  0x95   : > { %1547 = vmatmul.mubr.bf16.gmra.mxu1 %v11778_v28 }
  0x96   : > { %1556 = vmatprep.mubr.bf16.mxu1 %v11783_v45  ;;  %9847 = vmatpush3.bf16.msra.mxu1 %v11640_v55  ;;  %v10398_v55 = vld [vmem:[%s15758_s2 + $0x64] ss:$12 sps:$4 sm:$0xff]  }
  0x97   : > { %9848 = vmatprep.subr.bf16.mxu1 %v983_v49  ;;  %v10456_v49 = vld [vmem:[%s15758_s2 + $0x180] ss:$12 sps:$4 sm:$0xff]  }
  0x9a   : > { %1351 = vmatmul.mubr.bf16.gmra.mxu0 %v11881_v25  ;;  %9849 = vmatpush3.bf16.msra.mxu1 %v11664_v6  ;;  %v10401_v6 = vld [vmem:[%s15758_s2 + $0x4c] ss:$12 sps:$4 sm:$0xff]  }
  0x9b   : > { %1639 = vmatprep.mubr.bf16.mxu0 %v15788_v0  ;;  %2785 = vmatprep.subr.bf16.mxu1 %v10389_v56 }
  0x9d   : > { %1557 = vmatmul.mubr.bf16.gmra.mxu1 %v11803_v61 }
  0x9e   : > { %1566 = vmatprep.mubr.bf16.mxu1 %v11808_v29 }
  0xa2   : > { %9159 = vmatmul.mubr.msk.bf16.vlgmr.msra.gmra.mxu0 %vm1194_vm3, %v11905_v24 }
  0xa3   : > { %1649 = vmatprep.mubr.bf16.mxu0 %v15788_v0  ;;  %10220 = vmatpush3.bf16.msra.mxu0 %v1236_v13  ;;  %v10459_v13 = vld [vmem:[%s15758_s2 + $0x2e8] ss:$12 sps:$4 sm:$0xff]  }
  0xa4   : > { %10221 = vmatprep.subr.bf16.mxu0 %v15786_v52 }
  0xa5   : > { %1567 = vmatmul.mubr.bf16.gmra.mxu1 %v11827_v3 }
  0xa6   : > { %1576 = vmatprep.mubr.bf16.mxu1 %v11833_v32 }
  0xa7   : > { %10222 = vmatpush3.bf16.msra.mxu0 %v11593_v14  ;;  %v10437_v14 = vld [vmem:[%s15758_s2 + $0x22c] ss:$12 sps:$4 sm:$0xff]  }
  0xa8   : > { %10223 = vmatprep.subr.bf16.mxu0 %v15786_v52 }
  0xaa   : > { %9160 = vmatmul.mubr.msk.bf16.gmra.mxu0 %vm1194_vm3, %v11918_v54 }
  0xab   : > { %1659 = vmatprep.mubr.bf16.mxu0 %v15788_v0  ;;  %10224 = vmatpush3.bf16.msra.mxu0 %v11692_v34  ;;  %v10402_v34 = vld [vmem:[%s15758_s2 + $0x30] ss:$12 sps:$4 sm:$0xff]  }
  0xac   : > { %10225 = vmatprep.subr.bf16.mxu0 %v15786_v52 }
  0xad   : > { %1577 = vmatmul.mubr.bf16.gmra.mxu1 %v11845_v53 }
  0xae   : > { %1586 = vmatprep.mubr.bf16.mxu1 %v11851_v2 }
  0xaf   : > { %10226 = vmatpush3.bf16.msra.mxu0 %v11735_v57  ;;  %v10411_v57 = vld [vmem:[%s15758_s2 + $0x168] ss:$12 sps:$4 sm:$0xff]  }
  0xb0   : > { %2908 = vmatprep.subr.bf16.mxu0 %v10437_v14  ;;  %v10464_v14 = vld [vmem:[%s15758_s2 + $0x2d4] ss:$12 sps:$4 sm:$0xff]  }
  0xb2   : > { %9161 = vmatmul.mubr.msk.bf16.gmra.mxu0 %vm1194_vm3, %v11934_v63 }
  0xb3   : > { %1669 = vmatprep.mubr.bf16.mxu0 %v15788_v0 }
  0xb5   : > { %1587 = vmatmul.mubr.bf16.gmra.mxu1 %v11863_v7 }
  0xb6   : > { %1596 = vmatprep.mubr.bf16.mxu1 %v11869_v4 }
  0xba   : > { %9162 = vmatmul.mubr.msk.bf16.gmra.mxu0 %vm1194_vm3, %v11944_v40 }
  0xbb   : > { %1679 = vmatprep.mubr.bf16.mxu0 %v15788_v0 }
  0xbd   : > { %1597 = vmatmul.mubr.bf16.gmra.mxu1 %v11881_v25 }
  0xbe   : > { %1762 = vmatprep.mubr.bf16.mxu1 %v11820_v17  ;;  %v10455_v17 = vld [vmem:[%s15758_s2 + $0x19c] ss:$12 sps:$4 sm:$0xff]  }
  0xc2   : > { %9163 = vmatmul.mubr.msk.bf16.gmra.mxu0 %vm1194_vm3, %v11582_v8  ;;  %v10395_v8 = vld [vmem:[%s15758_s2 + $0x7c] ss:$12 sps:$4 sm:$0xff]  }
  0xc3   : > { %1689 = vmatprep.mubr.bf16.mxu0 %v15788_v0 }
  0xc5   : > { %1763 = vmatmul.mubr.bf16.vlgmr.msra.gmra.mxu1 %v11600_v9  ;;  %v10393_v9 = vld [vmem:[%s15758_s2 + $0x78] ss:$12 sps:$4 sm:$0xff]  }
  0xc6   : > { %1770 = vmatprep.mubr.bf16.mxu1 %v11611_v16  ;;  %2786 = vmatpush1.bf16.msra.mxu1 %v10387_v19  ;;  %v10396_v16 = vld [vmem:[%s15758_s2 + $0x60] ss:$12 sps:$4 sm:$0xff]   ;;  %v10467_v19 = vld [vmem:[%s15758_s2 + $0x2bc] ss:$12 sps:$4 sm:$0xff]  }
  0xc7   : > { %2787 = vmatprep.subr.bf16.mxu1 %v10392_v22 }
  0xca   : > { %9164 = vmatmul.mubr.msk.bf16.gmra.mxu0 %vm1194_vm3, %v11672_v26  ;;  %2788 = vmatpush1.bf16.msra.mxu1 %v10390_v31  ;;  %v10399_v26 = vld [vmem:[%s15758_s2 + $0x48] ss:$12 sps:$4 sm:$0xff]   ;;  %v10465_v31 = vld [vmem:[%s15758_s2 + $0x2b8] ss:$12 sps:$4 sm:$0xff]  }
  0xcb   : > { %1699 = vmatprep.mubr.bf16.mxu0 %v15788_v0  ;;  %2789 = vmatprep.subr.bf16.mxu1 %v10395_v8 }
  0xcd   : > { %1771 = vmatmul.mubr.bf16.gmra.mxu1 %v11682_v1  ;;  %v10404_v1 = vld [vmem:[%s15758_s2 + $0x34] ss:$12 sps:$4 sm:$0xff]  }
  0xce   : > { %1778 = vmatprep.mubr.bf16.mxu1 %v11697_v38  ;;  %2790 = vmatpush1.bf16.msra.mxu1 %v10393_v9  ;;  %v10407_v38 = vld [vmem:[%s15758_s2 + $0x1c] ss:$12 sps:$4 sm:$0xff]  }
  0xcf   : > { %2791 = vmatprep.subr.bf16.mxu1 %v10398_v55  ;;  %v10470_v55 = vld [vmem:[%s15758_s2 + $0x2a4] ss:$12 sps:$4 sm:$0xff]  }
  0xd2   : > { %9165 = vmatmul.mubr.msk.bf16.gmra.mxu0 %vm1194_vm3, %v11741_v42  ;;  %2792 = vmatpush1.bf16.msra.mxu1 %v10396_v16  ;;  %v10416_v42 = vld [vmem:[%s15758_s2 + $0x154] ss:$12 sps:$4 sm:$0xff]  }
  0xd3   : > { %1709 = vmatprep.mubr.bf16.mxu0 %v15788_v0  ;;  %2793 = vmatprep.subr.bf16.mxu1 %v10401_v6  ;;  %v11024_v16 = vld [vmem:[%s15757_s1 + $0x80] ss:$12 sps:$4 sm:$0xff]  }
  0xd5   : > { %1779 = vmatmul.mubr.bf16.gmra.mxu1 %v11746_v20  ;;  %v10435_v20 = vld [vmem:[%s15758_s2 + $0x228] ss:$12 sps:$4 sm:$0xff]  }
  0xd6   : > { %1786 = vmatprep.mubr.bf16.mxu1 %v11754_v39  ;;  %2794 = vmatpush1.bf16.msra.mxu1 %v10399_v26  ;;  %v10440_v39 = vld [vmem:[%s15758_s2 + $0x214] ss:$12 sps:$4 sm:$0xff]  }
  0xd7   : > { %2795 = vmatprep.subr.bf16.mxu1 %v10404_v1  ;;  %v10468_v26 = vld [vmem:[%s15758_s2 + $0x2a0] ss:$12 sps:$4 sm:$0xff]  }
  0xda   : > { %9166 = vmatmul.mubr.msk.bf16.gmra.mxu0 %vm1194_vm3, %v11773_v50  ;;  %2796 = vmatpush1.bf16.msra.mxu1 %v10402_v34  ;;  %v10425_v50 = vld [vmem:[%s15758_s2 + $0x10c] ss:$12 sps:$4 sm:$0xff]  }
  0xdb   : > { %1719 = vmatprep.mubr.bf16.mxu0 %v15788_v0  ;;  %2797 = vmatprep.subr.bf16.mxu1 %v10407_v38  ;;  %v10473_v34 = vld [vmem:[%s15758_s2 + $0x28c] ss:$12 sps:$4 sm:$0xff]  }
  0xdd   : > { %1787 = vmatmul.mubr.bf16.gmra.mxu1 %v11778_v28  ;;  %v10444_v28 = vld [vmem:[%s15758_s2 + $0x1e0] ss:$12 sps:$4 sm:$0xff]  }
  0xde   : > { %1794 = vmatprep.mubr.bf16.mxu1 %v11783_v45  ;;  %2798 = vmatpush1.bf16.msra.mxu1 %v10405_v12  ;;  %v10449_v45 = vld [vmem:[%s15758_s2 + $0x1cc] ss:$12 sps:$4 sm:$0xff]   ;;  %v10471_v12 = vld [vmem:[%s15758_s2 + $0x288] ss:$12 sps:$4 sm:$0xff]  }
  0xdf   : > { %2799 = vmatprep.subr.bf16.mxu1 %v10410_v11 }
  0xe2   : > { %9167 = vmatmul.mubr.msk.bf16.gmra.mxu0 %vm1194_vm3, %v11798_v33  ;;  %2800 = vmatpush1.bf16.msra.mxu1 %v10408_v15  ;;  %v10476_v15 = vld [vmem:[%s15758_s2 + $0x274] ss:$12 sps:$4 sm:$0xff]  }
  0xe3   : > { %10227 = vmatprep.mubr.msk.bf16.mxu0 %vm11071_vm5, %v15786_v52  ;;  %2801 = vmatprep.subr.bf16.mxu1 %v10413_v41 }
  0xe5   : > { %1795 = vmatmul.mubr.bf16.gmra.mxu1 %v11803_v61  ;;  %v10426_v61 = vld [vmem:[%s15758_s2 + $0xf0] ss:$12 sps:$4 sm:$0xff]  }
  0xe6   : > { %1802 = vmatprep.mubr.bf16.mxu1 %v11808_v29  ;;  %2802 = vmatpush2.bf16.msra.mxu1 %v10411_v57  ;;  %v10431_v29 = vld [vmem:[%s15758_s2 + $0xdc] ss:$12 sps:$4 sm:$0xff]   ;;  %v11025_v57 = vld [vmem:[%s15757_s1 + $0x98] ss:$12 sps:$4 sm:$0xff]  }
  0xe7   : > { %2803 = vmatprep.subr.bf16.mxu1 %v10416_v42 }
  0xea   : > { %10228 = vmatmul.mubr.msk.bf16.vlgmr.msra.gmra.mxu0 %vm1194_vm3, %v11905_v24  ;;  %2804 = vmatpush2.bf16.msra.mxu1 %v10414_v30  ;;  %v10474_v30 = vld [vmem:[%s15758_s2 + $0x270] ss:$12 sps:$4 sm:$0xff]  }
  0xeb   : > { %10231 = vmatprep.mubr.msk.bf16.mxu0 %vm11071_vm5, %v15786_v52  ;;  %2909 = vmatpush1.bf16.msra.mxu0 %v10435_v20 }
  0xec   : > { %2910 = vmatprep.subr.bf16.mxu0 %v10440_v39  ;;  %2805 = vmatprep.subr.bf16.mxu1 %v10419_v23  ;;  %v10479_v23 = vld [vmem:[%s15758_s2 + $0x25c] ss:$12 sps:$4 sm:$0xff]  }
  0xed   : > { %1803 = vmatmul.mubr.bf16.gmra.mxu1 %v11827_v3 }
  0xee   : > { %1810 = vmatprep.mubr.bf16.mxu1 %v11833_v32  ;;  %2806 = vmatpush2.bf16.msra.mxu1 %v10417_v48  ;;  %v10453_v32 = vld [vmem:[%s15758_s2 + $0x198] ss:$12 sps:$4 sm:$0xff]  }
  0xef   : > { %2911 = vmatpush1.bf16.msra.mxu0 %v10438_v35  ;;  %2807 = vmatprep.subr.bf16.mxu1 %v10422_v21 }
  0xf0   : > { %2912 = vmatprep.subr.bf16.mxu0 %v10443_v46 }
  0xf2   : > { %10232 = vmatmul.mubr.msk.bf16.gmra.mxu0 %vm1194_vm3, %v11918_v54  ;;  %2808 = vmatpush2.bf16.msra.mxu1 %v10420_v43  ;;  %v12096_v33 = vpop.f32.mrf.mxu1 }
  0xf3   : > { %10235 = vmatprep.mubr.msk.bf16.mxu0 %vm11071_vm5, %v15786_v52  ;;  %2913 = vmatpush1.bf16.msra.mxu0 %v10441_v51  ;;  %v10477_v51 = vld [vmem:[%s15758_s2 + $0x258] ss:$12 sps:$4 sm:$0xff]  }
  0xf4   : > { %2914 = vmatprep.subr.bf16.mxu0 %v10446_v37  ;;  %2809 = vmatprep.subr.bf16.mxu1 %v10425_v50  ;;  %v12113_v44 = vpop.f32.mrf.mxu1 }
  0xf5   : > { %1811 = vmatmul.mubr.bf16.gmra.mxu1 %v11845_v53  ;;  %v10432_v53 = vld [vmem:[%s15758_s2 + $0xc0] ss:$12 sps:$4 sm:$0xff]  }
  0xf6   : > { %1818 = vmatprep.mubr.bf16.mxu1 %v11851_v2  ;;  %2810 = vmatpush2.bf16.msra.mxu1 %v10423_v62  ;;  %v12118_v3 = vpop.f32.mrf.mxu1  ;;  %v10458_v2 = vld [vmem:[%s15758_s2 + $0x184] ss:$12 sps:$4 sm:$0xff]  }
  0xf7   : > { %2915 = vmatpush1.bf16.msra.mxu0 %v10444_v28  ;;  %2811 = vmatprep.subr.bf16.mxu1 %v10428_v58  ;;  %v10482_v28 = vld [vmem:[%s15758_s2 + $0x244] ss:$12 sps:$4 sm:$0xff]  }
  0xf8   : > { %2916 = vmatprep.subr.bf16.mxu0 %v10449_v45  ;;  %v12129_v36 = vpop.f32.mrf.mxu1  ;;  %v11026_v58 = vld [vmem:[%s15757_s1 + $0xb0] ss:$12 sps:$4 sm:$0xff]  }
  0xfa   : > { %10236 = vmatmul.mubr.msk.bf16.gmra.mxu0 %vm1194_vm3, %v11934_v63  ;;  %2812 = vmatpush2.bf16.msra.mxu1 %v10426_v61  ;;  %v11023_v63 = vld [vmem:[%s15757_s1 + $0x68] ss:$12 sps:$4 sm:$0xff]  }
  0xfb   : > { %10239 = vmatprep.mubr.msk.bf16.mxu0 %vm11071_vm5, %v15786_v52  ;;  %2917 = vmatpush1.bf16.msra.mxu0 %v10447_v60  ;;  %v10483_v61 = vld [vmem:[%s15758_s2 + $0x3a8] ss:$12 sps:$4 sm:$0xff]  }
  0xfc   : > { %2918 = vmatprep.subr.bf16.mxu0 %v10452_v10  ;;  %2813 = vmatprep.subr.bf16.mxu1 %v10431_v29 }
  0xfd   : > { %v12131_v27 = vpop.f32.mrf.mxu1  ;;  %1819 = vmatmul.mubr.bf16.gmra.mxu1 %v11863_v7  ;;  %v10485_v7 = vld [vmem:[%s15758_s2 + $0x3ac] ss:$12 sps:$4 sm:$0xff]  }
  0xfe   : > { %1826 = vmatprep.mubr.bf16.mxu1 %v11869_v4  ;;  %2814 = vmatpush2.bf16.msra.mxu1 %v10429_v5  ;;  %v10461_v4 = vld [vmem:[%s15758_s2 + $0x2ec] ss:$12 sps:$4 sm:$0xff]  }
  0xff   : > { %2919 = vmatpush1.bf16.msra.mxu0 %v10450_v47  ;;  %v12151_v56 = vpop.f32.mrf.mxu1  ;;  %2815 = vmatprep.subr.bf16.mxu1 %v10434_v18  ;;  %v10480_v47 = vld [vmem:[%s15758_s2 + $0x240] ss:$12 sps:$4 sm:$0xff]  }
 0x100   : > { %2920 = vmatprep.subr.bf16.mxu0 %v10455_v17 }
 0x101   : > { %v12153_v59 = vpop.f32.mrf.mxu1 }
 0x102   : > { %10240 = vmatmul.mubr.msk.bf16.gmra.mxu0 %vm1194_vm3, %v11944_v40  ;;  %2816 = vmatpush2.bf16.msra.mxu1 %v10432_v53 }
 0x103   : > { %10243 = vmatprep.mubr.msk.bf16.mxu0 %vm11071_vm5, %v15786_v52  ;;  %2921 = vmatpush1.bf16.msra.mxu0 %v10453_v32  ;;  %v12161_v24 = vpop.f32.mrf.mxu1  ;;  %v10488_v32 = vld [vmem:[%s15758_s2 + $0x390] ss:$12 sps:$4 sm:$0xff]  }
 0x104   : > { %2922 = vmatprep.subr.bf16.mxu0 %v10458_v2  ;;  %3031 = vmatprep.subr.bf16.mxu1 %v10485_v7  ;;  %v10495_v2 = vld [vmem:[%s15758_s2 + $0x37c] ss:$12 sps:$4 sm:$0xff]  }
 0x105   : > { %v12163_v54 = vpop.f32.mrf.mxu1  ;;  %1827 = vmatmul.mubr.bf16.gmra.mxu1 %v11881_v25  ;;  %v10462_v25 = vld [vmem:[%s15758_s2 + $0x2d0] ss:$12 sps:$4 sm:$0xff]  }
 0x107   : > { %2923 = vmatpush1.bf16.msra.mxu0 %v10456_v49  ;;  %v12175_v40 = vpop.f32.mrf.mxu1 }
 0x108   : > { %2924 = vmatprep.subr.bf16.mxu0 %v10461_v4 }
 0x109   : > { %v12183_v22 = vpop.f32.mrf.mxu1 }
 0x10a   : > { %10244 = vmatmul.mubr.msk.bf16.gmra.mxu0 %vm1194_vm3, %v11023_v63 }
 0x10b   : > { %10247 = vmatprep.mubr.msk.bf16.mxu0 %vm11071_vm5, %v15786_v52  ;;  %2925 = vmatpush2.bf16.msra.mxu0 %v10459_v13  ;;  %v12188_v8 = vpop.f32.mrf.mxu1 }
 0x10c   : > { %2926 = vmatprep.subr.bf16.mxu0 %v10464_v14 }
 0x10d   : > { %v12190_v9 = vpop.f32.mrf.mxu1 }
 0x10f   : > { %2927 = vmatpush2.bf16.msra.mxu0 %v10462_v25  ;;  %v12201_v6 = vpop.f32.mrf.mxu1 }
 0x110   : > { %2928 = vmatprep.subr.bf16.mxu0 %v10467_v19 }
 0x111   : > { %v12206_v1 = vpop.f32.mrf.mxu1 }
 0x112   : > { %10248 = vmatmul.mubr.msk.bf16.gmra.mxu0 %vm1194_vm3, %v11024_v16 }
 0x113   : > { %10251 = vmatprep.mubr.msk.bf16.mxu0 %vm11071_vm5, %v15786_v52  ;;  %2929 = vmatpush2.bf16.msra.mxu0 %v10465_v31  ;;  %v12211_v38 = vpop.f32.mrf.mxu1 }
 0x114   : > { %2930 = vmatprep.subr.bf16.mxu0 %v10470_v55 }
 0x115   : > { %v12216_v11 = vpop.f32.mrf.mxu1 }
 0x117   : > { %2931 = vmatpush2.bf16.msra.mxu0 %v10468_v26  ;;  %v12227_v42 = vpop.f32.mrf.mxu1  ;;  %v10498_v26 = vld [vmem:[%s15758_s2 + $0x360] ss:$12 sps:$4 sm:$0xff]  }
 0x118   : > { %2932 = vmatprep.subr.bf16.mxu0 %v10473_v34 }
 0x119   : > { %v12232_v39 = vpop.f32.mrf.mxu1 }
 0x11a   : > { %v1272_v41 = vpop.f32.mrf.mxu0  ;;  %10252 = vmatmul.mubr.msk.bf16.gmra.mxu0 %vm1194_vm3, %v11025_v57 }
 0x11b   : > { %10255 = vmatprep.mubr.msk.bf16.mxu0 %vm11071_vm5, %v15786_v52  ;;  %2933 = vmatpush2.bf16.msra.mxu0 %v10471_v12  ;;  %v12237_v46 = vpop.f32.mrf.mxu1  ;;  %v1396_v45 = vadd.f32 %v12096_v33, %v1272_v41 }
 0x11c   : > { %v1274_v20 = vpop.f32.mrf.mxu0  ;;  %2934 = vmatprep.subr.bf16.mxu0 %v10476_v15  ;;  %v10505_v15 = vld [vmem:[%s15758_s2 + $0x34c] ss:$12 sps:$4 sm:$0xff]  }
 0x11d   : > { %v1398_v37 = vadd.f32 %v12113_v44, %v1274_v20  ;;  %v12245_v50 = vpop.f32.mrf.mxu1  ;;  %v10490_v44 = vld [vmem:[%s15758_s2 + $0x394] ss:$12 sps:$4 sm:$0xff]  }
 0x11e   : > { %v1276_v35 = vpop.f32.mrf.mxu0 }
 0x11f   : > { %v1400_v48 = vadd.f32 %v12118_v3, %v1276_v35  ;;  %2935 = vmatpush2.bf16.msra.mxu0 %v10474_v30  ;;  %v12259_v10 = vpop.f32.mrf.mxu1  ;;  %v10486_v3 = vld [vmem:[%s15758_s2 + $0x170] ss:$12 sps:$4 sm:$0xff]  }
 0x120   : > { %v1278_v21 = vpop.f32.mrf.mxu0  ;;  %2936 = vmatprep.subr.bf16.mxu0 %v10479_v23 }
 0x121   : > { %v1402_v43 = vadd.f32 %v12129_v36, %v1278_v21  ;;  %v12264_v29 = vpack.c.bf16 %v1400_v48, %v1396_v45  ;;  %v12273_v17 = vpop.f32.mrf.mxu1 }
 0x122   : > { %v1282_v62 = vpop.f32.mrf.mxu0  ;;  %10256 = vmatmul.mubr.msk.bf16.gmra.mxu0 %vm1194_vm3, %v11026_v58 }
 0x123   : > { %v12255_v60 = vpack.c.bf16 %v1402_v43, %v1398_v37  ;;  %10259 = vmatprep.mubr.msk.bf16.mxu0 %vm11071_vm5, %v15786_v52  ;;  %2937 = vmatpush2.bf16.msra.mxu0 %v10477_v51  ;;  %v12279_v18 = vpop.f32.mrf.mxu1  ;;  %v1406_v13 = vadd.f32 %v12131_v27, %v1282_v62  ;;  %v10500_v27 = vld [vmem:[%s15758_s2 + $0x364] ss:$12 sps:$4 sm:$0xff]   ;;  %v10514_v62 = vld [vmem:[%s15758_s2 + $0x31c] ss:$12 sps:$4 sm:$0xff]  }
 0x124   : > { %v1284_v33 = vpop.f32.mrf.mxu0  ;;  %2938 = vmatprep.subr.bf16.mxu0 %v10482_v28  ;;  %v10507_v43 = vld [vmem:[%s15758_s2 + $0x330] ss:$12 sps:$4 sm:$0xff]  }
 0x125   : > { %2817 = vmatprep.mubr.bf16.mxu1 %v12255_v60  ;;  %v1408_v49 = vadd.f32 %v12151_v56, %v1284_v33  ;;  %v12290_v4 = vpop.f32.mrf.mxu1  ;;  %v10493_v56 = vld [vmem:[%s15758_s2 + $0x378] ss:$12 sps:$4 sm:$0xff]  }
 0x126   : > { %v1286_v5 = vpop.f32.mrf.mxu0  ;;  %2818 = vmatmul.mubr.bf16.vlgmr.msra.gmra.mxu1 %v12264_v29 }
 0x127   : > { %3032 = vmatpush1.bf16.msra.mxu1 %v10483_v61  ;;  %v1410_v36 = vadd.f32 %v12153_v59, %v1286_v5  ;;  %2939 = vmatpush2.bf16.msra.mxu0 %v10480_v47  ;;  %v11027_v59 = vld [vmem:[%s15757_s1 + $0xc8] ss:$12 sps:$4 sm:$0xff]   ;;  %v12299_v25 = vpop.f32.mrf.mxu1 }
 0x128   : > { %v1288_v53 = vpop.f32.mrf.mxu0  ;;  %3033 = vmatprep.subr.bf16.mxu1 %v10490_v44  ;;  %9917 = vmatprep.subr.bf16.mxu0 %v10486_v3 }
 0x129   : > { %v1412_v7 = vadd.f32 %v12161_v24, %v1288_v53  ;;  %v12304_v24 = vpack.c.bf16 %v1410_v36, %v1406_v13  ;;  %v12310_v31 = vpop.f32.mrf.mxu1 }
 0x12a   : > { %v1292_v14 = vpop.f32.mrf.mxu0  ;;  %10260 = vmatmul.mubr.msk.bf16.gmra.mxu0 %vm1194_vm3, %v11027_v59 }
 0x12b   : > { %v12297_v63 = vpack.c.bf16 %v1412_v7, %v1408_v49  ;;  %3034 = vmatpush1.bf16.msra.mxu1 %v10488_v32  ;;  %v12313_v16 = vpop.f32.mrf.mxu1  ;;  %v1416_v30 = vadd.f32 %v12163_v54, %v1292_v14 }
 0x12c   : > { %v1294_v19 = vpop.f32.mrf.mxu0  ;;  %3035 = vmatprep.subr.bf16.mxu1 %v10495_v2  ;;  %v10517_v2 = vld [vmem:[%s15758_s2 + $0x300] ss:$12 sps:$4 sm:$0xff]  }
 0x12d   : > { %2827 = vmatprep.mubr.bf16.mxu1 %v12297_v63  ;;  %v1418_v41 = vadd.f32 %v12175_v40, %v1294_v19  ;;  %v12324_v20 = vpop.f32.mrf.mxu1  ;;  %v10509_v40 = vld [vmem:[%s15758_s2 + $0x334] ss:$12 sps:$4 sm:$0xff]  }
 0x12e   : > { %v1296_v55 = vpop.f32.mrf.mxu0  ;;  %2828 = vmatmul.mubr.bf16.gmra.mxu1 %v12304_v24 }
 0x12f   : > { %3036 = vmatpush1.bf16.msra.mxu1 %v10493_v56  ;;  %v1420_v34 = vadd.f32 %v12183_v22, %v1296_v55  ;;  %v12329_v48 = vpop.f32.mrf.mxu1  ;;  %v10503_v22 = vld [vmem:[%s15758_s2 + $0x348] ss:$12 sps:$4 sm:$0xff]  }
 0x130   : > { %v1298_v12 = vpop.f32.mrf.mxu0  ;;  %3037 = vmatprep.subr.bf16.mxu1 %v10500_v27 }
 0x131   : > { %v1422_v57 = vadd.f32 %v12188_v8, %v1298_v12  ;;  %v12334_v21 = vpack.c.bf16 %v1420_v34, %v1416_v30  ;;  %v12340_v54 = vpop.f32.mrf.mxu1  ;;  %v10523_v30 = vld [vmem:[%s15758_s2 + $0x2f0] ss:$12 sps:$4 sm:$0xff]  }
 0x132   : > { %v1302_v23 = vpop.f32.mrf.mxu0 }
 0x133   : > { %v12327_v35 = vpack.c.bf16 %v1422_v57, %v1418_v41  ;;  %3038 = vmatpush1.bf16.msra.mxu1 %v10498_v26  ;;  %v12343_v37 = vpop.f32.mrf.mxu1  ;;  %v1426_v47 = vadd.f32 %v12190_v9, %v1302_v23 }
 0x134   : > { %v1304_v51 = vpop.f32.mrf.mxu0  ;;  %3039 = vmatprep.subr.bf16.mxu1 %v10505_v15 }
 0x135   : > { %2837 = vmatprep.mubr.bf16.mxu1 %v12327_v35  ;;  %v1428_v58 = vadd.f32 %v12201_v6, %v1304_v51  ;;  %v12354_v33 = vpop.f32.mrf.mxu1  ;;  %v10519_v6 = vld [vmem:[%s15758_s2 + $0x304] ss:$12 sps:$4 sm:$0xff]  }
 0x136   : > { %v1306_v8 = vpop.f32.mrf.mxu0  ;;  %2838 = vmatmul.mubr.bf16.gmra.mxu1 %v12334_v21 }
 0x137   : > { %3040 = vmatpush1.bf16.msra.mxu1 %v10503_v22  ;;  %v1430_v28 = vadd.f32 %v12206_v1, %v1306_v8  ;;  %v12359_v5 = vpop.f32.mrf.mxu1  ;;  %v10512_v1 = vld [vmem:[%s15758_s2 + $0x318] ss:$12 sps:$4 sm:$0xff]  }
 0x138   : > { %v1308_v45 = vpop.f32.mrf.mxu0  ;;  %3041 = vmatprep.subr.bf16.mxu1 %v10509_v40 }
 0x139   : > { %v1432_v61 = vadd.f32 %v12211_v38, %v1308_v45  ;;  %v12364_v32 = vpack.c.bf16 %v1430_v28, %v1426_v47  ;;  %v12370_v9 = vpop.f32.mrf.mxu1 }
 0x13a   : > { %v1312_v44 = vpop.f32.mrf.mxu0 }
 0x13b   : > { %v12357_v3 = vpack.c.bf16 %v1432_v61, %v1428_v58  ;;  %3042 = vmatpush1.bf16.msra.mxu1 %v10507_v43  ;;  %v12373_v53 = vpop.f32.mrf.mxu1  ;;  %v1436_v56 = vadd.f32 %v12216_v11, %v1312_v44 }
 0x13c   : > { %v1314_v36 = vpop.f32.mrf.mxu0  ;;  %3043 = vmatprep.subr.bf16.mxu1 %v10514_v62 }
 0x13d   : > { %2847 = vmatprep.mubr.bf16.mxu1 %v12357_v3  ;;  %v1438_v13 = vadd.f32 %v12227_v42, %v1314_v36  ;;  %v12381_v59 = vpop.f32.mrf.mxu1 }
 0x13e   : > { %v1316_v38 = vpop.f32.mrf.mxu0  ;;  %2848 = vmatmul.mubr.bf16.gmra.mxu1 %v12364_v32 }
 0x13f   : > { %3044 = vmatpush1.bf16.msra.mxu1 %v10512_v1  ;;  %v1440_v49 = vadd.f32 %v12232_v39, %v1316_v38  ;;  %v12386_v55 = vpop.f32.mrf.mxu1 }
 0x140   : > { %v1318_v7 = vpop.f32.mrf.mxu0  ;;  %3045 = vmatprep.subr.bf16.mxu1 %v10519_v6 }
 0x141   : > { %v1442_v14 = vadd.f32 %v12237_v46, %v1318_v7  ;;  %v12388_v26 = vpack.c.bf16 %v1440_v49, %v1436_v56  ;;  %v12391_v39 = vpop.f32.mrf.mxu1 }
 0x142   : > { %v1322_v19 = vpop.f32.mrf.mxu0 }
 0x143   : > { %v12384_v27 = vpack.c.bf16 %v1442_v14, %v1438_v13  ;;  %3046 = vmatpush1.bf16.msra.mxu1 %v10517_v2  ;;  %v12394_v46 = vpop.f32.mrf.mxu1  ;;  %v1446_v23 = vadd.f32 %v12245_v50, %v1322_v19 }
 0x144   : > { %v1324_v34 = vpop.f32.mrf.mxu0  ;;  %9987 = vmatprep.subr.bf16.mxu1 %v10523_v30 }
 0x145   : > { %2857 = vmatprep.mubr.bf16.mxu1 %v12384_v27  ;;  %v1448_v15 = vadd.f32 %v12259_v10, %v1324_v34  ;;  %v12399_v57 = vpop.f32.mrf.mxu1 }
 0x146   : > { %v1326_v42 = vpop.f32.mrf.mxu0  ;;  %2858 = vmatmul.mubr.bf16.gmra.mxu1 %v12388_v26 }
 0x147   : > { %v1450_v11 = vadd.f32 %v12273_v17, %v1326_v42  ;;  %v12407_v40 = vpop.f32.mrf.mxu1 }
 0x148   : > { %v1328_v12 = vpop.f32.mrf.mxu0 }
 0x149   : > { %v1452_v41 = vadd.f32 %v12279_v18, %v1328_v12  ;;  %v12409_v17 = vpack.c.bf16 %v1450_v11, %v1446_v23  ;;  %v12412_v10 = vpop.f32.mrf.mxu1 }
 0x14a   : > { %v1332_v22 = vpop.f32.mrf.mxu0 }
 0x14b   : > { %v12405_v51 = vpack.c.bf16 %v1452_v41, %v1448_v15  ;;  %v12415_v43 = vpop.f32.mrf.mxu1  ;;  %v1456_v61 = vadd.f32 %v12290_v4, %v1332_v22 }
 0x14c   : > { %v1334_v8 = vpop.f32.mrf.mxu0 }
 0x14d   : > { %2867 = vmatprep.mubr.bf16.mxu1 %v12405_v51  ;;  %v1458_v45 = vadd.f32 %v12299_v25, %v1334_v8  ;;  %v12420_v58 = vpop.f32.mrf.mxu1 }
 0x14e   : > { %v1336_v18 = vpop.f32.mrf.mxu0  ;;  %2868 = vmatmul.mubr.bf16.gmra.mxu1 %v12409_v17 }
 0x14f   : > { %v1460_v50 = vadd.f32 %v12310_v31, %v1336_v18  ;;  %v12425_v1 = vpop.f32.mrf.mxu1 }
 0x150   : > { %v1338_v28 = vpop.f32.mrf.mxu0 }
 0x151   : > { %v1462_v62 = vadd.f32 %v12313_v16, %v1338_v28  ;;  %v12427_v36 = vpack.c.bf16 %v1460_v50, %v1456_v61  ;;  %v12430_v31 = vpop.f32.mrf.mxu1 }
 0x152   : > { %v1342_v47 = vpop.f32.mrf.mxu0 }
 0x153   : > { %v12423_v44 = vpack.c.bf16 %v1462_v62, %v1458_v45  ;;  %v12433_v25 = vpop.f32.mrf.mxu1  ;;  %v1466_v13 = vadd.f32 %v12324_v20, %v1342_v47 }
 0x154   : > { %v1344_v6 = vpop.f32.mrf.mxu0 }
 0x155   : > { %2877 = vmatprep.mubr.bf16.mxu1 %v12423_v44  ;;  %v1468_v2 = vadd.f32 %v12329_v48, %v1344_v6  ;;  %v12438_v7 = vpop.f32.mrf.mxu1 }
 0x156   : > { %v1346_v38 = vpop.f32.mrf.mxu0  ;;  %2878 = vmatmul.mubr.bf16.gmra.mxu1 %v12427_v36 }
 0x157   : > { %v1470_v16 = vadd.f32 %v12340_v54, %v1346_v38  ;;  %v12443_v19 = vpop.f32.mrf.mxu1 }
 0x158   : > { %v1348_v4 = vpop.f32.mrf.mxu0 }
 0x159   : > { %v1472_v49 = vadd.f32 %v12343_v37, %v1348_v4  ;;  %v12445_v34 = vpack.c.bf16 %v1470_v16, %v1466_v13  ;;  %v12448_v54 = vpop.f32.mrf.mxu1  ;;  %v10487_v4 = vld [vmem:[%s15758_s2 + $0xb0] ss:$12 sps:$4 sm:$0xff]   ;;  %v10492_v13 = vld [vmem:[%s15758_s2 + $0x98] ss:$12 sps:$4 sm:$0xff]  }
 0x15a   : > { %v1352_v14 = vpop.f32.mrf.mxu0 }
 0x15b   : > { %v12441_v56 = vpack.c.bf16 %v1472_v49, %v1468_v2  ;;  %v12451_v48 = vpop.f32.mrf.mxu1  ;;  %v1476_v30 = vadd.f32 %v12354_v33, %v1352_v14 }
 0x15c   : > { %v1354_v42 = vpop.f32.mrf.mxu0 }
 0x15d   : > { %2887 = vmatprep.mubr.bf16.mxu1 %v12441_v56  ;;  %v1478_v12 = vadd.f32 %v12359_v5, %v1354_v42  ;;  %v12456_v41 = vpop.f32.mrf.mxu1 }
 0x15e   : > { %v1356_v11 = vpop.f32.mrf.mxu0  ;;  %2888 = vmatmul.mubr.bf16.gmra.mxu1 %v12445_v34 }
 0x15f   : > { %v1480_v37 = vadd.f32 %v12370_v9, %v1356_v11  ;;  %v12461_v8 = vpop.f32.mrf.mxu1  ;;  %v10496_v11 = vld [vmem:[%s15758_s2 + $0x140] ss:$12 sps:$4 sm:$0xff]  }
 0x160   : > { %v1358_v20 = vpop.f32.mrf.mxu0 }
 0x161   : > { %v1482_v15 = vadd.f32 %v12373_v53, %v1358_v20  ;;  %v12463_v18 = vpack.c.bf16 %v1480_v37, %v1476_v30  ;;  %v12466_v9 = vpop.f32.mrf.mxu1 }
 0x162   : > { %v1641_v23 = vpop.f32.mrf.mxu0 }
 0x163   : > { %v12459_v22 = vpack.c.bf16 %v1482_v15, %v1478_v12  ;;  %v12469_v5 = vpop.f32.mrf.mxu1  ;;  %v1642_v47 = vadd.f32 %v1641_v23, %v12381_v59 }
 0x164   : > { %v1643_v50 = vpop.f32.mrf.mxu0 }
 0x165   : > { %2897 = vmatprep.mubr.bf16.mxu1 %v12459_v22  ;;  %v1644_v45 = vadd.f32 %v1643_v50, %v12386_v55  ;;  %v12475_v61 = vpop.f32.mrf.mxu1  ;;  %v10491_v55 = vld [vmem:[%s15758_s2 + $0x158] ss:$12 sps:$4 sm:$0xff]  }
 0x166   : > { %v1645_v28 = vpop.f32.mrf.mxu0  ;;  %2898 = vmatmul.mubr.bf16.gmra.mxu1 %v12463_v18 }
 0x167   : > { %3063 = vmatprep.mubr.bf16.mxu1 %v15788_v0  ;;  %v1646_v33 = vadd.f32 %v1645_v28, %v12391_v39  ;;  %v12480_v16 = vpop.f32.mrf.mxu1 }
 0x168   : > { %v1647_v53 = vpop.f32.mrf.mxu0 }
 0x169   : > { %v1648_v62 = vadd.f32 %v1647_v53, %v12394_v46  ;;  %v12485_v2 = vpack.c.bf16 %v1646_v33, %v1642_v47  ;;  %v12491_v46 = vpop.f32.mrf.mxu1 }
 0x16a   : > { %v1651_v6 = vpop.f32.mrf.mxu0 }
 0x16b   : > { %v12478_v38 = vpack.c.bf16 %v1648_v62, %v1644_v45  ;;  %v12494_v49 = vpop.f32.mrf.mxu1  ;;  %v1652_v15 = vadd.f32 %v1651_v6, %v12399_v57  ;;  %v10502_v45 = vld [vmem:[%s15758_s2 + $0x68] ss:$12 sps:$4 sm:$0xff]   ;;  %v10506_v6 = vld [vmem:[%s15758_s2 + $0x110] ss:$12 sps:$4 sm:$0xff]  }
 0x16c   : > { %v1653_v39 = vpop.f32.mrf.mxu0 }
 0x16d   : > { %2940 = vmatprep.mubr.bf16.mxu0 %v12478_v38  ;;  %v1654_v37 = vadd.f32 %v1653_v39, %v12407_v40  ;;  %v12505_v12 = vpop.f32.mrf.mxu1  ;;  %v10501_v40 = vld [vmem:[%s15758_s2 + $0x128] ss:$12 sps:$4 sm:$0xff]  }
 0x16e   : > { %v1655_v59 = vpop.f32.mrf.mxu0  ;;  %2941 = vmatmul.mubr.bf16.vlgmr.msra.gmra.mxu0 %v12485_v2 }
 0x16f   : > { %9918 = vmatpush3.bf16.msra.mxu0 %v10487_v4  ;;  %v1656_v14 = vadd.f32 %v1655_v59, %v12412_v10  ;;  %v12510_v50 = vpop.f32.mrf.mxu1  ;;  %v10497_v10 = vld [vmem:[%s15758_s2 + $0x80] ss:$12 sps:$4 sm:$0xff]  }
 0x170   : > { %v1657_v42 = vpop.f32.mrf.mxu0  ;;  %9919 = vmatprep.subr.bf16.mxu0 %v10491_v55 }
 0x171   : > { %v1658_v20 = vadd.f32 %v1657_v42, %v12415_v43  ;;  %v12515_v28 = vpack.c.bf16 %v1656_v14, %v1652_v15  ;;  %v12521_v57 = vpop.f32.mrf.mxu1  ;;  %v10515_v15 = vld [vmem:[%s15758_s2 + $0x38] ss:$12 sps:$4 sm:$0xff]  }
 0x172   : > { %v1661_v30 = vpop.f32.mrf.mxu0 }
 0x173   : > { %v12508_v23 = vpack.c.bf16 %v1658_v20, %v1654_v37  ;;  %9920 = vmatpush3.bf16.msra.mxu0 %v10492_v13  ;;  %v12524_v53 = vpop.f32.mrf.mxu1  ;;  %v1662_v59 = vadd.f32 %v1661_v30, %v12420_v58 }
 0x174   : > { %v1663_v33 = vpop.f32.mrf.mxu0  ;;  %9921 = vmatprep.subr.bf16.mxu0 %v10496_v11 }
 0x175   : > { %2950 = vmatprep.mubr.bf16.mxu0 %v12508_v23  ;;  %v1664_v4 = vadd.f32 %v1663_v33, %v12425_v1  ;;  %v12535_v55 = vpop.f32.mrf.mxu1  ;;  %v10511_v1 = vld [vmem:[%s15758_s2 + $0xf8] ss:$12 sps:$4 sm:$0xff]   ;;  %v10516_v33 = vld [vmem:[%s15758_s2 + $0xe0] ss:$12 sps:$4 sm:$0xff]  }
 0x176   : > { %v1665_v43 = vpop.f32.mrf.mxu0  ;;  %2951 = vmatmul.mubr.bf16.gmra.mxu0 %v12515_v28 }
 0x177   : > { %9922 = vmatpush3.bf16.msra.mxu0 %v10497_v10  ;;  %v1666_v62 = vadd.f32 %v1665_v43, %v12430_v31  ;;  %v12540_v42 = vpop.f32.mrf.mxu1  ;;  %v10510_v31 = vld [vmem:[%s15758_s2 + $0x50] ss:$12 sps:$4 sm:$0xff]  }
 0x178   : > { %v1667_v47 = vpop.f32.mrf.mxu0  ;;  %9923 = vmatprep.subr.bf16.mxu0 %v10501_v40 }
 0x179   : > { %v1668_v39 = vadd.f32 %v1667_v47, %v12433_v25  ;;  %v12545_v11 = vpack.c.bf16 %v1666_v62, %v1662_v59  ;;  %v12551_v58 = vpop.f32.mrf.mxu1 }
 0x17a   : > { %v1671_v13 = vpop.f32.mrf.mxu0 }
 0x17b   : > { %v12538_v14 = vpack.c.bf16 %v1668_v39, %v1664_v4  ;;  %9924 = vmatpush3.bf16.msra.mxu0 %v10502_v45  ;;  %v12554_v20 = vpop.f32.mrf.mxu1  ;;  %v1672_v62 = vadd.f32 %v1671_v13, %v12438_v7 }
 0x17c   : > { %v1673_v37 = vpop.f32.mrf.mxu0  ;;  %9925 = vmatprep.subr.bf16.mxu0 %v10506_v6 }
 0x17d   : > { %2960 = vmatprep.mubr.bf16.mxu0 %v12538_v14  ;;  %v1674_v40 = vadd.f32 %v1673_v37, %v12443_v19  ;;  %v12565_v45 = vpop.f32.mrf.mxu1  ;;  %v10521_v19 = vld [vmem:[%s15758_s2 + $0xc8] ss:$12 sps:$4 sm:$0xff]  }
 0x17e   : > { %v1675_v25 = vpop.f32.mrf.mxu0  ;;  %2961 = vmatmul.mubr.bf16.gmra.mxu0 %v12545_v11 }
 0x17f   : > { %9926 = vmatpush3.bf16.msra.mxu0 %v10510_v31  ;;  %v1676_v30 = vadd.f32 %v1675_v25, %v12448_v54  ;;  %v12570_v4 = vpop.f32.mrf.mxu1  ;;  %v10520_v54 = vld [vmem:[%s15758_s2 + $0x20] ss:$12 sps:$4 sm:$0xff]   ;;  %v10522_v31 = vld [vmem:[%s15758_s2 + $0x8] ss:$12 sps:$4 sm:$0xff]  }
 0x180   : > { %v1677_v10 = vpop.f32.mrf.mxu0  ;;  %9927 = vmatprep.subr.bf16.mxu0 %v10511_v1 }
 0x181   : > { %v1678_v43 = vadd.f32 %v1677_v10, %v12451_v48  ;;  %v12575_v39 = vpack.c.bf16 %v1676_v30, %v1672_v62  ;;  %v12581_v7 = vpop.f32.mrf.mxu1 }
 0x182   : > { %v1681_v47 = vpop.f32.mrf.mxu0 }
 0x183   : > { %v12568_v6 = vpack.c.bf16 %v1678_v43, %v1674_v40  ;;  %9928 = vmatpush3.bf16.msra.mxu0 %v10515_v15  ;;  %v12584_v13 = vpop.f32.mrf.mxu1  ;;  %v1682_v10 = vadd.f32 %v1681_v47, %v12456_v41 }
 0x184   : > { %v1683_v59 = vpop.f32.mrf.mxu0  ;;  %9929 = vmatprep.subr.bf16.mxu0 %v10516_v33 }
 0x185   : > { %2970 = vmatprep.mubr.bf16.mxu0 %v12568_v6  ;;  %v1684_v25 = vadd.f32 %v1683_v59, %v12461_v8  ;;  %v12592_v30 = vpop.f32.mrf.mxu1 }
 0x186   : > { %v1685_v48 = vpop.f32.mrf.mxu0  ;;  %2971 = vmatmul.mubr.bf16.gmra.mxu0 %v12575_v39 }
 0x187   : > { %9930 = vmatpush3.bf16.msra.mxu0 %v10520_v54  ;;  %v1686_v37 = vadd.f32 %v1685_v48, %v12466_v9  ;;  %v12597_v43 = vpop.f32.mrf.mxu1 }
 0x188   : > { %v1687_v1 = vpop.f32.mrf.mxu0  ;;  %9931 = vmatprep.subr.bf16.mxu0 %v10521_v19 }
 0x189   : > { %v1688_v15 = vadd.f32 %v1687_v1, %v12469_v5  ;;  %v12599_v62 = vpack.c.bf16 %v1686_v37, %v1682_v10  ;;  %v12603_v8 = vpop.f32.mrf.mxu1 }
 0x18a   : > { %v1691_v33 = vpop.f32.mrf.mxu0 }
 0x18b   : > { %v12595_v40 = vpack.c.bf16 %v1688_v15, %v1684_v25  ;;  %9932 = vmatpush3.bf16.msra.mxu0 %v10522_v31  ;;  %v9854_v5 = vpop.f32.mrf.mxu1  ;;  %v1692_v31 = vadd.f32 %v1691_v33, %v12475_v61 }
 0x18c   : > { %v1693_v54 = vpop.f32.mrf.mxu0  ;;  %10263 = vmatprep.subr.bf16.mxu0 %v15786_v52 }
 0x18d   : > { %2980 = vmatprep.mubr.bf16.mxu0 %v12595_v40  ;;  %v1694_v59 = vadd.f32 %v1693_v54, %v12480_v16  ;;  %v12609_v48 = vpop.f32.mrf.mxu1 }
 0x18e   : > { %v1695_v9 = vpop.f32.mrf.mxu0  ;;  %2981 = vmatmul.mubr.bf16.gmra.mxu0 %v12599_v62 }
 0x18f   : > { %v1696_v41 = vadd.f32 %v1695_v9, %v12491_v46  ;;  %v12614_v25 = vpop.f32.mrf.mxu1 }
 0x190   : > { %v1697_v47 = vpop.f32.mrf.mxu0 }
 0x191   : > { %v1698_v19 = vadd.f32 %v1697_v47, %v12494_v49  ;;  %v12616_v15 = vpack.c.bf16 %v1696_v41, %v1692_v31  ;;  %v12619_v46 = vpop.f32.mrf.mxu1 }
 0x192   : > { %v1701_v37 = vpop.f32.mrf.mxu0 }
 0x193   : > { %v12612_v1 = vpack.c.bf16 %v1698_v19, %v1694_v59  ;;  %v12622_v16 = vpop.f32.mrf.mxu1  ;;  %v1702_v41 = vadd.f32 %v1701_v37, %v12505_v12 }
 0x194   : > { %v1703_v10 = vpop.f32.mrf.mxu0 }
 0x195   : > { %2990 = vmatprep.mubr.bf16.mxu0 %v12612_v1  ;;  %v1704_v33 = vadd.f32 %v1703_v10, %v12510_v50  ;;  %v12627_v47 = vpop.f32.mrf.mxu1 }
 0x196   : > { %v1705_v9 = vpop.f32.mrf.mxu0  ;;  %2991 = vmatmul.mubr.bf16.gmra.mxu0 %v12616_v15 }
 0x197   : > { %v1706_v49 = vadd.f32 %v1705_v9, %v12521_v57  ;;  %v12632_v31 = vpop.f32.mrf.mxu1 }
 0x198   : > { %v1707_v61 = vpop.f32.mrf.mxu0 }
 0x199   : > { %v1708_v54 = vadd.f32 %v1707_v61, %v12524_v53  ;;  %v12634_v52 = vpack.c.bf16 %v1706_v49, %v1702_v41  ;;  %v12637_v57 = vpop.f32.mrf.mxu1 }
 0x19a   : > { %v1711_v59 = vpop.f32.mrf.mxu0 }
 0x19b   : > { %v12630_v19 = vpack.c.bf16 %v1708_v54, %v1704_v33  ;;  %15864 = vst [vmem:[#allocation6_spill] sm:$0xff] %v12634_v52  ;;  %v12640_v50 = vpop.f32.mrf.mxu1  ;;  %v1712_v49 = vadd.f32 %v1711_v59, %v12535_v55 }
 0x19c   : > { %v1713_v0 = vpop.f32.mrf.mxu0 }
 0x19d   : > { %15863 = vst [vmem:[#allocation5_spill] sm:$0xff] %v12630_v19  ;;  %3000 = vmatprep.mubr.bf16.mxu0 %v12630_v19  ;;  %v1714_v37 = vadd.f32 %v1713_v0, %v12540_v42  ;;  %v12645_v61 = vpop.f32.mrf.mxu1 }
 0x19e   : > { %v1715_v9 = vpop.f32.mrf.mxu0  ;;  %3001 = vmatmul.mubr.bf16.gmra.mxu0 %v12634_v52 }
 0x19f   : > { %v1716_v53 = vadd.f32 %v1715_v9, %v12551_v58  ;;  %v12650_v41 = vpop.f32.mrf.mxu1 }
 0x1a0   : > { %v1717_v12 = vpop.f32.mrf.mxu0 }
 0x1a1   : > { %v1718_v10 = vadd.f32 %v1717_v12, %v12554_v20  ;;  %v12652_v19 = vpack.c.bf16 %v1716_v53, %v1712_v49  ;;  %v12655_v58 = vpop.f32.mrf.mxu1 }
 0x1a2   : > { %v1721_v33 = vpop.f32.mrf.mxu0 }
 0x1a3   : > { %v12648_v54 = vpack.c.bf16 %v1718_v10, %v1714_v37  ;;  %15866 = vst [vmem:[#allocation8_spill] sm:$0xff] %v12652_v19  ;;  %v12658_v0 = vpop.f32.mrf.mxu1  ;;  %v1722_v53 = vadd.f32 %v1721_v33, %v12565_v45 }
 0x1a4   : > { %v1723_v52 = vpop.f32.mrf.mxu0 }
 0x1a5   : > { %15865 = vst [vmem:[#allocation7_spill] sm:$0xff] %v12648_v54  ;;  %3010 = vmatprep.mubr.bf16.mxu0 %v12648_v54  ;;  %v1724_v20 = vadd.f32 %v1723_v52, %v12570_v4  ;;  %v12663_v12 = vpop.f32.mrf.mxu1 }
 0x1a6   : > { %v1725_v9 = vpop.f32.mrf.mxu0  ;;  %3011 = vmatmul.mubr.bf16.gmra.mxu0 %v12652_v19 }
 0x1a7   : > { %v1726_v42 = vadd.f32 %v1725_v9, %v12581_v7  ;;  %v12668_v49 = vpop.f32.mrf.mxu1  ;;  %v9852_v7 = vadd.f32 %v12597_v43, %v12592_v30  ;;  %v9855_v9 = vadd.f32 %v9854_v5, %v12603_v8  ;;  %v10524_v30 = vld [vmem:[%s15758_s2 + $0x230] ss:$12 sps:$4 sm:$0xff]   ;;  %v10526_v5 = vld [vmem:[%s15758_s2 + $0x2d8] ss:$12 sps:$4 sm:$0xff]  }
 0x1a8   : > { %v1727_v55 = vpop.f32.mrf.mxu0 }
 0x1a9   : > { %v1728_v59 = vadd.f32 %v1727_v55, %v12584_v13  ;;  %v12670_v54 = vpack.c.bf16 %v1726_v42, %v1722_v53  ;;  %v12676_v52 = vpop.f32.mrf.mxu1  ;;  %v10527_v53 = vld [vmem:[%s15758_s2 + $0x218] ss:$12 sps:$4 sm:$0xff]  }
 0x1aa   : > { %v1869_v37 = vpop.f32.mrf.mxu0 }
 0x1ab   : > { %v12666_v10 = vpack.c.bf16 %v1728_v59, %v1724_v20  ;;  %v1870_v45 = vadd.f32 %v9852_v7, %v1869_v37  ;;  %v12680_v33 = vpop.f32.mrf.mxu1  ;;  %v15867_v59 = vmov 0   ;;  %v9858_v37 = vadd.f32 %v12614_v25, %v12609_v48  ;;  %v10528_v48 = vld [vmem:[%s15758_s2 + $0x398] ss:$12 sps:$4 sm:$0xff]  }
 0x1ac   : > { %v10229_v19 = vpop.f32.mrf.mxu0  ;;  %v9861_v7 = vadd.f32 %v12622_v16, %v12619_v46  ;;  %v15868_v46 = vmov 0.0   ;;  %v10530_v16 = vld [vmem:[%s15758_s2 + $0x200] ss:$12 sps:$4 sm:$0xff]  }
 0x1ad   : > { %3020 = vmatprep.mubr.bf16.mxu0 %v12666_v10  ;;  %v12687_v8 = vpop.f32.mrf.mxu1 }
 0x1ae   : > { %v1872_v4 = vpop.f32.mrf.mxu0  ;;  %3021 = vmatmul.mubr.bf16.gmra.mxu0 %v12670_v54 }
 0x1af   : > { %v1873_v13 = vadd.f32 %v9855_v9, %v1872_v4  ;;  %3186 = vmatprep.mubr.bf16.mxu0 %v12255_v60  ;;  %v12693_v55 = vpop.f32.mrf.mxu1  ;;  %v10525_v60 = vld [vmem:[%s15758_s2 + $0x3b0] ss:$12 sps:$4 sm:$0xff]   ;;  %v10529_v4 = vld [vmem:[%s15758_s2 + $0x2c0] ss:$12 sps:$4 sm:$0xff]  }
 0x1b0   : > { %v10230_v42 = vpop.f32.mrf.mxu0 }
 0x1b1   : > { %v12685_v43 = vpack.c.bf16 %v1873_v13, %v1870_v45  ;;  %v12706_v9 = vpop.f32.mrf.mxu1 }
 0x1b2   : > { %v1877_v19 = vpop.f32.mrf.mxu0 }
 0x1b3   : > { %3064 = vmatmul.mubr.bf16.vlgmr.msra.gmra.mxu1 %v12685_v43  ;;  %v1878_v13 = vadd.f32 %v9858_v37, %v1877_v19  ;;  %v10533_v37 = vld [vmem:[%s15758_s2 + $0x1e8] ss:$12 sps:$4 sm:$0xff]  }
 0x1b4   : > { %v10233_v20 = vpop.f32.mrf.mxu0  ;;  %3073 = vmatprep.mubr.bf16.mxu1 %v15867_v59  ;;  %9988 = vmatpush3.bf16.msra.mxu1 %v10524_v30  ;;  %v12713_v30 = vpop.f32.mrf.mxu1 }
 0x1b5   : > { %9989 = vmatprep.subr.bf16.mxu1 %v10526_v5  ;;  %v10531_v20 = vld [vmem:[%s15758_s2 + $0x380] ss:$12 sps:$4 sm:$0xff]  }
 0x1b6   : > { %v1880_v45 = vpop.f32.mrf.mxu0  ;;  %3187 = vmatmul.mubr.bf16.vlgmr.msra.gmra.mxu0 %v12264_v29  ;;  %v12724_v5 = vpop.f32.mrf.mxu1 }
 0x1b7   : > { %v1881_v42 = vadd.f32 %v9861_v7, %v1880_v45  ;;  %3194 = vmatprep.mubr.bf16.mxu0 %v12297_v63  ;;  %10264 = vmatpush3.bf16.msra.mxu0 %v10525_v60  ;;  %v10532_v63 = vld [vmem:[%s15758_s2 + $0x2a8] ss:$12 sps:$4 sm:$0xff]   ;;  %v9864_v7 = vadd.f32 %v12632_v31, %v12627_v47  ;;  %v10535_v45 = vld [vmem:[%s15758_s2 + $0x290] ss:$12 sps:$4 sm:$0xff]  }
 0x1b8   : > { %v10234_v25 = vpop.f32.mrf.mxu0  ;;  %9990 = vmatpush3.bf16.msra.mxu1 %v10527_v53  ;;  %10265 = vmatprep.subr.bf16.mxu0 %v15868_v46  ;;  %v12730_v60 = vpop.f32.mrf.mxu1  ;;  %v10534_v47 = vld [vmem:[%s15758_s2 + $0x368] ss:$12 sps:$4 sm:$0xff]  }
 0x1b9   : > { %v12722_v29 = vpack.c.bf16 %v1881_v42, %v1878_v13  ;;  %9991 = vmatprep.subr.bf16.mxu1 %v10529_v4  ;;  %v9867_v4 = vadd.f32 %v12640_v50, %v12637_v57  ;;  %v10536_v57 = vld [vmem:[%s15758_s2 + $0x1d0] ss:$12 sps:$4 sm:$0xff]  }
 0x1ba   : > { %v1885_v19 = vpop.f32.mrf.mxu0  ;;  %v12748_v42 = vpop.f32.mrf.mxu1 }
 0x1bb   : > { %3074 = vmatmul.mubr.bf16.gmra.mxu1 %v12722_v29  ;;  %10266 = vmatpush3.bf16.msra.mxu0 %v10528_v48  ;;  %v1886_v48 = vadd.f32 %v9864_v7, %v1885_v19  ;;  %v10540_v7 = vld [vmem:[%s15758_s2 + $0x260] ss:$12 sps:$4 sm:$0xff]  }
 0x1bc   : > { %v10237_v53 = vpop.f32.mrf.mxu0  ;;  %3083 = vmatprep.mubr.bf16.mxu1 %v15867_v59  ;;  %9992 = vmatpush3.bf16.msra.mxu1 %v10530_v16  ;;  %v12763_v16 = vpop.f32.mrf.mxu1 }
 0x1bd   : > { %10267 = vmatprep.subr.bf16.mxu0 %v15868_v46  ;;  %9993 = vmatprep.subr.bf16.mxu1 %v10532_v63  ;;  %v10538_v63 = vld [vmem:[%s15758_s2 + $0x350] ss:$12 sps:$4 sm:$0xff]   ;;  %v9870_v53 = vadd.f32 %v12650_v41, %v12645_v61  ;;  %v10541_v61 = vld [vmem:[%s15758_s2 + $0x338] ss:$12 sps:$4 sm:$0xff]  }
 0x1be   : > { %v1888_v13 = vpop.f32.mrf.mxu0  ;;  %3195 = vmatmul.mubr.bf16.gmra.mxu0 %v12304_v24 }
 0x1bf   : > { %v1889_v25 = vadd.f32 %v9867_v4, %v1888_v13  ;;  %3202 = vmatprep.mubr.bf16.mxu0 %v12327_v35  ;;  %10268 = vmatpush3.bf16.msra.mxu0 %v10531_v20  ;;  %v10537_v35 = vld [vmem:[%s15758_s2 + $0x278] ss:$12 sps:$4 sm:$0xff]  }
 0x1c0   : > { %v10238_v31 = vpop.f32.mrf.mxu0  ;;  %9994 = vmatpush3.bf16.msra.mxu1 %v10533_v37  ;;  %10269 = vmatprep.subr.bf16.mxu0 %v15868_v46  ;;  %v10539_v20 = vld [vmem:[%s15758_s2 + $0x1b8] ss:$12 sps:$4 sm:$0xff]   ;;  %v9873_v37 = vadd.f32 %v12658_v0, %v12655_v58  ;;  %v10542_v58 = vld [vmem:[%s15758_s2 + $0x1a0] ss:$12 sps:$4 sm:$0xff]  }
 0x1c1   : > { %v12758_v24 = vpack.c.bf16 %v1889_v25, %v1886_v48  ;;  %9995 = vmatprep.subr.bf16.mxu1 %v10535_v45  ;;  %v12782_v45 = vpop.f32.mrf.mxu1 }
 0x1c2   : > { %v1893_v50 = vpop.f32.mrf.mxu0 }
 0x1c3   : > { %3084 = vmatmul.mubr.bf16.gmra.mxu1 %v12758_v24  ;;  %10270 = vmatpush3.bf16.msra.mxu0 %v10534_v47  ;;  %v1894_v13 = vadd.f32 %v9870_v53, %v1893_v50  ;;  %v9893_v25 = vpop.f32.mrf.mxu1  ;;  %v10544_v47 = vld [vmem:[%s15758_s2 + $0x320] ss:$12 sps:$4 sm:$0xff]   ;;  %v9879_v50 = vadd.f32 %v12680_v33, %v12676_v52 }
 0x1c4   : > { %v10241_v19 = vpop.f32.mrf.mxu0  ;;  %3093 = vmatprep.mubr.bf16.mxu1 %v15867_v59  ;;  %9996 = vmatpush3.bf16.msra.mxu1 %v10536_v57  ;;  %v10545_v57 = vld [vmem:[%s15758_s2 + $0x188] ss:$12 sps:$4 sm:$0xff]  }
 0x1c5   : > { %10271 = vmatprep.subr.bf16.mxu0 %v15868_v46  ;;  %9997 = vmatprep.subr.bf16.mxu1 %v10537_v35  ;;  %v9876_v35 = vadd.f32 %v12668_v49, %v12663_v12  ;;  %v9895_v19 = vpop.f32.mrf.mxu1 }
 0x1c6   : > { %v1896_v4 = vpop.f32.mrf.mxu0  ;;  %3203 = vmatmul.mubr.bf16.gmra.mxu0 %v12334_v21 }
 0x1c7   : > { %v1897_v48 = vadd.f32 %v9873_v37, %v1896_v4  ;;  %3210 = vmatprep.mubr.bf16.mxu0 %v12357_v3  ;;  %10272 = vmatpush3.bf16.msra.mxu0 %v10538_v63  ;;  %v10543_v3 = vld [vmem:[%s15758_s2 + $0x248] ss:$12 sps:$4 sm:$0xff]   ;;  %v9896_v33 = vpop.f32.mrf.mxu1 }
 0x1c8   : > { %v10242_v41 = vpop.f32.mrf.mxu0  ;;  %9998 = vmatpush3.bf16.msra.mxu1 %v10539_v20  ;;  %10273 = vmatprep.subr.bf16.mxu0 %v15868_v46  ;;  %v10546_v37 = vld [vmem:[%s15758_s2 + $0x308] ss:$12 sps:$4 sm:$0xff]  }
 0x1c9   : > { %v12792_v21 = vpack.c.bf16 %v1897_v48, %v1894_v13  ;;  %9999 = vmatprep.subr.bf16.mxu1 %v10540_v7  ;;  %v9885_v7 = vadd.f32 %v12713_v30, %v12706_v9  ;;  %v9898_v13 = vpop.f32.mrf.mxu1 }
 0x1ca   : > { %v1901_v0 = vpop.f32.mrf.mxu0 }
 0x1cb   : > { %3094 = vmatmul.mubr.bf16.gmra.mxu1 %v12792_v21  ;;  %10274 = vmatpush3.bf16.msra.mxu0 %v10541_v61  ;;  %v1902_v20 = vadd.f32 %v9876_v35, %v1901_v0  ;;  %v9899_v0 = vpop.f32.mrf.mxu1 }
 0x1cc   : > { %v10245_v31 = vpop.f32.mrf.mxu0  ;;  %3103 = vmatprep.mubr.bf16.mxu1 %v15867_v59  ;;  %10000 = vmatpush3.bf16.msra.mxu1 %v10542_v58 }
 0x1cd   : > { %10275 = vmatprep.subr.bf16.mxu0 %v15868_v46  ;;  %10001 = vmatprep.subr.bf16.mxu1 %v10543_v3 }
 0x1ce   : > { %v1904_v63 = vpop.f32.mrf.mxu0  ;;  %3211 = vmatmul.mubr.bf16.gmra.mxu0 %v12364_v32 }
 0x1cf   : > { %v1905_v53 = vadd.f32 %v9879_v50, %v1904_v63  ;;  %3218 = vmatprep.mubr.bf16.mxu0 %v12384_v27  ;;  %10276 = vmatpush3.bf16.msra.mxu0 %v10544_v47  ;;  %v9882_v27 = vadd.f32 %v12693_v55, %v12687_v8  ;;  %v9888_v8 = vadd.f32 %v12730_v60, %v12724_v5 }
 0x1d0   : > { %v10246_v12 = vpop.f32.mrf.mxu0  ;;  %10002 = vmatpush3.bf16.msra.mxu1 %v10545_v57  ;;  %10277 = vmatprep.subr.bf16.mxu0 %v15868_v46  ;;  %v9894_v5 = vadd.f32 %v9893_v25, %v12782_v45  ;;  %v9897_v60 = vadd.f32 %v9896_v33, %v9895_v19  ;;  %v9900_v45 = vadd.f32 %v9899_v0, %v9898_v13 }
 0x1d1   : > { %v12816_v49 = vpack.c.bf16 %v1905_v53, %v1902_v20 }
 0x1d2   : > { %v1909_v52 = vpop.f32.mrf.mxu0 }
 0x1d3   : > { %3104 = vmatmul.mubr.bf16.gmra.mxu1 %v12816_v49  ;;  %10278 = vmatpush3.bf16.msra.mxu0 %v10546_v37  ;;  %v1910_v48 = vadd.f32 %v9882_v27, %v1909_v52 }
 0x1d4   : > { %v10249_v32 = vpop.f32.mrf.mxu0  ;;  %3113 = vmatprep.mubr.bf16.mxu1 %v15867_v59 }
 0x1d6   : > { %v1912_v4 = vpop.f32.mrf.mxu0  ;;  %3219 = vmatmul.mubr.bf16.gmra.mxu0 %v12388_v26  ;;  %v9891_v26 = vadd.f32 %v12763_v16, %v12748_v42 }
 0x1d7   : > { %v1913_v61 = vadd.f32 %v9885_v7, %v1912_v4  ;;  %3226 = vmatprep.mubr.bf16.mxu0 %v12405_v51  ;;  %v9901_v51 = vpop.f32.mrf.mxu1 }
 0x1d8   : > { %v10250_v41 = vpop.f32.mrf.mxu0 }
 0x1d9   : > { %v12826_v58 = vpack.c.bf16 %v1913_v61, %v1910_v48  ;;  %v9902_v50 = vpop.f32.mrf.mxu1  ;;  %v15872_v48 = vld [vmem:[#allocation8_spill] sm:$0xff] }
 0x1da   : > { %v1917_v3 = vpop.f32.mrf.mxu0  ;;  %v9903_v25 = vadd.f32 %v9902_v50, %v9901_v51 }
 0x1db   : > { %3114 = vmatmul.mubr.bf16.gmra.mxu1 %v12826_v58  ;;  %v1918_v9 = vadd.f32 %v9888_v8, %v1917_v3 }
 0x1dc   : > { %v10253_v47 = vpop.f32.mrf.mxu0  ;;  %3123 = vmatprep.mubr.bf16.mxu1 %v15867_v59 }
 0x1de   : > { %v1920_v55 = vpop.f32.mrf.mxu0  ;;  %3227 = vmatmul.mubr.bf16.gmra.mxu0 %v12409_v17 }
 0x1df   : > { %v1921_v30 = vadd.f32 %v9891_v26, %v1920_v55  ;;  %3234 = vmatprep.mubr.bf16.mxu0 %v12423_v44 }
 0x1e0   : > { %v10254_v31 = vpop.f32.mrf.mxu0 }
 0x1e1   : > { %v12836_v57 = vpack.c.bf16 %v1921_v30, %v1918_v9 }
 0x1e2   : > { %v1925_v35 = vpop.f32.mrf.mxu0 }
 0x1e3   : > { %3124 = vmatmul.mubr.bf16.gmra.mxu1 %v12836_v57  ;;  %v1926_v16 = vadd.f32 %v9894_v5, %v1925_v35 }
 0x1e4   : > { %v10257_v63 = vpop.f32.mrf.mxu0  ;;  %3133 = vmatprep.mubr.bf16.mxu1 %v15867_v59 }
 0x1e6   : > { %v1928_v42 = vpop.f32.mrf.mxu0  ;;  %v12841_v17 = vpop.f32.mrf.mxu1  ;;  %3235 = vmatmul.mubr.bf16.gmra.mxu0 %v12427_v36 }
 0x1e7   : > { %v1929_v44 = vadd.f32 %v9897_v60, %v1928_v42  ;;  %3242 = vmatprep.mubr.bf16.mxu0 %v12441_v56 }
 0x1e8   : > { %v10258_v20 = vpop.f32.mrf.mxu0  ;;  %v12847_v37 = vpop.f32.mrf.mxu1 }
 0x1e9   : > { %v12845_v53 = vpack.c.bf16 %v1929_v44, %v1926_v16 }
 0x1ea   : > { %v1933_v12 = vpop.f32.mrf.mxu0  ;;  %v12851_v19 = vpop.f32.mrf.mxu1 }
 0x1eb   : > { %3134 = vmatmul.mubr.bf16.gmra.mxu1 %v12845_v53  ;;  %v1934_v33 = vadd.f32 %v9900_v45, %v1933_v12 }
 0x1ec   : > { %v10261_v52 = vpop.f32.mrf.mxu0  ;;  %3143 = vmatprep.mubr.bf16.mxu1 %v15867_v59  ;;  %v12855_v27 = vpop.f32.mrf.mxu1 }
 0x1ee   : > { %v1936_v36 = vpop.f32.mrf.mxu0  ;;  %3243 = vmatmul.mubr.bf16.gmra.mxu0 %v12445_v34  ;;  %v12861_v4 = vpop.f32.mrf.mxu1 }
 0x1ef   : > { %v1937_v56 = vadd.f32 %v9903_v25, %v1936_v36  ;;  %3250 = vmatprep.mubr.bf16.mxu0 %v12459_v22 }
 0x1f0   : > { %v10262_v32 = vpop.f32.mrf.mxu0  ;;  %v12866_v34 = vpop.f32.mrf.mxu1 }
 0x1f1   : > { %v12857_v7 = vpack.c.bf16 %v1937_v56, %v1934_v33 }
 0x1f2   : > { %v12870_v22 = vpop.f32.mrf.mxu1 }
 0x1f3   : > { %3144 = vmatmul.mubr.bf16.gmra.mxu1 %v12857_v7 }
 0x1f4   : > { %3291 = vmatprep.mubr.bf16.mxu1 %v12478_v38  ;;  %v12875_v38 = vpop.f32.mrf.mxu1 }
 0x1f6   : > { %3251 = vmatmul.mubr.bf16.gmra.mxu0 %v12463_v18  ;;  %v12879_v18 = vpop.f32.mrf.mxu1 }
 0x1f7   : > { %10279 = vmatprep.mubr.msk.bf16.mxu0 %vm11071_vm5, %v15868_v46 }
 0x1fb   : > { %3292 = vmatmul.mubr.bf16.vlgmr.msra.gmra.mxu1 %v12485_v2  ;;  %v12884_v2 = vpop.f32.mrf.mxu1 }
 0x1fc   : > { %3299 = vmatprep.mubr.bf16.mxu1 %v12508_v23 }
 0x1fd   : > { %v12888_v23 = vpop.f32.mrf.mxu1 }
 0x1fe   : > { %10280 = vmatmul.mubr.bf16.vlgmr.msra.gmra.mxu0 %v12685_v43 }
 0x1ff   : > { %10283 = vmatprep.mubr.msk.bf16.mxu0 %vm11071_vm5, %v15868_v46 }
 0x203   : > { %3300 = vmatmul.mubr.bf16.gmra.mxu1 %v12515_v28  ;;  %v12893_v28 = vpop.f32.mrf.mxu1 }
 0x204   : > { %3307 = vmatprep.mubr.bf16.mxu1 %v12538_v14 }
 0x205   : > { %v12897_v14 = vpop.f32.mrf.mxu1 }
 0x206   : > { %10284 = vmatmul.mubr.bf16.gmra.mxu0 %v12722_v29  ;;  %v15871_v29 = vld [vmem:[#allocation7_spill] sm:$0xff] }
 0x207   : > { %10287 = vmatprep.mubr.msk.bf16.mxu0 %vm11071_vm5, %v15868_v46 }
 0x20b   : > { %3308 = vmatmul.mubr.bf16.gmra.mxu1 %v12545_v11  ;;  %v12902_v11 = vpop.f32.mrf.mxu1 }
 0x20c   : > { %3315 = vmatprep.mubr.bf16.mxu1 %v12568_v6 }
 0x20d   : > { %v12906_v6 = vpop.f32.mrf.mxu1 }
 0x20e   : > { %10288 = vmatmul.mubr.bf16.gmra.mxu0 %v12758_v24 }
 0x20f   : > { %10291 = vmatprep.mubr.msk.bf16.mxu0 %vm11071_vm5, %v15868_v46 }
 0x213   : > { %3316 = vmatmul.mubr.bf16.gmra.mxu1 %v12575_v39  ;;  %v12911_v39 = vpop.f32.mrf.mxu1 }
 0x214   : > { %3323 = vmatprep.mubr.bf16.mxu1 %v12595_v40  ;;  %v15869_v40 = vld [vmem:[#allocation5_spill] sm:$0xff] }
 0x215   : > { %v12915_v43 = vpop.f32.mrf.mxu1 }
 0x216   : > { %10292 = vmatmul.mubr.bf16.gmra.mxu0 %v12792_v21 }
 0x217   : > { %10295 = vmatprep.mubr.msk.bf16.mxu0 %vm11071_vm5, %v15868_v46 }
 0x21b   : > { %3324 = vmatmul.mubr.bf16.gmra.mxu1 %v12599_v62  ;;  %v12920_v62 = vpop.f32.mrf.mxu1 }
 0x21c   : > { %3331 = vmatprep.mubr.bf16.mxu1 %v12612_v1  ;;  %v15870_v1 = vld [vmem:[#allocation6_spill] sm:$0xff] }
 0x21d   : > { %v12924_v24 = vpop.f32.mrf.mxu1 }
 0x21e   : > { %10296 = vmatmul.mubr.bf16.gmra.mxu0 %v12816_v49 }
 0x21f   : > { %10299 = vmatprep.mubr.msk.bf16.mxu0 %vm11071_vm5, %v15868_v46  ;;  %v12933_v49 = vpop.f32.mrf.mxu1 }
 0x221   : > { %v12941_v41 = vpop.f32.mrf.mxu1 }
 0x223   : > { %3332 = vmatmul.mubr.bf16.gmra.mxu1 %v12616_v15  ;;  %v12950_v0 = vpop.f32.mrf.mxu1 }
 0x224   : > { %3339 = vmatprep.mubr.bf16.mxu1 %v15869_v40 }
 0x226   : > { %10300 = vmatmul.mubr.bf16.gmra.mxu0 %v12826_v58 }
 0x227   : > { %10303 = vmatprep.mubr.msk.bf16.mxu0 %vm11071_vm5, %v15868_v46 }
 0x22b   : > { %3340 = vmatmul.mubr.bf16.gmra.mxu1 %v15870_v1 }
 0x22c   : > { %3347 = vmatprep.mubr.bf16.mxu1 %v15871_v29 }
 0x22e   : > { %v12926_v21 = vpop.f32.mrf.mxu0  ;;  %10304 = vmatmul.mubr.bf16.gmra.mxu0 %v12836_v57 }
 0x22f   : > { %10307 = vmatprep.mubr.msk.bf16.mxu0 %vm11071_vm5, %v15868_v46 }
 0x230   : > { %v12931_v15 = vpop.f32.mrf.mxu0 }
 0x232   : > { %v12935_v13 = vpop.f32.mrf.mxu0 }
 0x233   : > { %3348 = vmatmul.mubr.bf16.gmra.mxu1 %v15872_v48  ;;  %v3473_v48 = vlaneseq }
 0x234   : > { %v12938_v61 = vpop.f32.mrf.mxu0  ;;  %3355 = vmatprep.mubr.bf16.mxu1 %v12666_v10  ;;  %v12957_v10 = vpop.f32.mrf.mxu1 }
 0x236   : > { %v12943_v58 = vpop.f32.mrf.mxu0  ;;  %10308 = vmatmul.mubr.bf16.gmra.mxu0 %v12845_v53  ;;  %v12964_v51 = vpop.f32.mrf.mxu1 }
 0x237   : > { %10311 = vmatprep.mubr.msk.bf16.mxu0 %vm11071_vm5, %v15868_v46 }
 0x238   : > { %v12948_v3 = vpop.f32.mrf.mxu0  ;;  %v12970_v30 = vpop.f32.mrf.mxu1 }
 0x23a   : > { %v12952_v47 = vpop.f32.mrf.mxu0  ;;  %v12976_v57 = vpop.f32.mrf.mxu1 }
 0x23b   : > { %3356 = vmatmul.mubr.bf16.gmra.mxu1 %v12670_v54  ;;  %15873 = vst [vmem:[#allocation5_spill] sm:$0xff] %v12976_v57 }
 0x23c   : > { %v12955_v8 = vpop.f32.mrf.mxu0  ;;  %v12982_v63 = vpop.f32.mrf.mxu1 }
 0x23d   : > { %15874 = vst [vmem:[#allocation6_spill] sm:$0xff] %v12982_v63 }
 0x23e   : > { %v12959_v26 = vpop.f32.mrf.mxu0  ;;  %10312 = vmatmul.mubr.bf16.gmra.mxu0 %v12857_v7  ;;  %v12988_v42 = vpop.f32.mrf.mxu1 }
 0x23f   : > { %15875 = vst [vmem:[#allocation7_spill] sm:$0xff] %v12988_v42 }
 0x240   : > { %v12962_v55 = vpop.f32.mrf.mxu0  ;;  %v12994_v20 = vpop.f32.mrf.mxu1 }
 0x241   : > { %15876 = vst [vmem:[#allocation8_spill] sm:$0xff] %v12994_v20  ;;  %v13028_v20 = vshrl.u32 %v3473_v48, 7 }
 0x242   : > { %v12966_v46 = vpop.f32.mrf.mxu0  ;;  %v13000_v52 = vpop.f32.mrf.mxu1 }
 0x243   : > { %15877 = vst [vmem:[#allocation9_spill] sm:$0xff] %v13000_v52  ;;  %15889 = vst [vmem:[#allocation21_spill] sm:$0xff] %v13028_v20 }
 0x244   : > { %v12968_v9 = vpop.f32.mrf.mxu0  ;;  %v13006_v36 = vpop.f32.mrf.mxu1 }
 0x245   : > { %15878 = vst [vmem:[#allocation10_spill] sm:$0xff] %v13006_v36 }
 0x246   : > { %v12972_v31 = vpop.f32.mrf.mxu0  ;;  %v13012_v32 = vpop.f32.mrf.mxu1 }
 0x247   : > { %15881 = vst [vmem:[#allocation13_spill] sm:$0xff] %v13012_v32 }
 0x248   : > { %v12974_v54 = vpop.f32.mrf.mxu0  ;;  %v13018_v1 = vpop.f32.mrf.mxu1 }
 0x249   : > { %15884 = vst [vmem:[#allocation16_spill] sm:$0xff] %v13018_v1  ;;  %v13042_v1 = vld [vmem:[%s15759_s3] ss:$2 sm:$0x7] }
 0x24a   : > { %v12978_v35 = vpop.f32.mrf.mxu0  ;;  %v13024_v52 = vpop.f32.mrf.mxu1  ;;  %15894 = vst [vmem:[#allocation26_spill] sm:$0xff] %v13042_v1 }
 0x24b   : > { %15887 = vst [vmem:[#allocation19_spill] sm:$0xff] %v13024_v52  ;;  %v13047_v52 = vsub.s32 1, %v13028_v20 }
 0x24c   : > { %v12980_v50 = vpop.f32.mrf.mxu0  ;;  %v13032_v32 = vpop.f32.mrf.mxu1 }
 0x24d   : > { %15891 = vst [vmem:[#allocation23_spill] sm:$0xff] %v13032_v32  ;;  %15896 = vst [vmem:[#allocation28_spill] sm:$0xff] %v13047_v52  ;;  %v13054_v32 = vld [vmem:[%s15759_s3 + $0x1] ss:$2 sm:$0x7] }
 0x24e   : > { %v12984_v5 = vpop.f32.mrf.mxu0  ;;  %v13049_v48 = vpop.f32.mrf.mxu1 }
 0x24f   : > { %15897 = vst [vmem:[#allocation29_spill] sm:$0xff] %v13049_v48 }
 0x250   : > { %v12986_v60 = vpop.f32.mrf.mxu0 }
 0x252   : > { %v12990_v16 = vpop.f32.mrf.mxu0 }
 0x254   : > { %v12992_v44 = vpop.f32.mrf.mxu0 }
 0x256   : > { %v12996_v53 = vpop.f32.mrf.mxu0 }
 0x258   : > { %v12998_v12 = vpop.f32.mrf.mxu0 }
 0x25a   : > { %v13002_v45 = vpop.f32.mrf.mxu0 }
 0x25c   : > { %v13004_v25 = vpop.f32.mrf.mxu0 }
 0x25e   : > { %v13008_v33 = vpop.f32.mrf.mxu0 }
 0x25f   : > { %15879 = vst [vmem:[#allocation11_spill] sm:$0xff] %v13008_v33 }
 0x260   : > { %v13010_v56 = vpop.f32.mrf.mxu0 }
 0x261   : > { %15880 = vst [vmem:[#allocation12_spill] sm:$0xff] %v13010_v56 }
 0x262   : > { %v13014_v7 = vpop.f32.mrf.mxu0 }
 0x263   : > { %15882 = vst [vmem:[#allocation14_spill] sm:$0xff] %v13014_v7 }
 0x264   : > { %v13016_v40 = vpop.f32.mrf.mxu0 }
 0x265   : > { %15883 = vst [vmem:[#allocation15_spill] sm:$0xff] %v13016_v40  ;;  %v13037_v40 = vsub.s32 0, %v13028_v20  ;;  %v2945_v20 = vadd.f32 %v12931_v15, %v12847_v37 }
 0x266   : > { %v13020_v29 = vpop.f32.mrf.mxu0 }
 0x267   : > { %15885 = vst [vmem:[#allocation17_spill] sm:$0xff] %v13020_v29  ;;  %15893 = vst [vmem:[#allocation25_spill] sm:$0xff] %v13037_v40  ;;  %v13068_v48 = vrot.slane %v13054_v32, %v13037_v40 }
 0x268   : > { %v13022_v59 = vpop.f32.mrf.mxu0 }
 0x269   : > { %15886 = vst [vmem:[#allocation18_spill] sm:$0xff] %v13022_v59 }
 0x26a   : > { %v13026_v36 = vpop.f32.mrf.mxu0 }
 0x26b   : > { %15888 = vst [vmem:[#allocation20_spill] sm:$0xff] %v13026_v36  ;;  %v13062_v36 = vrot.slane %v13042_v1, %v13037_v40 }
 0x26c   : > { %v13030_v42 = vpop.f32.mrf.mxu0 }
 0x26d   : > { %15890 = vst [vmem:[#allocation22_spill] sm:$0xff] %v13030_v42 }
 0x26e   : > { %v13034_v7 = vpop.f32.mrf.mxu0 }
 0x26f   : > { %15892 = vst [vmem:[#allocation24_spill] sm:$0xff] %v13034_v7  ;;  %v2943_v7 = vadd.f32 %v12926_v21, %v12841_v17  ;;  %v13074_v17 = vrot.slane %v13042_v1, %v13047_v52 }
 0x270   : > { %v13044_v59 = vpop.f32.mrf.mxu0 }
 0x271   : > { %15895 = vst [vmem:[#allocation27_spill] sm:$0xff] %v13044_v59 }
 0x272   : > { %v13058_v42 = vpop.f32.mrf.mxu0 }
 0x273   : > { %15898 = vst [vmem:[#allocation30_spill] sm:$0xff] %v13058_v42  ;;  %v3065_v59 = vpop.f32.mrf.mxu1  ;;  %v2947_v42 = vadd.f32 %v12935_v13, %v12851_v19 }
 0x274   : > { %v3066_v29 = vadd.f32 %v3065_v59, %v2943_v7  ;;  %v13070_v63 = vpop.f32.mrf.mxu0  ;;  %v13081_v59 = vrot.slane %v13054_v32, %v13047_v52  ;;  %v2949_v7 = vadd.f32 %v12938_v61, %v12855_v27 }
 0x275   : > { %15899 = vst [vmem:[#allocation31_spill] sm:$0xff] %v13070_v63  ;;  %v3067_v21 = vpop.f32.mrf.mxu1 }
 0x276   : > { %v3488_v56 = vmul.f32 %v13062_v36, %v3066_v29  ;;  %v3068_v57 = vadd.f32 %v3067_v21, %v2945_v20  ;;  %v9933_v37 = vpop.f32.mrf.mxu0  ;;  %v2953_v20 = vadd.f32 %v12943_v58, %v12861_v4  ;;  %v2955_v58 = vadd.f32 %v12948_v3, %v12866_v34 }
 0x277   : > { %v3069_v15 = vpop.f32.mrf.mxu1  ;;  %v2959_v34 = vadd.f32 %v12955_v8, %v12875_v38  ;;  %v2963_v38 = vadd.f32 %v12959_v26, %v12879_v18 }
 0x278   : > { %v13086_v40 = vadd.f32 %v13068_v48, %v3488_v56  ;;  %v3489_v1 = vmul.f32 %v13074_v17, %v3068_v57  ;;  %v3070_v63 = vadd.f32 %v3069_v15, %v2947_v42  ;;  %v9934_v33 = vpop.f32.mrf.mxu0 }
 0x279   : > { %v13089_v19 = vadd.f32 %v9934_v33, %v9933_v37  ;;  %v3071_v13 = vpop.f32.mrf.mxu1 }
 0x27a   : > { %v13094_v29 = vadd.f32 %v13081_v59, %v3489_v1  ;;  %v3491_v21 = vmul.f32 %v13062_v36, %v3070_v63  ;;  %v3072_v52 = vadd.f32 %v3071_v13, %v2949_v7  ;;  %v13097_v27 = vpop.f32.mrf.mxu0  ;;  %v15801_v61 = vmax.f32 %v13086_v40, 0.0 }
 0x27b   : > { %v3075_v56 = vpop.f32.mrf.mxu1  ;;  %v2957_v1 = vadd.f32 %v12952_v47, %v12870_v22 }
 0x27c   : > { %v15802_v57 = vmax.f32 %v13094_v29, 0.0  ;;  %v13102_v42 = vadd.f32 %v13068_v48, %v3491_v21  ;;  %v3492_v33 = vmul.f32 %v13074_v17, %v3072_v52  ;;  %v3076_v37 = vadd.f32 %v3075_v56, %v2953_v20  ;;  %v13105_v4 = vpop.f32.mrf.mxu0 }
 0x27d   : > { %v3077_v63 = vpop.f32.mrf.mxu1 }
 0x27e   : > { %15900 = vst [vmem:[#allocation32_spill] sm:$0xff] %v13102_v42  ;;  %v9784_v15 = vpack.c.bf16 %v15802_v57, %v15801_v61  ;;  %v13116_v7 = vadd.f32 %v13081_v59, %v3492_v33  ;;  %v3494_v52 = vmul.f32 %v13062_v36, %v3076_v37  ;;  %v9939_v13 = vpop.f32.mrf.mxu0  ;;  %v3078_v20 = vadd.f32 %v3077_v63, %v2955_v58  ;;  %v10547_v58 = vld [vmem:[%s15760_s4 + $0x4] ss:$8 sps:$4 sm:$0xff]  }
 0x27f   : > { %v3079_v21 = vpop.f32.mrf.mxu1  ;;  %v15803_v3 = vmax.f32 %v13102_v42, 0.0  ;;  %9382 = vmatprep.mubr.msk.bf16.mxu1 %vm4685_vm6, %v10547_v58  ;;  %9392 = vmatprep.mubr.msk.bf16.mxu0 %vm4685_vm6, %v10547_v58  ;;  %v2969_v58 = vadd.f32 %v12968_v9, %v12893_v28 }
 0x280   : > { %3846 = vst [vmem:[#allocation2] sm:$0xff] %v9784_v15  ;;  %v15804_v22 = vmax.f32 %v13116_v7, 0.0  ;;  %v3080_v47 = vadd.f32 %v3079_v21, %v2957_v1  ;;  %v9940_v56 = vpop.f32.mrf.mxu0  ;;  %v3564_v61 = vadd.f32 %v13068_v48, %v3494_v52  ;;  %v3495_v33 = vmul.f32 %v13074_v17, %v3078_v20 }
 0x281   : > { %v13125_v57 = vadd.f32 %v9940_v56, %v9939_v13  ;;  %v3081_v37 = vpop.f32.mrf.mxu1  ;;  %v2965_v20 = vadd.f32 %v12962_v55, %v12884_v2 }
 0x282   : > { %v9786_v8 = vpack.c.bf16 %v15804_v22, %v15803_v3  ;;  %v3497_v63 = vmul.f32 %v13062_v36, %v3080_v47  ;;  %v3082_v1 = vadd.f32 %v3081_v37, %v2959_v34  ;;  %v13137_v15 = vpop.f32.mrf.mxu0  ;;  %v3565_v52 = vadd.f32 %v13081_v59, %v3495_v33 }
 0x283   : > { %v3085_v13 = vpop.f32.mrf.mxu1  ;;  %v3618_v34 = vmax.f32 %v3564_v61, 0.0  ;;  %v2967_v33 = vadd.f32 %v12966_v46, %v12888_v23  ;;  %v2973_v46 = vadd.f32 %v12972_v31, %v12897_v14 }
 0x284   : > { %3848 = vst [vmem:[#allocation2 + $0xc] sm:$0xff] %v9786_v8  ;;  %v3567_v18 = vadd.f32 %v13068_v48, %v3497_v63  ;;  %v3498_v26 = vmul.f32 %v13074_v17, %v3082_v1  ;;  %v3086_v21 = vadd.f32 %v3085_v13, %v2963_v38  ;;  %v13144_v56 = vpop.f32.mrf.mxu0  ;;  %v3619_v47 = vmax.f32 %v3565_v52, 0.0 }
 0x285   : > { %v3087_v37 = vpop.f32.mrf.mxu1 }
 0x286   : > { %v3568_v2 = vadd.f32 %v13081_v59, %v3498_v26  ;;  %v3500_v55 = vmul.f32 %v13062_v36, %v3086_v21  ;;  %v3088_v8 = vadd.f32 %v3087_v37, %v2965_v20  ;;  %v9945_v63 = vpop.f32.mrf.mxu0  ;;  %v3621_v1 = vmax.f32 %v3567_v18, 0.0 }
 0x287   : > { %v3089_v38 = vpop.f32.mrf.mxu1  ;;  %v2975_v21 = vadd.f32 %v12974_v54, %v12902_v11 }
 0x288   : > { %v3622_v13 = vmax.f32 %v3568_v2, 0.0  ;;  %v3570_v3 = vadd.f32 %v13068_v48, %v3500_v55  ;;  %v3501_v61 = vmul.f32 %v13074_v17, %v3088_v8  ;;  %v3090_v52 = vadd.f32 %v3089_v38, %v2967_v33  ;;  %v9946_v22 = vpop.f32.mrf.mxu0 }
 0x289   : > { %v13156_v42 = vadd.f32 %v9946_v22, %v9945_v63  ;;  %v3091_v23 = vpop.f32.mrf.mxu1  ;;  %v13172_v63 = vpack.c.bf16 %v3621_v1, %v3618_v34  ;;  %v2977_v38 = vadd.f32 %v12978_v35, %v12906_v6  ;;  %v2983_v35 = vadd.f32 %v12984_v5, %v12915_v43 }
 0x28a   : > { %v3571_v20 = vadd.f32 %v13081_v59, %v3501_v61  ;;  %v3503_v18 = vmul.f32 %v13062_v36, %v3090_v52  ;;  %v13162_v26 = vpop.f32.mrf.mxu0  ;;  %v3092_v37 = vadd.f32 %v3091_v23, %v2969_v58  ;;  %v3624_v2 = vmax.f32 %v3570_v3, 0.0 }
 0x28b   : > { %v3095_v33 = vpop.f32.mrf.mxu1  ;;  %v13168_v22 = vpack.c.bf16 %v3622_v13, %v3619_v47  ;;  %v2979_v47 = vadd.f32 %v12980_v50, %v12911_v39  ;;  %v2985_v43 = vadd.f32 %v12986_v60, %v12920_v62 }
 0x28c   : > { %v3625_v55 = vmax.f32 %v3571_v20, 0.0  ;;  %v3096_v28 = vadd.f32 %v3095_v33, %v2973_v46  ;;  %v13166_v9 = vpop.f32.mrf.mxu0  ;;  %v3573_v14 = vadd.f32 %v13068_v48, %v3503_v18  ;;  %v3504_v31 = vmul.f32 %v13074_v17, %v3092_v37 }
 0x28d   : > { %v3097_v8 = vpop.f32.mrf.mxu1 }
 0x28e   : > { %v3506_v11 = vmul.f32 %v13062_v36, %v3096_v28  ;;  %v3098_v54 = vadd.f32 %v3097_v8, %v2975_v21  ;;  %v9951_v3 = vpop.f32.mrf.mxu0  ;;  %v3574_v61 = vadd.f32 %v13081_v59, %v3504_v31  ;;  %v3627_v1 = vmax.f32 %v3573_v14, 0.0 }
 0x28f   : > { %v3099_v52 = vpop.f32.mrf.mxu1 }
 0x290   : > { %v3576_v13 = vadd.f32 %v13068_v48, %v3506_v11  ;;  %v3507_v58 = vmul.f32 %v13074_v17, %v3098_v54  ;;  %v3100_v23 = vadd.f32 %v3099_v52, %v2977_v38  ;;  %v9952_v34 = vpop.f32.mrf.mxu0  ;;  %v3628_v46 = vmax.f32 %v3574_v61, 0.0 }
 0x291   : > { %v13182_v20 = vadd.f32 %v9952_v34, %v9951_v3  ;;  %v3101_v6 = vpop.f32.mrf.mxu1  ;;  %v13198_v54 = vpack.c.bf16 %v3627_v1, %v3624_v2  ;;  %v2987_v3 = vadd.f32 %v12990_v16, %v12924_v24  ;;  %v2993_v16 = vadd.f32 %v12996_v53, %v12941_v41 }
 0x292   : > { %v3577_v18 = vadd.f32 %v13081_v59, %v3507_v58  ;;  %v3509_v21 = vmul.f32 %v13062_v36, %v3100_v23  ;;  %v3102_v37 = vadd.f32 %v3101_v6, %v2979_v47  ;;  %v13188_v39 = vpop.f32.mrf.mxu0  ;;  %v3630_v50 = vmax.f32 %v3576_v13, 0.0 }
 0x293   : > { %v3105_v33 = vpop.f32.mrf.mxu1  ;;  %v13196_v11 = vpack.c.bf16 %v3628_v46, %v3625_v55  ;;  %v2989_v23 = vadd.f32 %v12992_v44, %v12933_v49  ;;  %v2995_v49 = vadd.f32 %v12998_v12, %v12950_v0  ;;  %v2997_v0 = vadd.f32 %v13002_v45, %v12957_v10  ;;  %v15901_v45 = vld [vmem:[#allocation11_spill] sm:$0xff] }
 0x294   : > { %v3631_v28 = vmax.f32 %v3577_v18, 0.0  ;;  %v3579_v31 = vadd.f32 %v13068_v48, %v3509_v21  ;;  %v3510_v14 = vmul.f32 %v13074_v17, %v3102_v37  ;;  %v3106_v8 = vadd.f32 %v3105_v33, %v2983_v35  ;;  %v13192_v38 = vpop.f32.mrf.mxu0 }
 0x295   : > { %v3107_v5 = vpop.f32.mrf.mxu1 }
 0x296   : > { %v3580_v61 = vadd.f32 %v13081_v59, %v3510_v14  ;;  %v3512_v52 = vmul.f32 %v13062_v36, %v3106_v8  ;;  %v9957_v47 = vpop.f32.mrf.mxu0  ;;  %v3108_v13 = vadd.f32 %v3107_v5, %v2985_v43  ;;  %v3633_v34 = vmax.f32 %v3579_v31, 0.0 }
 0x297   : > { %v3109_v58 = vpop.f32.mrf.mxu1 }
 0x298   : > { %v3634_v62 = vmax.f32 %v3580_v61, 0.0  ;;  %v3110_v60 = vadd.f32 %v3109_v58, %v2987_v3  ;;  %v9958_v55 = vpop.f32.mrf.mxu0  ;;  %v3582_v2 = vadd.f32 %v13068_v48, %v3512_v52  ;;  %v3513_v1 = vmul.f32 %v13074_v17, %v3108_v13 }
 0x299   : > { %v13208_v46 = vadd.f32 %v9958_v55, %v9957_v47  ;;  %v3111_v24 = vpop.f32.mrf.mxu1  ;;  %v13224_v5 = vpack.c.bf16 %v3633_v34, %v3630_v50  ;;  %v2999_v50 = vadd.f32 %v13004_v25, %v12964_v51  ;;  %v3003_v55 = vadd.f32 %v15901_v45, %v12970_v30 }
 0x29a   : > { %v3515_v6 = vmul.f32 %v13062_v36, %v3110_v60  ;;  %v3112_v35 = vadd.f32 %v3111_v24, %v2989_v23  ;;  %v13213_v18 = vpop.f32.mrf.mxu0  ;;  %v3583_v44 = vadd.f32 %v13081_v59, %v3513_v1  ;;  %v13222_v8 = vpack.c.bf16 %v3634_v62, %v3631_v28 }
 0x29b   : > { %v3115_v21 = vpop.f32.mrf.mxu1  ;;  %v3636_v41 = vmax.f32 %v3582_v2, 0.0 }
 0x29c   : > { %v3585_v37 = vadd.f32 %v13068_v48, %v3515_v6  ;;  %v3516_v33 = vmul.f32 %v13074_v17, %v3112_v35  ;;  %v3116_v31 = vadd.f32 %v3115_v21, %v2993_v16  ;;  %v13220_v14 = vpop.f32.mrf.mxu0  ;;  %v3637_v53 = vmax.f32 %v3583_v44, 0.0  ;;  %v15902_v16 = vld [vmem:[#allocation5_spill] sm:$0xff]  ;;  %v15903_v6 = vld [vmem:[#allocation12_spill] sm:$0xff] }
 0x29d   : > { %v3117_v43 = vpop.f32.mrf.mxu1  ;;  %v3005_v35 = vadd.f32 %v15903_v6, %v15902_v16  ;;  %v15908_v16 = vld [vmem:[#allocation8_spill] sm:$0xff]  ;;  %v15909_v6 = vld [vmem:[#allocation17_spill] sm:$0xff] }
 0x29e   : > { %v3586_v12 = vadd.f32 %v13081_v59, %v3516_v33  ;;  %v3518_v3 = vmul.f32 %v13062_v36, %v3116_v31  ;;  %v3118_v61 = vadd.f32 %v3117_v43, %v2995_v49  ;;  %v9963_v52 = vpop.f32.mrf.mxu0  ;;  %v3639_v47 = vmax.f32 %v3585_v37, 0.0 }
 0x29f   : > { %v3119_v13 = vpop.f32.mrf.mxu1 }
 0x2a0   : > { %v3640_v58 = vmax.f32 %v3586_v12, 0.0  ;;  %v3588_v28 = vadd.f32 %v13068_v48, %v3518_v3  ;;  %v3519_v23 = vmul.f32 %v13074_v17, %v3118_v61  ;;  %v3120_v62 = vadd.f32 %v3119_v13, %v2997_v0  ;;  %v9964_v60 = vpop.f32.mrf.mxu0  ;;  %v15904_v12 = vld [vmem:[#allocation6_spill] sm:$0xff] }
 0x2a1   : > { %v13234_v34 = vadd.f32 %v9964_v60, %v9963_v52  ;;  %v3121_v10 = vpop.f32.mrf.mxu1  ;;  %v13250_v0 = vpack.c.bf16 %v3639_v47, %v3636_v41  ;;  %v15905_v3 = vld [vmem:[#allocation14_spill] sm:$0xff]  ;;  %v15906_v60 = vld [vmem:[#allocation7_spill] sm:$0xff] }
 0x2a2   : > { %v3589_v2 = vadd.f32 %v13081_v59, %v3519_v23  ;;  %v3521_v1 = vmul.f32 %v13062_v36, %v3120_v62  ;;  %v13240_v24 = vpop.f32.mrf.mxu0  ;;  %v3122_v49 = vadd.f32 %v3121_v10, %v2999_v50  ;;  %v3642_v21 = vmax.f32 %v3588_v28, 0.0 }
 0x2a3   : > { %v3125_v44 = vpop.f32.mrf.mxu1  ;;  %v13246_v33 = vpack.c.bf16 %v3640_v58, %v3637_v53  ;;  %v3007_v61 = vadd.f32 %v15905_v3, %v15904_v12  ;;  %v15907_v53 = vld [vmem:[#allocation15_spill] sm:$0xff] }
 0x2a4   : > { %v3643_v37 = vmax.f32 %v3589_v2, 0.0  ;;  %v3126_v51 = vadd.f32 %v3125_v44, %v3003_v55  ;;  %v13244_v25 = vpop.f32.mrf.mxu0  ;;  %v3591_v30 = vadd.f32 %v13068_v48, %v3521_v1  ;;  %v3522_v31 = vmul.f32 %v13074_v17, %v3122_v49 }
 0x2a5   : > { %v3127_v43 = vpop.f32.mrf.mxu1  ;;  %v3009_v58 = vadd.f32 %v15907_v53, %v15906_v60 }
 0x2a6   : > { %v3524_v52 = vmul.f32 %v13062_v36, %v3126_v51  ;;  %v3128_v13 = vadd.f32 %v3127_v43, %v3005_v35  ;;  %v9969_v28 = vpop.f32.mrf.mxu0  ;;  %v3592_v23 = vadd.f32 %v13081_v59, %v3522_v31  ;;  %v3645_v47 = vmax.f32 %v3591_v30, 0.0 }
 0x2a7   : > { %v3129_v62 = vpop.f32.mrf.mxu1  ;;  %v3013_v35 = vadd.f32 %v15909_v6, %v15908_v16 }
 0x2a8   : > { %v3594_v50 = vadd.f32 %v13068_v48, %v3524_v52  ;;  %v3525_v10 = vmul.f32 %v13074_v17, %v3128_v13  ;;  %v3130_v45 = vadd.f32 %v3129_v62, %v3007_v61  ;;  %v9970_v41 = vpop.f32.mrf.mxu0  ;;  %v3646_v55 = vmax.f32 %v3592_v23, 0.0  ;;  %v15913_v23 = vld [vmem:[#allocation18_spill] sm:$0xff] }
 0x2a9   : > { %v13260_v2 = vadd.f32 %v9970_v41, %v9969_v28  ;;  %v3131_v1 = vpop.f32.mrf.mxu1  ;;  %v15912_v28 = vld [vmem:[#allocation9_spill] sm:$0xff] }
 0x2aa   : > { %v3595_v49 = vadd.f32 %v13081_v59, %v3525_v10  ;;  %v3527_v44 = vmul.f32 %v13062_v36, %v3130_v45  ;;  %v3132_v51 = vadd.f32 %v3131_v1, %v3009_v58  ;;  %v13266_v31 = vpop.f32.mrf.mxu0  ;;  %v3648_v43 = vmax.f32 %v3594_v50, 0.0  ;;  %v15914_v58 = vld [vmem:[#allocation10_spill] sm:$0xff]  ;;  %v15915_v45 = vld [vmem:[#allocation20_spill] sm:$0xff] }
 0x2ab   : > { %15910 = vst [vmem:[#allocation11_spill] sm:$0xff] %v13266_v31  ;;  %v3135_v12 = vpop.f32.mrf.mxu1  ;;  %v3015_v62 = vadd.f32 %v15913_v23, %v15912_v28  ;;  %v13274_v53 = vpack.c.bf16 %v3646_v55, %v3643_v37  ;;  %v13276_v10 = vpack.c.bf16 %v3645_v47, %v3642_v21  ;;  %v3017_v50 = vadd.f32 %v15915_v45, %v15914_v58  ;;  %v15920_v45 = vld [vmem:[#allocation24_spill] sm:$0xff] }
 0x2ac   : > { %v3649_v3 = vmax.f32 %v3595_v49, 0.0  ;;  %v3597_v61 = vadd.f32 %v13068_v48, %v3527_v44  ;;  %v3528_v30 = vmul.f32 %v13074_v17, %v3132_v51  ;;  %v3136_v52 = vadd.f32 %v3135_v12, %v3013_v35  ;;  %v13270_v13 = vpop.f32.mrf.mxu0  ;;  %v15916_v49 = vld [vmem:[#allocation13_spill] sm:$0xff]  ;;  %v15917_v44 = vld [vmem:[#allocation22_spill] sm:$0xff] }
 0x2ad   : > { %15911 = vst [vmem:[#allocation5_spill] sm:$0xff] %v13270_v13  ;;  %v3137_v60 = vpop.f32.mrf.mxu1  ;;  %v3019_v51 = vadd.f32 %v15917_v44, %v15916_v49  ;;  %v15922_v49 = vld [vmem:[#allocation19_spill] sm:$0xff] }
 0x2ae   : > { %v3598_v41 = vadd.f32 %v13081_v59, %v3528_v30  ;;  %v3530_v1 = vmul.f32 %v13062_v36, %v3136_v52  ;;  %v9975_v16 = vpop.f32.mrf.mxu0  ;;  %v3138_v6 = vadd.f32 %v3137_v60, %v3015_v62  ;;  %v3651_v12 = vmax.f32 %v3597_v61, 0.0  ;;  %v15919_v30 = vld [vmem:[#allocation16_spill] sm:$0xff]  ;;  %v15923_v61 = vld [vmem:[#allocation27_spill] sm:$0xff] }
 0x2af   : > { %v3139_v35 = vpop.f32.mrf.mxu1  ;;  %v3023_v52 = vadd.f32 %v15920_v45, %v15919_v30  ;;  %v15925_v45 = vld [vmem:[#allocation23_spill] sm:$0xff] }
 0x2b0   : > { %v3652_v28 = vmax.f32 %v3598_v41, 0.0  ;;  %v3140_v23 = vadd.f32 %v3139_v35, %v3017_v50  ;;  %v9976_v37 = vpop.f32.mrf.mxu0  ;;  %v3600_v21 = vadd.f32 %v13068_v48, %v3530_v1  ;;  %v3531_v47 = vmul.f32 %v13074_v17, %v3138_v6 }
 0x2b1   : > { %v13286_v55 = vadd.f32 %v9976_v37, %v9975_v16  ;;  %v3141_v58 = vpop.f32.mrf.mxu1  ;;  %v3025_v41 = vadd.f32 %v15923_v61, %v15922_v49 }
 0x2b2   : > { %v3533_v62 = vmul.f32 %v13062_v36, %v3140_v23  ;;  %v3142_v60 = vadd.f32 %v3141_v58, %v3019_v51  ;;  %v13291_v13 = vpop.f32.mrf.mxu0  ;;  %v3601_v50 = vadd.f32 %v13081_v59, %v3531_v47  ;;  %v13300_v37 = vpack.c.bf16 %v3652_v28, %v3649_v3 }
 0x2b3   : > { %15918 = vst [vmem:[#allocation12_spill] sm:$0xff] %v13286_v55  ;;  %15921 = vst [vmem:[#allocation6_spill] sm:$0xff] %v13291_v13  ;;  %v3145_v35 = vpop.f32.mrf.mxu1  ;;  %v3654_v30 = vmax.f32 %v3600_v21, 0.0  ;;  %v13302_v58 = vpack.c.bf16 %v3651_v12, %v3648_v43  ;;  %v15926_v13 = vld [vmem:[#allocation30_spill] sm:$0xff]  ;;  %v15927_v43 = vld [vmem:[#allocation29_spill] sm:$0xff] }
 0x2b4   : > { %v3603_v1 = vadd.f32 %v13068_v48, %v3533_v62  ;;  %v3534_v16 = vmul.f32 %v13074_v17, %v3142_v60  ;;  %v3146_v6 = vadd.f32 %v3145_v35, %v3023_v52  ;;  %v13298_v44 = vpop.f32.mrf.mxu0  ;;  %v3655_v23 = vmax.f32 %v3601_v50, 0.0  ;;  %v15928_v12 = vld [vmem:[#allocation31_spill] sm:$0xff] }
 0x2b5   : > { %15924 = vst [vmem:[#allocation14_spill] sm:$0xff] %v13298_v44  ;;  %v3147_v51 = vpop.f32.mrf.mxu1  ;;  %v3027_v49 = vadd.f32 %v15926_v13, %v15925_v45  ;;  %v3029_v44 = vadd.f32 %v15928_v12, %v15927_v43  ;;  %v15929_v45 = vld [vmem:[#allocation21_spill] sm:$0xff] }
 0x2b6   : > { %v3604_v47 = vadd.f32 %v13081_v59, %v3534_v16  ;;  %v3536_v61 = vmul.f32 %v13062_v36, %v3146_v6  ;;  %v3148_v62 = vadd.f32 %v3147_v51, %v3025_v41  ;;  %v9981_v55 = vpop.f32.mrf.mxu0  ;;  %v3657_v60 = vmax.f32 %v3603_v1, 0.0 }
 0x2b7   : > { %v3149_v52 = vpop.f32.mrf.mxu1 }
 0x2b8   : > { %v3658_v35 = vmax.f32 %v3604_v47, 0.0  ;;  %v3606_v3 = vadd.f32 %v13068_v48, %v3536_v61  ;;  %v3537_v28 = vmul.f32 %v13074_v17, %v3148_v62  ;;  %v3150_v21 = vadd.f32 %v3149_v52, %v3027_v49  ;;  %v9982_v50 = vpop.f32.mrf.mxu0 }
 0x2b9   : > { %v13312_v31 = vadd.f32 %v9982_v50, %v9981_v55  ;;  %v3151_v13 = vpop.f32.mrf.mxu1  ;;  %v3483_v47 = vsub.s32 2, %v15929_v45  ;;  %v13323_v43 = vpack.c.bf16 %v3657_v60, %v3654_v30 }
 0x2ba   : > { %v3607_v16 = vadd.f32 %v13081_v59, %v3537_v28  ;;  %v3539_v41 = vmul.f32 %v13062_v36, %v3150_v21  ;;  %v13316_v6 = vpop.f32.mrf.mxu0  ;;  %v3152_v1 = vadd.f32 %v3151_v13, %v3029_v44  ;;  %v3660_v61 = vmax.f32 %v3606_v3, 0.0 }
 0x2bb   : > { %v10003_v51 = vpop.f32.mrf.mxu1  ;;  %v13321_v52 = vpack.c.bf16 %v3658_v35, %v3655_v23  ;;  %v15930_v23 = vld [vmem:[#allocation26_spill] sm:$0xff] }
 0x2bc   : > { %v3661_v62 = vmax.f32 %v3607_v16, 0.0  ;;  %v13319_v49 = vpop.f32.mrf.mxu0  ;;  %v3609_v55 = vadd.f32 %v13068_v48, %v3539_v41  ;;  %v3540_v28 = vmul.f32 %v13074_v17, %v3152_v1  ;;  %v13335_v48 = vrot.slane %v15930_v23, %v3483_v47 }
 0x2bd   : > { %v10004_v50 = vpop.f32.mrf.mxu1  ;;  %4743 = vmatprep.subr.bf16.mxu1 %v13321_v52  ;;  %v4235_v16 = vshll.u32 %v13323_v43, 16  ;;  %v9938_v41 = vadd.f32 %v13105_v4, %v13097_v27 }
 0x2be   : > { %v13327_v36 = vpack.c.bf16 %v3661_v62, %v3660_v61  ;;  %v10005_v21 = vadd.f32 %v10004_v50, %v10003_v51  ;;  %v3398_v44 = vpop.f32.mrf.mxu0  ;;  %v3610_v3 = vadd.f32 %v13081_v59, %v3540_v28  ;;  %4744 = vmatpush1.bf16.msra.mxu1 %v13323_v43  ;;  %v3663_v60 = vmax.f32 %v3609_v55, 0.0 }
 0x2bf   : > { %v10006_v12 = vpop.f32.mrf.mxu1  ;;  %4745 = vmatprep.subr.bf16.mxu1 %v13300_v37  ;;  %v4255_v59 = vshrl.u32 %v13323_v43, 16  ;;  %v13343_v51 = vrot.slane %v13054_v32, %v3483_v47  ;;  %v4500_v32 = vrot.slane %v4235_v16, 2 }
 0x2c0   : > { %3878 = vst [vmem:[#allocation2 + $0xc0] sm:$0xff] %v13327_v36  ;;  %v3294_v30 = vadd.f32 %v10005_v21, %v13089_v19  ;;  %v10281_v17 = vpop.f32.mrf.mxu0  ;;  %v3664_v35 = vmax.f32 %v3610_v3, 0.0 }
 0x2c1   : > { %v10007_v13 = vpop.f32.mrf.mxu1  ;;  %v4499_v27 = vrot.slane %v4255_v59, 1 }
 0x2c2   : > { %v3399_v1 = vadd.f32 %v3398_v44, %v3294_v30  ;;  %v10008_v19 = vadd.f32 %v10007_v13, %v10006_v12  ;;  %v3401_v45 = vpop.f32.mrf.mxu0  ;;  %v9818_v61 = vpack.c.bf16 %v3664_v35, %v3663_v60  ;;  %4746 = vmatpush1.bf16.msra.mxu1 %v13302_v58  ;;  %v9944_v13 = vadd.f32 %v13144_v56, %v13137_v15 }
 0x2c3   : > { %v10009_v62 = vpop.f32.mrf.mxu1  ;;  %4747 = vmatprep.subr.bf16.mxu1 %v13274_v53  ;;  %v13354_v30 = vor.u32 %v4500_v32, %v4499_v27 }
 0x2c4   : > { %v3490_v55 = vmul.f32 %v13335_v48, %v3399_v1  ;;  %v3297_v28 = vadd.f32 %v10008_v19, %v9938_v41  ;;  %v10282_v50 = vpop.f32.mrf.mxu0  ;;  %3880 = vst [vmem:[#allocation2 + $0xcc] sm:$0xff] %v9818_v61 }
 0x2c5   : > { %v10010_v21 = vpop.f32.mrf.mxu1 }
 0x2c6   : > { %v3560_v4 = vadd.f32 %v13343_v51, %v3490_v55  ;;  %v3402_v47 = vadd.f32 %v3401_v45, %v3297_v28  ;;  %v10011_v44 = vadd.f32 %v10010_v21, %v10009_v62  ;;  %v3406_v3 = vpop.f32.mrf.mxu0  ;;  %4748 = vmatpush1.bf16.msra.mxu1 %v13276_v10 }
 0x2c7   : > { %v10012_v12 = vpop.f32.mrf.mxu1  ;;  %4749 = vmatprep.subr.bf16.mxu1 %v13246_v33 }
 0x2c8   : > { %v3614_v23 = vmax.f32 %v3560_v4, 0.0  ;;  %v3493_v17 = vmul.f32 %v13335_v48, %v3402_v47  ;;  %v3302_v60 = vadd.f32 %v10011_v44, %v13125_v57  ;;  %v10285_v35 = vpop.f32.mrf.mxu0 }
 0x2c9   : > { %v10013_v41 = vpop.f32.mrf.mxu1 }
 0x2ca   : > { %v9785_v1 = vpack.c.bf16 %v3614_v23, %v3614_v23  ;;  %v3563_v19 = vadd.f32 %v13343_v51, %v3493_v17  ;;  %v3407_v45 = vadd.f32 %v3406_v3, %v3302_v60  ;;  %v10014_v61 = vadd.f32 %v10013_v41, %v10012_v12  ;;  %v3409_v62 = vpop.f32.mrf.mxu0  ;;  %4750 = vmatpush1.bf16.msra.mxu1 %v13250_v0 }
 0x2cb   : > { %v10015_v55 = vpop.f32.mrf.mxu1  ;;  %4751 = vmatprep.subr.bf16.mxu1 %v13222_v8  ;;  %v3918_v27 = vld [vmem:[#allocation2 + $0xcc] sm:$0x77] }
 0x2cc   : > { %3847 = vst [vmem:[#allocation2 + $0x8] sm:$0xf] %v9785_v1  ;;  %v3617_v28 = vmax.f32 %v3563_v19, 0.0  ;;  %v3496_v57 = vmul.f32 %v13335_v48, %v3407_v45  ;;  %v3305_v50 = vadd.f32 %v10014_v61, %v9944_v13  ;;  %v10286_v21 = vpop.f32.mrf.mxu0  ;;  %v13366_v56 = vcombine.low %v13327_v36, %v3918_v27 }
 0x2cd   : > { %v10016_v15 = vpop.f32.mrf.mxu1  ;;  %v13369_v32 = vcombine.high %v13327_v36, %v3918_v27  ;;  %v9950_v1 = vadd.f32 %v13166_v9, %v13162_v26  ;;  %v13383_v21 = vld [vmem:[#allocation2 + $0xcc] sm:$0xff] }
 0x2ce   : > { %v9787_v4 = vpack.c.bf16 %v3617_v28, %v3617_v28  ;;  %v3566_v47 = vadd.f32 %v13343_v51, %v3496_v57  ;;  %v3410_v44 = vadd.f32 %v3409_v62, %v3305_v50  ;;  %v10017_v3 = vadd.f32 %v10016_v15, %v10015_v55  ;;  %v3414_v12 = vpop.f32.mrf.mxu0  ;;  %4752 = vmatpush1.bf16.msra.mxu1 %v13224_v5 }
 0x2cf   : > { %v10018_v23 = vpop.f32.mrf.mxu1  ;;  %v4259_v17 = vshll.u32 %v13366_v56, 16  ;;  %4753 = vmatprep.subr.bf16.mxu1 %v13196_v11  ;;  %v4279_v61 = vshrl.u32 %v13366_v56, 16 }
 0x2d0   : > { %3849 = vst [vmem:[#allocation2 + $0x14] sm:$0xf] %v9787_v4  ;;  %v3620_v60 = vmax.f32 %v3566_v47, 0.0  ;;  %v3499_v35 = vmul.f32 %v13335_v48, %v3410_v44  ;;  %v3310_v13 = vadd.f32 %v10017_v3, %v13156_v42  ;;  %v10289_v41 = vpop.f32.mrf.mxu0  ;;  %v15931_v44 = vmax.f32 %v13094_v29, 0.0 }
 0x2d1   : > { %v10019_v19 = vpop.f32.mrf.mxu1  ;;  %v13379_v45 = vrot.slane %v4259_v17, 1  ;;  %v15932_v3 = vmax.f32 %v13116_v7, 0.0  ;;  %v15934_v29 = vmax.f32 %v13086_v40, 0.0  ;;  %v15935_v7 = vld [vmem:[#allocation32_spill] sm:$0xff]  ;;  %v13418_v40 = vrot.slane %v4235_v16, 1 }
 0x2d2   : > { %v9789_v62 = vpack.c.bf16 %v3620_v60, %v3620_v60  ;;  %v3569_v55 = vadd.f32 %v13343_v51, %v3499_v35  ;;  %v3415_v28 = vadd.f32 %v3414_v12, %v3310_v13  ;;  %v10020_v57 = vadd.f32 %v10019_v19, %v10018_v23  ;;  %v3417_v50 = vpop.f32.mrf.mxu0  ;;  %4754 = vmatpush1.bf16.msra.mxu1 %v13198_v54 }
 0x2d3   : > { %v10021_v42 = vpop.f32.mrf.mxu1  ;;  %v13387_v27 = vor.u32 %v4279_v61, %v13379_v45  ;;  %4755 = vmatprep.subr.bf16.mxu1 %v13168_v22  ;;  %v13395_v12 = vpack.c.bf16 %v15932_v3, %v15931_v44  ;;  %v13399_v23 = vcombine.low %v13327_v36, %v13383_v21  ;;  %v9956_v19 = vadd.f32 %v13192_v38, %v13188_v39 }
 0x2d4   : > { %3851 = vst [vmem:[#allocation2 + $0x20] sm:$0xf] %v9789_v62  ;;  %v3623_v26 = vmax.f32 %v3569_v55, 0.0  ;;  %v3502_v9 = vmul.f32 %v13335_v48, %v3415_v28  ;;  %v3313_v15 = vadd.f32 %v10020_v57, %v9950_v1  ;;  %v10290_v4 = vpop.f32.mrf.mxu0  ;;  %v3916_v1 = vld [vmem:[#allocation2 + $0xcc] sm:$0x33]  ;;  %v15936_v62 = vmax.f32 %v15935_v7, 0.0 }
 0x2d5   : > { %v10022_v47 = vpop.f32.mrf.mxu1  ;;  %15933 = vst [vmem:[#allocation7_spill] sm:$0xff] %v13399_v23  ;;  %v4512_v28 = vshrl.u32 %v13399_v23, 16  ;;  %v4515_v57 = vshll.u32 %v13399_v23, 16 }
 0x2d6   : > { %v9791_v17 = vpack.c.bf16 %v3623_v26, %v3623_v26  ;;  %v3572_v60 = vadd.f32 %v13343_v51, %v3502_v9  ;;  %v3418_v35 = vadd.f32 %v3417_v50, %v3313_v15  ;;  %v10023_v13 = vadd.f32 %v10022_v47, %v10021_v42  ;;  %v3422_v41 = vpop.f32.mrf.mxu0  ;;  %4756 = vmatpush1.bf16.msra.mxu1 %v13172_v63 }
 0x2d7   : > { %v10024_v61 = vpop.f32.mrf.mxu1  ;;  %v13409_v55 = vpack.c.bf16 %v15936_v62, %v15934_v29  ;;  %4757 = vmatprep.subr.bf16.mxu1 %v13395_v12  ;;  %v9359_v9 = vcombine.high %v13327_v36, %v3916_v1  ;;  %v9358_v15 = vcombine.low %v13327_v36, %v3916_v1  ;;  %v4514_v4 = vrot.slane %v4512_v28, 1 }
 0x2d8   : > { %3853 = vst [vmem:[#allocation2 + $0x2c] sm:$0xf] %v9791_v17  ;;  %v3626_v50 = vmax.f32 %v3572_v60, 0.0  ;;  %v3505_v42 = vmul.f32 %v13335_v48, %v3418_v35  ;;  %v3318_v26 = vadd.f32 %v10023_v13, %v13182_v20  ;;  %v10293_v39 = vpop.f32.mrf.mxu0  ;;  %v4517_v47 = vrot.slane %v4515_v57, 2 }
 0x2d9   : > { %v10025_v38 = vpop.f32.mrf.mxu1  ;;  %v4699_v1 = vsel %vm964_vm1, %v9358_v15, 0 }
 0x2da   : > { %v9793_v44 = vpack.c.bf16 %v3626_v50, %v3626_v50  ;;  %v3575_v3 = vadd.f32 %v13343_v51, %v3505_v42  ;;  %v3423_v17 = vadd.f32 %v3422_v41, %v3318_v26  ;;  %v10026_v60 = vadd.f32 %v10025_v38, %v10024_v61  ;;  %v3425_v20 = vpop.f32.mrf.mxu0  ;;  %4758 = vmatpush1.bf16.msra.mxu1 %v13409_v55  ;;  %v13441_v26 = vld [vmem:[%s15760_s4] ss:$8 sps:$4 sm:$0xff]   ;;  %v13448_v38 = vld [vmem:[%s15760_s4 + $0x14] ss:$8 sps:$4 sm:$0xff]  }
 0x2db   : > { %v10027_v35 = vpop.f32.mrf.mxu1  ;;  %v13424_v13 = vor.u32 %v4517_v47, %v4514_v4  ;;  %9381 = vmatprep.subr.msk.bf16.mxu1 %vm964_vm1, %v9359_v9  ;;  %v4257_v41 = vor.u32 %v4255_v59, %v13418_v40 }
 0x2dc   : > { %3855 = vst [vmem:[#allocation2 + $0x38] sm:$0xf] %v9793_v44  ;;  %v3629_v16 = vmax.f32 %v3575_v3, 0.0  ;;  %v3508_v29 = vmul.f32 %v13335_v48, %v3423_v17  ;;  %v3321_v7 = vadd.f32 %v10026_v60, %v9956_v19  ;;  %v10294_v62 = vpop.f32.mrf.mxu0  ;;  %v9962_v44 = vadd.f32 %v13220_v14, %v13213_v18 }
 0x2dd   : > { %v10028_v36 = vpop.f32.mrf.mxu1  ;;  %v13435_v61 = vsel %vm852_vm2, %v13354_v30, %v13424_v13  ;;  %v4262_v59 = vsel %vm608_vm0, %v4257_v41, %v13379_v45 }
 0x2de   : > { %v9795_v28 = vpack.c.bf16 %v3629_v16, %v3629_v16  ;;  %v3578_v57 = vadd.f32 %v13343_v51, %v3508_v29  ;;  %v3426_v50 = vadd.f32 %v3425_v20, %v3321_v7  ;;  %v10029_v19 = vadd.f32 %v10028_v36, %v10027_v35  ;;  %v3430_v42 = vpop.f32.mrf.mxu0  ;;  %4774 = vmatpush2.bf16.msra.mxu1 %v4699_v1 }
 0x2df   : > { %v10030_v39 = vpop.f32.mrf.mxu1  ;;  %4814 = vmatprep.subr.bf16.mxu1 %v4262_v59 }
 0x2e0   : > { %3857 = vst [vmem:[#allocation2 + $0x44] sm:$0xf] %v9795_v28  ;;  %v3632_v9 = vmax.f32 %v3578_v57, 0.0  ;;  %v3511_v15 = vmul.f32 %v13335_v48, %v3426_v50  ;;  %v3326_v4 = vadd.f32 %v10029_v19, %v13208_v46  ;;  %v10297_v47 = vpop.f32.mrf.mxu0  ;;  %v13463_v57 = vld [vmem:[%s15760_s4 + $0x10] ss:$8 sps:$4 sm:$0xff]  }
 0x2e1   : > { %v10031_v3 = vpop.f32.mrf.mxu1  ;;  %4776 = vmatmul.mubr.bf16.vlgmr.msra.gmra.mxu1 %v13441_v26  ;;  %v13468_v19 = vld [vmem:[%s15760_s4 + $0x24] ss:$8 sps:$4 sm:$0xff]  }
 0x2e2   : > { %v9797_v17 = vpack.c.bf16 %v3632_v9, %v3632_v9  ;;  %v3581_v45 = vadd.f32 %v13343_v51, %v3511_v15  ;;  %v3431_v60 = vadd.f32 %v3430_v42, %v3326_v4  ;;  %v10032_v20 = vadd.f32 %v10031_v3, %v10030_v39  ;;  %v3433_v35 = vpop.f32.mrf.mxu0  ;;  %9383 = vmatprep.mubr.msk.bf16.mxu1 %vm4685_vm6, %v13448_v38 }
 0x2e3   : > { %v10033_v16 = vpop.f32.mrf.mxu1  ;;  %v9968_v15 = vadd.f32 %v13244_v25, %v13240_v24  ;;  %v4651_v24 = vld [vmem:[%s15760_s4 + $0x30] sm:$0xff] }
 0x2e4   : > { %3859 = vst [vmem:[#allocation2 + $0x50] sm:$0xf] %v9797_v17  ;;  %v3635_v46 = vmax.f32 %v3581_v45, 0.0  ;;  %v3514_v29 = vmul.f32 %v13335_v48, %v3431_v60  ;;  %v3329_v7 = vadd.f32 %v10032_v20, %v9962_v44  ;;  %v10298_v62 = vpop.f32.mrf.mxu0 }
 0x2e5   : > { %v10034_v18 = vpop.f32.mrf.mxu1 }
 0x2e6   : > { %v9799_v14 = vpack.c.bf16 %v3635_v46, %v3635_v46  ;;  %v3584_v36 = vadd.f32 %v13343_v51, %v3514_v29  ;;  %v3434_v1 = vadd.f32 %v3433_v35, %v3329_v7  ;;  %v10035_v41 = vadd.f32 %v10034_v18, %v10033_v16  ;;  %v3438_v28 = vpop.f32.mrf.mxu0 }
 0x2e7   : > { %v10036_v50 = vpop.f32.mrf.mxu1 }
 0x2e8   : > { %3861 = vst [vmem:[#allocation2 + $0x5c] sm:$0xf] %v9799_v14  ;;  %v3638_v42 = vmax.f32 %v3584_v36, 0.0  ;;  %v3517_v39 = vmul.f32 %v13335_v48, %v3434_v1  ;;  %v3334_v59 = vadd.f32 %v10035_v41, %v13234_v34  ;;  %v10301_v9 = vpop.f32.mrf.mxu0  ;;  %v13486_v14 = vld [vmem:[%s15760_s4 + $0x20] ss:$8 sps:$4 sm:$0xff]   ;;  %v13488_v1 = vcombine.high %v4651_v24, %v4651_v24 }
 0x2e9   : > { %v10037_v4 = vpop.f32.mrf.mxu1  ;;  %4786 = vmatmul.mubr.bf16.gmra.mxu1 %v13463_v57 }
 0x2ea   : > { %v9801_v47 = vpack.c.bf16 %v3638_v42, %v3638_v42  ;;  %v3587_v44 = vadd.f32 %v13343_v51, %v3517_v39  ;;  %v3439_v3 = vadd.f32 %v3438_v28, %v3334_v59  ;;  %v10038_v17 = vadd.f32 %v10037_v4, %v10036_v50  ;;  %v3441_v45 = vpop.f32.mrf.mxu0  ;;  %9384 = vmatprep.mubr.msk.bf16.mxu1 %vm4685_vm6, %v13468_v19  ;;  %v15937_v39 = vld [vmem:[#allocation11_spill] sm:$0xff]  ;;  %v15938_v59 = vld [vmem:[#allocation5_spill] sm:$0xff] }
 0x2eb   : > { %v10039_v60 = vpop.f32.mrf.mxu1  ;;  %v9974_v9 = vadd.f32 %v15938_v59, %v15937_v39  ;;  %v15940_v39 = vld [vmem:[#allocation6_spill] sm:$0xff] }
 0x2ec   : > { %3863 = vst [vmem:[#allocation2 + $0x68] sm:$0xf] %v9801_v47  ;;  %v3641_v20 = vmax.f32 %v3587_v44, 0.0  ;;  %v3520_v34 = vmul.f32 %v13335_v48, %v3439_v3  ;;  %v3337_v35 = vadd.f32 %v10038_v17, %v9968_v15  ;;  %v10302_v16 = vpop.f32.mrf.mxu0  ;;  %v15941_v59 = vld [vmem:[#allocation14_spill] sm:$0xff] }
 0x2ed   : > { %v10040_v25 = vpop.f32.mrf.mxu1  ;;  %v13499_v16 = vcombine.low %v4651_v24, %v4651_v24 }
 0x2ee   : > { %v9803_v46 = vpack.c.bf16 %v3641_v20, %v3641_v20  ;;  %v3590_v29 = vadd.f32 %v13343_v51, %v3520_v34  ;;  %v3442_v7 = vadd.f32 %v3441_v45, %v3337_v35  ;;  %v10041_v62 = vadd.f32 %v10040_v25, %v10039_v60  ;;  %v3446_v18 = vpop.f32.mrf.mxu0 }
 0x2ef   : > { %v10042_v36 = vpop.f32.mrf.mxu1 }
 0x2f0   : > { %3865 = vst [vmem:[#allocation2 + $0x74] sm:$0xf] %v9803_v46  ;;  %v3644_v41 = vmax.f32 %v3590_v29, 0.0  ;;  %v3523_v28 = vmul.f32 %v13335_v48, %v3442_v7  ;;  %v3342_v50 = vadd.f32 %v10041_v62, %v13260_v2  ;;  %v10305_v42 = vpop.f32.mrf.mxu0 }
 0x2f1   : > { %v10043_v15 = vpop.f32.mrf.mxu1  ;;  %4796 = vmatmul.mubr.bf16.gmra.mxu1 %v13486_v14 }
 0x2f2   : > { %v9805_v4 = vpack.c.bf16 %v3644_v41, %v3644_v41  ;;  %v3593_v47 = vadd.f32 %v13343_v51, %v3523_v28  ;;  %v3447_v44 = vadd.f32 %v3446_v18, %v3342_v50  ;;  %v10044_v3 = vadd.f32 %v10043_v15, %v10042_v36  ;;  %v3449_v17 = vpop.f32.mrf.mxu0  ;;  %9385 = vmatprep.mubr.msk.bf16.mxu1 %vm4685_vm6, %v13488_v1  ;;  %v15939_v28 = vld [vmem:[#allocation12_spill] sm:$0xff] }
 0x2f3   : > { %v10045_v45 = vpop.f32.mrf.mxu1 }
 0x2f4   : > { %3867 = vst [vmem:[#allocation2 + $0x80] sm:$0xf] %v9805_v4  ;;  %v3647_v60 = vmax.f32 %v3593_v47, 0.0  ;;  %v3526_v2 = vmul.f32 %v13335_v48, %v3447_v44  ;;  %v3345_v20 = vadd.f32 %v10044_v3, %v9974_v9  ;;  %v10306_v34 = vpop.f32.mrf.mxu0  ;;  %v9980_v9 = vadd.f32 %v15941_v59, %v15940_v39 }
 0x2f5   : > { %v10046_v35 = vpop.f32.mrf.mxu1 }
 0x2f6   : > { %v9807_v25 = vpack.c.bf16 %v3647_v60, %v3647_v60  ;;  %v3596_v46 = vadd.f32 %v13343_v51, %v3526_v2  ;;  %v3450_v29 = vadd.f32 %v3449_v17, %v3345_v20  ;;  %v10047_v7 = vadd.f32 %v10046_v35, %v10045_v45  ;;  %v3454_v62 = vpop.f32.mrf.mxu0  ;;  %v13511_v45 = vld [vmem:[%s15760_s4 + $0x4] ss:$8 sps:$4 sm:$0xff]  }
 0x2f7   : > { %v10048_v18 = vpop.f32.mrf.mxu1 }
 0x2f8   : > { %3869 = vst [vmem:[#allocation2 + $0x8c] sm:$0xf] %v9807_v25  ;;  %v3650_v36 = vmax.f32 %v3596_v46, 0.0  ;;  %v3529_v41 = vmul.f32 %v13335_v48, %v3450_v29  ;;  %v3350_v50 = vadd.f32 %v10047_v7, %v15939_v28  ;;  %v10309_v42 = vpop.f32.mrf.mxu0 }
 0x2f9   : > { %v10049_v15 = vpop.f32.mrf.mxu1  ;;  %4806 = vmatmul.mubr.bf16.gmra.mxu1 %v13499_v16  ;;  %v9986_v42 = vadd.f32 %v13319_v49, %v13316_v6 }
 0x2fa   : > { %v9809_v24 = vpack.c.bf16 %v3650_v36, %v3650_v36  ;;  %v3599_v4 = vadd.f32 %v13343_v51, %v3529_v41  ;;  %v3455_v47 = vadd.f32 %v3454_v62, %v3350_v50  ;;  %v10050_v44 = vadd.f32 %v10049_v15, %v10048_v18  ;;  %v3457_v3 = vpop.f32.mrf.mxu0  ;;  %9387 = vmatprep.mubr.msk.bf16.mxu1 %vm4685_vm6, %v13511_v45 }
 0x2fb   : > { %v10051_v17 = vpop.f32.mrf.mxu1 }
 0x2fc   : > { %3871 = vst [vmem:[#allocation2 + $0x98] sm:$0xf] %v9809_v24  ;;  %v3653_v60 = vmax.f32 %v3599_v4, 0.0  ;;  %v3532_v2 = vmul.f32 %v13335_v48, %v3455_v47  ;;  %v3353_v20 = vadd.f32 %v10050_v44, %v9980_v9  ;;  %v10310_v34 = vpop.f32.mrf.mxu0 }
 0x2fd   : > { %v10052_v35 = vpop.f32.mrf.mxu1 }
 0x2fe   : > { %v9811_v25 = vpack.c.bf16 %v3653_v60, %v3653_v60  ;;  %v3602_v46 = vadd.f32 %v13343_v51, %v3532_v2  ;;  %v3458_v29 = vadd.f32 %v3457_v3, %v3353_v20  ;;  %v10053_v7 = vadd.f32 %v10052_v35, %v10051_v17  ;;  %v3462_v62 = vpop.f32.mrf.mxu0 }
 0x2ff   : > { %v10054_v18 = vpop.f32.mrf.mxu1  ;;  %v15821_v20 = vshll.u32 %v13302_v58, 16 }
 0x300   : > { %3873 = vst [vmem:[#allocation2 + $0xa4] sm:$0xf] %v9811_v25  ;;  %v3656_v36 = vmax.f32 %v3602_v46, 0.0  ;;  %v3535_v41 = vmul.f32 %v13335_v48, %v3458_v29  ;;  %v3358_v28 = vadd.f32 %v10053_v7, %v13312_v31  ;;  %v10313_v50 = vpop.f32.mrf.mxu0  ;;  %v15814_v46 = vshll.u32 %v13276_v10, 16 }
 0x301   : > { %v10055_v39 = vpop.f32.mrf.mxu1  ;;  %v4213_v25 = vrot.slane %v15821_v20, 1  ;;  %v15824_v7 = vshrl.u32 %v13302_v58, 16 }
 0x302   : > { %v9813_v59 = vpack.c.bf16 %v3656_v36, %v3656_v36  ;;  %v3605_v9 = vadd.f32 %v13343_v51, %v3535_v41  ;;  %v3463_v15 = vadd.f32 %v3462_v62, %v3358_v28  ;;  %v10056_v24 = vadd.f32 %v10055_v39, %v10054_v18  ;;  %v3465_v4 = vpop.f32.mrf.mxu0 }
 0x303   : > { %v4233_v36 = vor.u32 %v15824_v7, %v4213_v25  ;;  %v15817_v28 = vshrl.u32 %v13276_v10, 16 }
 0x304   : > { %3875 = vst [vmem:[#allocation2 + $0xb0] sm:$0xf] %v9813_v59  ;;  %v3659_v47 = vmax.f32 %v3605_v9, 0.0  ;;  %v3538_v44 = vmul.f32 %v13335_v48, %v3463_v15  ;;  %v3361_v3 = vadd.f32 %v10056_v24, %v9986_v42  ;;  %v10314_v17 = vpop.f32.mrf.mxu0  ;;  %v15809_v59 = vshll.u32 %v13224_v5, 16 }
 0x305   : > { %v4238_v41 = vsel %vm608_vm0, %v4233_v36, %v13418_v40  ;;  %v15807_v15 = vshll.u32 %v13172_v63, 16  ;;  %v4078_v24 = vshll.u32 %v13409_v55, 16  ;;  %v15815_v17 = vshll.u32 %v13198_v54, 16 }
 0x306   : > { %v9815_v60 = vpack.c.bf16 %v3659_v47, %v3659_v47  ;;  %v3608_v31 = vadd.f32 %v13343_v51, %v3538_v44  ;;  %v3466_v2 = vadd.f32 %v3465_v4, %v3361_v3  ;;  %v15811_v4 = vshrl.u32 %v13250_v0, 16  ;;  %v13556_v44 = vld [vmem:[#allocation2 + $0x80] ss:$12 sps:$4 sm:$0xff]  }
 0x307   : > { %v13542_v50 = vld [vmem:[#allocation2 + $0x98] ss:$12 sps:$4 sm:$0xff]   ;;  %v15808_v47 = vshll.u32 %v13321_v52, 16  ;;  %v15813_v36 = vshrl.u32 %v13224_v5, 16  ;;  %v15827_v20 = vshrl.u32 %v13556_v44, 16 }
 0x308   : > { %3877 = vst [vmem:[#allocation2 + $0xbc] sm:$0xf] %v9815_v60  ;;  %v3662_v6 = vmax.f32 %v3608_v31, 0.0  ;;  %v3541_v49 = vmul.f32 %v13335_v48, %v3466_v2  ;;  %v4189_v48 = vrot.slane %v15814_v46, 1  ;;  %v15812_v3 = vshll.u32 %v13542_v50, 16 }
 0x309   : > { %v4076_v60 = vshrl.u32 %v13409_v55, 16  ;;  %v4141_v2 = vrot.slane %v15809_v59, 1  ;;  %v4085_v55 = vrot.slane %v15807_v15, 1  ;;  %v15822_v15 = vshll.u32 %v13556_v44, 16 }
 0x30a   : > { %v9817_v34 = vpack.c.bf16 %v3662_v6, %v3662_v6  ;;  %v3611_v35 = vadd.f32 %v13343_v51, %v3541_v49  ;;  %v15810_v51 = vshll.u32 %v13250_v0, 16  ;;  %v4209_v42 = vor.u32 %v15817_v28, %v4189_v48  ;;  %v13612_v28 = vld [vmem:[#allocation2 + $0x50] ss:$12 sps:$4 sm:$0xff]  }
 0x30c   : > { %3879 = vst [vmem:[#allocation2 + $0xc8] sm:$0xf] %v9817_v34  ;;  %v3665_v29 = vmax.f32 %v3611_v35, 0.0  ;;  %v4165_v39 = vrot.slane %v15810_v51, 1  ;;  %v4214_v40 = vsel %vm608_vm0, %v4209_v42, %v4213_v25  ;;  %v4267_v34 = vshll.u32 %v13369_v32, 16 }
 0x30d   : > { %v15818_v42 = vshll.u32 %v13300_v37, 16 }
 0x30e   : > { %v9819_v62 = vpack.c.bf16 %v3665_v29, %v3665_v29  ;;  %v4185_v31 = vor.u32 %v15811_v4, %v4165_v39  ;;  %v4080_v29 = vrot.slane %v4078_v24, 1  ;;  %v4229_v24 = vrot.slane %v15812_v3, 1 }
 0x30f   : > { %v13531_v18 = vld [vmem:[#allocation2 + $0xb0] ss:$12 sps:$4 sm:$0xff]   ;;  %v15820_v4 = vshrl.u32 %v13542_v50, 16  ;;  %v15823_v3 = vshrl.u32 %v13198_v54, 16  ;;  %v4221_v46 = vrot.slane %v15818_v42, 1 }
 0x310   : > { %3881 = vst [vmem:[#allocation2 + $0xd4] sm:$0xf] %v9819_v62  ;;  %4815 = vmatpush1.bf16.msra.mxu1 %v13531_v18  ;;  %v15806_v9 = vshll.u32 %v13531_v18, 16  ;;  %v4190_v62 = vsel %vm608_vm0, %v4185_v31, %v4189_v48  ;;  %v4161_v48 = vor.u32 %v15813_v36, %v4141_v2  ;;  %v15819_v31 = vshrl.u32 %v13321_v52, 16 }
 0x311   : > { %4816 = vmatprep.subr.bf16.mxu1 %v4238_v41  ;;  %v4245_v41 = vrot.slane %v15808_v47, 1  ;;  %v13591_v47 = vrot.slane %v4267_v34, 1  ;;  %v4081_v7 = vor.u32 %v4080_v29, %v4076_v60  ;;  %v15834_v29 = vshll.u32 %v13222_v8, 16 }
 0x312   : > { %v4253_v25 = vrot.slane %v15806_v9, 1  ;;  %v4166_v36 = vsel %vm608_vm0, %v4161_v48, %v4165_v39  ;;  %v4205_v39 = vrot.slane %v15822_v15, 1  ;;  %v15830_v15 = vshrl.u32 %v13172_v63, 16 }
 0x313   : > { %v13565_v6 = vld [vmem:[#allocation2 + $0xc8] sm:$0xf]  ;;  %v4265_v34 = vor.u32 %v15819_v31, %v4245_v41  ;;  %v15825_v31 = vshrl.u32 %v13300_v37, 16 }
 0x314   : > { %4817 = vmatpush1.bf16.msra.mxu1 %v13542_v50 }
 0x315   : > { %4818 = vmatprep.subr.bf16.mxu1 %v4214_v40  ;;  %v13581_v40 = vld [vmem:[#allocation2 + $0x68] ss:$12 sps:$4 sm:$0xff]   ;;  %v4270_v42 = vsel %vm608_vm0, %v4265_v34, %v13591_v47  ;;  %v4241_v34 = vor.u32 %v15825_v31, %v4221_v46  ;;  %v15831_v31 = vshrl.u32 %v13274_v53, 16 }
 0x316   : > { %v15828_v48 = vshll.u32 %v13581_v40, 16 }
 0x317   : > { %v3919_v49 = vld [vmem:[#allocation2 + $0xd4] sm:$0x7] }
 0x318   : > { %v13569_v35 = vcombine.low %v13565_v6, %v3919_v49  ;;  %4819 = vmatpush1.bf16.msra.mxu1 %v13556_v44  ;;  %v15816_v49 = vshrl.u32 %v13531_v18, 16 }
 0x319   : > { %4820 = vmatprep.subr.bf16.mxu1 %v4190_v62  ;;  %v4117_v62 = vrot.slane %v15815_v17, 1  ;;  %v15826_v17 = vshll.u32 %v13274_v53, 16 }
 0x31a   : > { %v4275_v9 = vshll.u32 %v13569_v35, 16  ;;  %v4273_v59 = vor.u32 %v15816_v49, %v4253_v25  ;;  %v4249_v49 = vor.u32 %v15820_v4, %v4229_v24 }
 0x31c   : > { %v13597_v51 = vrot.slane %v4275_v9, 1  ;;  %4821 = vmatpush1.bf16.msra.mxu1 %v13581_v40  ;;  %v4254_v4 = vsel %vm608_vm0, %v4249_v49, %v4253_v25  ;;  %v4225_v25 = vor.u32 %v15827_v20, %v4205_v39  ;;  %v4181_v49 = vrot.slane %v15828_v48, 1 }
 0x31d   : > { %4822 = vmatprep.subr.bf16.mxu1 %v4166_v36  ;;  %v4137_v36 = vor.u32 %v15823_v3, %v4117_v62  ;;  %v4197_v3 = vrot.slane %v15826_v17, 1  ;;  %v15832_v17 = vshrl.u32 %v13581_v40, 16  ;;  %v4086_v20 = vsel %vm608_vm0, %v4081_v7, %v4085_v55 }
 0x31e   : > { %v4278_v9 = vsel %vm608_vm0, %v4273_v59, %v13597_v51  ;;  %v15829_v59 = vshll.u32 %v13246_v33, 16  ;;  %v15835_v48 = vrot.slane %v13531_v18, 2 }
 0x31f   : > { %4885 = vmatprep.subr.bf16.mxu0 %v4278_v9  ;;  %v4142_v9 = vsel %vm608_vm0, %v4137_v36, %v4141_v2  ;;  %v15833_v2 = vshll.u32 %v13612_v28, 16  ;;  %v4246_v36 = vsel %vm608_vm0, %v4241_v34, %v4245_v41  ;;  %v4217_v34 = vor.u32 %v15831_v31, %v4197_v3 }
 0x320   : > { %4886 = vmatpush1.bf16.msra.mxu0 %v4270_v42  ;;  %4823 = vmatpush1.bf16.msra.mxu1 %v13612_v28  ;;  %v13634_v42 = vld [vmem:[#allocation2 + $0x38] ss:$12 sps:$4 sm:$0xff]   ;;  %v4173_v60 = vrot.slane %v15829_v59, 1  ;;  %v15836_v59 = vshrl.u32 %v13246_v33, 16  ;;  %v4201_v7 = vor.u32 %v15832_v17, %v4181_v49  ;;  %v4601_v31 = vrot.slane %v13556_v44, 2 }
 0x321   : > { %4887 = vmatprep.subr.bf16.mxu0 %v4254_v4  ;;  %4824 = vmatprep.subr.bf16.mxu1 %v4142_v9  ;;  %v4113_v4 = vor.u32 %v15830_v15, %v4085_v55  ;;  %v4230_v9 = vsel %vm608_vm0, %v4225_v25, %v4229_v24  ;;  %v13655_v15 = vld [vmem:[#allocation2 + $0x14] sm:$0xf]  ;;  %v13660_v55 = vld [vmem:[#allocation2 + $0x20] ss:$12 sps:$4 sm:$0xff]   ;;  %v4157_v25 = vrot.slane %v15833_v2, 1  ;;  %v15839_v24 = vshrl.u32 %v13612_v28, 16 }
 0x322   : > { %v4206_v17 = vsel %vm608_vm0, %v4201_v7, %v4205_v39  ;;  %v3883_v2 = vld [vmem:[#allocation2 + $0x8] sm:$0xf]  ;;  %v4589_v39 = vrot.slane %v13612_v28, 2  ;;  %v15840_v7 = vrot.slane %v13634_v42, 2 }
 0x323   : > { %v4118_v41 = vsel %vm608_vm0, %v4113_v4, %v4117_v62  ;;  %v4607_v4 = vrot.slane %v13542_v50, 2 }
 0x324   : > { %4888 = vmatpush1.bf16.msra.mxu0 %v4246_v36  ;;  %4825 = vmatpush1.bf16.msra.mxu1 %v13634_v42  ;;  %v4222_v36 = vsel %vm608_vm0, %v4217_v34, %v4221_v46  ;;  %v4595_v46 = vrot.slane %v13581_v40, 2  ;;  %v9336_v34 = vcombine.low %v3883_v2, %v13655_v15 }
 0x325   : > { %4889 = vmatprep.subr.bf16.mxu0 %v4230_v9  ;;  %4826 = vmatprep.subr.bf16.mxu1 %v4118_v41  ;;  %v4193_v9 = vor.u32 %v15836_v59, %v4173_v60  ;;  %v4149_v41 = vrot.slane %v15834_v29, 1  ;;  %v13677_v62 = vsel %vm964_vm1, %v4607_v4, %v15835_v48  ;;  %v3917_v29 = vld [vmem:[#allocation2 + $0xd4] sm:$0x3]  ;;  %v4177_v48 = vor.u32 %v15839_v24, %v4157_v25 }
 0x326   : > { %15942 = vst [vmem:[#allocation15_spill] sm:$0xff] %v13677_v62  ;;  %v15944_v59 = vshll.u32 %v13634_v42, 16  ;;  %v13693_v23 = vsel %vm964_vm1, %v4595_v46, %v4601_v31  ;;  %v15842_v24 = vshrl.u32 %v13634_v42, 16 }
 0x327   : > { %v4198_v2 = vsel %vm608_vm0, %v4193_v9, %v4197_v3 }
 0x328   : > { %4890 = vmatpush1.bf16.msra.mxu0 %v4222_v36  ;;  %4827 = vmatpush1.bf16.msra.mxu1 %v13660_v55  ;;  %v13683_v36 = vsel %vm964_vm1, %v4601_v31, %v4607_v4  ;;  %v4133_v62 = vrot.slane %v15944_v59, 1  ;;  %v15841_v4 = vshrl.u32 %v13222_v8, 16  ;;  %v4182_v59 = vsel %vm608_vm0, %v4177_v48, %v4181_v49 }
 0x329   : > { %4891 = vmatprep.subr.bf16.mxu0 %v4206_v17  ;;  %15943 = vst [vmem:[#allocation8_spill] sm:$0xff] %v13683_v36  ;;  %4828 = vmatprep.subr.bf16.mxu1 %v4086_v20  ;;  %v13698_v36 = vsel %vm964_vm1, %v4589_v39, %v4595_v46  ;;  %v13703_v20 = vsel %vm964_vm1, %v15840_v7, %v4589_v39  ;;  %v15947_v46 = vshll.u32 %v13196_v11, 16  ;;  %v15948_v49 = vshll.u32 %v13660_v55, 16 }
 0x32a   : > { %15945 = vst [vmem:[#allocation17_spill] sm:$0xff] %v13698_v36  ;;  %15946 = vst [vmem:[#allocation9_spill] sm:$0xff] %v13703_v20  ;;  %v9360_v31 = vcombine.low %v13565_v6, %v3917_v29  ;;  %v4169_v3 = vor.u32 %v15841_v4, %v4149_v41  ;;  %v4153_v48 = vor.u32 %v15842_v24, %v4133_v62  ;;  %v4361_v7 = vrot.slane %v13321_v52, 1 }
 0x32b   : > { %v4125_v17 = vrot.slane %v15947_v46, 1  ;;  %v4109_v29 = vrot.slane %v15948_v49, 1  ;;  %v15843_v4 = vshrl.u32 %v13196_v11, 16  ;;  %v4090_v24 = vshll.u32 %v13395_v12, 16 }
 0x32c   : > { %4892 = vmatpush1.bf16.msra.mxu0 %v4198_v2  ;;  %4829 = vmatpush1.bf16.msra.mxu1 %v9336_v34  ;;  %v4102_v2 = vshll.u32 %v9336_v34, 16  ;;  %v4158_v46 = vsel %vm608_vm0, %v4153_v48, %v4157_v25  ;;  %v4705_v39 = vsel %vm964_vm1, %v9360_v31, 0  ;;  %v15949_v49 = vrot.slane %v13369_v32, 1 }
 0x32d   : > { %4893 = vmatprep.subr.bf16.mxu0 %v4182_v59  ;;  %9386 = vmatprep.subr.msk.bf16.mxu1 %vm964_vm1, %v13387_v27  ;;  %v4174_v59 = vsel %vm608_vm0, %v4169_v3, %v4173_v60  ;;  %v15844_v27 = vshrl.u32 %v13660_v55, 16  ;;  %v4145_v3 = vor.u32 %v15843_v4, %v4125_v17  ;;  %v4359_v48 = vrot.slane %v13323_v43, 1 }
 0x32e   : > { %v4368_v60 = vsel %vm790_vm4, %v4361_v7, %v15949_v49  ;;  %v4104_v9 = vrot.slane %v4102_v2, 1  ;;  %v15845_v20 = vshrl.u32 %v13168_v22, 16  ;;  %v4100_v4 = vshrl.u32 %v9336_v34, 16 }
 0x32f   : > { %v4129_v31 = vor.u32 %v15844_v27, %v4109_v29  ;;  %v4092_v27 = vrot.slane %v4090_v24, 1  ;;  %v4349_v24 = vrot.slane %v13274_v53, 1  ;;  %v15968_v36 = vrot.slane %v13369_v32, 1 }
 0x330   : > { %4894 = vmatpush1.bf16.msra.mxu0 %v4174_v59  ;;  %4845 = vmatpush2.bf16.msra.mxu1 %v4705_v39  ;;  %v15950_v59 = vshll.u32 %v13168_v22, 16  ;;  %v4355_v39 = vrot.slane %v13300_v37, 1 }
 0x331   : > { %4895 = vmatprep.subr.bf16.mxu0 %v4158_v46  ;;  %4956 = vmatprep.subr.bf16.mxu1 %v4368_v60  ;;  %v4150_v46 = vsel %vm608_vm0, %v4145_v3, %v4149_v41  ;;  %v4134_v49 = vsel %vm608_vm0, %v4129_v31, %v4133_v62  ;;  %v4105_v3 = vor.u32 %v4104_v9, %v4100_v4  ;;  %v4088_v62 = vshrl.u32 %v13395_v12, 16 }
 0x332   : > { %v4097_v25 = vrot.slane %v15950_v59, 1  ;;  %v15951_v59 = vrot.slane %v13366_v56, 1  ;;  %v4362_v2 = vsel %vm790_vm4, %v4355_v39, %v4361_v7  ;;  %v4356_v4 = vsel %vm790_vm4, %v4349_v24, %v4355_v39 }
 0x333   : > { %4847 = vmatmul.mubr.bf16.vlgmr.msra.gmra.mxu1 %v13441_v26  ;;  %v4110_v34 = vsel %vm608_vm0, %v4105_v3, %v4109_v29  ;;  %v4093_v9 = vor.u32 %v4092_v27, %v4088_v62  ;;  %v4347_v12 = vrot.slane %v13276_v10, 1  ;;  %v4343_v29 = vrot.slane %v13246_v33, 1 }
 0x334   : > { %4896 = vmatpush1.bf16.msra.mxu0 %v4150_v46  ;;  %v4366_v60 = vsel %vm790_vm4, %v4359_v48, %v15951_v59  ;;  %v4121_v41 = vor.u32 %v15845_v20, %v4097_v25  ;;  %v4353_v46 = vrot.slane %v13302_v58, 1  ;;  %9388 = vmatprep.mubr.msk.bf16.mxu1 %vm4685_vm6, %v13448_v38  ;;  %v4282_v59 = vshrl.u32 %v13369_v32, 16 }
 0x335   : > { %4897 = vmatprep.subr.bf16.mxu0 %v4134_v49  ;;  %4957 = vmatpush1.bf16.msra.mxu1 %v4366_v60  ;;  %v4285_v49 = vshrl.u32 %v13569_v35, 16  ;;  %v4350_v39 = vsel %vm790_vm4, %v4343_v29, %v4349_v24  ;;  %v15846_v62 = vrot.slane %v13569_v35, 1 }
 0x336   : > { %4958 = vmatprep.subr.bf16.mxu1 %v4362_v2  ;;  %v4126_v31 = vsel %vm608_vm0, %v4121_v41, %v4125_v17  ;;  %v4360_v7 = vsel %vm790_vm4, %v4353_v46, %v4359_v48  ;;  %v4098_v17 = vsel %vm608_vm0, %v4093_v9, %v4097_v25  ;;  %v4284_v48 = vor.u32 %v4282_v59, %v13591_v47 }
 0x337   : > { %v4287_v60 = vor.u32 %v4285_v49, %v13597_v51  ;;  %v4354_v27 = vsel %vm790_vm4, %v4347_v12, %v4353_v46  ;;  %v4341_v2 = vrot.slane %v13250_v0, 1  ;;  %v15952_v51 = vshrl.u32 %v13302_v58, 16 }
 0x338   : > { %4898 = vmatpush1.bf16.msra.mxu0 %v4126_v31  ;;  %v15953_v47 = vshll.u32 %v13302_v58, 16  ;;  %v4711_v3 = vsel %vm964_vm1, %v4284_v48, 0  ;;  %v4337_v46 = vrot.slane %v13222_v8, 1  ;;  %v3920_v31 = vld [vmem:[#allocation2] sm:$0xee]  ;;  %v15955_v49 = vshll.u32 %v13276_v10, 16 }
 0x339   : > { %4899 = vmatprep.subr.bf16.mxu0 %v4110_v34  ;;  %4959 = vmatpush1.bf16.msra.mxu1 %v4360_v7  ;;  %v4487_v25 = vrot.slane %v15952_v51, 1  ;;  %v4348_v24 = vsel %vm790_vm4, %v4341_v2, %v4347_v12  ;;  %v4363_v7 = vrot.slane %v13531_v18, 1  ;;  %v4331_v48 = vrot.slane %v13196_v11, 1  ;;  %v13789_v12 = vld [vmem:[#allocation2 + $0xc] sm:$0xff] }
 0x33a   : > { %4960 = vmatprep.subr.bf16.mxu1 %v4356_v4  ;;  %v4488_v41 = vrot.slane %v15953_v47, 2  ;;  %v4344_v34 = vsel %vm790_vm4, %v4337_v46, %v4343_v29  ;;  %v15954_v4 = vshrl.u32 %v13276_v10, 16  ;;  %v4476_v59 = vrot.slane %v15955_v49, 2  ;;  %v3923_v29 = vld [vmem:[#allocation2 + $0xd4] sm:$0xf] }
 0x33b   : > { %4857 = vmatmul.mubr.bf16.gmra.mxu1 %v13463_v57  ;;  %v4357_v47 = vrot.slane %v13542_v50, 1 }
 0x33c   : > { %4900 = vmatpush1.bf16.msra.mxu0 %v4098_v17  ;;  %9389 = vmatprep.mubr.msk.bf16.mxu1 %vm4685_vm6, %v13468_v19  ;;  %v4475_v9 = vrot.slane %v15954_v4, 1  ;;  %v4489_v17 = vor.u32 %v4488_v41, %v4487_v25  ;;  %v4338_v25 = vsel %vm790_vm4, %v4331_v48, %v4337_v46  ;;  %v15957_v46 = vshll.u32 %v13250_v0, 16 }
 0x33d   : > { %9391 = vmatprep.subr.msk.bf16.mxu0 %vm964_vm1, %v4287_v60  ;;  %4961 = vmatpush1.bf16.msra.mxu1 %v4354_v27  ;;  %v4335_v60 = vrot.slane %v13224_v5, 1  ;;  %v4370_v27 = vsel %vm790_vm4, %v4363_v7, %v15846_v62  ;;  %v15967_v62 = vshll.u32 %v13321_v52, 16 }
 0x33e   : > { %4962 = vmatprep.subr.bf16.mxu1 %v4350_v39  ;;  %v4502_v39 = vsel %vm852_vm2, %v4489_v17, %v13354_v30  ;;  %v4477_v41 = vor.u32 %v4476_v59, %v4475_v9  ;;  %v4324_v30 = vrot.slane %v13168_v22, 1  ;;  %v4464_v4 = vrot.slane %v15957_v46, 2 }
 0x33f   : > { %v4342_v51 = vsel %vm790_vm4, %v4335_v60, %v4341_v2  ;;  %v15956_v2 = vshrl.u32 %v13250_v0, 16  ;;  %v4364_v9 = vsel %vm790_vm4, %v4357_v47, %v4363_v7  ;;  %v11030_v7 = vld [vmem:[#allocation2 + $0xc0] sm:$0xff] }
 0x340   : > { %4916 = vmatpush2.bf16.msra.mxu0 %v4711_v3  ;;  %v4329_v3 = vrot.slane %v13198_v54, 1  ;;  %v4490_v59 = vsel %vm852_vm2, %v4477_v41, %v4489_v17  ;;  %v13830_v17 = vcombine.high %v11030_v7, %v13383_v21 }
 0x341   : > { %5027 = vmatprep.subr.bf16.mxu0 %v13435_v61  ;;  %4963 = vmatpush1.bf16.msra.mxu1 %v4348_v24  ;;  %v13792_v61 = vcombine.high %v3920_v31, %v13789_v12  ;;  %v13806_v24 = vcombine.low %v13565_v6, %v3923_v29  ;;  %v13822_v29 = vcombine.low %v3920_v31, %v13789_v12  ;;  %v4321_v31 = vrot.slane %v13172_v63, 1 }
 0x342   : > { %4964 = vmatprep.subr.bf16.mxu1 %v4344_v34  ;;  %v4463_v34 = vrot.slane %v15956_v2, 1  ;;  %v4336_v6 = vsel %vm790_vm4, %v4329_v3, %v4335_v60  ;;  %v4351_v60 = vrot.slane %v13556_v44, 1  ;;  %v4521_v7 = vshrl.u32 %v13830_v17, 16 }
 0x343   : > { %4918 = vmatmul.mubr.bf16.vlgmr.msra.gmra.mxu0 %v13441_v26  ;;  %4867 = vmatmul.mubr.bf16.gmra.mxu1 %v13486_v14  ;;  %v4323_v49 = vrot.slane %v13792_v61, 1  ;;  %v4530_v46 = vshrl.u32 %v13806_v24, 16  ;;  %v4524_v20 = vshll.u32 %v13830_v17, 16 }
 0x344   : > { %5028 = vmatpush1.bf16.msra.mxu0 %v4370_v27  ;;  %9393 = vmatprep.mubr.msk.bf16.mxu0 %vm4685_vm6, %v13448_v38  ;;  %v4332_v27 = vsel %vm790_vm4, %v4324_v30, %v4331_v48  ;;  %v4533_v48 = vshll.u32 %v13806_v24, 16 }
 0x345   : > { %5029 = vmatprep.subr.bf16.mxu0 %v4502_v39  ;;  %4965 = vmatpush1.bf16.msra.mxu1 %v4342_v51  ;;  %v15958_v39 = vshrl.u32 %v13224_v5, 16  ;;  %v4325_v21 = vsel %vm790_vm4, %v4323_v49, %v4324_v30 }
 0x346   : > { %4966 = vmatprep.subr.bf16.mxu1 %v4338_v25  ;;  %9390 = vmatprep.mubr.msk.bf16.mxu1 %vm4685_vm6, %v13488_v1  ;;  %v15959_v25 = vshll.u32 %v13224_v5, 16 }
 0x347   : > { %v4451_v51 = vrot.slane %v15958_v39, 1  ;;  %v4358_v39 = vsel %vm790_vm4, %v4351_v60, %v4357_v47  ;;  %v4320_v47 = vrot.slane %v13822_v29, 1 }
 0x348   : > { %5030 = vmatpush1.bf16.msra.mxu0 %v4364_v9  ;;  %v4452_v2 = vrot.slane %v15959_v25, 2  ;;  %v4465_v9 = vor.u32 %v4464_v4, %v4463_v34  ;;  %v4330_v25 = vsel %vm790_vm4, %v4321_v31, %v4329_v3  ;;  %v4345_v34 = vrot.slane %v13581_v40, 1 }
 0x349   : > { %5031 = vmatprep.subr.bf16.mxu0 %v4490_v59  ;;  %4967 = vmatpush1.bf16.msra.mxu1 %v4336_v6  ;;  %v4532_v4 = vrot.slane %v4530_v46, 1  ;;  %v4535_v3 = vrot.slane %v4533_v48, 2  ;;  %v15963_v48 = vshll.u32 %v13531_v18, 16 }
 0x34a   : > { %4968 = vmatprep.subr.bf16.mxu1 %v4332_v27  ;;  %v4478_v59 = vsel %vm852_vm2, %v4465_v9, %v4477_v41  ;;  %v4453_v6 = vor.u32 %v4452_v2, %v4451_v51  ;;  %v15960_v41 = vshrl.u32 %v13198_v54, 16  ;;  %v15961_v27 = vshll.u32 %v13198_v54, 16 }
 0x34b   : > { %4928 = vmatmul.mubr.bf16.gmra.mxu0 %v13463_v57  ;;  %4877 = vmatmul.mubr.bf16.gmra.mxu1 %v13499_v16  ;;  %v4352_v2 = vsel %vm790_vm4, %v4345_v34, %v4351_v60  ;;  %v4526_v60 = vrot.slane %v4524_v20, 2  ;;  %v4407_v20 = vshll.u32 %v13822_v29, 16 }
 0x34c   : > { %5032 = vmatpush1.bf16.msra.mxu0 %v4358_v39  ;;  %v4466_v30 = vsel %vm852_vm2, %v4453_v6, %v4465_v9  ;;  %9394 = vmatprep.mubr.msk.bf16.mxu0 %vm4685_vm6, %v13468_v19  ;;  %v4439_v49 = vrot.slane %v15960_v41, 1  ;;  %v4440_v51 = vrot.slane %v15961_v27, 2  ;;  %v4322_v39 = vsel %vm790_vm4, %v4320_v47, %v4321_v31 }
 0x34d   : > { %5033 = vmatprep.subr.bf16.mxu0 %v4478_v59  ;;  %4969 = vmatpush1.bf16.msra.mxu1 %v4330_v25  ;;  %v15962_v25 = vshrl.u32 %v13531_v18, 16  ;;  %v15964_v19 = vshrl.u32 %v13172_v63, 16  ;;  %v15965_v59 = vshll.u32 %v13172_v63, 16  ;;  %v4523_v27 = vrot.slane %v4521_v7, 1 }
 0x34e   : > { %4970 = vmatprep.subr.bf16.mxu1 %v4325_v21  ;;  %v4508_v21 = vrot.slane %v15963_v48, 2  ;;  %9397 = vmatprep.mubr.msk.bf16.mxu1 %vm4685_vm6, %v13511_v45  ;;  %v4339_v31 = vrot.slane %v13612_v28, 1  ;;  %v13866_v47 = vor.u32 %v4535_v3, %v4532_v4  ;;  %v4404_v7 = vshrl.u32 %v13822_v29, 16 }
 0x34f   : > { %v4507_v46 = vrot.slane %v15962_v25, 1  ;;  %v4411_v9 = vrot.slane %v15964_v19, 1  ;;  %v4412_v41 = vrot.slane %v15965_v59, 2  ;;  %v15966_v25 = vshrl.u32 %v13321_v52, 16 }
 0x350   : > { %5034 = vmatpush1.bf16.msra.mxu0 %v4352_v2  ;;  %v4504_v2 = vrot.slane %v15967_v62, 2  ;;  %v4441_v19 = vor.u32 %v4440_v51, %v4439_v49  ;;  %v4346_v4 = vsel %vm790_vm4, %v4339_v31, %v4345_v34  ;;  %v15970_v59 = vshll.u32 %v13542_v50, 16 }
 0x351   : > { %5035 = vmatprep.subr.bf16.mxu0 %v4466_v30  ;;  %4971 = vmatpush1.bf16.msra.mxu1 %v4322_v39  ;;  %v4503_v48 = vrot.slane %v15966_v25, 1  ;;  %v4509_v3 = vor.u32 %v4508_v21, %v4507_v46  ;;  %v15969_v30 = vshrl.u32 %v13542_v50, 16  ;;  %v13887_v51 = vor.u32 %v4526_v60, %v4523_v27 }
 0x352   : > { %9396 = vmatprep.subr.msk.bf16.mxu1 %vm964_vm1, %v15968_v36  ;;  %v4496_v62 = vrot.slane %v15970_v59, 2  ;;  %v4454_v32 = vsel %vm852_vm2, %v4441_v19, %v4453_v6  ;;  %v15971_v36 = vrot.slane %v13366_v56, 1  ;;  %v4333_v50 = vrot.slane %v13634_v42, 1 }
 0x353   : > { %4938 = vmatmul.mubr.bf16.gmra.mxu0 %v13486_v14  ;;  %v4495_v39 = vrot.slane %v15969_v30, 1  ;;  %v4537_v29 = vsel %vm852_vm2, %v4509_v3, %v13866_v47  ;;  %v4413_v34 = vor.u32 %v4412_v41, %v4411_v9  ;;  %v4505_v46 = vor.u32 %v4504_v2, %v4503_v48  ;;  %v3921_v9 = vld [vmem:[#allocation2 + $0x8] sm:$0xe] }
 0x354   : > { %5036 = vmatpush1.bf16.msra.mxu0 %v4346_v4  ;;  %v4717_v49 = vsel %vm964_vm1, %v15971_v36, 0  ;;  %9395 = vmatprep.mubr.msk.bf16.mxu0 %vm4685_vm6, %v13488_v1  ;;  %v4406_v6 = vrot.slane %v4404_v7, 1  ;;  %v4409_v21 = vrot.slane %v4407_v20, 2  ;;  %v15972_v56 = vshrl.u32 %v13300_v37, 16 }
 0x355   : > { %5037 = vmatprep.subr.bf16.mxu0 %v4454_v32  ;;  %4987 = vmatpush2.bf16.msra.mxu1 %v4717_v49  ;;  %v15973_v27 = vshll.u32 %v13300_v37, 16  ;;  %v4340_v4 = vsel %vm790_vm4, %v4333_v50, %v4339_v31  ;;  %v4497_v30 = vor.u32 %v4496_v62, %v4495_v39  ;;  %v15974_v59 = vshrl.u32 %v13556_v44, 16 }
 0x356   : > { %5098 = vmatprep.subr.bf16.mxu1 %v4537_v29  ;;  %v4491_v25 = vrot.slane %v15972_v56, 1  ;;  %v15975_v36 = vshll.u32 %v13556_v44, 16  ;;  %v4442_v41 = vsel %vm852_vm2, %v4413_v34, %v4441_v19  ;;  %v4528_v48 = vsel %vm852_vm2, %v4505_v46, %v13887_v51 }
 0x357   : > { %v4492_v60 = vrot.slane %v15973_v27, 2  ;;  %v4483_v32 = vrot.slane %v15974_v59, 1  ;;  %v13908_v2 = vcombine.low %v3921_v9, %v13655_v15  ;;  %v4510_v31 = vsel %vm852_vm2, %v4497_v30, %v4509_v3 }
 0x358   : > { %v4484_v49 = vrot.slane %v15975_v36, 2  ;;  %5038 = vmatpush1.bf16.msra.mxu0 %v4340_v4  ;;  %4989 = vmatmul.mubr.bf16.vlgmr.msra.gmra.mxu1 %v13441_v26  ;;  %v4327_v7 = vrot.slane %v13660_v55, 1  ;;  %v4410_v44 = vor.u32 %v4409_v21, %v4406_v6  ;;  %v15976_v39 = vshrl.u32 %v13274_v53, 16 }
 0x359   : > { %5039 = vmatprep.subr.bf16.mxu0 %v4442_v41  ;;  %5099 = vmatpush1.bf16.msra.mxu1 %v4528_v48  ;;  %v4493_v20 = vor.u32 %v4492_v60, %v4491_v25  ;;  %v15977_v26 = vshll.u32 %v13274_v53, 16  ;;  %v15978_v3 = vshrl.u32 %v13581_v40, 16  ;;  %v15979_v6 = vshll.u32 %v13581_v40, 16 }
 0x35a   : > { %5100 = vmatprep.subr.bf16.mxu1 %v4510_v31  ;;  %v4479_v19 = vrot.slane %v15976_v39, 1  ;;  %9398 = vmatprep.mubr.msk.bf16.mxu1 %vm4685_vm6, %v13448_v38  ;;  %v4334_v29 = vsel %vm790_vm4, %v4327_v7, %v4333_v50  ;;  %v4485_v56 = vor.u32 %v4484_v49, %v4483_v32  ;;  %v4414_v25 = vsel %vm852_vm2, %v4410_v44, %v4413_v34 }
 0x35b   : > { %v4480_v62 = vrot.slane %v15977_v26, 2  ;;  %4948 = vmatmul.mubr.bf16.gmra.mxu0 %v13499_v16  ;;  %v4471_v27 = vrot.slane %v15978_v3, 1  ;;  %v4472_v21 = vrot.slane %v15979_v6, 2  ;;  %v4506_v60 = vsel %vm852_vm2, %v4493_v20, %v4505_v46 }
 0x35c   : > { %5040 = vmatpush1.bf16.msra.mxu0 %v4334_v29  ;;  %9402 = vmatprep.mubr.msk.bf16.mxu0 %vm4685_vm6, %v13511_v45  ;;  %v4498_v38 = vsel %vm852_vm2, %v4485_v56, %v4497_v30  ;;  %v4326_v50 = vrot.slane %v13908_v2, 1  ;;  %v15980_v4 = vshrl.u32 %v13246_v33, 16  ;;  %v15981_v40 = vshll.u32 %v13246_v33, 16 }
 0x35d   : > { %5041 = vmatprep.subr.bf16.mxu0 %v4414_v25  ;;  %5101 = vmatpush1.bf16.msra.mxu1 %v4506_v60  ;;  %v4481_v36 = vor.u32 %v4480_v62, %v4479_v19  ;;  %v4473_v46 = vor.u32 %v4472_v21, %v4471_v27  ;;  %v15982_v49 = vshrl.u32 %v13612_v28, 16  ;;  %v15983_v41 = vshll.u32 %v13612_v28, 16  ;;  %v15984_v19 = vld [vmem:[#allocation7_spill] sm:$0xff] }
 0x35e   : > { %v4467_v59 = vrot.slane %v15980_v4, 1  ;;  %v4468_v32 = vrot.slane %v15981_v40, 2  ;;  %5102 = vmatprep.subr.bf16.mxu1 %v4498_v38  ;;  %v4328_v34 = vsel %vm790_vm4, %v4326_v50, %v4327_v7  ;;  %v4617_v31 = vrot.slane %v13830_v17, 2  ;;  %v10570_v17 = vld [vmem:[%s15761_s5 + $0x70] ss:$8 sps:$4 sm:$0xff]  }
 0x35f   : > { %v4459_v9 = vrot.slane %v15982_v49, 1  ;;  %v4460_v48 = vrot.slane %v15983_v41, 2  ;;  %v4494_v30 = vsel %vm852_vm2, %v4481_v36, %v4493_v20  ;;  %v4486_v7 = vsel %vm852_vm2, %v4473_v46, %v4485_v56 }
 0x360   : > { %5042 = vmatpush1.bf16.msra.mxu0 %v4328_v34  ;;  %4999 = vmatmul.mubr.bf16.gmra.mxu1 %v13463_v57  ;;  %v4611_v44 = vrot.slane %v13321_v52, 2  ;;  %v4469_v39 = vor.u32 %v4468_v32, %v4467_v59  ;;  %v4615_v26 = vrot.slane %v15984_v19, 2  ;;  %v15985_v28 = vshrl.u32 %v13222_v8, 16  ;;  %v13958_v52 = vld [vmem:[%s15760_s4 + $0x24] ss:$8 sps:$4 sm:$0xff]  }
 0x361   : > { %9401 = vmatprep.subr.msk.bf16.mxu0 %vm964_vm1, %v13424_v13  ;;  %5103 = vmatpush1.bf16.msra.mxu1 %v4494_v30  ;;  %v15986_v20 = vshll.u32 %v13222_v8, 16  ;;  %v15987_v57 = vshrl.u32 %v13634_v42, 16  ;;  %v15988_v13 = vshll.u32 %v13634_v42, 16  ;;  %v15989_v56 = vrot.slane %v13569_v35, 1  ;;  %v10573_v19 = vld [vmem:[%s15761_s5 + $0x60] ss:$8 sps:$4 sm:$0xff]  }
 0x362   : > { %5104 = vmatprep.subr.bf16.mxu1 %v4486_v7  ;;  %v4455_v62 = vrot.slane %v15985_v28, 1  ;;  %9399 = vmatprep.mubr.msk.bf16.mxu1 %vm4685_vm6, %v13958_v52  ;;  %v4461_v21 = vor.u32 %v4460_v48, %v4459_v9  ;;  %v4618_v25 = vsel %vm964_vm1, %v4611_v44, %v4617_v31  ;;  %v4482_v60 = vsel %vm852_vm2, %v4469_v39, %v4481_v36 }
 0x363   : > { %v4456_v29 = vrot.slane %v15986_v20, 2  ;;  %v4447_v3 = vrot.slane %v15987_v57, 1  ;;  %v4448_v27 = vrot.slane %v15988_v13, 2  ;;  %v4723_v6 = vsel %vm964_vm1, %v15989_v56, 0 }
 0x364   : > { %5058 = vmatpush2.bf16.msra.mxu0 %v4723_v6  ;;  %v4609_v38 = vrot.slane %v13323_v43, 2  ;;  %v4474_v50 = vsel %vm852_vm2, %v4461_v21, %v4473_v46  ;;  %v15990_v4 = vshrl.u32 %v13196_v11, 16  ;;  %v15991_v35 = vshll.u32 %v13196_v11, 16  ;;  %v13982_v43 = vld [vmem:[%s15760_s4] ss:$8 sps:$4 sm:$0xff]  }
 0x365   : > { %5169 = vmatprep.subr.bf16.mxu0 %v4618_v25  ;;  %5105 = vmatpush1.bf16.msra.mxu1 %v4482_v60  ;;  %v4605_v34 = vrot.slane %v13300_v37, 2  ;;  %v4457_v36 = vor.u32 %v4456_v29, %v4455_v62  ;;  %v4449_v49 = vor.u32 %v4448_v27, %v4447_v3  ;;  %v15992_v46 = vshrl.u32 %v13660_v55, 16 }
 0x366   : > { %v4443_v59 = vrot.slane %v15990_v4, 1  ;;  %v4444_v40 = vrot.slane %v15991_v35, 2  ;;  %5106 = vmatprep.subr.bf16.mxu1 %v4474_v50  ;;  %v4616_v32 = vsel %vm964_vm1, %v4609_v38, %v4615_v26  ;;  %v15993_v41 = vshll.u32 %v13660_v55, 16 }
 0x367   : > { %5060 = vmatmul.mubr.bf16.vlgmr.msra.gmra.mxu0 %v13982_v43  ;;  %v4435_v9 = vrot.slane %v15992_v46, 1  ;;  %v4428_v30 = vshrl.u32 %v13908_v2, 16  ;;  %v4431_v7 = vshll.u32 %v13908_v2, 16  ;;  %v4612_v37 = vsel %vm964_vm1, %v4605_v34, %v4611_v44 }
 0x368   : > { %v4436_v48 = vrot.slane %v15993_v41, 2  ;;  %5170 = vmatpush1.bf16.msra.mxu0 %v4616_v32  ;;  %v4470_v28 = vsel %vm852_vm2, %v4457_v36, %v4469_v39  ;;  %5009 = vmatmul.mubr.bf16.gmra.mxu1 %v13486_v14  ;;  %v4462_v62 = vsel %vm852_vm2, %v4449_v49, %v4461_v21  ;;  %v4603_v20 = vrot.slane %v13302_v58, 2  ;;  %v14004_v14 = vld [vmem:[%s15760_s4 + $0x14] ss:$8 sps:$4 sm:$0xff]   ;;  %v14022_v32 = vld [vmem:[%s15760_s4 + $0x10] ss:$8 sps:$4 sm:$0xff]  }
 0x369   : > { %5171 = vmatprep.subr.bf16.mxu0 %v4612_v37  ;;  %5107 = vmatpush1.bf16.msra.mxu1 %v4470_v28  ;;  %v4599_v29 = vrot.slane %v13274_v53, 2  ;;  %v4445_v57 = vor.u32 %v4444_v40, %v4443_v59  ;;  %v15994_v3 = vshrl.u32 %v13168_v22, 16  ;;  %v15995_v13 = vshll.u32 %v13168_v22, 16 }
 0x36a   : > { %5108 = vmatprep.subr.bf16.mxu1 %v4462_v62  ;;  %9403 = vmatprep.mubr.msk.bf16.mxu0 %vm4685_vm6, %v14004_v14  ;;  %v4416_v58 = vshrl.u32 %v13792_v61, 16  ;;  %v4419_v53 = vshll.u32 %v13792_v61, 16  ;;  %v4610_v39 = vsel %vm964_vm1, %v4603_v20, %v4609_v38  ;;  %v4437_v27 = vor.u32 %v4436_v48, %v4435_v9 }
 0x36b   : > { %v4423_v2 = vrot.slane %v15994_v3, 1  ;;  %v4424_v44 = vrot.slane %v15995_v13, 2  ;;  %v4430_v56 = vrot.slane %v4428_v30, 1  ;;  %v4433_v6 = vrot.slane %v4431_v7, 2  ;;  %9400 = vmatprep.mubr.msk.bf16.mxu1 %vm4685_vm6, %v13488_v1  ;;  %v3924_v7 = vld [vmem:[#allocation2] sm:$0xcc] }
 0x36c   : > { %5172 = vmatpush1.bf16.msra.mxu0 %v4610_v39  ;;  %v4606_v21 = vsel %vm964_vm1, %v4599_v29, %v4605_v34  ;;  %v4458_v25 = vsel %vm852_vm2, %v4445_v57, %v4457_v36  ;;  %v4450_v60 = vsel %vm852_vm2, %v4437_v27, %v4449_v49  ;;  %v4597_v50 = vrot.slane %v13276_v10, 2  ;;  %v10572_v39 = vld [vmem:[%s15761_s5 + $0x74] ss:$8 sps:$4 sm:$0xff]  }
 0x36d   : > { %5173 = vmatprep.subr.bf16.mxu0 %v4606_v21  ;;  %5109 = vmatpush1.bf16.msra.mxu1 %v4458_v25  ;;  %v4593_v61 = vrot.slane %v13246_v33, 2  ;;  %v4425_v38 = vor.u32 %v4424_v44, %v4423_v2  ;;  %v4418_v4 = vrot.slane %v4416_v58, 1  ;;  %v4421_v59 = vrot.slane %v4419_v53, 2  ;;  %v11036_v44 = vld [vmem:[%s15760_s4 + $0x4] ss:$8 sps:$4 sm:$0xff]   ;;  %v15999_v53 = vld [vmem:[#allocation8_spill] sm:$0xff] }
 0x36e   : > { %5110 = vmatprep.subr.bf16.mxu1 %v4450_v60  ;;  %v4604_v35 = vsel %vm964_vm1, %v4597_v50, %v4603_v20  ;;  %v4434_v40 = vor.u32 %v4433_v6, %v4430_v56  ;;  %v4591_v36 = vrot.slane %v13250_v0, 2  ;;  %v4587_v49 = vrot.slane %v13222_v8, 2  ;;  %v10576_v56 = vld [vmem:[%s15761_s5 + $0x50] ss:$8 sps:$4 sm:$0xff]   ;;  %v10581_v21 = vld [vmem:[%s15761_s5 + $0x44] ss:$8 sps:$4 sm:$0xff]  }
 0x36f   : > { %5070 = vmatmul.mubr.bf16.gmra.mxu0 %v14022_v32  ;;  %v4600_v34 = vsel %vm964_vm1, %v4593_v61, %v4599_v29  ;;  %v4446_v10 = vsel %vm852_vm2, %v4425_v38, %v4445_v57  ;;  %v4422_v46 = vor.u32 %v4421_v59, %v4418_v4  ;;  %v4585_v0 = vrot.slane %v13224_v5, 2  ;;  %v16001_v6 = vld [vmem:[#allocation9_spill] sm:$0xff]  ;;  %v3925_v25 = vld [vmem:[#allocation2 + $0x8] sm:$0xc] }
 0x370   : > { %5174 = vmatpush1.bf16.msra.mxu0 %v4604_v35  ;;  %5019 = vmatmul.mubr.bf16.gmra.mxu1 %v13499_v16  ;;  %v4438_v33 = vsel %vm852_vm2, %v4434_v40, %v4437_v27  ;;  %v4598_v9 = vsel %vm964_vm1, %v4591_v36, %v4597_v50  ;;  %v4594_v41 = vsel %vm964_vm1, %v4587_v49, %v4593_v61  ;;  %v4581_v8 = vrot.slane %v13196_v11, 2  ;;  %v10579_v4 = vld [vmem:[%s15761_s5 + $0x40] ss:$8 sps:$4 sm:$0xff]   ;;  %v10583_v59 = vld [vmem:[%s15761_s5 + $0x30] ss:$8 sps:$4 sm:$0xff]  }
 0x371   : > { %5175 = vmatprep.subr.bf16.mxu0 %v4600_v34  ;;  %5111 = vmatpush1.bf16.msra.mxu1 %v4446_v10  ;;  %v4426_v48 = vsel %vm852_vm2, %v4422_v46, %v4425_v38  ;;  %v4592_v30 = vsel %vm964_vm1, %v4585_v0, %v4591_v36  ;;  %v4729_v5 = vsel %vm964_vm1, %v13887_v51, 0  ;;  %v4579_v11 = vrot.slane %v13198_v54, 2  ;;  %v10588_v35 = vld [vmem:[%s15761_s5 + $0x24] ss:$8 sps:$4 sm:$0xff]   ;;  %v10612_v40 = vld [vmem:[%s15761_s5 + $0x174] ss:$8 sps:$4 sm:$0xff]  }
 0x372   : > { %5112 = vmatprep.subr.bf16.mxu1 %v4438_v33  ;;  %9404 = vmatprep.mubr.msk.bf16.mxu0 %vm4685_vm6, %v13958_v52  ;;  %v4588_v37 = vsel %vm964_vm1, %v4581_v8, %v4587_v49  ;;  %v4574_v28 = vrot.slane %v13168_v22, 2  ;;  %v15996_v62 = vmov 0   ;;  %v9371_v20 = vcombine.high %v3924_v7, %v13789_v12  ;;  %v10586_v10 = vld [vmem:[%s15761_s5 + $0x20] ss:$8 sps:$4 sm:$0xff]   ;;  %v10591_v33 = vld [vmem:[%s15761_s5 + $0x14] ss:$8 sps:$4 sm:$0xff]  }
 0x373   : > { %9407 = vmatprep.mubr.msk.bf16.mxu1 %vm4685_vm6, %v13511_v45  ;;  %v14046_v45 = vld [vmem:[%s15760_s4 + $0x20] ss:$8 sps:$4 sm:$0xff]   ;;  %v4586_v29 = vsel %vm964_vm1, %v4579_v11, %v4585_v0  ;;  %v15997_v57 = vrot.slane %v13531_v18, 2  ;;  %v4571_v22 = vrot.slane %v13172_v63, 2  ;;  %v9370_v54 = vcombine.low %v3924_v7, %v13789_v12  ;;  %v10610_v36 = vld [vmem:[%s15761_s5 + $0x170] ss:$8 sps:$4 sm:$0xff]  }
 0x374   : > { %5176 = vmatpush1.bf16.msra.mxu0 %v4598_v9  ;;  %v4582_v51 = vsel %vm964_vm1, %v4574_v28, %v4581_v8  ;;  %v4573_v2 = vrot.slane %v9371_v20, 2  ;;  %v15998_v63 = vld [vmem:[#allocation15_spill] sm:$0xff]  ;;  %v4735_v27 = vsel %vm964_vm1, %v4615_v26, 0  ;;  %v16000_v26 = vld [vmem:[#allocation17_spill] sm:$0xff]  ;;  %v4577_v60 = vrot.slane %v13660_v55, 2 }
 0x375   : > { %5177 = vmatprep.subr.bf16.mxu0 %v4594_v41  ;;  %5113 = vmatpush1.bf16.msra.mxu1 %v4426_v48  ;;  %v4580_v13 = vsel %vm964_vm1, %v4571_v22, %v4579_v11  ;;  %v4570_v12 = vrot.slane %v9370_v54, 2  ;;  %v9372_v50 = vcombine.low %v3925_v25, %v13655_v15  ;;  %v16002_v61 = vrot.slane %v13634_v42, 2  ;;  %v10585_v55 = vld [vmem:[%s15761_s5 + $0x34] ss:$8 sps:$4 sm:$0xff]   ;;  %v10589_v49 = vld [vmem:[%s15761_s5 + $0x10] ss:$8 sps:$4 sm:$0xff]  }
 0x376   : > { %9406 = vmatprep.subr.msk.bf16.mxu1 %vm964_vm1, %v13866_v47  ;;  %v4619_v47 = vrot.slane %v13806_v24, 2  ;;  %v4575_v18 = vsel %vm964_vm1, %v4573_v2, %v4574_v28  ;;  %v10618_v24 = vld [vmem:[%s15761_s5 + $0x164] ss:$8 sps:$4 sm:$0xff]   ;;  %v10616_v9 = vld [vmem:[%s15761_s5 + $0x160] ss:$8 sps:$4 sm:$0xff]  }
 0x377   : > { %5080 = vmatmul.mubr.bf16.gmra.mxu0 %v14046_v45  ;;  %v4572_v58 = vsel %vm964_vm1, %v4570_v12, %v4571_v22  ;;  %v4584_v38 = vsel %vm964_vm1, %v4577_v60, %v16002_v61  ;;  %v4576_v15 = vrot.slane %v9372_v50, 2  ;;  %v10594_v46 = vld [vmem:[%s15761_s5 + $0x4] ss:$8 sps:$4 sm:$0xff]   ;;  %v10624_v48 = vld [vmem:[%s15761_s5 + $0x154] ss:$8 sps:$4 sm:$0xff]  }
 0x378   : > { %5178 = vmatpush1.bf16.msra.mxu0 %v4592_v30  ;;  %9405 = vmatprep.mubr.msk.bf16.mxu0 %vm4685_vm6, %v13488_v1  ;;  %v4620_v3 = vsel %vm964_vm1, %v15997_v57, %v4619_v47  ;;  %v4741_v34 = vsel %vm964_vm1, %v4619_v47, 0  ;;  %v10597_v8 = vld [vmem:[%s15761_s5 + $0xf4] ss:$8 sps:$4 sm:$0xff]   ;;  %v10622_v30 = vld [vmem:[%s15761_s5 + $0x150] ss:$8 sps:$4 sm:$0xff]  }
 0x379   : > { %5179 = vmatprep.subr.bf16.mxu0 %v4588_v37  ;;  %5129 = vmatpush2.bf16.msra.mxu1 %v4729_v5  ;;  %v4578_v42 = vsel %vm964_vm1, %v4576_v15, %v4577_v60  ;;  %v10630_v7 = vld [vmem:[%s15761_s5 + $0x144] ss:$8 sps:$4 sm:$0xff]   ;;  %v10595_v37 = vld [vmem:[%s15761_s5 + $0xf0] ss:$8 sps:$4 sm:$0xff]   ;;  %v10628_v28 = vld [vmem:[%s15761_s5 + $0x140] ss:$8 sps:$4 sm:$0xff]  }
 0x37a   : > { %5240 = vmatprep.subr.bf16.mxu1 %v15996_v62  ;;  %v10600_v47 = vld [vmem:[%s15761_s5 + $0xe4] ss:$8 sps:$4 sm:$0xff]   ;;  %v10636_v20 = vld [vmem:[%s15761_s5 + $0x134] ss:$8 sps:$4 sm:$0xff]   ;;  %v10601_v54 = vld [vmem:[%s15761_s5 + $0xd0] ss:$8 sps:$4 sm:$0xff]  }
 0x37b   : > { %v10603_v57 = vld [vmem:[%s15761_s5 + $0xd4] ss:$8 sps:$4 sm:$0xff]   ;;  %v10666_v25 = vld [vmem:[%s15761_s5 + $0x1e4] ss:$8 sps:$4 sm:$0xff]   ;;  %v10619_v50 = vld [vmem:[%s15761_s5 + $0x90] ss:$8 sps:$4 sm:$0xff]  }
 0x37c   : > { %5180 = vmatpush1.bf16.msra.mxu0 %v4586_v29  ;;  %5131 = vmatmul.mubr.bf16.vlgmr.msra.gmra.mxu1 %v13982_v43  ;;  %v10625_v15 = vld [vmem:[%s15761_s5 + $0x80] ss:$8 sps:$4 sm:$0xff]  }
 0x37d   : > { %5181 = vmatprep.subr.bf16.mxu0 %v4582_v51  ;;  %5241 = vmatpush1.bf16.msra.mxu1 %v4620_v3  ;;  %v10634_v3 = vld [vmem:[%s15761_s5 + $0x130] ss:$8 sps:$4 sm:$0xff]  }
 0x37e   : > { %5242 = vmatprep.subr.bf16.mxu1 %v15996_v62  ;;  %9408 = vmatprep.mubr.msk.bf16.mxu1 %vm4685_vm6, %v14004_v14 }
 0x37f   : > { %5090 = vmatmul.mubr.bf16.gmra.mxu0 %v13499_v16 }
 0x380   : > { %5182 = vmatpush1.bf16.msra.mxu0 %v4580_v13  ;;  %9412 = vmatprep.mubr.msk.bf16.mxu0 %vm4685_vm6, %v11036_v44  ;;  %v10606_v13 = vld [vmem:[%s15761_s5 + $0xc4] ss:$8 sps:$4 sm:$0xff]  }
 0x381   : > { %5183 = vmatprep.subr.bf16.mxu0 %v4575_v18  ;;  %5243 = vmatpush1.bf16.msra.mxu1 %v15998_v63  ;;  %v10640_v18 = vld [vmem:[%s15761_s5 + $0x120] ss:$8 sps:$4 sm:$0xff]  }
 0x382   : > { %5244 = vmatprep.subr.bf16.mxu1 %v15996_v62 }
 0x384   : > { %5184 = vmatpush1.bf16.msra.mxu0 %v4572_v58  ;;  %5141 = vmatmul.mubr.bf16.gmra.mxu1 %v14022_v32  ;;  %v10609_v58 = vld [vmem:[%s15761_s5 + $0xb4] ss:$8 sps:$4 sm:$0xff]  }
 0x385   : > { %9411 = vmatprep.subr.msk.bf16.mxu0 %vm964_vm1, %v4617_v31  ;;  %5245 = vmatpush1.bf16.msra.mxu1 %v15999_v53  ;;  %v10575_v31 = vld [vmem:[%s15761_s5 + $0x64] ss:$8 sps:$4 sm:$0xff]   ;;  %v10646_v53 = vld [vmem:[%s15761_s5 + $0x110] ss:$8 sps:$4 sm:$0xff]  }
 0x386   : > { %5246 = vmatprep.subr.bf16.mxu1 %v15996_v62  ;;  %9409 = vmatprep.mubr.msk.bf16.mxu1 %vm4685_vm6, %v13958_v52 }
 0x388   : > { %5200 = vmatpush2.bf16.msra.mxu0 %v4735_v27  ;;  %v10607_v27 = vld [vmem:[%s15761_s5 + $0xb0] ss:$8 sps:$4 sm:$0xff]  }
 0x389   : > { %5247 = vmatpush1.bf16.msra.mxu1 %v13693_v23  ;;  %6804 = vmatprep.subr.bf16.mxu0 %v10572_v39  ;;  %v10578_v23 = vld [vmem:[%s15761_s5 + $0x54] ss:$8 sps:$4 sm:$0xff]  }
 0x38a   : > { %5248 = vmatprep.subr.bf16.mxu1 %v15996_v62 }
 0x38b   : > { %5202 = vmatmul.mubr.bf16.vlgmr.msra.gmra.mxu0 %v13982_v43 }
 0x38c   : > { %6805 = vmatpush1.bf16.msra.mxu0 %v10570_v17  ;;  %5151 = vmatmul.mubr.bf16.gmra.mxu1 %v14046_v45 }
 0x38d   : > { %5249 = vmatpush1.bf16.msra.mxu1 %v16000_v26  ;;  %6806 = vmatprep.subr.bf16.mxu0 %v10575_v31  ;;  %v10615_v31 = vld [vmem:[%s15761_s5 + $0xa4] ss:$8 sps:$4 sm:$0xff]   ;;  %v10660_v26 = vld [vmem:[%s15761_s5 + $0x1f4] ss:$8 sps:$4 sm:$0xff]  }
 0x38e   : > { %5250 = vmatprep.subr.bf16.mxu1 %v15996_v62  ;;  %9410 = vmatprep.mubr.msk.bf16.mxu1 %vm4685_vm6, %v13488_v1 }
 0x38f   : > { %9413 = vmatprep.mubr.msk.bf16.mxu0 %vm4685_vm6, %v14004_v14 }
 0x390   : > { %6807 = vmatpush1.bf16.msra.mxu0 %v10573_v19  ;;  %v10652_v19 = vld [vmem:[%s15761_s5 + $0x100] ss:$8 sps:$4 sm:$0xff]  }
 0x391   : > { %5251 = vmatpush1.bf16.msra.mxu1 %v16001_v6  ;;  %6808 = vmatprep.subr.bf16.mxu0 %v10578_v23  ;;  %v10621_v6 = vld [vmem:[%s15761_s5 + $0x94] ss:$8 sps:$4 sm:$0xff]  }
 0x392   : > { %5252 = vmatprep.subr.bf16.mxu1 %v15996_v62 }
 0x393   : > { %5212 = vmatmul.mubr.bf16.gmra.mxu0 %v14022_v32 }
 0x394   : > { %6809 = vmatpush1.bf16.msra.mxu0 %v10576_v56  ;;  %5161 = vmatmul.mubr.bf16.gmra.mxu1 %v13499_v16 }
 0x395   : > { %5253 = vmatpush1.bf16.msra.mxu1 %v4584_v38  ;;  %6810 = vmatprep.subr.bf16.mxu0 %v10581_v21  ;;  %v10658_v21 = vld [vmem:[%s15761_s5 + $0x1f0] ss:$8 sps:$4 sm:$0xff]   ;;  %v10627_v38 = vld [vmem:[%s15761_s5 + $0x84] ss:$8 sps:$4 sm:$0xff]  }
 0x396   : > { %5254 = vmatprep.subr.bf16.mxu1 %v15996_v62  ;;  %9414 = vmatprep.mubr.msk.bf16.mxu0 %vm4685_vm6, %v13958_v52 }
 0x397   : > { %9416 = vmatprep.mubr.msk.bf16.mxu1 %vm4685_vm6, %v11036_v44  ;;  %v10648_v44 = vld [vmem:[%s15761_s5 + $0x114] ss:$8 sps:$4 sm:$0xff]  }
 0x398   : > { %6811 = vmatpush1.bf16.msra.mxu0 %v10579_v4  ;;  %v10664_v4 = vld [vmem:[%s15761_s5 + $0x1e0] ss:$8 sps:$4 sm:$0xff]  }
 0x399   : > { %5255 = vmatpush1.bf16.msra.mxu1 %v4578_v42  ;;  %6812 = vmatprep.subr.bf16.mxu0 %v10585_v55  ;;  %v10672_v55 = vld [vmem:[%s15761_s5 + $0x1d4] ss:$8 sps:$4 sm:$0xff]  }
 0x39a   : > { %5270 = vmatprep.subr.bf16.mxu1 %v15996_v62  ;;  %v10633_v42 = vld [vmem:[%s15761_s5 + $0x274] ss:$8 sps:$4 sm:$0xff]  }
 0x39b   : > { %5222 = vmatmul.mubr.bf16.gmra.mxu0 %v14046_v45 }
 0x39c   : > { %6813 = vmatpush1.bf16.msra.mxu0 %v10583_v59  ;;  %9415 = vmatprep.mubr.msk.bf16.mxu0 %vm4685_vm6, %v13488_v1  ;;  %v10670_v59 = vld [vmem:[%s15761_s5 + $0x1d0] ss:$8 sps:$4 sm:$0xff]  }
 0x39d   : > { %5271 = vmatpush2.bf16.msra.mxu1 %v4741_v34  ;;  %6814 = vmatprep.subr.bf16.mxu0 %v10588_v35  ;;  %v10678_v35 = vld [vmem:[%s15761_s5 + $0x1c4] ss:$8 sps:$4 sm:$0xff]   ;;  %v10631_v34 = vld [vmem:[%s15761_s5 + $0x270] ss:$8 sps:$4 sm:$0xff]  }
 0x39e   : > { %6875 = vmatprep.subr.bf16.mxu1 %v10612_v40 }
 0x3a0   : > { %6815 = vmatpush1.bf16.msra.mxu0 %v10586_v10  ;;  %5273 = vmatmul.mubr.bf16.vlgmr.msra.gmra.mxu1 %v13982_v43  ;;  %v10592_v43 = vld [vmem:[%s15761_s5] ss:$8 sps:$4 sm:$0xff]  }
 0x3a1   : > { %6816 = vmatprep.subr.bf16.mxu0 %v10591_v33  ;;  %6876 = vmatpush1.bf16.msra.mxu1 %v10610_v36  ;;  %v14182_v41 = vpop.f32.mrf.mxu1  ;;  %v10639_v33 = vld [vmem:[%s15761_s5 + $0x264] ss:$8 sps:$4 sm:$0xff]   ;;  %v10676_v36 = vld [vmem:[%s15761_s5 + $0x1c0] ss:$8 sps:$4 sm:$0xff]  }
 0x3a2   : > { %6877 = vmatprep.subr.bf16.mxu1 %v10618_v24  ;;  %9417 = vmatprep.mubr.msk.bf16.mxu1 %vm4685_vm6, %v14004_v14  ;;  %v10684_v24 = vld [vmem:[%s15761_s5 + $0x1b4] ss:$8 sps:$4 sm:$0xff]  }
 0x3a3   : > { %5232 = vmatmul.mubr.bf16.gmra.mxu0 %v13499_v16  ;;  %v4779_v0 = vpop.f32.mrf.mxu1 }
 0x3a4   : > { %6817 = vmatpush1.bf16.msra.mxu0 %v10589_v49  ;;  %v10637_v49 = vld [vmem:[%s15761_s5 + $0x260] ss:$8 sps:$4 sm:$0xff]  }
 0x3a5   : > { %6818 = vmatprep.subr.bf16.mxu0 %v10594_v46  ;;  %6878 = vmatpush1.bf16.msra.mxu1 %v10616_v9  ;;  %v14199_v14 = vpop.f32.mrf.mxu1  ;;  %v10645_v46 = vld [vmem:[%s15761_s5 + $0x254] ss:$8 sps:$4 sm:$0xff]   ;;  %v10682_v9 = vld [vmem:[%s15761_s5 + $0x1b0] ss:$8 sps:$4 sm:$0xff]  }
 0x3a6   : > { %6879 = vmatprep.subr.bf16.mxu1 %v10624_v48  ;;  %v5304_v40 = vpack.c.bf16 %v14199_v14, %v14182_v41  ;;  %v10690_v41 = vld [vmem:[%s15761_s5 + $0x1a4] ss:$8 sps:$4 sm:$0xff]   ;;  %v10696_v14 = vld [vmem:[%s15761_s5 + $0x194] ss:$8 sps:$4 sm:$0xff]  }
 0x3a7   : > { %v4783_v5 = vpop.f32.mrf.mxu1 }
 0x3a8   : > { %6819 = vmatpush1.bf16.msra.mxu0 %v10592_v43  ;;  %5281 = vmatmul.mubr.bf16.gmra.mxu1 %v14022_v32  ;;  %v5305_v11 = vpack.c.bf16 %v4783_v5, %v4779_v0  ;;  %v10598_v32 = vld [vmem:[%s15761_s5 + $0xe0] ss:$8 sps:$4 sm:$0xff]   ;;  %v10643_v43 = vld [vmem:[%s15761_s5 + $0x250] ss:$8 sps:$4 sm:$0xff]  }
 0x3a9   : > { %6820 = vmatprep.subr.bf16.mxu0 %v10597_v8  ;;  %6880 = vmatpush1.bf16.msra.mxu1 %v10622_v30  ;;  %v14217_v29 = vpop.f32.mrf.mxu1  ;;  %v10651_v8 = vld [vmem:[%s15761_s5 + $0x244] ss:$8 sps:$4 sm:$0xff]   ;;  %v10688_v30 = vld [vmem:[%s15761_s5 + $0x1a0] ss:$8 sps:$4 sm:$0xff]   ;;  %v10694_v5 = vld [vmem:[%s15761_s5 + $0x190] ss:$8 sps:$4 sm:$0xff]  }
 0x3aa   : > { %6881 = vmatprep.subr.bf16.mxu1 %v10630_v7  ;;  %9418 = vmatprep.mubr.msk.bf16.mxu1 %vm4685_vm6, %v13958_v52  ;;  %v10642_v52 = vld [vmem:[%s15761_s5 + $0x124] ss:$8 sps:$4 sm:$0xff]   ;;  %v10649_v7 = vld [vmem:[%s15761_s5 + $0x240] ss:$8 sps:$4 sm:$0xff]  }
 0x3ab   : > { %6836 = vmatprep.mubr.bf16.mxu0 %v5305_v11  ;;  %v14224_v51 = vpop.f32.mrf.mxu1 }
 0x3ac   : > { %6821 = vmatpush2.bf16.msra.mxu0 %v10595_v37  ;;  %v10657_v37 = vld [vmem:[%s15761_s5 + $0x234] ss:$8 sps:$4 sm:$0xff]  }
 0x3ad   : > { %6822 = vmatprep.subr.bf16.mxu0 %v10600_v47  ;;  %6882 = vmatpush1.bf16.msra.mxu1 %v10628_v28  ;;  %v14235_v22 = vpop.f32.mrf.mxu1  ;;  %v10702_v47 = vld [vmem:[%s15761_s5 + $0x184] ss:$8 sps:$4 sm:$0xff]   ;;  %v10655_v28 = vld [vmem:[%s15761_s5 + $0x230] ss:$8 sps:$4 sm:$0xff]  }
 0x3ae   : > { %6883 = vmatprep.subr.bf16.mxu1 %v10636_v20  ;;  %v5319_v48 = vpack.c.bf16 %v14235_v22, %v14217_v29  ;;  %v10663_v29 = vld [vmem:[%s15761_s5 + $0x224] ss:$8 sps:$4 sm:$0xff]   ;;  %v10667_v22 = vld [vmem:[%s15761_s5 + $0x210] ss:$8 sps:$4 sm:$0xff]  }
 0x3af   : > { %v14240_v2 = vpop.f32.mrf.mxu1 }
 0x3b0   : > { %6823 = vmatpush2.bf16.msra.mxu0 %v10598_v32  ;;  %5289 = vmatmul.mubr.bf16.gmra.mxu1 %v14046_v45  ;;  %v10604_v45 = vld [vmem:[%s15761_s5 + $0xc0] ss:$8 sps:$4 sm:$0xff]   ;;  %v5320_v10 = vpack.c.bf16 %v14240_v2, %v14224_v51  ;;  %v10708_v51 = vld [vmem:[%s15761_s5 + $0x374] ss:$8 sps:$4 sm:$0xff]  }
 0x3b1   : > { %6824 = vmatprep.subr.bf16.mxu0 %v10603_v57  ;;  %6884 = vmatpush1.bf16.msra.mxu1 %v10634_v3  ;;  %v14252_v63 = vpop.f32.mrf.mxu1  ;;  %v10700_v32 = vld [vmem:[%s15761_s5 + $0x180] ss:$8 sps:$4 sm:$0xff]   ;;  %v10669_v3 = vld [vmem:[%s15761_s5 + $0x214] ss:$8 sps:$4 sm:$0xff]  }
 0x3b2   : > { %6885 = vmatprep.subr.bf16.mxu1 %v10642_v52  ;;  %9419 = vmatprep.mubr.msk.bf16.mxu1 %vm4685_vm6, %v13488_v1  ;;  %v10654_v1 = vld [vmem:[%s15761_s5 + $0x104] ss:$8 sps:$4 sm:$0xff]   ;;  %v10661_v57 = vld [vmem:[%s15761_s5 + $0x220] ss:$8 sps:$4 sm:$0xff]  }
 0x3b3   : > { %v14259_v12 = vpop.f32.mrf.mxu1  ;;  %v10673_v2 = vld [vmem:[%s15761_s5 + $0x200] ss:$8 sps:$4 sm:$0xff]  }
 0x3b4   : > { %6825 = vmatpush2.bf16.msra.mxu0 %v10601_v54  ;;  %v10675_v54 = vld [vmem:[%s15761_s5 + $0x204] ss:$8 sps:$4 sm:$0xff]  }
 0x3b5   : > { %6826 = vmatprep.subr.bf16.mxu0 %v10606_v13  ;;  %6886 = vmatpush1.bf16.msra.mxu1 %v10640_v18  ;;  %v14270_v39 = vpop.f32.mrf.mxu1  ;;  %v10681_v13 = vld [vmem:[%s15761_s5 + $0x2f4] ss:$8 sps:$4 sm:$0xff]   ;;  %v10679_v18 = vld [vmem:[%s15761_s5 + $0x2f0] ss:$8 sps:$4 sm:$0xff]  }
 0x3b6   : > { %6887 = vmatprep.subr.bf16.mxu1 %v10648_v44  ;;  %v5334_v11 = vpack.c.bf16 %v14270_v39, %v14252_v63  ;;  %v10687_v44 = vld [vmem:[%s15761_s5 + $0x2e4] ss:$8 sps:$4 sm:$0xff]   ;;  %v10685_v63 = vld [vmem:[%s15761_s5 + $0x2e0] ss:$8 sps:$4 sm:$0xff]   ;;  %v10705_v39 = vld [vmem:[%s15761_s5 + $0x2b4] ss:$8 sps:$4 sm:$0xff]  }
 0x3b7   : > { %v14275_v17 = vpop.f32.mrf.mxu1 }
 0x3b8   : > { %6827 = vmatpush2.bf16.msra.mxu0 %v10604_v45  ;;  %5297 = vmatmul.mubr.bf16.gmra.mxu1 %v13499_v16  ;;  %v10613_v16 = vld [vmem:[%s15761_s5 + $0xa0] ss:$8 sps:$4 sm:$0xff]   ;;  %v5335_v0 = vpack.c.bf16 %v14275_v17, %v14259_v12  ;;  %v10693_v45 = vld [vmem:[%s15761_s5 + $0x2d4] ss:$8 sps:$4 sm:$0xff]   ;;  %v10691_v12 = vld [vmem:[%s15761_s5 + $0x2d0] ss:$8 sps:$4 sm:$0xff]  }
 0x3b9   : > { %6828 = vmatprep.subr.bf16.mxu0 %v10609_v58  ;;  %6888 = vmatpush1.bf16.msra.mxu1 %v10646_v53  ;;  %v14287_v23 = vpop.f32.mrf.mxu1  ;;  %v10699_v58 = vld [vmem:[%s15761_s5 + $0x2c4] ss:$8 sps:$4 sm:$0xff]  }
 0x3ba   : > { %6889 = vmatprep.subr.bf16.mxu1 %v10654_v1  ;;  %v5349_v52 = vpack.c.bf16 %v14287_v23, %v14287_v23  ;;  %v10697_v1 = vld [vmem:[%s15761_s5 + $0x2c0] ss:$8 sps:$4 sm:$0xff]  }
 0x3bb   : > { %v14292_v56 = vpop.f32.mrf.mxu1 }
 0x3bc   : > { %6829 = vmatpush2.bf16.msra.mxu0 %v10607_v27  ;;  %v5350_v20 = vpack.c.bf16 %v14292_v56, %v14292_v56 }
 0x3bd   : > { %6830 = vmatprep.subr.bf16.mxu0 %v10615_v31  ;;  %6890 = vmatpush1.bf16.msra.mxu1 %v10652_v19  ;;  %v4811_v60 = vpop.f32.mrf.mxu1  ;;  %v10703_v31 = vld [vmem:[%s15761_s5 + $0x2b0] ss:$8 sps:$4 sm:$0xff]   ;;  %v10711_v19 = vld [vmem:[%s15761_s5 + $0x2a4] ss:$8 sps:$4 sm:$0xff]  }
 0x3be   : > { %6891 = vmatprep.subr.bf16.mxu1 %v10660_v26  ;;  %v10717_v60 = vld [vmem:[%s15761_s5 + $0x294] ss:$8 sps:$4 sm:$0xff]  }
 0x3bf   : > { %v4812_v61 = vpop.f32.mrf.mxu1 }
 0x3c0   : > { %6831 = vmatpush2.bf16.msra.mxu0 %v10613_v16  ;;  %v10706_v16 = vld [vmem:[%s15761_s5 + $0x370] ss:$8 sps:$4 sm:$0xff]   ;;  %v10712_v61 = vld [vmem:[%s15761_s5 + $0x360] ss:$8 sps:$4 sm:$0xff]  }
 0x3c1   : > { %6832 = vmatprep.subr.bf16.mxu0 %v10621_v6  ;;  %6892 = vmatpush2.bf16.msra.mxu1 %v10658_v21  ;;  %v10709_v21 = vld [vmem:[%s15761_s5 + $0x2a0] ss:$8 sps:$4 sm:$0xff]  }
 0x3c2   : > { %6893 = vmatprep.subr.bf16.mxu1 %v10666_v25  ;;  %v10714_v25 = vld [vmem:[%s15761_s5 + $0x364] ss:$8 sps:$4 sm:$0xff]  }
 0x3c4   : > { %6833 = vmatpush2.bf16.msra.mxu0 %v10619_v50 }
 0x3c5   : > { %6834 = vmatprep.subr.bf16.mxu0 %v10627_v38  ;;  %6894 = vmatpush2.bf16.msra.mxu1 %v10664_v4  ;;  %v10715_v4 = vld [vmem:[%s15761_s5 + $0x290] ss:$8 sps:$4 sm:$0xff]  }
 0x3c6   : > { %6895 = vmatprep.subr.bf16.mxu1 %v10672_v55  ;;  %v10720_v55 = vld [vmem:[%s15761_s5 + $0x354] ss:$8 sps:$4 sm:$0xff]  }
 0x3c8   : > { %6835 = vmatpush2.bf16.msra.mxu0 %v10625_v15  ;;  %v10723_v15 = vld [vmem:[%s15761_s5 + $0x284] ss:$8 sps:$4 sm:$0xff]  }
 0x3c9   : > { %6946 = vmatprep.subr.bf16.mxu0 %v10633_v42  ;;  %6896 = vmatpush2.bf16.msra.mxu1 %v10670_v59 }
 0x3ca   : > { %6897 = vmatprep.subr.bf16.mxu1 %v10678_v35 }
 0x3cb   : > { %6837 = vmatmul.mubr.bf16.vlgmr.msra.gmra.mxu0 %v5304_v40 }
 0x3cc   : > { %6947 = vmatpush1.bf16.msra.mxu0 %v10631_v34  ;;  %6846 = vmatprep.mubr.bf16.mxu0 %v5320_v10  ;;  %v10718_v34 = vld [vmem:[%s15761_s5 + $0x350] ss:$8 sps:$4 sm:$0xff]  }
 0x3cd   : > { %6948 = vmatprep.subr.bf16.mxu0 %v10639_v33  ;;  %6898 = vmatpush2.bf16.msra.mxu1 %v10676_v36  ;;  %v10721_v33 = vld [vmem:[%s15761_s5 + $0x280] ss:$8 sps:$4 sm:$0xff]   ;;  %v10726_v36 = vld [vmem:[%s15761_s5 + $0x344] ss:$8 sps:$4 sm:$0xff]  }
 0x3ce   : > { %6899 = vmatprep.subr.bf16.mxu1 %v10684_v24 }
 0x3d0   : > { %6949 = vmatpush1.bf16.msra.mxu0 %v10637_v49  ;;  %v10729_v49 = vld [vmem:[%s15761_s5 + $0x474] ss:$8 sps:$4 sm:$0xff]  }
 0x3d1   : > { %6950 = vmatprep.subr.bf16.mxu0 %v10645_v46  ;;  %6900 = vmatpush2.bf16.msra.mxu1 %v10682_v9 }
 0x3d2   : > { %6901 = vmatprep.subr.bf16.mxu1 %v10690_v41  ;;  %v10724_v41 = vld [vmem:[%s15761_s5 + $0x340] ss:$8 sps:$4 sm:$0xff]  }
 0x3d3   : > { %6847 = vmatmul.mubr.bf16.gmra.mxu0 %v5319_v48 }
 0x3d4   : > { %6951 = vmatpush1.bf16.msra.mxu0 %v10643_v43  ;;  %6856 = vmatprep.mubr.bf16.mxu0 %v5335_v0  ;;  %v10732_v43 = vld [vmem:[%s15761_s5 + $0x334] ss:$8 sps:$4 sm:$0xff]  }
 0x3d5   : > { %6952 = vmatprep.subr.bf16.mxu0 %v10651_v8  ;;  %6902 = vmatpush2.bf16.msra.mxu1 %v10688_v30 }
 0x3d6   : > { %6903 = vmatprep.subr.bf16.mxu1 %v10696_v14 }
 0x3d8   : > { %6953 = vmatpush1.bf16.msra.mxu0 %v10649_v7 }
 0x3d9   : > { %6954 = vmatprep.subr.bf16.mxu0 %v10657_v37  ;;  %6904 = vmatpush2.bf16.msra.mxu1 %v10694_v5  ;;  %v10727_v37 = vld [vmem:[%s15761_s5 + $0x470] ss:$8 sps:$4 sm:$0xff]  }
 0x3da   : > { %6905 = vmatprep.subr.bf16.mxu1 %v10702_v47 }
 0x3db   : > { %6857 = vmatmul.mubr.bf16.gmra.mxu0 %v5334_v11  ;;  %v10730_v11 = vld [vmem:[%s15761_s5 + $0x330] ss:$8 sps:$4 sm:$0xff]  }
 0x3dc   : > { %6955 = vmatpush1.bf16.msra.mxu0 %v10655_v28  ;;  %6866 = vmatprep.mubr.bf16.mxu0 %v5350_v20  ;;  %v10735_v28 = vld [vmem:[%s15761_s5 + $0x464] ss:$8 sps:$4 sm:$0xff]  }
 0x3dd   : > { %6956 = vmatprep.subr.bf16.mxu0 %v10663_v29  ;;  %6906 = vmatpush2.bf16.msra.mxu1 %v10700_v32  ;;  %v10738_v29 = vld [vmem:[%s15761_s5 + $0x324] ss:$8 sps:$4 sm:$0xff]  }
 0x3de   : > { %7017 = vmatprep.subr.bf16.mxu1 %v10708_v51  ;;  %v10733_v51 = vld [vmem:[%s15761_s5 + $0x460] ss:$8 sps:$4 sm:$0xff]  }
 0x3e0   : > { %6957 = vmatpush1.bf16.msra.mxu0 %v10661_v57 }
 0x3e1   : > { %6958 = vmatprep.subr.bf16.mxu0 %v10669_v3 }
 0x3e3   : > { %6867 = vmatmul.mubr.bf16.gmra.mxu0 %v5349_v52  ;;  %v10736_v52 = vld [vmem:[%s15761_s5 + $0x320] ss:$8 sps:$4 sm:$0xff]  }
 0x3e4   : > { %6959 = vmatpush1.bf16.msra.mxu0 %v10667_v22 }
 0x3e5   : > { %6960 = vmatprep.subr.bf16.mxu0 %v10675_v54  ;;  %v10741_v54 = vld [vmem:[%s15761_s5 + $0x454] ss:$8 sps:$4 sm:$0xff]  }
 0x3e8   : > { %6961 = vmatpush1.bf16.msra.mxu0 %v10673_v2  ;;  %v10744_v2 = vld [vmem:[%s15761_s5 + $0x314] ss:$8 sps:$4 sm:$0xff]  }
 0x3e9   : > { %6962 = vmatprep.subr.bf16.mxu0 %v10681_v13 }
 0x3ec   : > { %6963 = vmatpush2.bf16.msra.mxu0 %v10679_v18 }
 0x3ed   : > { %6964 = vmatprep.subr.bf16.mxu0 %v10687_v44 }
 0x3f0   : > { %6965 = vmatpush2.bf16.msra.mxu0 %v10685_v63 }
 0x3f1   : > { %6966 = vmatprep.subr.bf16.mxu0 %v10693_v45 }
 0x3f3   : > { %v4848_v53 = vpop.f32.mrf.mxu1 }
 0x3f4   : > { %6967 = vmatpush2.bf16.msra.mxu0 %v10691_v12  ;;  %v10739_v12 = vld [vmem:[%s15761_s5 + $0x450] ss:$8 sps:$4 sm:$0xff]  }
 0x3f5   : > { %6968 = vmatprep.subr.bf16.mxu0 %v10699_v58  ;;  %v4850_v27 = vpop.f32.mrf.mxu1 }
 0x3f7   : > { %v4852_v17 = vpop.f32.mrf.mxu1 }
 0x3f8   : > { %6969 = vmatpush2.bf16.msra.mxu0 %v10697_v1  ;;  %v5306_v56 = vpack.c.bf16 %v4852_v17, %v4848_v53  ;;  %v10742_v1 = vld [vmem:[%s15761_s5 + $0x310] ss:$8 sps:$4 sm:$0xff]  }
 0x3f9   : > { %6970 = vmatprep.subr.bf16.mxu0 %v10705_v39  ;;  %v4854_v26 = vpop.f32.mrf.mxu1  ;;  %v10747_v39 = vld [vmem:[%s15761_s5 + $0x444] ss:$8 sps:$4 sm:$0xff]  }
 0x3fa   : > { %v5307_v23 = vpack.c.bf16 %v4854_v26, %v4850_v27  ;;  %v10750_v27 = vld [vmem:[%s15761_s5 + $0x304] ss:$8 sps:$4 sm:$0xff]   ;;  %v10748_v26 = vld [vmem:[%s15761_s5 + $0x300] ss:$8 sps:$4 sm:$0xff]  }
 0x3fb   : > { %v4858_v6 = vpop.f32.mrf.mxu1 }
 0x3fc   : > { %6971 = vmatpush2.bf16.msra.mxu0 %v10703_v31  ;;  %6907 = vmatprep.mubr.bf16.mxu1 %v5307_v23  ;;  %v10745_v31 = vld [vmem:[%s15761_s5 + $0x440] ss:$8 sps:$4 sm:$0xff]   ;;  %v10753_v23 = vld [vmem:[%s15761_s5 + $0x434] ss:$8 sps:$4 sm:$0xff]  }
 0x3fd   : > { %6972 = vmatprep.subr.bf16.mxu0 %v10711_v19  ;;  %v4860_v50 = vpop.f32.mrf.mxu1  ;;  %6908 = vmatmul.mubr.bf16.vlgmr.msra.gmra.mxu1 %v5306_v56 }
 0x3fe   : > { %7018 = vmatpush1.bf16.msra.mxu1 %v10706_v16  ;;  %v10756_v16 = vld [vmem:[%s15761_s5 + $0x3f4] ss:$8 sps:$4 sm:$0xff]  }
 0x3ff   : > { %v4862_v38 = vpop.f32.mrf.mxu1  ;;  %7019 = vmatprep.subr.bf16.mxu1 %v10714_v25 }
 0x400   : > { %6973 = vmatpush2.bf16.msra.mxu0 %v10709_v21  ;;  %v5321_v42 = vpack.c.bf16 %v4862_v38, %v4858_v6 }
 0x401   : > { %6974 = vmatprep.subr.bf16.mxu0 %v10717_v60  ;;  %v4864_v59 = vpop.f32.mrf.mxu1  ;;  %v10751_v60 = vld [vmem:[%s15761_s5 + $0x430] ss:$8 sps:$4 sm:$0xff]  }
 0x402   : > { %v5322_v35 = vpack.c.bf16 %v4864_v59, %v4860_v50  ;;  %7020 = vmatpush1.bf16.msra.mxu1 %v10712_v61  ;;  %v10754_v61 = vld [vmem:[%s15761_s5 + $0x3f0] ss:$8 sps:$4 sm:$0xff]   ;;  %v10757_v59 = vld [vmem:[%s15761_s5 + $0x420] ss:$8 sps:$4 sm:$0xff]  }
 0x403   : > { %v4919_v40 = vpop.f32.mrf.mxu0  ;;  %v4868_v10 = vpop.f32.mrf.mxu1  ;;  %7021 = vmatprep.subr.bf16.mxu1 %v10720_v55  ;;  %v10762_v55 = vld [vmem:[%s15761_s5 + $0x3e4] ss:$8 sps:$4 sm:$0xff]  }
 0x404   : > { %6975 = vmatpush2.bf16.msra.mxu0 %v10715_v4  ;;  %6917 = vmatprep.mubr.bf16.mxu1 %v5322_v35  ;;  %v10759_v4 = vld [vmem:[%s15761_s5 + $0x424] ss:$8 sps:$4 sm:$0xff]  }
 0x405   : > { %v4921_v24 = vpop.f32.mrf.mxu0  ;;  %6976 = vmatprep.subr.bf16.mxu0 %v10723_v15  ;;  %v4870_v46 = vpop.f32.mrf.mxu1  ;;  %6918 = vmatmul.mubr.bf16.gmra.mxu1 %v5321_v42 }
 0x406   : > { %7022 = vmatpush1.bf16.msra.mxu1 %v10718_v34  ;;  %v10760_v34 = vld [vmem:[%s15761_s5 + $0x3e0] ss:$8 sps:$4 sm:$0xff]  }
 0x407   : > { %v4923_v9 = vpop.f32.mrf.mxu0  ;;  %v4872_v48 = vpop.f32.mrf.mxu1  ;;  %7023 = vmatprep.subr.bf16.mxu1 %v10726_v36 }
 0x408   : > { %6977 = vmatpush2.bf16.msra.mxu0 %v10721_v33  ;;  %v5308_v0 = vpack.c.bf16 %v4923_v9, %v4919_v40  ;;  %v5336_v30 = vpack.c.bf16 %v4872_v48, %v4868_v10  ;;  %v10765_v10 = vld [vmem:[%s15761_s5 + $0x414] ss:$8 sps:$4 sm:$0xff]  }
 0x409   : > { %v4925_v8 = vpop.f32.mrf.mxu0  ;;  %7088 = vmatprep.subr.bf16.mxu0 %v10729_v49  ;;  %v4874_v7 = vpop.f32.mrf.mxu1 }
 0x40a   : > { %v5309_v14 = vpack.c.bf16 %v4925_v8, %v4921_v24  ;;  %v5337_v5 = vpack.c.bf16 %v4874_v7, %v4870_v46  ;;  %7024 = vmatpush1.bf16.msra.mxu1 %v10724_v41  ;;  %v10768_v24 = vld [vmem:[%s15761_s5 + $0x3d4] ss:$8 sps:$4 sm:$0xff]   ;;  %v10763_v41 = vld [vmem:[%s15761_s5 + $0x410] ss:$8 sps:$4 sm:$0xff]   ;;  %v10774_v8 = vld [vmem:[%s15761_s5 + $0x3c4] ss:$8 sps:$4 sm:$0xff]  }
 0x40b   : > { %v4929_v47 = vpop.f32.mrf.mxu0  ;;  %7025 = vmatprep.subr.bf16.mxu1 %v10732_v43  ;;  %v4878_v20 = vpop.f32.mrf.mxu1  ;;  %v10766_v43 = vld [vmem:[%s15761_s5 + $0x3d0] ss:$8 sps:$4 sm:$0xff]  }
 0x40c   : > { %6978 = vmatprep.mubr.bf16.mxu0 %v5309_v14  ;;  %6927 = vmatprep.mubr.bf16.mxu1 %v5337_v5  ;;  %v5351_v63 = vpack.c.bf16 %v4878_v20, %v4878_v20  ;;  %v10769_v14 = vld [vmem:[%s15761_s5 + $0x400] ss:$8 sps:$4 sm:$0xff]   ;;  %v10777_v5 = vld [vmem:[%s15761_s5 + $0x4f4] ss:$8 sps:$4 sm:$0xff]  }
 0x40d   : > { %v4931_v32 = vpop.f32.mrf.mxu0  ;;  %6979 = vmatmul.mubr.bf16.vlgmr.msra.gmra.mxu0 %v5308_v0  ;;  %6928 = vmatmul.mubr.bf16.gmra.mxu1 %v5336_v30  ;;  %v4880_v57 = vpop.f32.mrf.mxu1  ;;  %v10771_v0 = vld [vmem:[%s15761_s5 + $0x404] ss:$8 sps:$4 sm:$0xff]  }
 0x40e   : > { %7089 = vmatpush1.bf16.msra.mxu0 %v10727_v37  ;;  %7026 = vmatpush1.bf16.msra.mxu1 %v10730_v11  ;;  %v5352_v22 = vpack.c.bf16 %v4880_v57, %v4880_v57  ;;  %v10772_v37 = vld [vmem:[%s15761_s5 + $0x3c0] ss:$8 sps:$4 sm:$0xff]   ;;  %v10780_v11 = vld [vmem:[%s15761_s5 + $0x3b4] ss:$8 sps:$4 sm:$0xff]   ;;  %v10783_v57 = vld [vmem:[%s15761_s5 + $0x4e4] ss:$8 sps:$4 sm:$0xff]  }
 0x40f   : > { %v4933_v3 = vpop.f32.mrf.mxu0  ;;  %7090 = vmatprep.subr.bf16.mxu0 %v10735_v28  ;;  %7027 = vmatprep.subr.bf16.mxu1 %v10738_v29  ;;  %v4882_v13 = vpop.f32.mrf.mxu1  ;;  %v10775_v29 = vld [vmem:[%s15761_s5 + $0x4f0] ss:$8 sps:$4 sm:$0xff]  }
 0x410   : > { %v5323_v18 = vpack.c.bf16 %v4933_v3, %v4929_v47  ;;  %6937 = vmatprep.mubr.bf16.mxu1 %v5352_v22 }
 0x411   : > { %v4935_v44 = vpop.f32.mrf.mxu0  ;;  %v4883_v58 = vpop.f32.mrf.mxu1 }
 0x412   : > { %v5324_v45 = vpack.c.bf16 %v4935_v44, %v4931_v32  ;;  %7091 = vmatpush1.bf16.msra.mxu0 %v10733_v51  ;;  %7028 = vmatpush1.bf16.msra.mxu1 %v10736_v52  ;;  %v10778_v51 = vld [vmem:[%s15761_s5 + $0x3b0] ss:$8 sps:$4 sm:$0xff]   ;;  %v10786_v52 = vld [vmem:[%s15761_s5 + $0x3a4] ss:$8 sps:$4 sm:$0xff]   ;;  %v10784_v44 = vld [vmem:[%s15761_s5 + $0x3a0] ss:$8 sps:$4 sm:$0xff]  }
 0x413   : > { %v4939_v53 = vpop.f32.mrf.mxu0  ;;  %7092 = vmatprep.subr.bf16.mxu0 %v10741_v54  ;;  %7029 = vmatprep.subr.bf16.mxu1 %v10744_v2  ;;  %v10781_v2 = vld [vmem:[%s15761_s5 + $0x4e0] ss:$8 sps:$4 sm:$0xff]  }
 0x414   : > { %6988 = vmatprep.mubr.bf16.mxu0 %v5324_v45 }
 0x415   : > { %v4941_v17 = vpop.f32.mrf.mxu0  ;;  %6989 = vmatmul.mubr.bf16.gmra.mxu0 %v5323_v18  ;;  %6938 = vmatmul.mubr.bf16.gmra.mxu1 %v5351_v63  ;;  %v10789_v63 = vld [vmem:[%s15761_s5 + $0x4d4] ss:$8 sps:$4 sm:$0xff]  }
 0x416   : > { %7093 = vmatpush1.bf16.msra.mxu0 %v10739_v12  ;;  %7030 = vmatpush1.bf16.msra.mxu1 %v10742_v1  ;;  %v10792_v12 = vld [vmem:[%s15761_s5 + $0x394] ss:$8 sps:$4 sm:$0xff]   ;;  %v10787_v1 = vld [vmem:[%s15761_s5 + $0x4d0] ss:$8 sps:$4 sm:$0xff]  }
 0x417   : > { %v4943_v19 = vpop.f32.mrf.mxu0  ;;  %7094 = vmatprep.subr.bf16.mxu0 %v10747_v39  ;;  %7031 = vmatprep.subr.bf16.mxu1 %v10750_v27  ;;  %v10790_v27 = vld [vmem:[%s15761_s5 + $0x390] ss:$8 sps:$4 sm:$0xff]  }
 0x418   : > { %v14539_v56 = vpop.f32.mrf.mxu1  ;;  %v5338_v6 = vpack.c.bf16 %v4943_v19, %v4939_v53  ;;  %v10798_v19 = vld [vmem:[%s15761_s5 + $0x384] ss:$8 sps:$4 sm:$0xff]  }
 0x419   : > { %v4945_v21 = vpop.f32.mrf.mxu0 }
 0x41a   : > { %v5339_v25 = vpack.c.bf16 %v4945_v21, %v4941_v17  ;;  %7095 = vmatpush1.bf16.msra.mxu0 %v10745_v31  ;;  %v4992_v50 = vpop.f32.mrf.mxu1  ;;  %7032 = vmatpush1.bf16.msra.mxu1 %v10748_v26  ;;  %v10795_v17 = vld [vmem:[%s15761_s5 + $0x4c4] ss:$8 sps:$4 sm:$0xff]   ;;  %v10796_v21 = vld [vmem:[%s15761_s5 + $0x380] ss:$8 sps:$4 sm:$0xff]  }
 0x41b   : > { %7096 = vmatprep.subr.bf16.mxu0 %v10753_v23  ;;  %v4949_v38 = vpop.f32.mrf.mxu0  ;;  %7033 = vmatprep.subr.bf16.mxu1 %v10756_v16  ;;  %v10793_v16 = vld [vmem:[%s15761_s5 + $0x4c0] ss:$8 sps:$4 sm:$0xff]  }
 0x41c   : > { %6998 = vmatprep.mubr.bf16.mxu0 %v5339_v25  ;;  %v14553_v15 = vpop.f32.mrf.mxu1  ;;  %v5353_v46 = vpack.c.bf16 %v4949_v38, %v4949_v38  ;;  %v10801_v25 = vld [vmem:[%s15761_s5 + $0x4b4] ss:$8 sps:$4 sm:$0xff]   ;;  %v10799_v38 = vld [vmem:[%s15761_s5 + $0x4b0] ss:$8 sps:$4 sm:$0xff]  }
 0x41d   : > { %6999 = vmatmul.mubr.bf16.gmra.mxu0 %v5338_v6  ;;  %v4951_v42 = vpop.f32.mrf.mxu0 }
 0x41e   : > { %7097 = vmatpush1.bf16.msra.mxu0 %v10751_v60  ;;  %v5354_v35 = vpack.c.bf16 %v4951_v42, %v4951_v42  ;;  %v4996_v40 = vpop.f32.mrf.mxu1  ;;  %7034 = vmatpush2.bf16.msra.mxu1 %v10754_v61 }
 0x41f   : > { %7098 = vmatprep.subr.bf16.mxu0 %v10759_v4  ;;  %v4953_v33 = vpop.f32.mrf.mxu0  ;;  %v5311_v36 = vpack.c.bf16 %v4996_v40, %v4992_v50  ;;  %7035 = vmatprep.subr.bf16.mxu1 %v10762_v55  ;;  %v10804_v50 = vld [vmem:[%s15761_s5 + $0x574] ss:$8 sps:$4 sm:$0xff]   ;;  %v10802_v4 = vld [vmem:[%s15761_s5 + $0x570] ss:$8 sps:$4 sm:$0xff]   ;;  %v10807_v55 = vld [vmem:[%s15761_s5 + $0x4a4] ss:$8 sps:$4 sm:$0xff]  }
 0x420   : > { %7008 = vmatprep.mubr.bf16.mxu0 %v5354_v35  ;;  %v14567_v49 = vpop.f32.mrf.mxu1  ;;  %v10810_v40 = vld [vmem:[%s15761_s5 + $0x564] ss:$8 sps:$4 sm:$0xff]   ;;  %v10805_v33 = vld [vmem:[%s15761_s5 + $0x4a0] ss:$8 sps:$4 sm:$0xff]  }
 0x421   : > { %v4954_v9 = vpop.f32.mrf.mxu0  ;;  %7049 = vmatprep.mubr.bf16.mxu1 %v5311_v36 }
 0x422   : > { %7099 = vmatpush1.bf16.msra.mxu0 %v10757_v59  ;;  %v14572_v48 = vpop.f32.mrf.mxu1  ;;  %7036 = vmatpush2.bf16.msra.mxu1 %v10760_v34  ;;  %v5310_v59 = vpack.c.bf16 %v14553_v15, %v14539_v56  ;;  %v10808_v56 = vld [vmem:[%s15761_s5 + $0x560] ss:$8 sps:$4 sm:$0xff]   ;;  %v10813_v15 = vld [vmem:[%s15761_s5 + $0x494] ss:$8 sps:$4 sm:$0xff]  }
 0x423   : > { %7100 = vmatprep.subr.bf16.mxu0 %v10765_v10  ;;  %7037 = vmatprep.subr.bf16.mxu1 %v10768_v24 }
 0x424   : > { %v14583_v30 = vpop.f32.mrf.mxu1 }
 0x425   : > { %7009 = vmatmul.mubr.bf16.gmra.mxu0 %v5353_v46  ;;  %v10816_v46 = vld [vmem:[%s15761_s5 + $0x554] ss:$8 sps:$4 sm:$0xff]  }
 0x426   : > { %7101 = vmatpush1.bf16.msra.mxu0 %v10763_v41  ;;  %v14588_v7 = vpop.f32.mrf.mxu1  ;;  %7038 = vmatpush2.bf16.msra.mxu1 %v10766_v43  ;;  %v10811_v43 = vld [vmem:[%s15761_s5 + $0x490] ss:$8 sps:$4 sm:$0xff]  }
 0x427   : > { %7102 = vmatprep.subr.bf16.mxu0 %v10771_v0  ;;  %v14596_v47 = vpop.f32.mrf.mxu0  ;;  %7039 = vmatprep.subr.bf16.mxu1 %v10774_v8  ;;  %v5326_v35 = vpack.c.bf16 %v14588_v7, %v14572_v48  ;;  %v5325_v48 = vpack.c.bf16 %v14583_v30, %v14567_v49  ;;  %v10814_v8 = vld [vmem:[%s15761_s5 + $0x550] ss:$8 sps:$4 sm:$0xff]   ;;  %v10822_v30 = vld [vmem:[%s15761_s5 + $0x544] ss:$8 sps:$4 sm:$0xff]  }
 0x428   : > { %v14601_v28 = vpop.f32.mrf.mxu1 }
 0x429   : > { %v5063_v20 = vpop.f32.mrf.mxu0 }
 0x42a   : > { %7103 = vmatpush1.bf16.msra.mxu0 %v10769_v14  ;;  %v14606_v32 = vpop.f32.mrf.mxu1  ;;  %7040 = vmatpush2.bf16.msra.mxu1 %v10772_v37  ;;  %v10819_v14 = vld [vmem:[%s15761_s5 + $0x484] ss:$8 sps:$4 sm:$0xff]  }
 0x42b   : > { %7104 = vmatprep.subr.bf16.mxu0 %v10777_v5  ;;  %v14614_v3 = vpop.f32.mrf.mxu0  ;;  %7041 = vmatprep.subr.bf16.mxu1 %v10780_v11  ;;  %v10817_v11 = vld [vmem:[%s15761_s5 + $0x480] ss:$8 sps:$4 sm:$0xff]  }
 0x42c   : > { %v14619_v22 = vpop.f32.mrf.mxu1 }
 0x42d   : > { %v5067_v54 = vpop.f32.mrf.mxu0 }
 0x42e   : > { %7105 = vmatpush2.bf16.msra.mxu0 %v10775_v29  ;;  %v5313_v13 = vpack.c.bf16 %v5067_v54, %v5063_v20  ;;  %v14624_v18 = vpop.f32.mrf.mxu1  ;;  %7042 = vmatpush2.bf16.msra.mxu1 %v10778_v51  ;;  %v10820_v29 = vld [vmem:[%s15761_s5 + $0x540] ss:$8 sps:$4 sm:$0xff]   ;;  %v10828_v51 = vld [vmem:[%s15761_s5 + $0x534] ss:$8 sps:$4 sm:$0xff]  }
 0x42f   : > { %7106 = vmatprep.subr.bf16.mxu0 %v10783_v57  ;;  %v14632_v45 = vpop.f32.mrf.mxu0  ;;  %7043 = vmatprep.subr.bf16.mxu1 %v10786_v52  ;;  %v5341_v49 = vpack.c.bf16 %v14624_v18, %v14606_v32  ;;  %v10825_v32 = vld [vmem:[%s15761_s5 + $0x674] ss:$8 sps:$4 sm:$0xff]   ;;  %v10823_v52 = vld [vmem:[%s15761_s5 + $0x670] ss:$8 sps:$4 sm:$0xff]   ;;  %v10831_v18 = vld [vmem:[%s15761_s5 + $0x664] ss:$8 sps:$4 sm:$0xff]  }
 0x430   : > { %7120 = vmatprep.mubr.bf16.mxu0 %v5313_v13  ;;  %v14637_v58 = vpop.f32.mrf.mxu1  ;;  %v5340_v13 = vpack.c.bf16 %v14619_v22, %v14601_v28 }
 0x431   : > { %v14639_v53 = vpop.f32.mrf.mxu0 }
 0x432   : > { %7107 = vmatpush2.bf16.msra.mxu0 %v10781_v2  ;;  %v14644_v39 = vpop.f32.mrf.mxu1  ;;  %7044 = vmatpush2.bf16.msra.mxu1 %v10784_v44  ;;  %v5312_v2 = vpack.c.bf16 %v14614_v3, %v14596_v47  ;;  %v10834_v3 = vld [vmem:[%s15761_s5 + $0x524] ss:$8 sps:$4 sm:$0xff]  }
 0x433   : > { %7108 = vmatprep.subr.bf16.mxu0 %v10789_v63  ;;  %v14652_v31 = vpop.f32.mrf.mxu0  ;;  %7045 = vmatprep.subr.bf16.mxu1 %v10792_v12  ;;  %v10826_v12 = vld [vmem:[%s15761_s5 + $0x530] ss:$8 sps:$4 sm:$0xff]   ;;  %v5356_v47 = vpack.c.bf16 %v14644_v39, %v14644_v39  ;;  %v10837_v39 = vld [vmem:[%s15761_s5 + $0x654] ss:$8 sps:$4 sm:$0xff]  }
 0x434   : > { %v5024_v26 = vpop.f32.mrf.mxu1 }
 0x435   : > { %v14657_v23 = vpop.f32.mrf.mxu0  ;;  %v10840_v26 = vld [vmem:[%s15761_s5 + $0x514] ss:$8 sps:$4 sm:$0xff]  }
 0x436   : > { %7109 = vmatpush2.bf16.msra.mxu0 %v10787_v1  ;;  %v5025_v6 = vpop.f32.mrf.mxu1  ;;  %7046 = vmatpush2.bf16.msra.mxu1 %v10790_v27  ;;  %v5328_v63 = vpack.c.bf16 %v14657_v23, %v14639_v53  ;;  %v10829_v53 = vld [vmem:[%s15761_s5 + $0x660] ss:$8 sps:$4 sm:$0xff]  }
 0x437   : > { %7110 = vmatprep.subr.bf16.mxu0 %v10795_v17  ;;  %v14668_v60 = vpop.f32.mrf.mxu0  ;;  %7047 = vmatprep.subr.bf16.mxu1 %v10798_v19  ;;  %v10832_v17 = vld [vmem:[%s15761_s5 + $0x520] ss:$8 sps:$4 sm:$0xff]  }
 0x439   : > { %v14673_v61 = vpop.f32.mrf.mxu0 }
 0x43a   : > { %7111 = vmatpush2.bf16.msra.mxu0 %v10793_v16  ;;  %7048 = vmatpush2.bf16.msra.mxu1 %v10796_v21  ;;  %v10835_v16 = vld [vmem:[%s15761_s5 + $0x650] ss:$8 sps:$4 sm:$0xff]   ;;  %v5327_v21 = vpack.c.bf16 %v14652_v31, %v14632_v45 }
 0x43b   : > { %7112 = vmatprep.subr.bf16.mxu0 %v10801_v25  ;;  %v14684_v42 = vpop.f32.mrf.mxu0  ;;  %7159 = vmatprep.subr.bf16.mxu1 %v10804_v50  ;;  %v5355_v25 = vpack.c.bf16 %v14637_v58, %v14637_v58  ;;  %v10843_v50 = vld [vmem:[%s15761_s5 + $0x644] ss:$8 sps:$4 sm:$0xff]  }
 0x43c   : > { %v14693_v34 = vpop.f32.mrf.mxu1  ;;  %v10846_v58 = vld [vmem:[%s15761_s5 + $0x504] ss:$8 sps:$4 sm:$0xff]  }
 0x43d   : > { %v14695_v10 = vpop.f32.mrf.mxu0  ;;  %7050 = vmatmul.mubr.bf16.vlgmr.msra.gmra.mxu1 %v5310_v59 }
 0x43e   : > { %7113 = vmatpush2.bf16.msra.mxu0 %v10799_v38  ;;  %v14700_v36 = vpop.f32.mrf.mxu1  ;;  %7160 = vmatpush1.bf16.msra.mxu1 %v10802_v4  ;;  %v5343_v4 = vpack.c.bf16 %v14695_v10, %v14673_v61  ;;  %v10841_v61 = vld [vmem:[%s15761_s5 + $0x640] ss:$8 sps:$4 sm:$0xff]  }
 0x43f   : > { %7114 = vmatprep.subr.bf16.mxu0 %v10807_v55  ;;  %v14708_v24 = vpop.f32.mrf.mxu0  ;;  %7161 = vmatprep.subr.bf16.mxu1 %v10810_v40  ;;  %v10838_v55 = vld [vmem:[%s15761_s5 + $0x510] ss:$8 sps:$4 sm:$0xff]   ;;  %v10849_v40 = vld [vmem:[%s15761_s5 + $0x634] ss:$8 sps:$4 sm:$0xff]  }
 0x440   : > { %7059 = vmatprep.mubr.bf16.mxu1 %v5326_v35  ;;  %v14713_v9 = vpop.f32.mrf.mxu1 }
 0x441   : > { %v14715_v41 = vpop.f32.mrf.mxu0 }
 0x442   : > { %7115 = vmatpush2.bf16.msra.mxu0 %v10805_v33  ;;  %v14722_v0 = vpop.f32.mrf.mxu1  ;;  %7162 = vmatpush1.bf16.msra.mxu1 %v10808_v56  ;;  %v10844_v33 = vld [vmem:[%s15761_s5 + $0x500] ss:$8 sps:$4 sm:$0xff]   ;;  %v10852_v56 = vld [vmem:[%s15761_s5 + $0x5f4] ss:$8 sps:$4 sm:$0xff]  }
 0x443   : > { %7116 = vmatprep.subr.bf16.mxu0 %v10813_v15  ;;  %v5095_v7 = vpop.f32.mrf.mxu0  ;;  %7163 = vmatprep.subr.bf16.mxu1 %v10816_v46  ;;  %v5315_v45 = vpack.c.bf16 %v14722_v0, %v14700_v36  ;;  %v10847_v46 = vld [vmem:[%s15761_s5 + $0x630] ss:$8 sps:$4 sm:$0xff]   ;;  %v10855_v0 = vld [vmem:[%s15761_s5 + $0x624] ss:$8 sps:$4 sm:$0xff]  }
 0x444   : > { %v14735_v37 = vpop.f32.mrf.mxu1  ;;  %v10850_v7 = vld [vmem:[%s15761_s5 + $0x5f0] ss:$8 sps:$4 sm:$0xff]  }
 0x445   : > { %v5096_v5 = vpop.f32.mrf.mxu0  ;;  %7060 = vmatmul.mubr.bf16.gmra.mxu1 %v5325_v48 }
 0x446   : > { %7117 = vmatpush2.bf16.msra.mxu0 %v10811_v43  ;;  %v14740_v20 = vpop.f32.mrf.mxu1  ;;  %7164 = vmatpush1.bf16.msra.mxu1 %v10814_v8  ;;  %v5342_v43 = vpack.c.bf16 %v14684_v42, %v14668_v60  ;;  %v10858_v60 = vld [vmem:[%s15761_s5 + $0x5e4] ss:$8 sps:$4 sm:$0xff]   ;;  %v10856_v5 = vld [vmem:[%s15761_s5 + $0x5e0] ss:$8 sps:$4 sm:$0xff]  }
 0x447   : > { %7118 = vmatprep.subr.bf16.mxu0 %v10819_v14  ;;  %7165 = vmatprep.subr.bf16.mxu1 %v10822_v30  ;;  %v5358_v14 = vpack.c.bf16 %v14715_v41, %v14715_v41  ;;  %v10861_v41 = vld [vmem:[%s15761_s5 + $0x614] ss:$8 sps:$4 sm:$0xff]  }
 0x448   : > { %7069 = vmatprep.mubr.bf16.mxu1 %v5341_v49  ;;  %v14751_v57 = vpop.f32.mrf.mxu1  ;;  %v10853_v49 = vld [vmem:[%s15761_s5 + $0x620] ss:$8 sps:$4 sm:$0xff]  }
 0x44a   : > { %7119 = vmatpush2.bf16.msra.mxu0 %v10817_v11  ;;  %v14756_v54 = vpop.f32.mrf.mxu1  ;;  %7166 = vmatpush1.bf16.msra.mxu1 %v10820_v29  ;;  %v10864_v29 = vld [vmem:[%s15761_s5 + $0x5d4] ss:$8 sps:$4 sm:$0xff]  }
 0x44b   : > { %7230 = vmatprep.subr.bf16.mxu0 %v10825_v32  ;;  %v14765_v44 = vpop.f32.mrf.mxu0  ;;  %7167 = vmatprep.subr.bf16.mxu1 %v10828_v51  ;;  %v10859_v51 = vld [vmem:[%s15761_s5 + $0x610] ss:$8 sps:$4 sm:$0xff]  }
 0x44c   : > { %v14774_v28 = vpop.f32.mrf.mxu1 }
 0x44d   : > { %7121 = vmatmul.mubr.bf16.vlgmr.msra.gmra.mxu0 %v5312_v2  ;;  %v14779_v22 = vpop.f32.mrf.mxu0  ;;  %7070 = vmatmul.mubr.bf16.gmra.mxu1 %v5340_v13  ;;  %v5357_v2 = vpack.c.bf16 %v14708_v24, %v14708_v24  ;;  %v10867_v13 = vld [vmem:[%s15761_s5 + $0x604] ss:$8 sps:$4 sm:$0xff]  }
 0x44e   : > { %7130 = vmatprep.mubr.bf16.mxu0 %v5328_v63  ;;  %7231 = vmatpush1.bf16.msra.mxu0 %v10823_v52  ;;  %v14784_v1 = vpop.f32.mrf.mxu1  ;;  %v10870_v24 = vld [vmem:[%s15761_s5 + $0x5c4] ss:$8 sps:$4 sm:$0xff]  }
 0x44f   : > { %7232 = vmatprep.subr.bf16.mxu0 %v10831_v18  ;;  %v14789_v27 = vpop.f32.mrf.mxu0  ;;  %7168 = vmatpush1.bf16.msra.mxu1 %v10826_v12  ;;  %v10862_v12 = vld [vmem:[%s15761_s5 + $0x5d0] ss:$8 sps:$4 sm:$0xff]  }
 0x450   : > { %7079 = vmatprep.mubr.bf16.mxu1 %v5356_v47  ;;  %v14794_v19 = vpop.f32.mrf.mxu1  ;;  %7169 = vmatprep.subr.bf16.mxu1 %v10834_v3 }
 0x451   : > { %v14799_v23 = vpop.f32.mrf.mxu0 }
 0x452   : > { %7233 = vmatpush1.bf16.msra.mxu0 %v10829_v53  ;;  %v14804_v6 = vpop.f32.mrf.mxu1  ;;  %v5317_v63 = vpack.c.bf16 %v14799_v23, %v14779_v22  ;;  %v10865_v22 = vld [vmem:[%s15761_s5 + $0x600] ss:$8 sps:$4 sm:$0xff]  }
 0x453   : > { %7234 = vmatprep.subr.bf16.mxu0 %v10837_v39  ;;  %v14813_v38 = vpop.f32.mrf.mxu0  ;;  %7170 = vmatpush1.bf16.msra.mxu1 %v10832_v17  ;;  %v10873_v39 = vld [vmem:[%s15761_s5 + $0x6f4] ss:$8 sps:$4 sm:$0xff]  }
 0x454   : > { %v14822_v31 = vpop.f32.mrf.mxu1  ;;  %7171 = vmatprep.subr.bf16.mxu1 %v10840_v26  ;;  %v10868_v26 = vld [vmem:[%s15761_s5 + $0x5c0] ss:$8 sps:$4 sm:$0xff]  }
 0x455   : > { %7131 = vmatmul.mubr.bf16.gmra.mxu0 %v5327_v21  ;;  %v14827_v59 = vpop.f32.mrf.mxu0  ;;  %7080 = vmatmul.mubr.bf16.gmra.mxu1 %v5355_v25  ;;  %v10871_v25 = vld [vmem:[%s15761_s5 + $0x6f0] ss:$8 sps:$4 sm:$0xff]  }
 0x456   : > { %7140 = vmatprep.mubr.bf16.mxu0 %v5343_v4  ;;  %7235 = vmatpush1.bf16.msra.mxu0 %v10835_v16  ;;  %v14832_v35 = vpop.f32.mrf.mxu1  ;;  %v10876_v16 = vld [vmem:[%s15761_s5 + $0x5b4] ss:$8 sps:$4 sm:$0xff]   ;;  %v10879_v4 = vld [vmem:[%s15761_s5 + $0x6e4] ss:$8 sps:$4 sm:$0xff]  }
 0x457   : > { %7236 = vmatprep.subr.bf16.mxu0 %v10843_v50  ;;  %v14837_v10 = vpop.f32.mrf.mxu0  ;;  %7172 = vmatpush1.bf16.msra.mxu1 %v10838_v55  ;;  %v10874_v55 = vld [vmem:[%s15761_s5 + $0x5b0] ss:$8 sps:$4 sm:$0xff]  }
 0x458   : > { %7191 = vmatprep.mubr.bf16.mxu1 %v5315_v45  ;;  %v5166_v36 = vpop.f32.mrf.mxu1  ;;  %7173 = vmatprep.subr.bf16.mxu1 %v10846_v58  ;;  %v10882_v58 = vld [vmem:[%s15761_s5 + $0x5a4] ss:$8 sps:$4 sm:$0xff]  }
 0x459   : > { %v14845_v15 = vpop.f32.mrf.mxu0  ;;  %v10880_v36 = vld [vmem:[%s15761_s5 + $0x5a0] ss:$8 sps:$4 sm:$0xff]  }
 0x45a   : > { %7237 = vmatpush1.bf16.msra.mxu0 %v10841_v61  ;;  %v5167_v48 = vpop.f32.mrf.mxu1  ;;  %v10877_v61 = vld [vmem:[%s15761_s5 + $0x6e0] ss:$8 sps:$4 sm:$0xff]  }
 0x45b   : > { %7238 = vmatprep.subr.bf16.mxu0 %v10849_v40  ;;  %v14855_v8 = vpop.f32.mrf.mxu0  ;;  %7174 = vmatpush1.bf16.msra.mxu1 %v10844_v33  ;;  %v10885_v33 = vld [vmem:[%s15761_s5 + $0x6d4] ss:$8 sps:$4 sm:$0xff]   ;;  %v10883_v48 = vld [vmem:[%s15761_s5 + $0x6d0] ss:$8 sps:$4 sm:$0xff]  }
 0x45c   : > { %7175 = vmatprep.subr.bf16.mxu1 %v10852_v56 }
 0x45d   : > { %7141 = vmatmul.mubr.bf16.gmra.mxu0 %v5342_v43  ;;  %v14865_v42 = vpop.f32.mrf.mxu0 }
 0x45e   : > { %7150 = vmatprep.mubr.bf16.mxu0 %v5358_v14  ;;  %7239 = vmatpush1.bf16.msra.mxu0 %v10847_v46  ;;  %v10888_v46 = vld [vmem:[%s15761_s5 + $0x594] ss:$8 sps:$4 sm:$0xff]   ;;  %v10886_v14 = vld [vmem:[%s15761_s5 + $0x590] ss:$8 sps:$4 sm:$0xff]  }
 0x45f   : > { %7240 = vmatprep.subr.bf16.mxu0 %v10855_v0  ;;  %v14873_v30 = vpop.f32.mrf.mxu0  ;;  %7176 = vmatpush2.bf16.msra.mxu1 %v10850_v7  ;;  %v10891_v0 = vld [vmem:[%s15761_s5 + $0x6c4] ss:$8 sps:$4 sm:$0xff]  }
 0x460   : > { %v14878_v11 = vpop.f32.mrf.mxu1  ;;  %7177 = vmatprep.subr.bf16.mxu1 %v10858_v60  ;;  %v10894_v60 = vld [vmem:[%s15761_s5 + $0x584] ss:$8 sps:$4 sm:$0xff]  }
 0x461   : > { %v14883_v32 = vpop.f32.mrf.mxu0 }
 0x462   : > { %7241 = vmatpush1.bf16.msra.mxu0 %v10853_v49  ;;  %v5276_v52 = vpop.f32.mrf.mxu1  ;;  %v10889_v49 = vld [vmem:[%s15761_s5 + $0x6c0] ss:$8 sps:$4 sm:$0xff]  }
 0x463   : > { %7242 = vmatprep.subr.bf16.mxu0 %v10861_v41  ;;  %v14893_v18 = vpop.f32.mrf.mxu0  ;;  %7178 = vmatpush2.bf16.msra.mxu1 %v10856_v5  ;;  %v10897_v5 = vld [vmem:[%s15761_s5 + $0x6b4] ss:$8 sps:$4 sm:$0xff]  }
 0x464   : > { %v14900_v47 = vpop.f32.mrf.mxu1  ;;  %7179 = vmatprep.subr.bf16.mxu1 %v10864_v29  ;;  %v10892_v29 = vld [vmem:[%s15761_s5 + $0x580] ss:$8 sps:$4 sm:$0xff]   ;;  %v10900_v52 = vld [vmem:[%s15761_s5 + $0x774] ss:$8 sps:$4 sm:$0xff]  }
 0x465   : > { %7151 = vmatmul.mubr.bf16.gmra.mxu0 %v5357_v2  ;;  %v14905_v3 = vpop.f32.mrf.mxu0  ;;  %v10895_v2 = vld [vmem:[%s15761_s5 + $0x6b0] ss:$8 sps:$4 sm:$0xff]  }
 0x466   : > { %7243 = vmatpush1.bf16.msra.mxu0 %v10859_v51  ;;  %7262 = vmatprep.mubr.bf16.mxu0 %v5317_v63  ;;  %v5279_v53 = vpop.f32.mrf.mxu1  ;;  %v10903_v63 = vld [vmem:[%s15761_s5 + $0x6a4] ss:$8 sps:$4 sm:$0xff]  }
 0x467   : > { %7244 = vmatprep.subr.bf16.mxu0 %v10867_v13  ;;  %v5237_v17 = vpop.f32.mrf.mxu0  ;;  %7180 = vmatpush2.bf16.msra.mxu1 %v10862_v12  ;;  %v10898_v12 = vld [vmem:[%s15761_s5 + $0x770] ss:$8 sps:$4 sm:$0xff]   ;;  %v10906_v53 = vld [vmem:[%s15761_s5 + $0x764] ss:$8 sps:$4 sm:$0xff]  }
 0x468   : > { %v14916_v23 = vpop.f32.mrf.mxu1  ;;  %7181 = vmatprep.subr.bf16.mxu1 %v10870_v24  ;;  %v10901_v17 = vld [vmem:[%s15761_s5 + $0x6a0] ss:$8 sps:$4 sm:$0xff]  }
 0x469   : > { %v5238_v21 = vpop.f32.mrf.mxu0 }
 0x46a   : > { %7245 = vmatpush1.bf16.msra.mxu0 %v10865_v22  ;;  %v5284_v50 = vpop.f32.mrf.mxu1  ;;  %v5314_v22 = vpack.c.bf16 %v14713_v9, %v14693_v34  ;;  %v10909_v34 = vld [vmem:[%s15761_s5 + $0x694] ss:$8 sps:$4 sm:$0xff]   ;;  %v10904_v9 = vld [vmem:[%s15761_s5 + $0x760] ss:$8 sps:$4 sm:$0xff]   ;;  %v10910_v21 = vld [vmem:[%s15761_s5 + $0x750] ss:$8 sps:$4 sm:$0xff]  }
 0x46b   : > { %7246 = vmatprep.subr.bf16.mxu0 %v10873_v39  ;;  %7182 = vmatpush2.bf16.msra.mxu1 %v10868_v26  ;;  %v5330_v39 = vpack.c.bf16 %v14756_v54, %v14740_v20  ;;  %v10912_v20 = vld [vmem:[%s15761_s5 + $0x754] ss:$8 sps:$4 sm:$0xff]   ;;  %v10907_v54 = vld [vmem:[%s15761_s5 + $0x690] ss:$8 sps:$4 sm:$0xff]   ;;  %v10918_v50 = vld [vmem:[%s15761_s5 + $0x744] ss:$8 sps:$4 sm:$0xff]  }
 0x46c   : > { %v14930_v45 = vpop.f32.mrf.mxu1  ;;  %7183 = vmatprep.subr.bf16.mxu1 %v10876_v16  ;;  %v10915_v16 = vld [vmem:[%s15761_s5 + $0x684] ss:$8 sps:$4 sm:$0xff]  }
 0x46e   : > { %7247 = vmatpush2.bf16.msra.mxu0 %v10871_v25  ;;  %v5287_v40 = vpop.f32.mrf.mxu1  ;;  %v5329_v25 = vpack.c.bf16 %v14751_v57, %v14735_v37  ;;  %v10916_v37 = vld [vmem:[%s15761_s5 + $0x740] ss:$8 sps:$4 sm:$0xff]   ;;  %v10921_v57 = vld [vmem:[%s15761_s5 + $0x734] ss:$8 sps:$4 sm:$0xff]  }
 0x46f   : > { %7248 = vmatprep.subr.bf16.mxu0 %v10879_v4  ;;  %7184 = vmatpush2.bf16.msra.mxu1 %v10874_v55  ;;  %v5345_v4 = vpack.c.bf16 %v14804_v6, %v14784_v1  ;;  %v10913_v55 = vld [vmem:[%s15761_s5 + $0x680] ss:$8 sps:$4 sm:$0xff]   ;;  %v5316_v1 = vpack.c.bf16 %v14789_v27, %v14765_v44  ;;  %v5344_v40 = vpack.c.bf16 %v14794_v19, %v14774_v28  ;;  %v10927_v28 = vld [vmem:[%s15761_s5 + $0x714] ss:$8 sps:$4 sm:$0xff]  }
 0x470   : > { %v14944_v56 = vpop.f32.mrf.mxu1  ;;  %7185 = vmatprep.subr.bf16.mxu1 %v10882_v58  ;;  %v5332_v58 = vpack.c.bf16 %v14845_v15, %v14827_v59  ;;  %v5360_v27 = vpack.c.bf16 %v14832_v35, %v14832_v35  ;;  %v10922_v15 = vld [vmem:[%s15761_s5 + $0x720] ss:$8 sps:$4 sm:$0xff]   ;;  %v5347_v35 = vpack.c.bf16 %v14883_v32, %v14865_v42 }
 0x472   : > { %7249 = vmatpush2.bf16.msra.mxu0 %v10877_v61  ;;  %v5292_v43 = vpop.f32.mrf.mxu1  ;;  %v10919_v61 = vld [vmem:[%s15761_s5 + $0x730] ss:$8 sps:$4 sm:$0xff]  }
 0x473   : > { %7250 = vmatprep.subr.bf16.mxu0 %v10885_v33  ;;  %7186 = vmatpush2.bf16.msra.mxu1 %v10880_v36  ;;  %v10924_v33 = vld [vmem:[%s15761_s5 + $0x724] ss:$8 sps:$4 sm:$0xff]   ;;  %v5331_v36 = vpack.c.bf16 %v14837_v10, %v14813_v38  ;;  %v5359_v43 = vpack.c.bf16 %v14822_v31, %v14822_v31  ;;  %v10928_v10 = vld [vmem:[%s15761_s5 + $0x700] ss:$8 sps:$4 sm:$0xff]   ;;  %v5346_v31 = vpack.c.bf16 %v14873_v30, %v14855_v8 }
 0x474   : > { %v14958_v7 = vpop.f32.mrf.mxu1  ;;  %7187 = vmatprep.subr.bf16.mxu1 %v10888_v46  ;;  %v5333_v30 = vpack.c.bf16 %v14930_v45, %v14916_v23 }
 0x476   : > { %7251 = vmatpush2.bf16.msra.mxu0 %v10883_v48  ;;  %v5295_v41 = vpop.f32.mrf.mxu1  ;;  %v10925_v48 = vld [vmem:[%s15761_s5 + $0x710] ss:$8 sps:$4 sm:$0xff]  }
 0x477   : > { %7252 = vmatprep.subr.bf16.mxu0 %v10891_v0  ;;  %7188 = vmatpush2.bf16.msra.mxu1 %v10886_v14  ;;  %v10930_v0 = vld [vmem:[%s15761_s5 + $0x704] ss:$8 sps:$4 sm:$0xff]  }
 0x478   : > { %v14972_v51 = vpop.f32.mrf.mxu1  ;;  %7189 = vmatprep.subr.bf16.mxu1 %v10894_v60  ;;  %v5362_v60 = vpack.c.bf16 %v14905_v3, %v14905_v3 }
 0x47a   : > { %7253 = vmatpush2.bf16.msra.mxu0 %v10889_v49  ;;  %v5300_v13 = vpop.f32.mrf.mxu1  ;;  %v5318_v49 = vpack.c.bf16 %v14900_v47, %v14878_v11 }
 0x47b   : > { %7254 = vmatprep.subr.bf16.mxu0 %v10897_v5  ;;  %7190 = vmatpush2.bf16.msra.mxu1 %v10892_v29 }
 0x47c   : > { %v5301_v24 = vpop.f32.mrf.mxu1  ;;  %7301 = vmatprep.subr.bf16.mxu1 %v10900_v52  ;;  %v5361_v52 = vpack.c.bf16 %v14893_v18, %v14893_v18  ;;  %v5363_v18 = vpack.c.bf16 %v14972_v51, %v14972_v51 }
 0x47e   : > { %7255 = vmatpush2.bf16.msra.mxu0 %v10895_v2  ;;  %v5302_v26 = vpop.f32.mrf.mxu1  ;;  %7192 = vmatmul.mubr.bf16.vlgmr.msra.gmra.mxu1 %v5314_v22  ;;  %v5348_v2 = vpack.c.bf16 %v14958_v7, %v14944_v56 }
 0x47f   : > { %7256 = vmatprep.subr.bf16.mxu0 %v10903_v63  ;;  %7201 = vmatprep.mubr.bf16.mxu1 %v5330_v39 }
 0x480   : > { %7302 = vmatpush1.bf16.msra.mxu1 %v10898_v12 }
 0x481   : > { %7303 = vmatprep.subr.bf16.mxu1 %v10906_v53 }
 0x482   : > { %7257 = vmatpush2.bf16.msra.mxu0 %v10901_v17 }
 0x483   : > { %7258 = vmatprep.subr.bf16.mxu0 %v10909_v34 }
 0x484   : > { %7304 = vmatpush1.bf16.msra.mxu1 %v10904_v9 }
 0x485   : > { %7305 = vmatprep.subr.bf16.mxu1 %v10912_v20 }
 0x486   : > { %7259 = vmatpush2.bf16.msra.mxu0 %v10907_v54  ;;  %7202 = vmatmul.mubr.bf16.gmra.mxu1 %v5329_v25 }
 0x487   : > { %7260 = vmatprep.subr.bf16.mxu0 %v10915_v16  ;;  %7211 = vmatprep.mubr.bf16.mxu1 %v5345_v4 }
 0x488   : > { %7306 = vmatpush1.bf16.msra.mxu1 %v10910_v21 }
 0x489   : > { %7307 = vmatprep.subr.bf16.mxu1 %v10918_v50 }
 0x48a   : > { %7261 = vmatpush2.bf16.msra.mxu0 %v10913_v55 }
 0x48b   : > { %v15032_v6 = vpop.f32.mrf.mxu0 }
 0x48c   : > { %7308 = vmatpush1.bf16.msra.mxu1 %v10916_v37 }
 0x48d   : > { %7263 = vmatmul.mubr.bf16.vlgmr.msra.gmra.mxu0 %v5316_v1  ;;  %7309 = vmatprep.subr.bf16.mxu1 %v10921_v57  ;;  %v6840_v44 = vpop.f32.mrf.mxu0 }
 0x48e   : > { %7272 = vmatprep.mubr.bf16.mxu0 %v5332_v58  ;;  %7212 = vmatmul.mubr.bf16.gmra.mxu1 %v5344_v40 }
 0x48f   : > { %v6842_v59 = vpop.f32.mrf.mxu0  ;;  %7221 = vmatprep.mubr.bf16.mxu1 %v5360_v27 }
 0x490   : > { %7310 = vmatpush1.bf16.msra.mxu1 %v10919_v61 }
 0x491   : > { %7311 = vmatprep.subr.bf16.mxu1 %v10924_v33  ;;  %v6844_v19 = vpop.f32.mrf.mxu0 }
 0x493   : > { %v6848_v46 = vpop.f32.mrf.mxu0 }
 0x494   : > { %7312 = vmatpush1.bf16.msra.mxu1 %v10922_v15 }
 0x495   : > { %7273 = vmatmul.mubr.bf16.gmra.mxu0 %v5331_v36  ;;  %7313 = vmatprep.subr.bf16.mxu1 %v10927_v28  ;;  %v6850_v14 = vpop.f32.mrf.mxu0 }
 0x496   : > { %7282 = vmatprep.mubr.bf16.mxu0 %v5347_v35  ;;  %7222 = vmatmul.mubr.bf16.gmra.mxu1 %v5359_v43 }
 0x497   : > { %v6852_v38 = vpop.f32.mrf.mxu0  ;;  %7333 = vmatprep.mubr.bf16.mxu1 %v15996_v62 }
 0x498   : > { %7314 = vmatpush1.bf16.msra.mxu1 %v10925_v48 }
 0x499   : > { %7315 = vmatprep.subr.bf16.mxu1 %v10930_v0  ;;  %v6854_v42 = vpop.f32.mrf.mxu0 }
 0x49b   : > { %v6858_v32 = vpop.f32.mrf.mxu0 }
 0x49c   : > { %7316 = vmatpush1.bf16.msra.mxu1 %v10928_v10 }
 0x49d   : > { %7283 = vmatmul.mubr.bf16.gmra.mxu0 %v5346_v31  ;;  %v6860_v41 = vpop.f32.mrf.mxu0 }
 0x49e   : > { %7292 = vmatprep.mubr.bf16.mxu0 %v5362_v60 }
 0x49f   : > { %7334 = vmatmul.mubr.bf16.vlgmr.msra.gmra.mxu1 %v5318_v49  ;;  %v6862_v5 = vpop.f32.mrf.mxu0 }
 0x4a0   : > { %7343 = vmatprep.mubr.bf16.mxu1 %v15996_v62 }
 0x4a1   : > { %v6864_v29 = vpop.f32.mrf.mxu0 }
 0x4a3   : > { %v6868_v8 = vpop.f32.mrf.mxu0 }
 0x4a5   : > { %7293 = vmatmul.mubr.bf16.gmra.mxu0 %v5361_v52  ;;  %v6870_v3 = vpop.f32.mrf.mxu0 }
 0x4a6   : > { %7837 = vmatprep.mubr.bf16.mxu0 %v15996_v62 }
 0x4a7   : > { %7344 = vmatmul.mubr.bf16.gmra.mxu1 %v5333_v30  ;;  %v6872_v11 = vpop.f32.mrf.mxu0 }
 0x4a8   : > { %7353 = vmatprep.mubr.bf16.mxu1 %v15996_v62 }
 0x4a9   : > { %v6873_v47 = vpop.f32.mrf.mxu0 }
 0x4af   : > { %7354 = vmatmul.mubr.bf16.gmra.mxu1 %v5348_v2 }
 0x4b0   : > { %7363 = vmatprep.mubr.bf16.mxu1 %v15996_v62 }
 0x4b7   : > { %7364 = vmatmul.mubr.bf16.gmra.mxu1 %v5363_v18 }
 0x4b8   : > { %7794 = vmatprep.mubr.bf16.mxu1 %v15996_v62 }
 0x4bd   : > { %v6909_v23 = vpop.f32.mrf.mxu1 }
 0x4be   : > { %v6910_v45 = vadd.f32 %v6909_v23, %v15032_v6 }
 0x4bf   : > { %v6911_v13 = vpop.f32.mrf.mxu1 }
 0x4c0   : > { %v6912_v63 = vadd.f32 %v6911_v13, %v6840_v44 }
 0x4c1   : > { %v6913_v12 = vpop.f32.mrf.mxu1 }
 0x4c2   : > { %v6914_v24 = vadd.f32 %v6913_v12, %v6842_v59 }
 0x4c3   : > { %v6915_v22 = vpop.f32.mrf.mxu1 }
 0x4c4   : > { %v6916_v53 = vadd.f32 %v6915_v22, %v6844_v19 }
 0x4c5   : > { %v6919_v39 = vpop.f32.mrf.mxu1 }
 0x4c6   : > { %v6920_v56 = vadd.f32 %v6919_v39, %v6848_v46 }
 0x4c7   : > { %v6921_v7 = vpop.f32.mrf.mxu1 }
 0x4c8   : > { %v6922_v17 = vadd.f32 %v6921_v7, %v6850_v14 }
 0x4c9   : > { %v6923_v26 = vpop.f32.mrf.mxu1 }
 0x4ca   : > { %v6924_v34 = vadd.f32 %v6923_v26, %v6852_v38 }
 0x4cb   : > { %v6925_v9 = vpop.f32.mrf.mxu1 }
 0x4cc   : > { %v6926_v51 = vadd.f32 %v6925_v9, %v6854_v42 }
 0x4cd   : > { %v6980_v20 = vpop.f32.mrf.mxu0  ;;  %v6929_v16 = vpop.f32.mrf.mxu1 }
 0x4ce   : > { %v6981_v54 = vadd.f32 %v6980_v20, %v6910_v45  ;;  %v6930_v21 = vadd.f32 %v6929_v16, %v6858_v32 }
 0x4cf   : > { %v6982_v25 = vpop.f32.mrf.mxu0  ;;  %v6931_v4 = vpop.f32.mrf.mxu1 }
 0x4d0   : > { %v6983_v50 = vadd.f32 %v6982_v25, %v6912_v63  ;;  %v6932_v55 = vadd.f32 %v6931_v4, %v6860_v41 }
 0x4d1   : > { %v6984_v37 = vpop.f32.mrf.mxu0  ;;  %v6933_v1 = vpop.f32.mrf.mxu1 }
 0x4d2   : > { %v6985_v57 = vadd.f32 %v6984_v37, %v6914_v24  ;;  %v6934_v6 = vadd.f32 %v6933_v1, %v6862_v5 }
 0x4d3   : > { %v6986_v58 = vpop.f32.mrf.mxu0  ;;  %v6935_v40 = vpop.f32.mrf.mxu1 }
 0x4d4   : > { %v6987_v61 = vadd.f32 %v6986_v58, %v6916_v53  ;;  %v6936_v33 = vadd.f32 %v6935_v40, %v6864_v29 }
 0x4d5   : > { %v6990_v44 = vpop.f32.mrf.mxu0  ;;  %v6939_v59 = vpop.f32.mrf.mxu1 }
 0x4d6   : > { %v6991_v27 = vadd.f32 %v6990_v44, %v6920_v56  ;;  %v6940_v15 = vadd.f32 %v6939_v59, %v6868_v8 }
 0x4d7   : > { %v6992_v28 = vpop.f32.mrf.mxu0  ;;  %v6941_v36 = vpop.f32.mrf.mxu1 }
 0x4d8   : > { %v6993_v19 = vadd.f32 %v6992_v28, %v6922_v17  ;;  %v6942_v46 = vadd.f32 %v6941_v36, %v6870_v3 }
 0x4d9   : > { %v6994_v35 = vpop.f32.mrf.mxu0  ;;  %v6943_v43 = vpop.f32.mrf.mxu1 }
 0x4da   : > { %v6995_v48 = vadd.f32 %v6994_v35, %v6924_v34 }
 0x4db   : > { %v6996_v0 = vpop.f32.mrf.mxu0  ;;  %v6944_v38 = vpop.f32.mrf.mxu1 }
 0x4dc   : > { %v6997_v14 = vadd.f32 %v6996_v0, %v6926_v51 }
 0x4dd   : > { %v7000_v10 = vpop.f32.mrf.mxu0 }
 0x4de   : > { %v7001_v42 = vadd.f32 %v7000_v10, %v6930_v21 }
 0x4df   : > { %v7002_v31 = vpop.f32.mrf.mxu0 }
 0x4e0   : > { %v7003_v32 = vadd.f32 %v7002_v31, %v6932_v55 }
 0x4e1   : > { %v7004_v60 = vpop.f32.mrf.mxu0 }
 0x4e2   : > { %v7005_v49 = vadd.f32 %v7004_v60, %v6934_v6 }
 0x4e3   : > { %v7006_v41 = vpop.f32.mrf.mxu0 }
 0x4e4   : > { %v7007_v5 = vadd.f32 %v7006_v41, %v6936_v33 }
 0x4e5   : > { %v7010_v29 = vpop.f32.mrf.mxu0 }
 0x4e6   : > { %v7011_v52 = vadd.f32 %v7010_v29, %v6940_v15 }
 0x4e7   : > { %v7012_v8 = vpop.f32.mrf.mxu0 }
 0x4e8   : > { %v7013_v30 = vadd.f32 %v7012_v8, %v6942_v46 }
 0x4e9   : > { %v7014_v11 = vpop.f32.mrf.mxu0 }
 0x4eb   : > { %v7015_v3 = vpop.f32.mrf.mxu0 }
 0x4fd   : > { %v7051_v47 = vpop.f32.mrf.mxu1 }
 0x4fe   : > { %v7052_v2 = vadd.f32 %v7051_v47, %v6981_v54 }
 0x4ff   : > { %v7053_v18 = vpop.f32.mrf.mxu1 }
 0x500   : > { %v7054_v23 = vadd.f32 %v7053_v18, %v6983_v50 }
 0x501   : > { %v7055_v45 = vpop.f32.mrf.mxu1 }
 0x502   : > { %v7056_v13 = vadd.f32 %v7055_v45, %v6985_v57 }
 0x503   : > { %v7057_v63 = vpop.f32.mrf.mxu1 }
 0x504   : > { %v7058_v12 = vadd.f32 %v7057_v63, %v6987_v61 }
 0x505   : > { %v7061_v24 = vpop.f32.mrf.mxu1 }
 0x506   : > { %v7062_v22 = vadd.f32 %v7061_v24, %v6991_v27 }
 0x507   : > { %v7063_v53 = vpop.f32.mrf.mxu1 }
 0x508   : > { %v7064_v39 = vadd.f32 %v7063_v53, %v6993_v19 }
 0x509   : > { %v7065_v56 = vpop.f32.mrf.mxu1 }
 0x50a   : > { %v7066_v7 = vadd.f32 %v7065_v56, %v6995_v48 }
 0x50b   : > { %v7067_v17 = vpop.f32.mrf.mxu1 }
 0x50c   : > { %v7068_v26 = vadd.f32 %v7067_v17, %v6997_v14 }
 0x50d   : > { %v7122_v34 = vpop.f32.mrf.mxu0  ;;  %v7071_v51 = vpop.f32.mrf.mxu1 }
 0x50e   : > { %v15088_v9 = vadd.f32 %v7122_v34, %v7052_v2  ;;  %v7072_v54 = vadd.f32 %v7071_v51, %v7001_v42 }
 0x50f   : > { %v7124_v20 = vpop.f32.mrf.mxu0  ;;  %v7073_v21 = vpop.f32.mrf.mxu1 }
 0x510   : > { %v15090_v16 = vadd.f32 %v7124_v20, %v7054_v23  ;;  %v7074_v50 = vadd.f32 %v7073_v21, %v7003_v32  ;;  %v7372_v21 = vld [vmem:[%s15762_s6] ss:$2 sm:$0x3] }
 0x511   : > { %v7126_v25 = vpop.f32.mrf.mxu0  ;;  %v7075_v55 = vpop.f32.mrf.mxu1 }
 0x512   : > { %v15092_v4 = vadd.f32 %v7126_v25, %v7056_v13  ;;  %v7076_v57 = vadd.f32 %v7075_v55, %v7005_v49 }
 0x513   : > { %v7128_v37 = vpop.f32.mrf.mxu0  ;;  %v7077_v6 = vpop.f32.mrf.mxu1 }
 0x514   : > { %v15094_v1 = vadd.f32 %v7128_v37, %v7058_v12  ;;  %v7078_v61 = vadd.f32 %v7077_v6, %v7007_v5 }
 0x515   : > { %v7132_v58 = vpop.f32.mrf.mxu0  ;;  %v7081_v33 = vpop.f32.mrf.mxu1 }
 0x516   : > { %v15096_v40 = vadd.f32 %v7132_v58, %v7062_v22  ;;  %v7082_v27 = vadd.f32 %v7081_v33, %v7011_v52  ;;  %v16003_v58 = vld [vmem:[#allocation25_spill] sm:$0xff] }
 0x517   : > { %v7134_v44 = vpop.f32.mrf.mxu0  ;;  %v7083_v15 = vpop.f32.mrf.mxu1 }
 0x518   : > { %v15098_v59 = vadd.f32 %v7134_v44, %v7064_v39  ;;  %v7084_v19 = vadd.f32 %v7083_v15, %v7013_v30 }
 0x519   : > { %v7136_v28 = vpop.f32.mrf.mxu0  ;;  %v7085_v46 = vpop.f32.mrf.mxu1 }
 0x51a   : > { %v15100_v36 = vadd.f32 %v7136_v28, %v7066_v7 }
 0x51b   : > { %v7138_v35 = vpop.f32.mrf.mxu0  ;;  %v7086_v43 = vpop.f32.mrf.mxu1 }
 0x51c   : > { %v15102_v48 = vadd.f32 %v7138_v35, %v7068_v26 }
 0x51d   : > { %v7142_v0 = vpop.f32.mrf.mxu0 }
 0x51e   : > { %v15104_v14 = vadd.f32 %v7142_v0, %v7072_v54 }
 0x51f   : > { %v7144_v38 = vpop.f32.mrf.mxu0 }
 0x520   : > { %v15106_v10 = vadd.f32 %v7144_v38, %v7074_v50  ;;  %v9660_v50 = vld [vmem:[%s15762_s6 + $0x1] ss:$2 sm:$0x3] }
 0x521   : > { %v7146_v42 = vpop.f32.mrf.mxu0 }
 0x522   : > { %v15108_v31 = vadd.f32 %v7146_v42, %v7076_v57 }
 0x523   : > { %v7148_v32 = vpop.f32.mrf.mxu0 }
 0x524   : > { %v15110_v60 = vadd.f32 %v7148_v32, %v7078_v61  ;;  %v15139_v61 = vrot.slane %v7372_v21, %v16003_v58 }
 0x525   : > { %v7152_v49 = vpop.f32.mrf.mxu0 }
 0x526   : > { %v15112_v41 = vadd.f32 %v7152_v49, %v7082_v27  ;;  %v15144_v27 = vrot.slane %v9660_v50, %v16003_v58 }
 0x527   : > { %v7154_v5 = vpop.f32.mrf.mxu0 }
 0x528   : > { %v15114_v29 = vadd.f32 %v7154_v5, %v7084_v19  ;;  %v16004_v19 = vld [vmem:[#allocation28_spill] sm:$0xff] }
 0x529   : > { %v7156_v52 = vpop.f32.mrf.mxu0  ;;  %v15148_v46 = vrot.slane %v7372_v21, %v16004_v19  ;;  %v15154_v42 = vrot.slane %v9660_v50, %v16004_v19 }
 0x52b   : > { %v7157_v8 = vpop.f32.mrf.mxu0 }
 0x53e   : > { %v7193_v30 = vpop.f32.mrf.mxu1 }
 0x53f   : > { %v7194_v25 = vadd.f32 %v7193_v30, %v15088_v9 }
 0x540   : > { %v7195_v11 = vpop.f32.mrf.mxu1 }
 0x541   : > { %v7196_v57 = vadd.f32 %v7195_v11, %v15090_v16 }
 0x542   : > { %v7197_v3 = vpop.f32.mrf.mxu1 }
 0x543   : > { %v7198_v9 = vadd.f32 %v7197_v3, %v15092_v4 }
 0x544   : > { %v7199_v47 = vpop.f32.mrf.mxu1 }
 0x545   : > { %v7200_v32 = vadd.f32 %v7199_v47, %v15094_v1 }
 0x546   : > { %v7203_v2 = vpop.f32.mrf.mxu1 }
 0x547   : > { %v7204_v5 = vadd.f32 %v7203_v2, %v15096_v40 }
 0x548   : > { %v7205_v18 = vpop.f32.mrf.mxu1 }
 0x54a   : > { %v7207_v23 = vpop.f32.mrf.mxu1 }
 0x54b   : > { %v7208_v47 = vadd.f32 %v7207_v23, %v15100_v36 }
 0x54c   : > { %v7209_v45 = vpop.f32.mrf.mxu1 }
 0x54d   : > { %v7264_v13 = vpop.f32.mrf.mxu0 }
 0x54e   : > { %v15116_v63 = vpop.f32.mrf.mxu1  ;;  %v7265_v6 = vadd.f32 %v7264_v13, %v7194_v25 }
 0x54f   : > { %v7266_v12 = vpop.f32.mrf.mxu0  ;;  %v7214_v23 = vadd.f32 %v15116_v63, %v15104_v14 }
 0x550   : > { %v15118_v24 = vpop.f32.mrf.mxu1  ;;  %v7267_v15 = vadd.f32 %v7266_v12, %v7196_v57  ;;  %v7206_v12 = vadd.f32 %v7205_v18, %v15098_v59 }
 0x551   : > { %v7268_v22 = vpop.f32.mrf.mxu0 }
 0x552   : > { %v15120_v53 = vpop.f32.mrf.mxu1  ;;  %v7269_v43 = vadd.f32 %v7268_v22, %v7198_v9 }
 0x553   : > { %v7270_v39 = vpop.f32.mrf.mxu0 }
 0x554   : > { %v15122_v56 = vpop.f32.mrf.mxu1  ;;  %v7271_v11 = vadd.f32 %v7270_v39, %v7200_v32  ;;  %v7210_v39 = vadd.f32 %v7209_v45, %v15102_v48 }
 0x555   : > { %v7274_v7 = vpop.f32.mrf.mxu0  ;;  %v7220_v14 = vadd.f32 %v15122_v56, %v15110_v60 }
 0x556   : > { %v15124_v17 = vpop.f32.mrf.mxu1  ;;  %v7275_v22 = vadd.f32 %v7274_v7, %v7204_v5 }
 0x557   : > { %v7276_v26 = vpop.f32.mrf.mxu0 }
 0x558   : > { %v15126_v34 = vpop.f32.mrf.mxu1  ;;  %v7277_v2 = vadd.f32 %v7276_v26, %v7206_v12  ;;  %v7216_v26 = vadd.f32 %v15118_v24, %v15106_v10 }
 0x559   : > { %v7278_v51 = vpop.f32.mrf.mxu0  ;;  %v7226_v5 = vadd.f32 %v15126_v34, %v15114_v29 }
 0x55a   : > { %v7227_v20 = vpop.f32.mrf.mxu1  ;;  %v7279_v58 = vadd.f32 %v7278_v51, %v7208_v47 }
 0x55b   : > { %v7280_v54 = vpop.f32.mrf.mxu0 }
 0x55c   : > { %v7228_v55 = vpop.f32.mrf.mxu1 }
 0x55d   : > { %v15135_v37 = vpop.f32.mrf.mxu0 }
 0x55e   : > { %v7285_v24 = vadd.f32 %v15135_v37, %v7214_v23 }
 0x55f   : > { %v15141_v33 = vpop.f32.mrf.mxu0  ;;  %v7335_v44 = vpop.f32.mrf.mxu1 }
 0x560   : > { %v7336_v28 = vadd.f32 %v7335_v44, %v7265_v6 }
 0x561   : > { %v15150_v35 = vpop.f32.mrf.mxu0  ;;  %v7337_v16 = vpop.f32.mrf.mxu1 }
 0x562   : > { %v7386_v0 = vmul.f32 %v15139_v61, %v7336_v28  ;;  %v7338_v38 = vadd.f32 %v7337_v16, %v7267_v15  ;;  %v7281_v28 = vadd.f32 %v7280_v54, %v7210_v39 }
 0x563   : > { %v15157_v49 = vpop.f32.mrf.mxu0  ;;  %v7339_v4 = vpop.f32.mrf.mxu1 }
 0x564   : > { %v7411_v52 = vadd.f32 %v15144_v27, %v7386_v0  ;;  %v7387_v8 = vmul.f32 %v15148_v46, %v7338_v38  ;;  %v7340_v30 = vadd.f32 %v7339_v4, %v7269_v43  ;;  %v7218_v43 = vadd.f32 %v15120_v53, %v15108_v31 }
 0x565   : > { %v7294_v3 = vpop.f32.mrf.mxu0  ;;  %v7341_v13 = vpop.f32.mrf.mxu1  ;;  %v7224_v4 = vadd.f32 %v15124_v17, %v15112_v41  ;;  %v7291_v29 = vadd.f32 %v15157_v49, %v7220_v14 }
 0x566   : > { %v7412_v20 = vadd.f32 %v15154_v42, %v7387_v8  ;;  %v7388_v1 = vmul.f32 %v15139_v61, %v7340_v30  ;;  %v7342_v21 = vadd.f32 %v7341_v13, %v7271_v11  ;;  %v7425_v50 = vmax.f32 %v7411_v52, 0.0 }
 0x567   : > { %v7296_v25 = vpop.f32.mrf.mxu0  ;;  %v7345_v40 = vpop.f32.mrf.mxu1  ;;  %v7287_v30 = vadd.f32 %v15141_v33, %v7216_v26  ;;  %v7289_v11 = vadd.f32 %v15150_v35, %v7218_v43 }
 0x568   : > { %v7426_v55 = vmax.f32 %v7412_v20, 0.0  ;;  %v7346_v57 = vadd.f32 %v7345_v40, %v7275_v22  ;;  %v7413_v6 = vadd.f32 %v15144_v27, %v7388_v1  ;;  %v7389_v59 = vmul.f32 %v15148_v46, %v7342_v21 }
 0x569   : > { %v7298_v18 = vpop.f32.mrf.mxu0  ;;  %v7347_v7 = vpop.f32.mrf.mxu1  ;;  %v7295_v22 = vadd.f32 %v7294_v3, %v7224_v4  ;;  %v7297_v20 = vadd.f32 %v7296_v25, %v7226_v5 }
 0x56a   : > { %v9820_v44 = vpack.c.bf16 %v7426_v55, %v7425_v50  ;;  %v7390_v9 = vmul.f32 %v15139_v61, %v7346_v57  ;;  %v7348_v36 = vadd.f32 %v7347_v7, %v7277_v2  ;;  %v7414_v15 = vadd.f32 %v15154_v42, %v7389_v59 }
 0x56b   : > { %v7299_v48 = vpop.f32.mrf.mxu0  ;;  %v7349_v45 = vpop.f32.mrf.mxu1  ;;  %v7427_v63 = vmax.f32 %v7413_v6, 0.0 }
 0x56c   : > { %7483 = vst [vmem:[#allocation3 + $0x30] sm:$0xff] %v9820_v44  ;;  %v7415_v19 = vadd.f32 %v15144_v27, %v7390_v9  ;;  %v7391_v51 = vmul.f32 %v15148_v46, %v7348_v36  ;;  %v7350_v16 = vadd.f32 %v7349_v45, %v7279_v58  ;;  %v7428_v0 = vmax.f32 %v7414_v15, 0.0 }
 0x56d   : > { %v7351_v10 = vpop.f32.mrf.mxu1  ;;  %v15194_v12 = vpack.c.bf16 %v7427_v63, %v7425_v50 }
 0x56e   : > { %v7416_v38 = vadd.f32 %v15154_v42, %v7391_v51  ;;  %v7392_v54 = vmul.f32 %v15139_v61, %v7350_v16  ;;  %v7352_v32 = vadd.f32 %v7351_v10, %v7281_v28  ;;  %v15188_v31 = vpack.c.bf16 %v7428_v0, %v7427_v63 }
 0x56f   : > { %v7429_v53 = vmax.f32 %v7415_v19, 0.0  ;;  %v7355_v60 = vpop.f32.mrf.mxu1  ;;  %v15196_v41 = vpack.c.bf16 %v7428_v0, %v7426_v55  ;;  %v7544_v2 = vshll.u32 %v15194_v12, 16  ;;  %v7542_v59 = vshrl.u32 %v15194_v12, 16 }
 0x570   : > { %v7430_v56 = vmax.f32 %v7416_v38, 0.0  ;;  %v7417_v52 = vadd.f32 %v15144_v27, %v7392_v54  ;;  %v7393_v37 = vmul.f32 %v15148_v46, %v7352_v32  ;;  %v7356_v8 = vadd.f32 %v7355_v60, %v7285_v24 }
 0x571   : > { %v7357_v13 = vpop.f32.mrf.mxu1  ;;  %v7556_v21 = vshll.u32 %v15196_v41, 16  ;;  %v7554_v39 = vshrl.u32 %v15196_v41, 16  ;;  %v7546_v58 = vrot.slane %v7544_v2, 1 }
 0x572   : > { %v7418_v17 = vadd.f32 %v15154_v42, %v7393_v37  ;;  %v7394_v34 = vmul.f32 %v15139_v61, %v7356_v8  ;;  %v7358_v1 = vadd.f32 %v7357_v13, %v7287_v30  ;;  %v7431_v33 = vmax.f32 %v7417_v52, 0.0 }
 0x573   : > { %v7359_v47 = vpop.f32.mrf.mxu1  ;;  %v7498_v50 = vld [vmem:[#allocation3 + $0x30] sm:$0xee]  ;;  %v7558_v6 = vrot.slane %v7556_v21, 1  ;;  %v7547_v63 = vor.u32 %v7546_v58, %v7542_v59 }
 0x574   : > { %v7432_v40 = vmax.f32 %v7418_v17, 0.0  ;;  %v7360_v35 = vadd.f32 %v7359_v47, %v7289_v11  ;;  %v7419_v55 = vadd.f32 %v15144_v27, %v7394_v34  ;;  %v7395_v49 = vmul.f32 %v15148_v46, %v7358_v1 }
 0x575   : > { %v7361_v57 = vpop.f32.mrf.mxu1  ;;  %v15210_v44 = vcombine.high %v7498_v50, %v15188_v31  ;;  %v15213_v9 = vcombine.low %v7498_v50, %v15188_v31  ;;  %v15219_v19 = vpack.c.bf16 %v7431_v33, %v7429_v53  ;;  %v7559_v51 = vor.u32 %v7558_v6, %v7554_v39 }
 0x576   : > { %v7396_v3 = vmul.f32 %v15139_v61, %v7360_v35  ;;  %v7362_v25 = vadd.f32 %v7361_v57, %v7291_v29  ;;  %v7420_v18 = vadd.f32 %v15154_v42, %v7395_v49  ;;  %v15217_v15 = vpack.c.bf16 %v7432_v40, %v7430_v56 }
 0x577   : > { %v7365_v7 = vpop.f32.mrf.mxu1  ;;  %v7433_v48 = vmax.f32 %v7419_v55, 0.0  ;;  %v7549_v38 = vshll.u32 %v15219_v19, 16  ;;  %v7615_v52 = vrot.slane %v15219_v19, 1  ;;  %v7617_v8 = vrot.slane %v15210_v44, 1 }
 0x578   : > { %v7421_v36 = vadd.f32 %v15144_v27, %v7396_v3  ;;  %v7397_v23 = vmul.f32 %v15148_v46, %v7362_v25  ;;  %v7366_v26 = vadd.f32 %v7365_v7, %v7295_v22  ;;  %v7434_v45 = vmax.f32 %v7420_v18, 0.0 }
 0x579   : > { %v7367_v28 = vpop.f32.mrf.mxu1  ;;  %v7561_v24 = vshll.u32 %v15217_v15, 16  ;;  %v7573_v5 = vshrl.u32 %v15217_v15, 16  ;;  %v7551_v56 = vrot.slane %v7549_v38, 1  ;;  %v7614_v30 = vrot.slane %v15213_v9, 1 }
 0x57a   : > { %v7422_v16 = vadd.f32 %v15154_v42, %v7397_v23  ;;  %v7398_v43 = vmul.f32 %v15139_v61, %v7366_v26  ;;  %v7368_v14 = vadd.f32 %v7367_v28, %v7297_v20  ;;  %v7435_v0 = vmax.f32 %v7421_v36, 0.0 }
 0x57b   : > { %v7369_v10 = vpop.f32.mrf.mxu1  ;;  %v7563_v60 = vrot.slane %v7561_v24, 1  ;;  %v7618_v61 = vrot.slane %v15217_v15, 1  ;;  %v15238_v13 = vsel %vm608_vm0, %v7547_v63, %v7551_v56  ;;  %v7659_v1 = vrot.slane %v7573_v5, 1 }
 0x57c   : > { %v7436_v54 = vmax.f32 %v7422_v16, 0.0  ;;  %v7423_v32 = vadd.f32 %v15144_v27, %v7398_v43  ;;  %v7399_v4 = vmul.f32 %v15148_v46, %v7368_v14  ;;  %v7565_v27 = vshrl.u32 %v15219_v19, 16 }
 0x57d   : > { %v7370_v53 = vpop.f32.mrf.mxu1  ;;  %v15235_v46 = vsel %vm608_vm0, %v7559_v51, %v7563_v60  ;;  %v15242_v34 = vpack.c.bf16 %v7435_v0, %v7433_v48  ;;  %v7575_v22 = vor.u32 %v7573_v5, %v7563_v60  ;;  %v15248_v47 = vsel %vm790_vm4, %v7614_v30, %v7615_v52 }
 0x57e   : > { %v7424_v37 = vadd.f32 %v15154_v42, %v7399_v4  ;;  %v7437_v11 = vmax.f32 %v7423_v32, 0.0  ;;  %v15240_v17 = vpack.c.bf16 %v7436_v54, %v7434_v45  ;;  %v15245_v42 = vsel %vm790_vm4, %v7617_v8, %v7618_v61 }
 0x57f   : > { %v7567_v20 = vor.u32 %v7565_v27, %v7551_v56  ;;  %v7569_v35 = vshll.u32 %v15242_v34, 16  ;;  %v7581_v2 = vshrl.u32 %v15242_v34, 16  ;;  %v7620_v55 = vrot.slane %v15242_v34, 1 }
 0x580   : > { %v7438_v29 = vmax.f32 %v7424_v37, 0.0  ;;  %v7577_v33 = vshll.u32 %v15240_v17, 16  ;;  %v7589_v40 = vshrl.u32 %v15240_v17, 16  ;;  %v7622_v50 = vrot.slane %v15240_v17, 1 }
 0x581   : > { %v7660_v49 = vrot.slane %v7561_v24, 2  ;;  %v7571_v39 = vrot.slane %v7569_v35, 1  ;;  %v15258_v3 = vpack.c.bf16 %v7437_v11, %v7437_v11  ;;  %v15268_v7 = vsel %vm790_vm4, %v7615_v52, %v7620_v55 }
 0x582   : > { %v9826_v21 = vpack.c.bf16 %v7438_v29, %v7437_v11  ;;  %v7579_v57 = vrot.slane %v7577_v33, 1  ;;  %v15256_v6 = vpack.c.bf16 %v7438_v29, %v7438_v29  ;;  %v15263_v25 = vsel %vm790_vm4, %v7618_v61, %v7622_v50 }
 0x583   : > { %v7667_v59 = vrot.slane %v7589_v40, 1  ;;  %v7668_v18 = vrot.slane %v7577_v33, 2  ;;  %v15274_v36 = vsel %vm608_vm0, %v7567_v20, %v7571_v39  ;;  %v7647_v23 = vrot.slane %v7565_v27, 1 }
 0x584   : > { %7489 = vst [vmem:[#allocation3 + $0x28] sm:$0xff] %v9826_v21  ;;  %v15271_v58 = vsel %vm608_vm0, %v7575_v22, %v7579_v57  ;;  %v7648_v26 = vrot.slane %v7549_v38, 2  ;;  %v7681_v48 = vshrl.u32 %v15256_v6, 16  ;;  %v7684_v45 = vshll.u32 %v15256_v6, 16 }
 0x585   : > { %v7672_v28 = vshrl.u32 %v15258_v3, 16  ;;  %v7675_v51 = vshll.u32 %v15258_v3, 16  ;;  %v7669_v16 = vor.u32 %v7668_v18, %v7667_v59  ;;  %v7663_v43 = vrot.slane %v7581_v2, 1 }
 0x586   : > { %v7664_v14 = vrot.slane %v7569_v35, 2  ;;  %v7661_v63 = vor.u32 %v7660_v49, %v7659_v1  ;;  %v7683_v0 = vrot.slane %v7681_v48, 1  ;;  %v7686_v10 = vrot.slane %v7684_v45, 2 }
 0x587   : > { %v7674_v24 = vrot.slane %v7672_v28, 1  ;;  %v7677_v54 = vrot.slane %v7675_v51, 2  ;;  %v15283_v38 = vor.u32 %v7648_v26, %v7647_v23  ;;  %v7652_v61 = vshrl.u32 %v15210_v44, 16 }
 0x588   : > { %v7665_v32 = vor.u32 %v7664_v14, %v7663_v43  ;;  %v15281_v4 = vsel %vm852_vm2, %v7661_v63, %v7669_v16  ;;  %v15285_v60 = vor.u32 %v7686_v10, %v7683_v0  ;;  %v7655_v52 = vshll.u32 %v15210_v44, 16 }
 0x589   : > { %v15287_v56 = vor.u32 %v7677_v54, %v7674_v24  ;;  %v7591_v33 = vor.u32 %v7589_v40, %v7579_v57  ;;  %v7712_v35 = vrot.slane %v15256_v6, 2  ;;  %v7654_v49 = vrot.slane %v7652_v61, 1  ;;  %v7500_v40 = vld [vmem:[#allocation3 + $0x30] sm:$0xcc] }
 0x58a   : > { %v15297_v27 = vsel %vm852_vm2, %v7669_v16, %v15285_v60  ;;  %v15305_v22 = vsel %vm852_vm2, %v15283_v38, %v7665_v32  ;;  %v7657_v26 = vrot.slane %v7655_v52, 2  ;;  %v7583_v48 = vor.u32 %v7581_v2, %v7571_v39  ;;  %v10943_v6 = vld [vmem:[%s15764_s8 + $0x28] sm:$0xff]  }
 0x58b   : > { %v7496_v5 = vld [vmem:[#allocation3 + $0x28] sm:$0x33]  ;;  %v15301_v29 = vsel %vm852_vm2, %v7665_v32, %v15287_v56  ;;  %v7708_v45 = vrot.slane %v15240_v17, 2  ;;  %v7710_v43 = vrot.slane %v15258_v3, 2  ;;  %v7640_v0 = vshrl.u32 %v15213_v9, 16 }
 0x58c   : > { %v7497_v53 = vld [vmem:[#allocation3 + $0x28] sm:$0x77]  ;;  %v9675_v37 = vcombine.high %v7496_v5, %v7496_v5  ;;  %v9674_v8 = vcombine.low %v7496_v5, %v7496_v5  ;;  %v7658_v57 = vor.u32 %v7657_v26, %v7654_v49  ;;  %v7643_v2 = vshll.u32 %v15213_v9, 16  ;;  %v10956_v49 = vld [vmem:[%s15764_s8 + $0xd8] sm:$0xff]   ;;  %v10960_v26 = vld [vmem:[%s15764_s8 + $0xd0] sm:$0xff]  }
 0x58d   : > { %v15291_v30 = vcombine.high %v7497_v53, %v7497_v53  ;;  %v15293_v11 = vcombine.low %v7497_v53, %v7497_v53  ;;  %v15322_v14 = vsel %vm964_vm1, %v7708_v45, %v7712_v35  ;;  %v7706_v10 = vrot.slane %v15242_v34, 2  ;;  %v10946_v3 = vld [vmem:[%s15764_s8 + $0x60] sm:$0xff]  }
 0x58e   : > { %9685 = vmatprep.subr.msk.bf16.mxu1 %vm7731_vm7, %v9675_v37  ;;  %v7733_v44 = vsel %vm7731_vm7, %v9674_v8, 0  ;;  %v7704_v24 = vrot.slane %v15217_v15, 2  ;;  %v7701_v54 = vrot.slane %v15219_v19, 2  ;;  %v7662_v32 = vsel %vm852_vm2, %v7658_v57, %v7661_v63  ;;  %v10969_v57 = vld [vmem:[%s15764_s8 + $0x80] sm:$0xff]  }
 0x58f   : > { %v7593_v20 = vshll.u32 %v15291_v30, 16  ;;  %v7585_v1 = vshll.u32 %v15293_v11, 16  ;;  %7771 = vmatpush1.bf16.msra.mxu1 %v7733_v44  ;;  %v7600_v21 = vshrl.u32 %v15291_v30, 16  ;;  %v7597_v23 = vshrl.u32 %v15293_v11, 16 }
 0x590   : > { %7772 = vmatprep.subr.bf16.mxu1 %v15240_v17  ;;  %v7642_v5 = vrot.slane %v7640_v0, 1  ;;  %v7645_v53 = vrot.slane %v7643_v2, 2  ;;  %v9683_v61 = vcombine.high %v7500_v40, %v15188_v31  ;;  %v7711_v9 = vsel %vm964_vm1, %v7706_v10, %v7710_v43  ;;  %v10936_v17 = vld [vmem:[%s15764_s8 + $0x78] sm:$0xff]  }
 0x591   : > { %v7595_v59 = vrot.slane %v7593_v20, 1  ;;  %v7587_v18 = vrot.slane %v7585_v1, 1  ;;  %v7709_v52 = vsel %vm964_vm1, %v7704_v24, %v7708_v45  ;;  %v7707_v37 = vsel %vm964_vm1, %v7701_v54, %v7706_v10  ;;  %v10962_v45 = vld [vmem:[%s15764_s8 + $0x40] sm:$0xff]  }
 0x592   : > { %v7646_v8 = vor.u32 %v7645_v53, %v7642_v5  ;;  %v7703_v44 = vrot.slane %v9683_v61, 2  ;;  %v10970_v61 = vld [vmem:[%s15764_s8 + $0x170] sm:$0xff]  }
 0x593   : > { %v7602_v28 = vor.u32 %v7600_v21, %v7595_v59  ;;  %v7599_v51 = vor.u32 %v7597_v23, %v7587_v18  ;;  %v7596_v16 = vsel %vm608_vm0, %v7591_v33, %v7595_v59  ;;  %7773 = vmatpush1.bf16.msra.mxu1 %v15242_v34  ;;  %v7588_v63 = vsel %vm608_vm0, %v7583_v48, %v7587_v18  ;;  %v10937_v34 = vld [vmem:[%s15764_s8 + $0x38] sm:$0xff]   ;;  %v10958_v18 = vld [vmem:[%s15764_s8 + $0x48] sm:$0xff]   ;;  %v10961_v48 = vld [vmem:[%s15764_s8 + $0x90] sm:$0xff]  }
 0x594   : > { %7774 = vmatprep.subr.bf16.mxu1 %v15217_v15  ;;  %v9682_v15 = vcombine.low %v7500_v40, %v15188_v31  ;;  %v7650_v1 = vsel %vm852_vm2, %v7646_v8, %v15283_v38  ;;  %v7705_v21 = vsel %vm964_vm1, %v7703_v44, %v7704_v24  ;;  %v7626_v33 = vrot.slane %v15291_v30, 1  ;;  %v10935_v31 = vld [vmem:[%s15763_s7] sm:$0xff]   ;;  %v10951_v30 = vld [vmem:[%s15764_s8 + $0x18] sm:$0xff]   ;;  %v10959_v23 = vld [vmem:[%s15764_s8 + $0x8] sm:$0xff]  }
 0x595   : > { %9687 = vmatprep.subr.msk.bf16.mxu0 %vm7731_vm7, %v7602_v28  ;;  %v7739_v39 = vsel %vm7731_vm7, %v7599_v51, 0  ;;  %v10957_v59 = vld [vmem:[%s15764_s8 + $0x98] sm:$0xff]   ;;  %v10963_v28 = vld [vmem:[%s15764_s8] sm:$0xff]   ;;  %v10964_v51 = vld [vmem:[%s15764_s8 + $0xc8] sm:$0xff]  }
 0x596   : > { %7814 = vmatpush1.bf16.msra.mxu0 %v7739_v39  ;;  %v7700_v20 = vrot.slane %v9682_v15, 2  ;;  %v7627_v38 = vsel %vm790_vm4, %v7622_v50, %v7626_v33  ;;  %v10942_v50 = vld [vmem:[%s15764_s8 + $0x68] sm:$0xff]   ;;  %v10968_v40 = vld [vmem:[%s15764_s8 + $0xc0] sm:$0xff]  }
 0x597   : > { %7815 = vmatprep.subr.bf16.mxu0 %v7596_v16  ;;  %7775 = vmatpush1.bf16.msra.mxu1 %v15219_v19  ;;  %v7624_v19 = vrot.slane %v15293_v11, 1  ;;  %v10954_v11 = vld [vmem:[%s15764_s8 + $0x50] sm:$0xff]   ;;  %v10965_v16 = vld [vmem:[%s15764_s8 + $0x88] sm:$0xff]  }
 0x598   : > { %7776 = vmatprep.subr.bf16.mxu1 %v15196_v41  ;;  %v7702_v41 = vsel %vm964_vm1, %v7700_v20, %v7701_v54  ;;  %v10974_v8 = vld [vmem:[%s15764_s8 + $0x168] sm:$0xff]   ;;  %v10976_v20 = vld [vmem:[%s15764_s8 + $0x1f0] sm:$0xff]  }
 0x59a   : > { %7816 = vmatpush1.bf16.msra.mxu0 %v7588_v63  ;;  %v10973_v63 = vld [vmem:[%s15764_s8 + $0x1b8] sm:$0xff]  }
 0x59b   : > { %7817 = vmatprep.subr.bf16.mxu0 %v15271_v58  ;;  %7777 = vmatpush1.bf16.msra.mxu1 %v15194_v12  ;;  %v7745_v58 = vsel %vm7731_vm7, %v7624_v19, 0  ;;  %v7625_v12 = vsel %vm790_vm4, %v7620_v55, %v7624_v19  ;;  %v10940_v55 = vld [vmem:[%s15764_s8 + $0xf8] sm:$0xff]   ;;  %v10980_v19 = vld [vmem:[%s15764_s8 + $0x1e8] sm:$0xff]  }
 0x59c   : > { %9689 = vmatprep.subr.msk.bf16.mxu1 %vm7731_vm7, %v7626_v33 }
 0x59e   : > { %7818 = vmatpush1.bf16.msra.mxu0 %v15274_v36  ;;  %9686 = vmatmul.mubr.msk.bf16.vlgmr.msra.gmra.mxu1 %vm7727_vm8, %v10935_v31  ;;  %v10947_v36 = vld [vmem:[%s15764_s8 + $0x20] sm:$0xff]  }
 0x59f   : > { %7819 = vmatprep.subr.bf16.mxu0 %v15235_v46  ;;  %7857 = vmatpush1.bf16.msra.mxu1 %v7745_v58  ;;  %v7751_v46 = vsel %vm7731_vm7, %v15287_v56, 0  ;;  %v10948_v56 = vld [vmem:[%s15764_s8 + $0xe8] sm:$0xff]   ;;  %v10979_v58 = vld [vmem:[%s15764_s8 + $0x120] sm:$0xff]  }
 0x5a0   : > { %7880 = vmatprep.mubr.bf16.mxu1 %v15996_v62  ;;  %7858 = vmatprep.subr.bf16.mxu1 %v7627_v38  ;;  %v10982_v38 = vld [vmem:[%s15764_s8 + $0x158] sm:$0xff]  }
 0x5a2   : > { %7820 = vmatpush1.bf16.msra.mxu0 %v15238_v13  ;;  %v7757_v13 = vsel %vm7731_vm7, %v7710_v43, 0  ;;  %v10966_v43 = vld [vmem:[%s15764_s8 + $0x178] sm:$0xff]  }
 0x5a3   : > { %9691 = vmatprep.subr.msk.bf16.mxu0 %vm7731_vm7, %v15285_v60  ;;  %7859 = vmatpush1.bf16.msra.mxu1 %v7625_v12  ;;  %v10945_v60 = vld [vmem:[%s15764_s8 + $0xb0] sm:$0xff]  }
 0x5a4   : > { %7860 = vmatprep.subr.bf16.mxu1 %v15263_v25  ;;  %v10941_v25 = vld [vmem:[%s15764_s8 + $0xb8] sm:$0xff]  }
 0x5a5   : > { %9688 = vmatmul.mubr.msk.bf16.vlgmr.msra.gmra.mxu0 %vm7727_vm8, %v10935_v31 }
 0x5a6   : > { %7900 = vmatpush1.bf16.msra.mxu0 %v7751_v46  ;;  %7923 = vmatprep.mubr.bf16.mxu0 %v15996_v62  ;;  %v10981_v46 = vld [vmem:[%s15764_s8 + $0x1a8] sm:$0xff]  }
 0x5a7   : > { %7901 = vmatprep.subr.bf16.mxu0 %v15297_v27  ;;  %7861 = vmatpush1.bf16.msra.mxu1 %v15268_v7  ;;  %v10944_v7 = vld [vmem:[%s15764_s8 + $0xf0] sm:$0xff]   ;;  %v10949_v27 = vld [vmem:[%s15764_s8 + $0xa8] sm:$0xff]  }
 0x5a8   : > { %7862 = vmatprep.subr.bf16.mxu1 %v15245_v42  ;;  %v10938_v42 = vld [vmem:[%s15764_s8 + $0x70] sm:$0xff]  }
 0x5aa   : > { %7902 = vmatpush1.bf16.msra.mxu0 %v15301_v29  ;;  %v10952_v29 = vld [vmem:[%s15764_s8 + $0xe0] sm:$0xff]  }
 0x5ab   : > { %7903 = vmatprep.subr.bf16.mxu0 %v15281_v4  ;;  %7863 = vmatpush1.bf16.msra.mxu1 %v15248_v47  ;;  %v10939_v47 = vld [vmem:[%s15764_s8 + $0x30] sm:$0xff]   ;;  %v10950_v4 = vld [vmem:[%s15764_s8 + $0x58] sm:$0xff]  }
 0x5ac   : > { %9693 = vmatprep.subr.msk.bf16.mxu1 %vm7731_vm7, %v7712_v35  ;;  %v10953_v35 = vld [vmem:[%s15764_s8 + $0xa0] sm:$0xff]  }
 0x5ae   : > { %7904 = vmatpush1.bf16.msra.mxu0 %v15305_v22  ;;  %9690 = vmatmul.mubr.msk.bf16.vlgmr.msra.gmra.mxu1 %vm7727_vm8, %v10935_v31  ;;  %v10955_v22 = vld [vmem:[%s15764_s8 + $0x10] sm:$0xff]  }
 0x5af   : > { %7905 = vmatprep.subr.bf16.mxu0 %v7662_v32  ;;  %7943 = vmatpush1.bf16.msra.mxu1 %v7757_v13  ;;  %v10967_v32 = vld [vmem:[%s15764_s8 + $0x138] sm:$0xff]   ;;  %v10984_v13 = vld [vmem:[%s15764_s8 + $0x1e0] sm:$0xff]  }
 0x5b0   : > { %7966 = vmatprep.mubr.bf16.mxu1 %v15996_v62  ;;  %7944 = vmatprep.subr.bf16.mxu1 %v15322_v14  ;;  %v10972_v14 = vld [vmem:[%s15764_s8 + $0x1f8] sm:$0xff]  }
 0x5b2   : > { %7906 = vmatpush1.bf16.msra.mxu0 %v7650_v1  ;;  %v10975_v1 = vld [vmem:[%s15764_s8 + $0x128] sm:$0xff]  }
 0x5b3   : > { %10074 = vmatprep.subr.bf16.mxu0 %v10936_v17  ;;  %7945 = vmatpush1.bf16.msra.mxu1 %v7711_v9 }
 0x5b4   : > { %7946 = vmatprep.subr.bf16.mxu1 %v7709_v52  ;;  %v10971_v52 = vld [vmem:[%s15764_s8 + $0x130] sm:$0xff]  }
 0x5b5   : > { %9692 = vmatmul.mubr.msk.bf16.vlgmr.msra.gmra.mxu0 %vm7727_vm8, %v10935_v31 }
 0x5b6   : > { %10075 = vmatpush3.bf16.msra.mxu0 %v10937_v34 }
 0x5b7   : > { %10076 = vmatprep.subr.bf16.mxu0 %v10938_v42  ;;  %7947 = vmatpush1.bf16.msra.mxu1 %v7707_v37  ;;  %v10983_v42 = vld [vmem:[%s15764_s8 + $0x118] sm:$0xff]  }
 0x5b8   : > { %7948 = vmatprep.subr.bf16.mxu1 %v7705_v21  ;;  %v10978_v21 = vld [vmem:[%s15764_s8 + $0x160] sm:$0xff]  }
 0x5ba   : > { %10077 = vmatpush3.bf16.msra.mxu0 %v10939_v47 }
 0x5bb   : > { %10078 = vmatprep.subr.bf16.mxu0 %v10942_v50  ;;  %7949 = vmatpush1.bf16.msra.mxu1 %v7702_v41  ;;  %v10986_v50 = vld [vmem:[%s15764_s8 + $0x150] sm:$0xff]  }
 0x5bc   : > { %10096 = vmatprep.subr.bf16.mxu1 %v10940_v55 }
 0x5be   : > { %10079 = vmatpush3.bf16.msra.mxu0 %v10943_v6  ;;  %9694 = vmatmul.mubr.msk.bf16.vlgmr.msra.gmra.mxu1 %vm7727_vm8, %v10935_v31  ;;  %v10977_v31 = vld [vmem:[%s15764_s8 + $0x1b0] sm:$0xff]   ;;  %v10985_v6 = vld [vmem:[%s15764_s8 + $0x1a0] sm:$0xff]  }
 0x5bf   : > { %10080 = vmatprep.subr.bf16.mxu0 %v10946_v3  ;;  %10097 = vmatpush3.bf16.msra.mxu1 %v10941_v25  ;;  %v10988_v3 = vld [vmem:[%s15764_s8 + $0x1d8] sm:$0xff]  }
 0x5c0   : > { %10098 = vmatprep.subr.bf16.mxu1 %v10944_v7  ;;  %v10987_v7 = vld [vmem:[%s15764_s8 + $0x110] sm:$0xff]  }
 0x5c2   : > { %10081 = vmatpush3.bf16.msra.mxu0 %v10947_v36  ;;  %v10990_v36 = vld [vmem:[%s15764_s8 + $0x148] sm:$0xff]  }
 0x5c3   : > { %10082 = vmatprep.subr.bf16.mxu0 %v10950_v4  ;;  %10099 = vmatpush3.bf16.msra.mxu1 %v10945_v60  ;;  %v10989_v60 = vld [vmem:[%s15764_s8 + $0x198] sm:$0xff]  }
 0x5c4   : > { %10100 = vmatprep.subr.bf16.mxu1 %v10948_v56 }
 0x5c6   : > { %10083 = vmatpush3.bf16.msra.mxu0 %v10951_v30  ;;  %v10992_v30 = vld [vmem:[%s15764_s8 + $0x1d0] sm:$0xff]  }
 0x5c7   : > { %10084 = vmatprep.subr.bf16.mxu0 %v10954_v11  ;;  %10101 = vmatpush3.bf16.msra.mxu1 %v10949_v27  ;;  %v10991_v11 = vld [vmem:[%s15764_s8 + $0x108] sm:$0xff]   ;;  %v10994_v27 = vld [vmem:[%s15764_s8 + $0x140] sm:$0xff]  }
 0x5c8   : > { %10102 = vmatprep.subr.bf16.mxu1 %v10952_v29 }
 0x5ca   : > { %10085 = vmatpush3.bf16.msra.mxu0 %v10955_v22  ;;  %v10993_v22 = vld [vmem:[%s15764_s8 + $0x190] sm:$0xff]  }
 0x5cb   : > { %10103 = vmatpush3.bf16.msra.mxu1 %v10953_v35  ;;  %10086 = vmatprep.subr.bf16.mxu0 %v10958_v18  ;;  %v10996_v35 = vld [vmem:[%s15764_s8 + $0x1c8] sm:$0xff]   ;;  %v10998_v18 = vld [vmem:[%s15764_s8 + $0x278] sm:$0xff]  }
 0x5cc   : > { %10104 = vmatprep.subr.bf16.mxu1 %v10956_v49 }
 0x5ce   : > { %10087 = vmatpush3.bf16.msra.mxu0 %v10959_v23 }
 0x5cf   : > { %10105 = vmatpush3.bf16.msra.mxu1 %v10957_v59  ;;  %10088 = vmatprep.subr.bf16.mxu0 %v10962_v45  ;;  %v10995_v59 = vld [vmem:[%s15764_s8 + $0x100] sm:$0xff]  }
 0x5d0   : > { %10106 = vmatprep.subr.bf16.mxu1 %v10960_v26  ;;  %v10997_v26 = vld [vmem:[%s15764_s8 + $0x188] sm:$0xff]  }
 0x5d2   : > { %10089 = vmatpush3.bf16.msra.mxu0 %v10963_v28  ;;  %v10999_v28 = vld [vmem:[%s15764_s8 + $0x238] sm:$0xff]  }
 0x5d3   : > { %10107 = vmatpush3.bf16.msra.mxu1 %v10961_v48  ;;  %10118 = vmatprep.subr.bf16.mxu0 %v10966_v43  ;;  %v11000_v48 = vld [vmem:[%s15764_s8 + $0x1c0] sm:$0xff]   ;;  %v11002_v43 = vld [vmem:[%s15764_s8 + $0x270] sm:$0xff]  }
 0x5d4   : > { %10108 = vmatprep.subr.bf16.mxu1 %v10964_v51 }
 0x5d7   : > { %10109 = vmatpush3.bf16.msra.mxu1 %v10965_v16 }
 0x5d8   : > { %10110 = vmatprep.subr.bf16.mxu1 %v10968_v40  ;;  %v11001_v40 = vld [vmem:[%s15764_s8 + $0x180] sm:$0xff]  }
 0x5db   : > { %10111 = vmatpush3.bf16.msra.mxu1 %v10969_v57  ;;  %v11003_v57 = vld [vmem:[%s15764_s8 + $0x230] sm:$0xff]  }
 0x5dc   : > { %10140 = vmatprep.subr.bf16.mxu1 %v10972_v14 }
 0x65e   : > { %v7796_v0 = vpop.f32.mrf.mxu1 }
 0x660   : > { %v7798_v2 = vpop.f32.mrf.mxu1 }
 0x662   : > { %v7800_v39 = vpop.f32.mrf.mxu1 }
 0x663   : > { %v7977_v5 = vpack.c.bf16 %v7800_v39, %v7796_v0  ;;  %v11004_v0 = vld [vmem:[%s15764_s8 + $0x268] sm:$0xff]   ;;  %v11006_v39 = vld [vmem:[%s15764_s8 + $0x260] sm:$0xff]  }
 0x664   : > { %v7802_v10 = vpop.f32.mrf.mxu1 }
 0x665   : > { %v7839_v24 = vpop.f32.mrf.mxu0  ;;  %v7978_v54 = vpack.c.bf16 %v7802_v10, %v7798_v2  ;;  %v11005_v2 = vld [vmem:[%s15764_s8 + $0x228] sm:$0xff]   ;;  %v11007_v10 = vld [vmem:[%s15764_s8 + $0x220] sm:$0xff]  }
 0x667   : > { %v7841_v53 = vpop.f32.mrf.mxu0  ;;  %8659 = vmatprep.mubr.bf16.mxu0 %v7978_v54  ;;  %v11009_v54 = vld [vmem:[%s15764_s8 + $0x218] sm:$0xff]  }
 0x668   : > { %8660 = vmatmul.mubr.bf16.vlgmr.msra.gmra.mxu0 %v7977_v5  ;;  %v11011_v5 = vld [vmem:[%s15764_s8 + $0x210] sm:$0xff]  }
 0x669   : > { %v7843_v9 = vpop.f32.mrf.mxu0  ;;  %10119 = vmatpush3.bf16.msra.mxu0 %v10967_v32  ;;  %v11010_v32 = vld [vmem:[%s15764_s8 + $0x250] sm:$0xff]  }
 0x66a   : > { %v7979_v37 = vpack.c.bf16 %v7843_v9, %v7839_v24  ;;  %10120 = vmatprep.subr.bf16.mxu0 %v10970_v61  ;;  %v11008_v24 = vld [vmem:[%s15764_s8 + $0x258] sm:$0xff]   ;;  %v11013_v61 = vld [vmem:[%s15764_s8 + $0x208] sm:$0xff]   ;;  %v11014_v9 = vld [vmem:[%s15764_s8 + $0x240] sm:$0xff]  }
 0x66b   : > { %v7845_v15 = vpop.f32.mrf.mxu0 }
 0x66c   : > { %v7980_v44 = vpack.c.bf16 %v7845_v15, %v7841_v53  ;;  %v11012_v53 = vld [vmem:[%s15764_s8 + $0x248] sm:$0xff]   ;;  %v8958_v15 = vld [vmem:[%s15767_s11 + $0xf8] sm:$0xff] }
 0x66d   : > { %10121 = vmatpush3.bf16.msra.mxu0 %v10971_v52  ;;  %v11015_v52 = vld [vmem:[%s15764_s8 + $0x200] sm:$0xff]  }
 0x66e   : > { %8700 = vmatprep.mubr.bf16.mxu1 %v7980_v44  ;;  %10122 = vmatprep.subr.bf16.mxu0 %v10974_v8  ;;  %v15518_v33 = vpop.f32.mrf.mxu1  ;;  %v8942_v8 = vld [vmem:[%s15767_s11 + $0x78] sm:$0xff]  ;;  %v8957_v44 = vld [vmem:[%s15767_s11 + $0xf0] sm:$0xff] }
 0x66f   : > { %8701 = vmatmul.mubr.bf16.vlgmr.msra.gmra.mxu1 %v7979_v37 }
 0x670   : > { %10141 = vmatpush3.bf16.msra.mxu1 %v10973_v63  ;;  %v7884_v41 = vpop.f32.mrf.mxu1  ;;  %v8941_v63 = vld [vmem:[%s15767_s11 + $0x70] sm:$0xff] }
 0x671   : > { %10142 = vmatprep.subr.bf16.mxu1 %v10976_v20  ;;  %10123 = vmatpush3.bf16.msra.mxu0 %v10975_v1  ;;  %v8940_v20 = vld [vmem:[%s15767_s11 + $0x68] sm:$0xff]  ;;  %v8955_v1 = vld [vmem:[%s15767_s11 + $0xe0] sm:$0xff] }
 0x672   : > { %10124 = vmatprep.subr.bf16.mxu0 %v10978_v21  ;;  %v7886_v12 = vpop.f32.mrf.mxu1  ;;  %v8939_v21 = vld [vmem:[%s15767_s11 + $0x60] sm:$0xff] }
 0x673   : > { %v7981_v16 = vpack.c.bf16 %v7886_v12, %v15518_v33  ;;  %v8954_v33 = vld [vmem:[%s15767_s11 + $0xd8] sm:$0xff]  ;;  %v8951_v12 = vld [vmem:[%s15767_s11 + $0xc0] sm:$0xff] }
 0x674   : > { %10143 = vmatpush3.bf16.msra.mxu1 %v10977_v31  ;;  %v7888_v17 = vpop.f32.mrf.mxu1  ;;  %v8938_v31 = vld [vmem:[%s15767_s11 + $0x58] sm:$0xff] }
 0x675   : > { %10144 = vmatprep.subr.bf16.mxu1 %v10980_v19  ;;  %v15538_v34 = vpop.f32.mrf.mxu0  ;;  %10125 = vmatpush3.bf16.msra.mxu0 %v10979_v58  ;;  %v7982_v47 = vpack.c.bf16 %v7888_v17, %v7884_v41  ;;  %v8953_v19 = vld [vmem:[%s15767_s11 + $0xd0] sm:$0xff]  ;;  %v8952_v58 = vld [vmem:[%s15767_s11 + $0xc8] sm:$0xff]  ;;  %v8934_v17 = vld [vmem:[%s15767_s11 + $0x38] sm:$0xff] }
 0x676   : > { %10126 = vmatprep.subr.bf16.mxu0 %v10982_v38  ;;  %v8937_v41 = vld [vmem:[%s15767_s11 + $0x50] sm:$0xff]  ;;  %v8936_v38 = vld [vmem:[%s15767_s11 + $0x48] sm:$0xff] }
 0x677   : > { %v7927_v55 = vpop.f32.mrf.mxu0  ;;  %8741 = vmatprep.mubr.bf16.mxu0 %v7982_v47  ;;  %v8948_v47 = vld [vmem:[%s15767_s11 + $0xa8] sm:$0xff] }
 0x678   : > { %10145 = vmatpush3.bf16.msra.mxu1 %v10981_v46  ;;  %v8935_v46 = vld [vmem:[%s15767_s11 + $0x40] sm:$0xff] }
 0x679   : > { %10146 = vmatprep.subr.bf16.mxu1 %v10984_v13  ;;  %v7929_v25 = vpop.f32.mrf.mxu0  ;;  %10127 = vmatpush3.bf16.msra.mxu0 %v10983_v42  ;;  %v8950_v13 = vld [vmem:[%s15767_s11 + $0xb8] sm:$0xff]  ;;  %v8933_v42 = vld [vmem:[%s15767_s11 + $0x30] sm:$0xff] }
 0x67a   : > { %10128 = vmatprep.subr.bf16.mxu0 %v10986_v50  ;;  %v7983_v14 = vpack.c.bf16 %v7929_v25, %v15538_v34  ;;  %v8949_v34 = vld [vmem:[%s15767_s11 + $0xb0] sm:$0xff]  ;;  %v8932_v50 = vld [vmem:[%s15767_s11 + $0x28] sm:$0xff]  ;;  %v8930_v25 = vld [vmem:[%s15767_s11 + $0x18] sm:$0xff] }
 0x67b   : > { %v7931_v4 = vpop.f32.mrf.mxu0 }
 0x67c   : > { %10147 = vmatpush3.bf16.msra.mxu1 %v10985_v6  ;;  %v7984_v56 = vpack.c.bf16 %v7931_v4, %v7927_v55  ;;  %v8947_v55 = vld [vmem:[%s15767_s11 + $0xa0] sm:$0xff] }
 0x67d   : > { %10148 = vmatprep.subr.bf16.mxu1 %v10988_v3  ;;  %10129 = vmatpush3.bf16.msra.mxu0 %v10987_v7  ;;  %v8931_v6 = vld [vmem:[%s15767_s11 + $0x20] sm:$0xff]  ;;  %v8946_v3 = vld [vmem:[%s15767_s11 + $0x98] sm:$0xff]  ;;  %v8945_v7 = vld [vmem:[%s15767_s11 + $0x90] sm:$0xff] }
 0x67e   : > { %8782 = vmatprep.mubr.bf16.mxu1 %v7984_v56  ;;  %10130 = vmatprep.subr.bf16.mxu0 %v10990_v36  ;;  %v7968_v29 = vpop.f32.mrf.mxu1 }
 0x680   : > { %10149 = vmatpush3.bf16.msra.mxu1 %v10989_v60  ;;  %v7970_v49 = vpop.f32.mrf.mxu1 }
 0x681   : > { %10150 = vmatprep.subr.bf16.mxu1 %v10992_v30  ;;  %10131 = vmatpush3.bf16.msra.mxu0 %v10991_v11 }
 0x682   : > { %10132 = vmatprep.subr.bf16.mxu0 %v10994_v27  ;;  %v7972_v23 = vpop.f32.mrf.mxu1 }
 0x683   : > { %v7985_v37 = vpack.c.bf16 %v7972_v23, %v7968_v29 }
 0x684   : > { %10151 = vmatpush3.bf16.msra.mxu1 %v10993_v22  ;;  %v7974_v45 = vpop.f32.mrf.mxu1 }
 0x685   : > { %10152 = vmatprep.subr.bf16.mxu1 %v10996_v35  ;;  %10133 = vmatpush3.bf16.msra.mxu0 %v10995_v59  ;;  %v7986_v51 = vpack.c.bf16 %v7974_v45, %v7970_v49 }
 0x686   : > { %10162 = vmatprep.subr.bf16.mxu0 %v10998_v18 }
 0x688   : > { %10153 = vmatpush3.bf16.msra.mxu1 %v10997_v26  ;;  %8742 = vmatmul.mubr.bf16.vlgmr.msra.gmra.mxu0 %v7981_v16 }
 0x689   : > { %10154 = vmatprep.subr.bf16.mxu1 %v11000_v48  ;;  %10163 = vmatpush3.bf16.msra.mxu0 %v10999_v28 }
 0x68a   : > { %8823 = vmatprep.mubr.bf16.mxu0 %v7986_v51  ;;  %10164 = vmatprep.subr.bf16.mxu0 %v11002_v43 }
 0x68c   : > { %10155 = vmatpush3.bf16.msra.mxu1 %v11001_v40 }
 0x68d   : > { %10165 = vmatpush3.bf16.msra.mxu0 %v11003_v57  ;;  %10184 = vmatprep.subr.mxu1 %v8958_v15 }
 0x68e   : > { %10166 = vmatprep.subr.bf16.mxu0 %v11004_v0 }
 0x68f   : > { %8783 = vmatmul.mubr.bf16.vlgmr.msra.gmra.mxu1 %v7983_v14 }
 0x690   : > { %10185 = vmatpush3.msra.mxu1 %v8942_v8 }
 0x691   : > { %10167 = vmatpush3.bf16.msra.mxu0 %v11005_v2  ;;  %10186 = vmatprep.subr.mxu1 %v8957_v44  ;;  %v9776_v44 = vld [vmem:[%s15765_s9 + $0x1] ss:$0 sm:$0xff] }
 0x692   : > { %10168 = vmatprep.subr.bf16.mxu0 %v11006_v39  ;;  %10187 = vmatpush3.msra.mxu1 %v8941_v63 }
 0x695   : > { %10169 = vmatpush3.bf16.msra.mxu0 %v11007_v10 }
 0x696   : > { %10170 = vmatprep.subr.bf16.mxu0 %v11008_v24 }
 0x699   : > { %10171 = vmatpush3.bf16.msra.mxu0 %v11009_v54 }
 0x69a   : > { %10172 = vmatprep.subr.bf16.mxu0 %v11010_v32 }
 0x69d   : > { %10173 = vmatpush3.bf16.msra.mxu0 %v11011_v5  ;;  %v9775_v5 = vld [vmem:[%s15765_s9] ss:$0 sm:$0xff] }
 0x69e   : > { %10174 = vmatprep.subr.bf16.mxu0 %v11012_v53 }
 0x6a1   : > { %10175 = vmatpush3.bf16.msra.mxu0 %v11013_v61 }
 0x6a2   : > { %10176 = vmatprep.subr.bf16.mxu0 %v11014_v9 }
 0x6a5   : > { %10177 = vmatpush3.bf16.msra.mxu0 %v11015_v52 }
 0x6a8   : > { %8824 = vmatmul.mubr.bf16.vlgmr.msra.gmra.mxu0 %v7985_v37 }
 0x6a9   : > { %8918 = vmatprep.mubr.bf16.mxu0 %v15996_v62  ;;  %v8956_v62 = vld [vmem:[%s15767_s11 + $0xe8] sm:$0xff] }
 0x6aa   : > { %10188 = vmatprep.subr.mxu1 %v8956_v62 }
 0x6ab   : > { %10189 = vmatpush3.msra.mxu1 %v8940_v20 }
 0x6ac   : > { %10190 = vmatprep.subr.mxu1 %v8955_v1 }
 0x6ad   : > { %10191 = vmatpush3.msra.mxu1 %v8939_v21 }
 0x6ae   : > { %10192 = vmatprep.subr.mxu1 %v8954_v33 }
 0x6af   : > { %10193 = vmatpush3.msra.mxu1 %v8938_v31 }
 0x6b0   : > { %10194 = vmatprep.subr.mxu1 %v8953_v19 }
 0x6b1   : > { %10195 = vmatpush3.msra.mxu1 %v8937_v41 }
 0x6b2   : > { %10196 = vmatprep.subr.mxu1 %v8952_v58  ;;  %v11072_v58 = vmov 65535  }
 0x6b3   : > { %10197 = vmatpush3.msra.mxu1 %v8936_v38  ;;  %v8879_v38 = vsel %vm790_vm4, 4294967295, %v11072_v58 }
 0x6b4   : > { %10198 = vmatprep.subr.mxu1 %v8951_v12 }
 0x6b5   : > { %10199 = vmatpush3.msra.mxu1 %v8935_v46 }
 0x6b6   : > { %10200 = vmatprep.subr.mxu1 %v8950_v13 }
 0x6b7   : > { %10201 = vmatpush3.msra.mxu1 %v8934_v17  ;;  %v8880_v17 = vsel %vm8878_vm9, %v8879_v38, 0 }
 0x6b8   : > { %10202 = vmatprep.subr.mxu1 %v8949_v34 }
 0x6b9   : > { %10203 = vmatpush3.msra.mxu1 %v8933_v42 }
 0x6ba   : > { %10204 = vmatprep.subr.mxu1 %v8948_v47  ;;  %v8872_v47 = vld [vmem:[%s15766_s10] sm:$0xf] }
 0x6bb   : > { %10205 = vmatpush3.msra.mxu1 %v8932_v50  ;;  %v8929_v50 = vld [vmem:[%s15767_s11 + $0x10] sm:$0xff] }
 0x6bc   : > { %10206 = vmatprep.subr.mxu1 %v8947_v55  ;;  %v8944_v55 = vld [vmem:[%s15767_s11 + $0x88] sm:$0xff] }
 0x6bd   : > { %10207 = vmatpush3.msra.mxu1 %v8931_v6  ;;  %v8928_v6 = vld [vmem:[%s15767_s11 + $0x8] sm:$0xff] }
 0x6be   : > { %10208 = vmatprep.subr.mxu1 %v8946_v3  ;;  %v8943_v3 = vld [vmem:[%s15767_s11 + $0x80] sm:$0xff] }
 0x6bf   : > { %10209 = vmatpush3.msra.mxu1 %v8930_v25  ;;  %v8927_v25 = vld [vmem:[%s15767_s11] sm:$0xff] }
 0x6c0   : > { %10210 = vmatprep.subr.mxu1 %v8945_v7 }
 0x6c1   : > { %10211 = vmatpush3.msra.mxu1 %v8929_v50 }
 0x6c2   : > { %10212 = vmatprep.subr.mxu1 %v8944_v55 }
 0x6c3   : > { %10213 = vmatpush3.msra.mxu1 %v8928_v6 }
 0x6c4   : > { %10214 = vmatprep.subr.mxu1 %v8943_v3 }
 0x6c5   : > { %10215 = vmatpush3.msra.mxu1 %v8927_v25 }
 0x728   : > { %v10090_v36 = vpop.f32.mrf.mxu0 }
 0x72a   : > { %v10091_v60 = vpop.f32.mrf.mxu0 }
 0x72b   : > { %v10092_v48 = vadd.f32 %v10091_v60, %v10090_v36 }
 0x72c   : > { %v10093_v30 = vpop.f32.mrf.mxu0 }
 0x72e   : > { %v10094_v27 = vpop.f32.mrf.mxu0 }
 0x72f   : > { %v10112_v4 = vpop.f32.mrf.mxu1  ;;  %v10095_v14 = vadd.f32 %v10094_v27, %v10093_v30  ;;  %v9781_v30 = vld [vmem:[%s15768_s12] ss:$0 sm:$0xff] }
 0x731   : > { %v10113_v56 = vpop.f32.mrf.mxu1 }
 0x732   : > { %v10114_v23 = vadd.f32 %v10113_v56, %v10112_v4 }
 0x733   : > { %v10115_v11 = vpop.f32.mrf.mxu1 }
 0x734   : > { %v8703_v51 = vadd.f32 %v10114_v23, %v10092_v48 }
 0x735   : > { %v10116_v29 = vpop.f32.mrf.mxu1 }
 0x736   : > { %v10117_v16 = vadd.f32 %v10116_v29, %v10115_v11 }
 0x738   : > { %v8706_v10 = vadd.f32 %v10117_v16, %v10095_v14 }
 0x748   : > { %v10134_v22 = vpop.f32.mrf.mxu0 }
 0x74a   : > { %v10135_v49 = vpop.f32.mrf.mxu0 }
 0x74b   : > { %v10136_v45 = vadd.f32 %v10135_v49, %v10134_v22 }
 0x74c   : > { %v10137_v18 = vpop.f32.mrf.mxu0 }
 0x74d   : > { %v8744_v0 = vadd.f32 %v10136_v45, %v8703_v51 }
 0x74e   : > { %v10138_v28 = vpop.f32.mrf.mxu0 }
 0x74f   : > { %v10156_v35 = vpop.f32.mrf.mxu1  ;;  %v10139_v2 = vadd.f32 %v10138_v28, %v10137_v18 }
 0x751   : > { %v10157_v59 = vpop.f32.mrf.mxu1  ;;  %v8747_v61 = vadd.f32 %v10139_v2, %v8706_v10 }
 0x752   : > { %v10158_v43 = vadd.f32 %v10157_v59, %v10156_v35 }
 0x753   : > { %v10159_v26 = vpop.f32.mrf.mxu1 }
 0x754   : > { %v8785_v24 = vadd.f32 %v10158_v43, %v8744_v0 }
 0x755   : > { %v10160_v40 = vpop.f32.mrf.mxu1 }
 0x756   : > { %v10161_v54 = vadd.f32 %v10160_v40, %v10159_v26 }
 0x758   : > { %v8788_v37 = vadd.f32 %v10161_v54, %v8747_v61 }
 0x768   : > { %v10178_v57 = vpop.f32.mrf.mxu0 }
 0x76a   : > { %v10179_v39 = vpop.f32.mrf.mxu0 }
 0x76b   : > { %v10180_v32 = vadd.f32 %v10179_v39, %v10178_v57 }
 0x76c   : > { %v10181_v53 = vpop.f32.mrf.mxu0 }
 0x76d   : > { %v8826_v9 = vadd.f32 %v10180_v32, %v8785_v24 }
 0x76e   : > { %v10182_v52 = vpop.f32.mrf.mxu0 }
 0x76f   : > { %v8838_v15 = vmul.f32 %v9775_v5, %v8826_v9  ;;  %v10183_v8 = vadd.f32 %v10182_v52, %v10181_v53 }
 0x771   : > { %v8829_v63 = vadd.f32 %v10183_v8, %v8788_v37  ;;  %v8844_v62 = vadd.f32 %v9776_v44, %v8838_v15 }
 0x773   : > { %v8839_v20 = vmul.f32 %v9775_v5, %v8829_v63  ;;  %v8846_v21 = vmax.f32 %v8844_v62, 0.0 }
 0x775   : > { %v8845_v1 = vadd.f32 %v9776_v44, %v8839_v20 }
 0x777   : > { %v8847_v33 = vmax.f32 %v8845_v1, 0.0 }
 0x779   : > { %v9832_v31 = vpack.c.bf16 %v8847_v33, %v8846_v21 }
 0x77b   : > { %9833 = vst [vmem:[#allocation4] sm:$0xff] %v9832_v31  }
 0x782   : > { %v11016_v19 = vld [vmem:[#allocation4] sm:$0xff]  }
 0x783   : > { %v8868_v41 = vshll.u32 %v11016_v19, 16  ;;  %v8866_v12 = vshrl.u32 %v11016_v19, 16  ;;  %v8881_v42 = vand.u32 %v11016_v19, %v8880_v17 }
 0x785   : > { %v8870_v46 = vrot.slane %v8868_v41, 1 }
 0x787   : > { %v8871_v13 = vor.u32 %v8870_v46, %v8866_v12 }
 0x789   : > { %v8884_v34 = vand.u32 %v8880_v17, %v8871_v13 }
 0x78b   : > { %8900 = vmatprep.subr.bf16.mxu0 %v8884_v34 }
 0x78c   : > { %8901 = vmatpush1.bf16.msra.mxu0 %v8881_v42 }
 0x78f   : > { %9780 = vmatmul.mubr.msk.bf16.vlgmr.msra.gmra.mxu0 %vm8873_vm10, %v8872_v47 }
 0x84f   : > { %v8920_v7 = vpop.f32.mrf.mxu0 }
 0x851   : > { %v8922_v36 = vpop.f32.mrf.mxu0 }
 0x852   : > { %9030 = vmatprep.mubr.f32.mxu1 %v8922_v36 }
 0x853   : > { %v8924_v4 = vpop.f32.mrf.mxu0  ;;  %9031 = vmatmul.mubr.f32.vlgmr.msra.gmra.mxu1 %v8920_v7 }
 0x855   : > { %v8925_v60 = vpop.f32.mrf.mxu0 }
 0x913   : > { %v10216_v56 = vpop.f32.mrf.mxu1 }
 0x915   : > { %v10217_v11 = vpop.f32.mrf.mxu1 }
 0x916   : > { %v10218_v27 = vadd.f32 %v10217_v11, %v10216_v56 }
 0x918   : > { %v9033_v29 = vadd.f32 %v10218_v27, %v9781_v30 }
 0x91a   : > { %9036 = vst [vmem:[%s440_s19] sm:$0xff] %v9033_v29 }
 0x91b PF: > { %s23_s25 = sadd.s32 1, %s11067_s25  }
 0x91c   : > { %p20_p5 = scmp.ge.s32.totalorder %s23_s25, 4  }
 0x91e   :  { %22 = sbr.rel (!%p20_p5) target bundleno = 1 (0x1), region = 104 }

</bundles_post_ra>
